<compile_context>
chip_gen: v7x
topology: tpu7x:2x2x1
jax: 0.10.0
libtpu: 0.0.40
codegen_flags: <defaults>
</compile_context>

<pallas_src>
import math
import jax
import jax.numpy as jnp
from jax.experimental import pallas as pl
from jax.experimental.pallas import tpu as pltpu

# --- small synthetic config (GPT-2 structure, tiny dims) -----------------
B, S, H = 2, 8, 32          # batch, seq, hidden
N_HEAD = 4
D_HEAD = H // N_HEAD
N_LAYER = 6                  # "first 6 layers of GPT-2"
FF = 4 * H                   # MLP inner dim
LN_EPS = 1e-5


def _layer_norm(x, g, b):
    mu = jnp.mean(x, axis=-1, keepdims=True)
    var = jnp.mean((x - mu) ** 2, axis=-1, keepdims=True)
    return (x - mu) * jax.lax.rsqrt(var + LN_EPS) * g + b


def _gelu_new(x):
    # GPT-2 "gelu_new" (tanh approximation)
    return 0.5 * x * (1.0 + jnp.tanh(
        math.sqrt(2.0 / math.pi) * (x + 0.044715 * x * x * x)))


def gpt_node1_kernel(x_ref,
                     ln1g_ref, ln1b_ref,
                     wqkv_ref, bqkv_ref,
                     woh_ref, bo_ref,
                     ln2g_ref, ln2b_ref,
                     wfc_ref, bfc_ref,
                     wp_ref, bp_ref,
                     out_ref):
    # x_ref / out_ref: (B*S, H).  All weights stacked along layer axis, resident
    # in VMEM for the whole kernel.  Single grid point; layers unrolled below.
    h = x_ref[...]                                        # (B*S, H) carried state

    # ---- hoisted, layer-invariant constants -------------------------------
    row = jax.lax.broadcasted_iota(jnp.int32, (S, S), 0)
    col = jax.lax.broadcasted_iota(jnp.int32, (S, S), 1)
    mask_bias = jnp.where(row >= col, 0.0, -1e9).astype(jnp.float32)   # (S, S)
    scale = 1.0 / math.sqrt(D_HEAD)

    for l in range(N_LAYER):                              # static unrolled layers
        # ---------------- attention sub-block ----------------
        hn = _layer_norm(h, ln1g_ref[l], ln1b_ref[l])     # (B*S, H)
        qkv = jnp.dot(hn, wqkv_ref[l],
                      preferred_element_type=jnp.float32) + bqkv_ref[l]  # (B*S, 3H)
        qkv = qkv.reshape(B, S, 3 * H)
        q = qkv[:, :, 0:H] * scale                        # scale folded into q
        k = qkv[:, :, H:2 * H]
        v = qkv[:, :, 2 * H:3 * H]

        attn = jnp.zeros((B * S, H), jnp.float32)
        for n in range(N_HEAD):                           # static head loop
            qs = q[:, :, n * D_HEAD:(n + 1) * D_HEAD]     # (B, S, Dh)
            ks = k[:, :, n * D_HEAD:(n + 1) * D_HEAD]
            vs = v[:, :, n * D_HEAD:(n + 1) * D_HEAD]
            sc = jnp.einsum('bqd,bkd->bqk', qs, ks,
                            preferred_element_type=jnp.float32)          # (B, S, S)
            sc = sc + mask_bias[None, :, :]
            sc = sc - jnp.max(sc, axis=-1, keepdims=True)
            p = jnp.exp(sc)
            p = p / jnp.sum(p, axis=-1, keepdims=True)
            ctx = jnp.einsum('bqk,bkd->bqd', p, vs,
                             preferred_element_type=jnp.float32)          # (B, S, Dh)
            # Accumulate per-head output projection (replaces concat + big matmul).
            attn = attn + jnp.dot(ctx.reshape(B * S, D_HEAD), woh_ref[l, n],
                                  preferred_element_type=jnp.float32)
        h = h + attn + bo_ref[l]                          # residual 1

        # ---------------- MLP sub-block ----------------
        hn2 = _layer_norm(h, ln2g_ref[l], ln2b_ref[l])
        ff = jnp.dot(hn2, wfc_ref[l],
                     preferred_element_type=jnp.float32) + bfc_ref[l]     # (B*S, FF)
        ff = _gelu_new(ff)
        mlp = jnp.dot(ff, wp_ref[l],
                      preferred_element_type=jnp.float32) + bp_ref[l]     # (B*S, H)
        h = h + mlp                                        # residual 2

    out_ref[...] = h


def gpt_node1(x, params):
    """Apply the 6 stacked GPT-2 blocks to x: (B, S, H) -> (B, S, H)."""
    (ln1g, ln1b, wqkv, bqkv, wo, bo, ln2g, ln2b, wfc, bfc, wp, bp) = params

    # Host-side (free) reorganisation of the attention output projection into
    # per-head slabs: (L, H, H) -> (L, N_HEAD, D_HEAD, H).
    wo_heads = wo.reshape(N_LAYER, N_HEAD, D_HEAD, H)
    x2d = x.reshape(B * S, H)                              # lane-dense 2-D state

    vmem = pl.BlockSpec(memory_space=pltpu.MemorySpace.VMEM)
    out2d = pl.pallas_call(
        gpt_node1_kernel,
        out_shape=jax.ShapeDtypeStruct((B * S, H), jnp.float32),
        in_specs=[vmem] * 13,
        out_specs=vmem,
    )(x2d, ln1g, ln1b, wqkv, bqkv, wo_heads, bo,
      ln2g, ln2b, wfc, bfc, wp, bp)
    return out2d.reshape(B, S, H)


def gpt_node1_ref(x, params):
    """Pure-JAX reference (same math) for a sanity check."""
    (ln1g, ln1b, wqkv, bqkv, wo, bo, ln2g, ln2b, wfc, bfc, wp, bp) = params
    h = x
    row = jax.lax.broadcasted_iota(jnp.int32, (S, S), 0)
    col = jax.lax.broadcasted_iota(jnp.int32, (S, S), 1)
    causal = row >= col
    scale = 1.0 / math.sqrt(D_HEAD)
    for l in range(N_LAYER):
        hn = _layer_norm(h, ln1g[l], ln1b[l])
        qkv = hn @ wqkv[l] + bqkv[l]
        q, k, v = qkv[..., :H], qkv[..., H:2 * H], qkv[..., 2 * H:]
        outs = []
        for hd in range(N_HEAD):
            qs = q[..., hd * D_HEAD:(hd + 1) * D_HEAD]
            ks = k[..., hd * D_HEAD:(hd + 1) * D_HEAD]
            vs = v[..., hd * D_HEAD:(hd + 1) * D_HEAD]
            sc = jnp.einsum('bqd,bkd->bqk', qs, ks) * scale
            sc = jnp.where(causal[None], sc, -1e9)
            p = jax.nn.softmax(sc, axis=-1)
            outs.append(jnp.einsum('bqk,bkd->bqd', p, vs))
        ctx = jnp.concatenate(outs, axis=-1)
        h = h + (ctx @ wo[l] + bo[l])
        hn2 = _layer_norm(h, ln2g[l], ln2b[l])
        h = h + (_gelu_new(hn2 @ wfc[l] + bfc[l]) @ wp[l] + bp[l])
    return h


def init_params(key):
    ks = jax.random.split(key, 8)
    s = 0.02
    ln1g = jnp.ones((N_LAYER, 1, H), jnp.float32)
    ln1b = jnp.zeros((N_LAYER, 1, H), jnp.float32)
    ln2g = jnp.ones((N_LAYER, 1, H), jnp.float32)
    ln2b = jnp.zeros((N_LAYER, 1, H), jnp.float32)
    wqkv = s * jax.random.normal(ks[0], (N_LAYER, H, 3 * H), jnp.float32)
    bqkv = s * jax.random.normal(ks[1], (N_LAYER, 1, 3 * H), jnp.float32)
    wo = s * jax.random.normal(ks[2], (N_LAYER, H, H), jnp.float32)
    bo = s * jax.random.normal(ks[3], (N_LAYER, 1, H), jnp.float32)
    wfc = s * jax.random.normal(ks[4], (N_LAYER, H, FF), jnp.float32)
    bfc = s * jax.random.normal(ks[5], (N_LAYER, 1, FF), jnp.float32)
    wp = s * jax.random.normal(ks[6], (N_LAYER, FF, H), jnp.float32)
    bp = s * jax.random.normal(ks[7], (N_LAYER, 1, H), jnp.float32)
    return (ln1g, ln1b, wqkv, bqkv, wo, bo, ln2g, ln2b, wfc, bfc, wp, bp)


if __name__ == "__main__":
    key = jax.random.PRNGKey(0)
    kx, kp = jax.random.split(key)
    # x stands in for `x.last_hidden_state`: (B, S, H)
    x = jax.random.normal(kx, (B, S, H), jnp.float32)
    params = init_params(kp)

    out = jax.block_until_ready(gpt_node1(x, params))
    ref = jax.block_until_ready(gpt_node1_ref(x, params))

    assert out.shape == (B, S, H)
    assert bool(jnp.all(jnp.isfinite(out)))
    assert bool(jnp.allclose(out, ref, atol=1e-4, rtol=1e-4)), "mismatch vs reference"
    print("KERNEL_OK")
</pallas_src>

<mosaic_0001>
module attributes {stable_mosaic.version = 11 : i64} {
  func.func @gpt_node1_kernel(%arg0: memref<16x32xf32, #tpu.memory_space<vmem>>, %arg1: memref<6x1x32xf32, #tpu.memory_space<vmem>>, %arg2: memref<6x1x32xf32, #tpu.memory_space<vmem>>, %arg3: memref<6x32x96xf32, #tpu.memory_space<vmem>>, %arg4: memref<6x1x96xf32, #tpu.memory_space<vmem>>, %arg5: memref<6x4x8x32xf32, #tpu.memory_space<vmem>>, %arg6: memref<6x1x32xf32, #tpu.memory_space<vmem>>, %arg7: memref<6x1x32xf32, #tpu.memory_space<vmem>>, %arg8: memref<6x1x32xf32, #tpu.memory_space<vmem>>, %arg9: memref<6x32x128xf32, #tpu.memory_space<vmem>>, %arg10: memref<6x1x128xf32, #tpu.memory_space<vmem>>, %arg11: memref<6x128x32xf32, #tpu.memory_space<vmem>>, %arg12: memref<6x1x32xf32, #tpu.memory_space<vmem>>, %arg13: memref<16x32xf32, #tpu.memory_space<vmem>>) attributes {dimension_semantics = [], scalar_prefetch = 0 : i64, scratch_operands = 0 : i64, tpu.core_type = #tpu.core_type<tc>} {
    %c0 = arith.constant 0 : index
    %c0_0 = arith.constant 0 : index
    %0 = vector.load %arg0[%c0, %c0_0] : memref<16x32xf32, #tpu.memory_space<vmem>>, vector<16x32xf32>
    %1 = tpu.iota {dimensions = array<i32: 0>} : vector<8x8xi32>
    %2 = tpu.iota {dimensions = array<i32: 1>} : vector<8x8xi32>
    %3 = arith.cmpi sge, %1, %2 : vector<8x8xi32>
    %cst = arith.constant 0.000000e+00 : f32
    %cst_1 = arith.constant -1.000000e+09 : f32
    %4 = vector.broadcast %cst : f32 to vector<8x8xf32>
    %5 = vector.broadcast %cst_1 : f32 to vector<8x8xf32>
    %6 = arith.select %3, %4, %5 : vector<8x8xi1>, vector<8x8xf32>
    %c0_2 = arith.constant 0 : index
    %c0_3 = arith.constant 0 : index
    %c0_4 = arith.constant 0 : index
    %7 = vector.load %arg1[%c0_2, %c0_3, %c0_4] : memref<6x1x32xf32, #tpu.memory_space<vmem>>, vector<1x1x32xf32>
    %8 = vector.shape_cast %7 : vector<1x1x32xf32> to vector<1x32xf32>
    %c0_5 = arith.constant 0 : index
    %c0_6 = arith.constant 0 : index
    %c0_7 = arith.constant 0 : index
    %9 = vector.load %arg2[%c0_5, %c0_6, %c0_7] : memref<6x1x32xf32, #tpu.memory_space<vmem>>, vector<1x1x32xf32>
    %10 = vector.shape_cast %9 : vector<1x1x32xf32> to vector<1x32xf32>
    %cst_8 = arith.constant dense<0.000000e+00> : vector<16xf32>
    %11 = vector.multi_reduction <add>, %0, %cst_8 [1] : vector<16x32xf32> to vector<16xf32>
    %12 = vector.shape_cast %11 : vector<16xf32> to vector<16x1xf32>
    %cst_9 = arith.constant 3.200000e+01 : f32
    %13 = vector.broadcast %cst_9 : f32 to vector<16x1xf32>
    %14 = arith.divf %12, %13 : vector<16x1xf32>
    %15 = vector.broadcast %14 : vector<16x1xf32> to vector<16x32xf32>
    %16 = arith.subf %0, %15 : vector<16x32xf32>
    %17 = arith.mulf %16, %16 : vector<16x32xf32>
    %cst_10 = arith.constant dense<0.000000e+00> : vector<16xf32>
    %18 = vector.multi_reduction <add>, %17, %cst_10 [1] : vector<16x32xf32> to vector<16xf32>
    %19 = vector.shape_cast %18 : vector<16xf32> to vector<16x1xf32>
    %cst_11 = arith.constant 3.200000e+01 : f32
    %20 = vector.broadcast %cst_11 : f32 to vector<16x1xf32>
    %21 = arith.divf %19, %20 : vector<16x1xf32>
    %22 = vector.broadcast %14 : vector<16x1xf32> to vector<16x32xf32>
    %23 = arith.subf %0, %22 : vector<16x32xf32>
    %cst_12 = arith.constant 9.99999974E-6 : f32
    %24 = vector.broadcast %cst_12 : f32 to vector<16x1xf32>
    %25 = arith.addf %21, %24 : vector<16x1xf32>
    %26 = math.rsqrt %25 : vector<16x1xf32>
    %27 = vector.broadcast %26 : vector<16x1xf32> to vector<16x32xf32>
    %28 = arith.mulf %23, %27 : vector<16x32xf32>
    %29 = vector.broadcast %8 : vector<1x32xf32> to vector<16x32xf32>
    %30 = arith.mulf %28, %29 : vector<16x32xf32>
    %31 = vector.broadcast %10 : vector<1x32xf32> to vector<16x32xf32>
    %32 = arith.addf %30, %31 : vector<16x32xf32>
    %c0_13 = arith.constant 0 : index
    %c0_14 = arith.constant 0 : index
    %c0_15 = arith.constant 0 : index
    %33 = vector.load %arg3[%c0_13, %c0_14, %c0_15] : memref<6x32x96xf32, #tpu.memory_space<vmem>>, vector<1x32x96xf32>
    %34 = vector.shape_cast %33 : vector<1x32x96xf32> to vector<32x96xf32>
    %cst_16 = arith.constant dense<0.000000e+00> : vector<16x96xf32>
    %35 = tpu.matmul %32, %34, %cst_16 {dimension_numbers = #tpu.dot_dimension_numbers<[1], [0], [0], [1], [0, 0, 1, 1], [], []>} : vector<16x32xf32>, vector<32x96xf32>, vector<16x96xf32> -> vector<16x96xf32>
    %c0_17 = arith.constant 0 : index
    %c0_18 = arith.constant 0 : index
    %c0_19 = arith.constant 0 : index
    %36 = vector.load %arg4[%c0_17, %c0_18, %c0_19] : memref<6x1x96xf32, #tpu.memory_space<vmem>>, vector<1x1x96xf32>
    %37 = vector.shape_cast %36 : vector<1x1x96xf32> to vector<1x96xf32>
    %38 = vector.broadcast %37 : vector<1x96xf32> to vector<16x96xf32>
    %39 = arith.addf %35, %38 : vector<16x96xf32>
    %40 = vector.shape_cast %39 : vector<16x96xf32> to vector<2x8x96xf32>
    %41 = vector.extract_strided_slice %40 {offsets = [0, 0, 0], sizes = [2, 8, 32], strides = [1, 1, 1]} : vector<2x8x96xf32> to vector<2x8x32xf32>
    %cst_20 = arith.constant 0.353553385 : f32
    %42 = vector.broadcast %cst_20 : f32 to vector<2x8x32xf32>
    %43 = arith.mulf %41, %42 : vector<2x8x32xf32>
    %44 = vector.extract_strided_slice %40 {offsets = [0, 0, 32], sizes = [2, 8, 32], strides = [1, 1, 1]} : vector<2x8x96xf32> to vector<2x8x32xf32>
    %45 = vector.extract_strided_slice %40 {offsets = [0, 0, 64], sizes = [2, 8, 32], strides = [1, 1, 1]} : vector<2x8x96xf32> to vector<2x8x32xf32>
    %cst_21 = arith.constant 0.000000e+00 : f32
    %46 = vector.broadcast %cst_21 : f32 to vector<16x32xf32>
    %47 = vector.extract_strided_slice %43 {offsets = [0, 0, 0], sizes = [2, 8, 8], strides = [1, 1, 1]} : vector<2x8x32xf32> to vector<2x8x8xf32>
    %48 = vector.extract_strided_slice %44 {offsets = [0, 0, 0], sizes = [2, 8, 8], strides = [1, 1, 1]} : vector<2x8x32xf32> to vector<2x8x8xf32>
    %49 = vector.extract_strided_slice %45 {offsets = [0, 0, 0], sizes = [2, 8, 8], strides = [1, 1, 1]} : vector<2x8x32xf32> to vector<2x8x8xf32>
    "tpu.trace_start"() <{level = 10 : i32, message = "bqd,bkd->bqk"}> : () -> ()
    %cst_22 = arith.constant dense<0.000000e+00> : vector<2x8x8xf32>
    %50 = tpu.matmul %47, %48, %cst_22 {dimension_numbers = #tpu.dot_dimension_numbers<[2], [2], [1], [1], [0, 0, 0, 1, 1, 1], [0], [0]>} : vector<2x8x8xf32>, vector<2x8x8xf32>, vector<2x8x8xf32> -> vector<2x8x8xf32>
    "tpu.trace_stop"() : () -> ()
    %51 = vector.shape_cast %6 : vector<8x8xf32> to vector<1x8x8xf32>
    %52 = vector.broadcast %51 : vector<1x8x8xf32> to vector<2x8x8xf32>
    %53 = arith.addf %50, %52 : vector<2x8x8xf32>
    %cst_23 = arith.constant dense<0xFF800000> : vector<2x8xf32>
    %54 = vector.multi_reduction <maximumf>, %53, %cst_23 [2] : vector<2x8x8xf32> to vector<2x8xf32>
    %55 = vector.shape_cast %54 : vector<2x8xf32> to vector<2x8x1xf32>
    %56 = vector.broadcast %55 : vector<2x8x1xf32> to vector<2x8x8xf32>
    %57 = arith.subf %53, %56 : vector<2x8x8xf32>
    %58 = math.exp %57 : vector<2x8x8xf32>
    %cst_24 = arith.constant dense<0.000000e+00> : vector<2x8xf32>
    %59 = vector.multi_reduction <add>, %58, %cst_24 [2] : vector<2x8x8xf32> to vector<2x8xf32>
    %60 = vector.shape_cast %59 : vector<2x8xf32> to vector<2x8x1xf32>
    %61 = vector.broadcast %60 : vector<2x8x1xf32> to vector<2x8x8xf32>
    %62 = arith.divf %58, %61 : vector<2x8x8xf32>
    "tpu.trace_start"() <{level = 10 : i32, message = "bqk,bkd->bqd"}> : () -> ()
    %cst_25 = arith.constant dense<0.000000e+00> : vector<2x8x8xf32>
    %63 = tpu.matmul %62, %49, %cst_25 {dimension_numbers = #tpu.dot_dimension_numbers<[2], [1], [1], [2], [0, 0, 0, 1, 1, 2], [0], [0]>} : vector<2x8x8xf32>, vector<2x8x8xf32>, vector<2x8x8xf32> -> vector<2x8x8xf32>
    "tpu.trace_stop"() : () -> ()
    %64 = vector.shape_cast %63 : vector<2x8x8xf32> to vector<16x8xf32>
    %c0_26 = arith.constant 0 : index
    %c0_27 = arith.constant 0 : index
    %c0_28 = arith.constant 0 : index
    %c0_29 = arith.constant 0 : index
    %65 = vector.load %arg5[%c0_26, %c0_27, %c0_28, %c0_29] : memref<6x4x8x32xf32, #tpu.memory_space<vmem>>, vector<1x1x8x32xf32>
    %66 = vector.shape_cast %65 : vector<1x1x8x32xf32> to vector<8x32xf32>
    %cst_30 = arith.constant dense<0.000000e+00> : vector<16x32xf32>
    %67 = tpu.matmul %64, %66, %cst_30 {dimension_numbers = #tpu.dot_dimension_numbers<[1], [0], [0], [1], [0, 0, 1, 1], [], []>} : vector<16x8xf32>, vector<8x32xf32>, vector<16x32xf32> -> vector<16x32xf32>
    %68 = arith.addf %46, %67 : vector<16x32xf32>
    %69 = vector.extract_strided_slice %43 {offsets = [0, 0, 8], sizes = [2, 8, 8], strides = [1, 1, 1]} : vector<2x8x32xf32> to vector<2x8x8xf32>
    %70 = vector.extract_strided_slice %44 {offsets = [0, 0, 8], sizes = [2, 8, 8], strides = [1, 1, 1]} : vector<2x8x32xf32> to vector<2x8x8xf32>
    %71 = vector.extract_strided_slice %45 {offsets = [0, 0, 8], sizes = [2, 8, 8], strides = [1, 1, 1]} : vector<2x8x32xf32> to vector<2x8x8xf32>
    "tpu.trace_start"() <{level = 10 : i32, message = "bqd,bkd->bqk"}> : () -> ()
    %cst_31 = arith.constant dense<0.000000e+00> : vector<2x8x8xf32>
    %72 = tpu.matmul %69, %70, %cst_31 {dimension_numbers = #tpu.dot_dimension_numbers<[2], [2], [1], [1], [0, 0, 0, 1, 1, 1], [0], [0]>} : vector<2x8x8xf32>, vector<2x8x8xf32>, vector<2x8x8xf32> -> vector<2x8x8xf32>
    "tpu.trace_stop"() : () -> ()
    %73 = vector.shape_cast %6 : vector<8x8xf32> to vector<1x8x8xf32>
    %74 = vector.broadcast %73 : vector<1x8x8xf32> to vector<2x8x8xf32>
    %75 = arith.addf %72, %74 : vector<2x8x8xf32>
    %cst_32 = arith.constant dense<0xFF800000> : vector<2x8xf32>
    %76 = vector.multi_reduction <maximumf>, %75, %cst_32 [2] : vector<2x8x8xf32> to vector<2x8xf32>
    %77 = vector.shape_cast %76 : vector<2x8xf32> to vector<2x8x1xf32>
    %78 = vector.broadcast %77 : vector<2x8x1xf32> to vector<2x8x8xf32>
    %79 = arith.subf %75, %78 : vector<2x8x8xf32>
    %80 = math.exp %79 : vector<2x8x8xf32>
    %cst_33 = arith.constant dense<0.000000e+00> : vector<2x8xf32>
    %81 = vector.multi_reduction <add>, %80, %cst_33 [2] : vector<2x8x8xf32> to vector<2x8xf32>
    %82 = vector.shape_cast %81 : vector<2x8xf32> to vector<2x8x1xf32>
    %83 = vector.broadcast %82 : vector<2x8x1xf32> to vector<2x8x8xf32>
    %84 = arith.divf %80, %83 : vector<2x8x8xf32>
    "tpu.trace_start"() <{level = 10 : i32, message = "bqk,bkd->bqd"}> : () -> ()
    %cst_34 = arith.constant dense<0.000000e+00> : vector<2x8x8xf32>
    %85 = tpu.matmul %84, %71, %cst_34 {dimension_numbers = #tpu.dot_dimension_numbers<[2], [1], [1], [2], [0, 0, 0, 1, 1, 2], [0], [0]>} : vector<2x8x8xf32>, vector<2x8x8xf32>, vector<2x8x8xf32> -> vector<2x8x8xf32>
    "tpu.trace_stop"() : () -> ()
    %86 = vector.shape_cast %85 : vector<2x8x8xf32> to vector<16x8xf32>
    %c0_35 = arith.constant 0 : index
    %c1 = arith.constant 1 : index
    %c0_36 = arith.constant 0 : index
    %c0_37 = arith.constant 0 : index
    %87 = vector.load %arg5[%c0_35, %c1, %c0_36, %c0_37] : memref<6x4x8x32xf32, #tpu.memory_space<vmem>>, vector<1x1x8x32xf32>
    %88 = vector.shape_cast %87 : vector<1x1x8x32xf32> to vector<8x32xf32>
    %cst_38 = arith.constant dense<0.000000e+00> : vector<16x32xf32>
    %89 = tpu.matmul %86, %88, %cst_38 {dimension_numbers = #tpu.dot_dimension_numbers<[1], [0], [0], [1], [0, 0, 1, 1], [], []>} : vector<16x8xf32>, vector<8x32xf32>, vector<16x32xf32> -> vector<16x32xf32>
    %90 = arith.addf %68, %89 : vector<16x32xf32>
    %91 = vector.extract_strided_slice %43 {offsets = [0, 0, 16], sizes = [2, 8, 8], strides = [1, 1, 1]} : vector<2x8x32xf32> to vector<2x8x8xf32>
    %92 = vector.extract_strided_slice %44 {offsets = [0, 0, 16], sizes = [2, 8, 8], strides = [1, 1, 1]} : vector<2x8x32xf32> to vector<2x8x8xf32>
    %93 = vector.extract_strided_slice %45 {offsets = [0, 0, 16], sizes = [2, 8, 8], strides = [1, 1, 1]} : vector<2x8x32xf32> to vector<2x8x8xf32>
    "tpu.trace_start"() <{level = 10 : i32, message = "bqd,bkd->bqk"}> : () -> ()
    %cst_39 = arith.constant dense<0.000000e+00> : vector<2x8x8xf32>
    %94 = tpu.matmul %91, %92, %cst_39 {dimension_numbers = #tpu.dot_dimension_numbers<[2], [2], [1], [1], [0, 0, 0, 1, 1, 1], [0], [0]>} : vector<2x8x8xf32>, vector<2x8x8xf32>, vector<2x8x8xf32> -> vector<2x8x8xf32>
    "tpu.trace_stop"() : () -> ()
    %95 = vector.shape_cast %6 : vector<8x8xf32> to vector<1x8x8xf32>
    %96 = vector.broadcast %95 : vector<1x8x8xf32> to vector<2x8x8xf32>
    %97 = arith.addf %94, %96 : vector<2x8x8xf32>
    %cst_40 = arith.constant dense<0xFF800000> : vector<2x8xf32>
    %98 = vector.multi_reduction <maximumf>, %97, %cst_40 [2] : vector<2x8x8xf32> to vector<2x8xf32>
    %99 = vector.shape_cast %98 : vector<2x8xf32> to vector<2x8x1xf32>
    %100 = vector.broadcast %99 : vector<2x8x1xf32> to vector<2x8x8xf32>
    %101 = arith.subf %97, %100 : vector<2x8x8xf32>
    %102 = math.exp %101 : vector<2x8x8xf32>
    %cst_41 = arith.constant dense<0.000000e+00> : vector<2x8xf32>
    %103 = vector.multi_reduction <add>, %102, %cst_41 [2] : vector<2x8x8xf32> to vector<2x8xf32>
    %104 = vector.shape_cast %103 : vector<2x8xf32> to vector<2x8x1xf32>
    %105 = vector.broadcast %104 : vector<2x8x1xf32> to vector<2x8x8xf32>
    %106 = arith.divf %102, %105 : vector<2x8x8xf32>
    "tpu.trace_start"() <{level = 10 : i32, message = "bqk,bkd->bqd"}> : () -> ()
    %cst_42 = arith.constant dense<0.000000e+00> : vector<2x8x8xf32>
    %107 = tpu.matmul %106, %93, %cst_42 {dimension_numbers = #tpu.dot_dimension_numbers<[2], [1], [1], [2], [0, 0, 0, 1, 1, 2], [0], [0]>} : vector<2x8x8xf32>, vector<2x8x8xf32>, vector<2x8x8xf32> -> vector<2x8x8xf32>
    "tpu.trace_stop"() : () -> ()
    %108 = vector.shape_cast %107 : vector<2x8x8xf32> to vector<16x8xf32>
    %c0_43 = arith.constant 0 : index
    %c2 = arith.constant 2 : index
    %c0_44 = arith.constant 0 : index
    %c0_45 = arith.constant 0 : index
    %109 = vector.load %arg5[%c0_43, %c2, %c0_44, %c0_45] : memref<6x4x8x32xf32, #tpu.memory_space<vmem>>, vector<1x1x8x32xf32>
    %110 = vector.shape_cast %109 : vector<1x1x8x32xf32> to vector<8x32xf32>
    %cst_46 = arith.constant dense<0.000000e+00> : vector<16x32xf32>
    %111 = tpu.matmul %108, %110, %cst_46 {dimension_numbers = #tpu.dot_dimension_numbers<[1], [0], [0], [1], [0, 0, 1, 1], [], []>} : vector<16x8xf32>, vector<8x32xf32>, vector<16x32xf32> -> vector<16x32xf32>
    %112 = arith.addf %90, %111 : vector<16x32xf32>
    %113 = vector.extract_strided_slice %43 {offsets = [0, 0, 24], sizes = [2, 8, 8], strides = [1, 1, 1]} : vector<2x8x32xf32> to vector<2x8x8xf32>
    %114 = vector.extract_strided_slice %44 {offsets = [0, 0, 24], sizes = [2, 8, 8], strides = [1, 1, 1]} : vector<2x8x32xf32> to vector<2x8x8xf32>
    %115 = vector.extract_strided_slice %45 {offsets = [0, 0, 24], sizes = [2, 8, 8], strides = [1, 1, 1]} : vector<2x8x32xf32> to vector<2x8x8xf32>
    "tpu.trace_start"() <{level = 10 : i32, message = "bqd,bkd->bqk"}> : () -> ()
    %cst_47 = arith.constant dense<0.000000e+00> : vector<2x8x8xf32>
    %116 = tpu.matmul %113, %114, %cst_47 {dimension_numbers = #tpu.dot_dimension_numbers<[2], [2], [1], [1], [0, 0, 0, 1, 1, 1], [0], [0]>} : vector<2x8x8xf32>, vector<2x8x8xf32>, vector<2x8x8xf32> -> vector<2x8x8xf32>
    "tpu.trace_stop"() : () -> ()
    %117 = vector.shape_cast %6 : vector<8x8xf32> to vector<1x8x8xf32>
    %118 = vector.broadcast %117 : vector<1x8x8xf32> to vector<2x8x8xf32>
    %119 = arith.addf %116, %118 : vector<2x8x8xf32>
    %cst_48 = arith.constant dense<0xFF800000> : vector<2x8xf32>
    %120 = vector.multi_reduction <maximumf>, %119, %cst_48 [2] : vector<2x8x8xf32> to vector<2x8xf32>
    %121 = vector.shape_cast %120 : vector<2x8xf32> to vector<2x8x1xf32>
    %122 = vector.broadcast %121 : vector<2x8x1xf32> to vector<2x8x8xf32>
    %123 = arith.subf %119, %122 : vector<2x8x8xf32>
    %124 = math.exp %123 : vector<2x8x8xf32>
    %cst_49 = arith.constant dense<0.000000e+00> : vector<2x8xf32>
    %125 = vector.multi_reduction <add>, %124, %cst_49 [2] : vector<2x8x8xf32> to vector<2x8xf32>
    %126 = vector.shape_cast %125 : vector<2x8xf32> to vector<2x8x1xf32>
    %127 = vector.broadcast %126 : vector<2x8x1xf32> to vector<2x8x8xf32>
    %128 = arith.divf %124, %127 : vector<2x8x8xf32>
    "tpu.trace_start"() <{level = 10 : i32, message = "bqk,bkd->bqd"}> : () -> ()
    %cst_50 = arith.constant dense<0.000000e+00> : vector<2x8x8xf32>
    %129 = tpu.matmul %128, %115, %cst_50 {dimension_numbers = #tpu.dot_dimension_numbers<[2], [1], [1], [2], [0, 0, 0, 1, 1, 2], [0], [0]>} : vector<2x8x8xf32>, vector<2x8x8xf32>, vector<2x8x8xf32> -> vector<2x8x8xf32>
    "tpu.trace_stop"() : () -> ()
    %130 = vector.shape_cast %129 : vector<2x8x8xf32> to vector<16x8xf32>
    %c0_51 = arith.constant 0 : index
    %c3 = arith.constant 3 : index
    %c0_52 = arith.constant 0 : index
    %c0_53 = arith.constant 0 : index
    %131 = vector.load %arg5[%c0_51, %c3, %c0_52, %c0_53] : memref<6x4x8x32xf32, #tpu.memory_space<vmem>>, vector<1x1x8x32xf32>
    %132 = vector.shape_cast %131 : vector<1x1x8x32xf32> to vector<8x32xf32>
    %cst_54 = arith.constant dense<0.000000e+00> : vector<16x32xf32>
    %133 = tpu.matmul %130, %132, %cst_54 {dimension_numbers = #tpu.dot_dimension_numbers<[1], [0], [0], [1], [0, 0, 1, 1], [], []>} : vector<16x8xf32>, vector<8x32xf32>, vector<16x32xf32> -> vector<16x32xf32>
    %134 = arith.addf %112, %133 : vector<16x32xf32>
    %135 = arith.addf %0, %134 : vector<16x32xf32>
    %c0_55 = arith.constant 0 : index
    %c0_56 = arith.constant 0 : index
    %c0_57 = arith.constant 0 : index
    %136 = vector.load %arg6[%c0_55, %c0_56, %c0_57] : memref<6x1x32xf32, #tpu.memory_space<vmem>>, vector<1x1x32xf32>
    %137 = vector.shape_cast %136 : vector<1x1x32xf32> to vector<1x32xf32>
    %138 = vector.broadcast %137 : vector<1x32xf32> to vector<16x32xf32>
    %139 = arith.addf %135, %138 : vector<16x32xf32>
    %c0_58 = arith.constant 0 : index
    %c0_59 = arith.constant 0 : index
    %c0_60 = arith.constant 0 : index
    %140 = vector.load %arg7[%c0_58, %c0_59, %c0_60] : memref<6x1x32xf32, #tpu.memory_space<vmem>>, vector<1x1x32xf32>
    %141 = vector.shape_cast %140 : vector<1x1x32xf32> to vector<1x32xf32>
    %c0_61 = arith.constant 0 : index
    %c0_62 = arith.constant 0 : index
    %c0_63 = arith.constant 0 : index
    %142 = vector.load %arg8[%c0_61, %c0_62, %c0_63] : memref<6x1x32xf32, #tpu.memory_space<vmem>>, vector<1x1x32xf32>
    %143 = vector.shape_cast %142 : vector<1x1x32xf32> to vector<1x32xf32>
    %cst_64 = arith.constant dense<0.000000e+00> : vector<16xf32>
    %144 = vector.multi_reduction <add>, %139, %cst_64 [1] : vector<16x32xf32> to vector<16xf32>
    %145 = vector.shape_cast %144 : vector<16xf32> to vector<16x1xf32>
    %cst_65 = arith.constant 3.200000e+01 : f32
    %146 = vector.broadcast %cst_65 : f32 to vector<16x1xf32>
    %147 = arith.divf %145, %146 : vector<16x1xf32>
    %148 = vector.broadcast %147 : vector<16x1xf32> to vector<16x32xf32>
    %149 = arith.subf %139, %148 : vector<16x32xf32>
    %150 = arith.mulf %149, %149 : vector<16x32xf32>
    %cst_66 = arith.constant dense<0.000000e+00> : vector<16xf32>
    %151 = vector.multi_reduction <add>, %150, %cst_66 [1] : vector<16x32xf32> to vector<16xf32>
    %152 = vector.shape_cast %151 : vector<16xf32> to vector<16x1xf32>
    %cst_67 = arith.constant 3.200000e+01 : f32
    %153 = vector.broadcast %cst_67 : f32 to vector<16x1xf32>
    %154 = arith.divf %152, %153 : vector<16x1xf32>
    %155 = vector.broadcast %147 : vector<16x1xf32> to vector<16x32xf32>
    %156 = arith.subf %139, %155 : vector<16x32xf32>
    %cst_68 = arith.constant 9.99999974E-6 : f32
    %157 = vector.broadcast %cst_68 : f32 to vector<16x1xf32>
    %158 = arith.addf %154, %157 : vector<16x1xf32>
    %159 = math.rsqrt %158 : vector<16x1xf32>
    %160 = vector.broadcast %159 : vector<16x1xf32> to vector<16x32xf32>
    %161 = arith.mulf %156, %160 : vector<16x32xf32>
    %162 = vector.broadcast %141 : vector<1x32xf32> to vector<16x32xf32>
    %163 = arith.mulf %161, %162 : vector<16x32xf32>
    %164 = vector.broadcast %143 : vector<1x32xf32> to vector<16x32xf32>
    %165 = arith.addf %163, %164 : vector<16x32xf32>
    %c0_69 = arith.constant 0 : index
    %c0_70 = arith.constant 0 : index
    %c0_71 = arith.constant 0 : index
    %166 = vector.load %arg9[%c0_69, %c0_70, %c0_71] : memref<6x32x128xf32, #tpu.memory_space<vmem>>, vector<1x32x128xf32>
    %167 = vector.shape_cast %166 : vector<1x32x128xf32> to vector<32x128xf32>
    %cst_72 = arith.constant dense<0.000000e+00> : vector<16x128xf32>
    %168 = tpu.matmul %165, %167, %cst_72 {dimension_numbers = #tpu.dot_dimension_numbers<[1], [0], [0], [1], [0, 0, 1, 1], [], []>} : vector<16x32xf32>, vector<32x128xf32>, vector<16x128xf32> -> vector<16x128xf32>
    %c0_73 = arith.constant 0 : index
    %c0_74 = arith.constant 0 : index
    %c0_75 = arith.constant 0 : index
    %169 = vector.load %arg10[%c0_73, %c0_74, %c0_75] : memref<6x1x128xf32, #tpu.memory_space<vmem>>, vector<1x1x128xf32>
    %170 = vector.shape_cast %169 : vector<1x1x128xf32> to vector<1x128xf32>
    %171 = vector.broadcast %170 : vector<1x128xf32> to vector<16x128xf32>
    %172 = arith.addf %168, %171 : vector<16x128xf32>
    %cst_76 = arith.constant 5.000000e-01 : f32
    %173 = vector.broadcast %cst_76 : f32 to vector<16x128xf32>
    %174 = arith.mulf %173, %172 : vector<16x128xf32>
    %cst_77 = arith.constant 4.471500e-02 : f32
    %175 = vector.broadcast %cst_77 : f32 to vector<16x128xf32>
    %176 = arith.mulf %175, %172 : vector<16x128xf32>
    %177 = arith.mulf %176, %172 : vector<16x128xf32>
    %178 = arith.mulf %177, %172 : vector<16x128xf32>
    %179 = arith.addf %172, %178 : vector<16x128xf32>
    %cst_78 = arith.constant 0.797884583 : f32
    %180 = vector.broadcast %cst_78 : f32 to vector<16x128xf32>
    %181 = arith.mulf %180, %179 : vector<16x128xf32>
    %182 = math.tanh %181 : vector<16x128xf32>
    %cst_79 = arith.constant 1.000000e+00 : f32
    %183 = vector.broadcast %cst_79 : f32 to vector<16x128xf32>
    %184 = arith.addf %183, %182 : vector<16x128xf32>
    %185 = arith.mulf %174, %184 : vector<16x128xf32>
    %c0_80 = arith.constant 0 : index
    %c0_81 = arith.constant 0 : index
    %c0_82 = arith.constant 0 : index
    %186 = vector.load %arg11[%c0_80, %c0_81, %c0_82] : memref<6x128x32xf32, #tpu.memory_space<vmem>>, vector<1x128x32xf32>
    %187 = vector.shape_cast %186 : vector<1x128x32xf32> to vector<128x32xf32>
    %cst_83 = arith.constant dense<0.000000e+00> : vector<16x32xf32>
    %188 = tpu.matmul %185, %187, %cst_83 {dimension_numbers = #tpu.dot_dimension_numbers<[1], [0], [0], [1], [0, 0, 1, 1], [], []>} : vector<16x128xf32>, vector<128x32xf32>, vector<16x32xf32> -> vector<16x32xf32>
    %c0_84 = arith.constant 0 : index
    %c0_85 = arith.constant 0 : index
    %c0_86 = arith.constant 0 : index
    %189 = vector.load %arg12[%c0_84, %c0_85, %c0_86] : memref<6x1x32xf32, #tpu.memory_space<vmem>>, vector<1x1x32xf32>
    %190 = vector.shape_cast %189 : vector<1x1x32xf32> to vector<1x32xf32>
    %191 = vector.broadcast %190 : vector<1x32xf32> to vector<16x32xf32>
    %192 = arith.addf %188, %191 : vector<16x32xf32>
    %193 = arith.addf %139, %192 : vector<16x32xf32>
    %c1_87 = arith.constant 1 : index
    %c0_88 = arith.constant 0 : index
    %c0_89 = arith.constant 0 : index
    %194 = vector.load %arg1[%c1_87, %c0_88, %c0_89] : memref<6x1x32xf32, #tpu.memory_space<vmem>>, vector<1x1x32xf32>
    %195 = vector.shape_cast %194 : vector<1x1x32xf32> to vector<1x32xf32>
    %c1_90 = arith.constant 1 : index
    %c0_91 = arith.constant 0 : index
    %c0_92 = arith.constant 0 : index
    %196 = vector.load %arg2[%c1_90, %c0_91, %c0_92] : memref<6x1x32xf32, #tpu.memory_space<vmem>>, vector<1x1x32xf32>
    %197 = vector.shape_cast %196 : vector<1x1x32xf32> to vector<1x32xf32>
    %cst_93 = arith.constant dense<0.000000e+00> : vector<16xf32>
    %198 = vector.multi_reduction <add>, %193, %cst_93 [1] : vector<16x32xf32> to vector<16xf32>
    %199 = vector.shape_cast %198 : vector<16xf32> to vector<16x1xf32>
    %cst_94 = arith.constant 3.200000e+01 : f32
    %200 = vector.broadcast %cst_94 : f32 to vector<16x1xf32>
    %201 = arith.divf %199, %200 : vector<16x1xf32>
    %202 = vector.broadcast %201 : vector<16x1xf32> to vector<16x32xf32>
    %203 = arith.subf %193, %202 : vector<16x32xf32>
    %204 = arith.mulf %203, %203 : vector<16x32xf32>
    %cst_95 = arith.constant dense<0.000000e+00> : vector<16xf32>
    %205 = vector.multi_reduction <add>, %204, %cst_95 [1] : vector<16x32xf32> to vector<16xf32>
    %206 = vector.shape_cast %205 : vector<16xf32> to vector<16x1xf32>
    %cst_96 = arith.constant 3.200000e+01 : f32
    %207 = vector.broadcast %cst_96 : f32 to vector<16x1xf32>
    %208 = arith.divf %206, %207 : vector<16x1xf32>
    %209 = vector.broadcast %201 : vector<16x1xf32> to vector<16x32xf32>
    %210 = arith.subf %193, %209 : vector<16x32xf32>
    %cst_97 = arith.constant 9.99999974E-6 : f32
    %211 = vector.broadcast %cst_97 : f32 to vector<16x1xf32>
    %212 = arith.addf %208, %211 : vector<16x1xf32>
    %213 = math.rsqrt %212 : vector<16x1xf32>
    %214 = vector.broadcast %213 : vector<16x1xf32> to vector<16x32xf32>
    %215 = arith.mulf %210, %214 : vector<16x32xf32>
    %216 = vector.broadcast %195 : vector<1x32xf32> to vector<16x32xf32>
    %217 = arith.mulf %215, %216 : vector<16x32xf32>
    %218 = vector.broadcast %197 : vector<1x32xf32> to vector<16x32xf32>
    %219 = arith.addf %217, %218 : vector<16x32xf32>
    %c1_98 = arith.constant 1 : index
    %c0_99 = arith.constant 0 : index
    %c0_100 = arith.constant 0 : index
    %220 = vector.load %arg3[%c1_98, %c0_99, %c0_100] : memref<6x32x96xf32, #tpu.memory_space<vmem>>, vector<1x32x96xf32>
    %221 = vector.shape_cast %220 : vector<1x32x96xf32> to vector<32x96xf32>
    %cst_101 = arith.constant dense<0.000000e+00> : vector<16x96xf32>
    %222 = tpu.matmul %219, %221, %cst_101 {dimension_numbers = #tpu.dot_dimension_numbers<[1], [0], [0], [1], [0, 0, 1, 1], [], []>} : vector<16x32xf32>, vector<32x96xf32>, vector<16x96xf32> -> vector<16x96xf32>
    %c1_102 = arith.constant 1 : index
    %c0_103 = arith.constant 0 : index
    %c0_104 = arith.constant 0 : index
    %223 = vector.load %arg4[%c1_102, %c0_103, %c0_104] : memref<6x1x96xf32, #tpu.memory_space<vmem>>, vector<1x1x96xf32>
    %224 = vector.shape_cast %223 : vector<1x1x96xf32> to vector<1x96xf32>
    %225 = vector.broadcast %224 : vector<1x96xf32> to vector<16x96xf32>
    %226 = arith.addf %222, %225 : vector<16x96xf32>
    %227 = vector.shape_cast %226 : vector<16x96xf32> to vector<2x8x96xf32>
    %228 = vector.extract_strided_slice %227 {offsets = [0, 0, 0], sizes = [2, 8, 32], strides = [1, 1, 1]} : vector<2x8x96xf32> to vector<2x8x32xf32>
    %cst_105 = arith.constant 0.353553385 : f32
    %229 = vector.broadcast %cst_105 : f32 to vector<2x8x32xf32>
    %230 = arith.mulf %228, %229 : vector<2x8x32xf32>
    %231 = vector.extract_strided_slice %227 {offsets = [0, 0, 32], sizes = [2, 8, 32], strides = [1, 1, 1]} : vector<2x8x96xf32> to vector<2x8x32xf32>
    %232 = vector.extract_strided_slice %227 {offsets = [0, 0, 64], sizes = [2, 8, 32], strides = [1, 1, 1]} : vector<2x8x96xf32> to vector<2x8x32xf32>
    %cst_106 = arith.constant 0.000000e+00 : f32
    %233 = vector.broadcast %cst_106 : f32 to vector<16x32xf32>
    %234 = vector.extract_strided_slice %230 {offsets = [0, 0, 0], sizes = [2, 8, 8], strides = [1, 1, 1]} : vector<2x8x32xf32> to vector<2x8x8xf32>
    %235 = vector.extract_strided_slice %231 {offsets = [0, 0, 0], sizes = [2, 8, 8], strides = [1, 1, 1]} : vector<2x8x32xf32> to vector<2x8x8xf32>
    %236 = vector.extract_strided_slice %232 {offsets = [0, 0, 0], sizes = [2, 8, 8], strides = [1, 1, 1]} : vector<2x8x32xf32> to vector<2x8x8xf32>
    "tpu.trace_start"() <{level = 10 : i32, message = "bqd,bkd->bqk"}> : () -> ()
    %cst_107 = arith.constant dense<0.000000e+00> : vector<2x8x8xf32>
    %237 = tpu.matmul %234, %235, %cst_107 {dimension_numbers = #tpu.dot_dimension_numbers<[2], [2], [1], [1], [0, 0, 0, 1, 1, 1], [0], [0]>} : vector<2x8x8xf32>, vector<2x8x8xf32>, vector<2x8x8xf32> -> vector<2x8x8xf32>
    "tpu.trace_stop"() : () -> ()
    %238 = vector.shape_cast %6 : vector<8x8xf32> to vector<1x8x8xf32>
    %239 = vector.broadcast %238 : vector<1x8x8xf32> to vector<2x8x8xf32>
    %240 = arith.addf %237, %239 : vector<2x8x8xf32>
    %cst_108 = arith.constant dense<0xFF800000> : vector<2x8xf32>
    %241 = vector.multi_reduction <maximumf>, %240, %cst_108 [2] : vector<2x8x8xf32> to vector<2x8xf32>
    %242 = vector.shape_cast %241 : vector<2x8xf32> to vector<2x8x1xf32>
    %243 = vector.broadcast %242 : vector<2x8x1xf32> to vector<2x8x8xf32>
    %244 = arith.subf %240, %243 : vector<2x8x8xf32>
    %245 = math.exp %244 : vector<2x8x8xf32>
    %cst_109 = arith.constant dense<0.000000e+00> : vector<2x8xf32>
    %246 = vector.multi_reduction <add>, %245, %cst_109 [2] : vector<2x8x8xf32> to vector<2x8xf32>
    %247 = vector.shape_cast %246 : vector<2x8xf32> to vector<2x8x1xf32>
    %248 = vector.broadcast %247 : vector<2x8x1xf32> to vector<2x8x8xf32>
    %249 = arith.divf %245, %248 : vector<2x8x8xf32>
    "tpu.trace_start"() <{level = 10 : i32, message = "bqk,bkd->bqd"}> : () -> ()
    %cst_110 = arith.constant dense<0.000000e+00> : vector<2x8x8xf32>
    %250 = tpu.matmul %249, %236, %cst_110 {dimension_numbers = #tpu.dot_dimension_numbers<[2], [1], [1], [2], [0, 0, 0, 1, 1, 2], [0], [0]>} : vector<2x8x8xf32>, vector<2x8x8xf32>, vector<2x8x8xf32> -> vector<2x8x8xf32>
    "tpu.trace_stop"() : () -> ()
    %251 = vector.shape_cast %250 : vector<2x8x8xf32> to vector<16x8xf32>
    %c1_111 = arith.constant 1 : index
    %c0_112 = arith.constant 0 : index
    %c0_113 = arith.constant 0 : index
    %c0_114 = arith.constant 0 : index
    %252 = vector.load %arg5[%c1_111, %c0_112, %c0_113, %c0_114] : memref<6x4x8x32xf32, #tpu.memory_space<vmem>>, vector<1x1x8x32xf32>
    %253 = vector.shape_cast %252 : vector<1x1x8x32xf32> to vector<8x32xf32>
    %cst_115 = arith.constant dense<0.000000e+00> : vector<16x32xf32>
    %254 = tpu.matmul %251, %253, %cst_115 {dimension_numbers = #tpu.dot_dimension_numbers<[1], [0], [0], [1], [0, 0, 1, 1], [], []>} : vector<16x8xf32>, vector<8x32xf32>, vector<16x32xf32> -> vector<16x32xf32>
    %255 = arith.addf %233, %254 : vector<16x32xf32>
    %256 = vector.extract_strided_slice %230 {offsets = [0, 0, 8], sizes = [2, 8, 8], strides = [1, 1, 1]} : vector<2x8x32xf32> to vector<2x8x8xf32>
    %257 = vector.extract_strided_slice %231 {offsets = [0, 0, 8], sizes = [2, 8, 8], strides = [1, 1, 1]} : vector<2x8x32xf32> to vector<2x8x8xf32>
    %258 = vector.extract_strided_slice %232 {offsets = [0, 0, 8], sizes = [2, 8, 8], strides = [1, 1, 1]} : vector<2x8x32xf32> to vector<2x8x8xf32>
    "tpu.trace_start"() <{level = 10 : i32, message = "bqd,bkd->bqk"}> : () -> ()
    %cst_116 = arith.constant dense<0.000000e+00> : vector<2x8x8xf32>
    %259 = tpu.matmul %256, %257, %cst_116 {dimension_numbers = #tpu.dot_dimension_numbers<[2], [2], [1], [1], [0, 0, 0, 1, 1, 1], [0], [0]>} : vector<2x8x8xf32>, vector<2x8x8xf32>, vector<2x8x8xf32> -> vector<2x8x8xf32>
    "tpu.trace_stop"() : () -> ()
    %260 = vector.shape_cast %6 : vector<8x8xf32> to vector<1x8x8xf32>
    %261 = vector.broadcast %260 : vector<1x8x8xf32> to vector<2x8x8xf32>
    %262 = arith.addf %259, %261 : vector<2x8x8xf32>
    %cst_117 = arith.constant dense<0xFF800000> : vector<2x8xf32>
    %263 = vector.multi_reduction <maximumf>, %262, %cst_117 [2] : vector<2x8x8xf32> to vector<2x8xf32>
    %264 = vector.shape_cast %263 : vector<2x8xf32> to vector<2x8x1xf32>
    %265 = vector.broadcast %264 : vector<2x8x1xf32> to vector<2x8x8xf32>
    %266 = arith.subf %262, %265 : vector<2x8x8xf32>
    %267 = math.exp %266 : vector<2x8x8xf32>
    %cst_118 = arith.constant dense<0.000000e+00> : vector<2x8xf32>
    %268 = vector.multi_reduction <add>, %267, %cst_118 [2] : vector<2x8x8xf32> to vector<2x8xf32>
    %269 = vector.shape_cast %268 : vector<2x8xf32> to vector<2x8x1xf32>
    %270 = vector.broadcast %269 : vector<2x8x1xf32> to vector<2x8x8xf32>
    %271 = arith.divf %267, %270 : vector<2x8x8xf32>
    "tpu.trace_start"() <{level = 10 : i32, message = "bqk,bkd->bqd"}> : () -> ()
    %cst_119 = arith.constant dense<0.000000e+00> : vector<2x8x8xf32>
    %272 = tpu.matmul %271, %258, %cst_119 {dimension_numbers = #tpu.dot_dimension_numbers<[2], [1], [1], [2], [0, 0, 0, 1, 1, 2], [0], [0]>} : vector<2x8x8xf32>, vector<2x8x8xf32>, vector<2x8x8xf32> -> vector<2x8x8xf32>
    "tpu.trace_stop"() : () -> ()
    %273 = vector.shape_cast %272 : vector<2x8x8xf32> to vector<16x8xf32>
    %c1_120 = arith.constant 1 : index
    %c1_121 = arith.constant 1 : index
    %c0_122 = arith.constant 0 : index
    %c0_123 = arith.constant 0 : index
    %274 = vector.load %arg5[%c1_120, %c1_121, %c0_122, %c0_123] : memref<6x4x8x32xf32, #tpu.memory_space<vmem>>, vector<1x1x8x32xf32>
    %275 = vector.shape_cast %274 : vector<1x1x8x32xf32> to vector<8x32xf32>
    %cst_124 = arith.constant dense<0.000000e+00> : vector<16x32xf32>
    %276 = tpu.matmul %273, %275, %cst_124 {dimension_numbers = #tpu.dot_dimension_numbers<[1], [0], [0], [1], [0, 0, 1, 1], [], []>} : vector<16x8xf32>, vector<8x32xf32>, vector<16x32xf32> -> vector<16x32xf32>
    %277 = arith.addf %255, %276 : vector<16x32xf32>
    %278 = vector.extract_strided_slice %230 {offsets = [0, 0, 16], sizes = [2, 8, 8], strides = [1, 1, 1]} : vector<2x8x32xf32> to vector<2x8x8xf32>
    %279 = vector.extract_strided_slice %231 {offsets = [0, 0, 16], sizes = [2, 8, 8], strides = [1, 1, 1]} : vector<2x8x32xf32> to vector<2x8x8xf32>
    %280 = vector.extract_strided_slice %232 {offsets = [0, 0, 16], sizes = [2, 8, 8], strides = [1, 1, 1]} : vector<2x8x32xf32> to vector<2x8x8xf32>
    "tpu.trace_start"() <{level = 10 : i32, message = "bqd,bkd->bqk"}> : () -> ()
    %cst_125 = arith.constant dense<0.000000e+00> : vector<2x8x8xf32>
    %281 = tpu.matmul %278, %279, %cst_125 {dimension_numbers = #tpu.dot_dimension_numbers<[2], [2], [1], [1], [0, 0, 0, 1, 1, 1], [0], [0]>} : vector<2x8x8xf32>, vector<2x8x8xf32>, vector<2x8x8xf32> -> vector<2x8x8xf32>
    "tpu.trace_stop"() : () -> ()
    %282 = vector.shape_cast %6 : vector<8x8xf32> to vector<1x8x8xf32>
    %283 = vector.broadcast %282 : vector<1x8x8xf32> to vector<2x8x8xf32>
    %284 = arith.addf %281, %283 : vector<2x8x8xf32>
    %cst_126 = arith.constant dense<0xFF800000> : vector<2x8xf32>
    %285 = vector.multi_reduction <maximumf>, %284, %cst_126 [2] : vector<2x8x8xf32> to vector<2x8xf32>
    %286 = vector.shape_cast %285 : vector<2x8xf32> to vector<2x8x1xf32>
    %287 = vector.broadcast %286 : vector<2x8x1xf32> to vector<2x8x8xf32>
    %288 = arith.subf %284, %287 : vector<2x8x8xf32>
    %289 = math.exp %288 : vector<2x8x8xf32>
    %cst_127 = arith.constant dense<0.000000e+00> : vector<2x8xf32>
    %290 = vector.multi_reduction <add>, %289, %cst_127 [2] : vector<2x8x8xf32> to vector<2x8xf32>
    %291 = vector.shape_cast %290 : vector<2x8xf32> to vector<2x8x1xf32>
    %292 = vector.broadcast %291 : vector<2x8x1xf32> to vector<2x8x8xf32>
    %293 = arith.divf %289, %292 : vector<2x8x8xf32>
    "tpu.trace_start"() <{level = 10 : i32, message = "bqk,bkd->bqd"}> : () -> ()
    %cst_128 = arith.constant dense<0.000000e+00> : vector<2x8x8xf32>
    %294 = tpu.matmul %293, %280, %cst_128 {dimension_numbers = #tpu.dot_dimension_numbers<[2], [1], [1], [2], [0, 0, 0, 1, 1, 2], [0], [0]>} : vector<2x8x8xf32>, vector<2x8x8xf32>, vector<2x8x8xf32> -> vector<2x8x8xf32>
    "tpu.trace_stop"() : () -> ()
    %295 = vector.shape_cast %294 : vector<2x8x8xf32> to vector<16x8xf32>
    %c1_129 = arith.constant 1 : index
    %c2_130 = arith.constant 2 : index
    %c0_131 = arith.constant 0 : index
    %c0_132 = arith.constant 0 : index
    %296 = vector.load %arg5[%c1_129, %c2_130, %c0_131, %c0_132] : memref<6x4x8x32xf32, #tpu.memory_space<vmem>>, vector<1x1x8x32xf32>
    %297 = vector.shape_cast %296 : vector<1x1x8x32xf32> to vector<8x32xf32>
    %cst_133 = arith.constant dense<0.000000e+00> : vector<16x32xf32>
    %298 = tpu.matmul %295, %297, %cst_133 {dimension_numbers = #tpu.dot_dimension_numbers<[1], [0], [0], [1], [0, 0, 1, 1], [], []>} : vector<16x8xf32>, vector<8x32xf32>, vector<16x32xf32> -> vector<16x32xf32>
    %299 = arith.addf %277, %298 : vector<16x32xf32>
    %300 = vector.extract_strided_slice %230 {offsets = [0, 0, 24], sizes = [2, 8, 8], strides = [1, 1, 1]} : vector<2x8x32xf32> to vector<2x8x8xf32>
    %301 = vector.extract_strided_slice %231 {offsets = [0, 0, 24], sizes = [2, 8, 8], strides = [1, 1, 1]} : vector<2x8x32xf32> to vector<2x8x8xf32>
    %302 = vector.extract_strided_slice %232 {offsets = [0, 0, 24], sizes = [2, 8, 8], strides = [1, 1, 1]} : vector<2x8x32xf32> to vector<2x8x8xf32>
    "tpu.trace_start"() <{level = 10 : i32, message = "bqd,bkd->bqk"}> : () -> ()
    %cst_134 = arith.constant dense<0.000000e+00> : vector<2x8x8xf32>
    %303 = tpu.matmul %300, %301, %cst_134 {dimension_numbers = #tpu.dot_dimension_numbers<[2], [2], [1], [1], [0, 0, 0, 1, 1, 1], [0], [0]>} : vector<2x8x8xf32>, vector<2x8x8xf32>, vector<2x8x8xf32> -> vector<2x8x8xf32>
    "tpu.trace_stop"() : () -> ()
    %304 = vector.shape_cast %6 : vector<8x8xf32> to vector<1x8x8xf32>
    %305 = vector.broadcast %304 : vector<1x8x8xf32> to vector<2x8x8xf32>
    %306 = arith.addf %303, %305 : vector<2x8x8xf32>
    %cst_135 = arith.constant dense<0xFF800000> : vector<2x8xf32>
    %307 = vector.multi_reduction <maximumf>, %306, %cst_135 [2] : vector<2x8x8xf32> to vector<2x8xf32>
    %308 = vector.shape_cast %307 : vector<2x8xf32> to vector<2x8x1xf32>
    %309 = vector.broadcast %308 : vector<2x8x1xf32> to vector<2x8x8xf32>
    %310 = arith.subf %306, %309 : vector<2x8x8xf32>
    %311 = math.exp %310 : vector<2x8x8xf32>
    %cst_136 = arith.constant dense<0.000000e+00> : vector<2x8xf32>
    %312 = vector.multi_reduction <add>, %311, %cst_136 [2] : vector<2x8x8xf32> to vector<2x8xf32>
    %313 = vector.shape_cast %312 : vector<2x8xf32> to vector<2x8x1xf32>
    %314 = vector.broadcast %313 : vector<2x8x1xf32> to vector<2x8x8xf32>
    %315 = arith.divf %311, %314 : vector<2x8x8xf32>
    "tpu.trace_start"() <{level = 10 : i32, message = "bqk,bkd->bqd"}> : () -> ()
    %cst_137 = arith.constant dense<0.000000e+00> : vector<2x8x8xf32>
    %316 = tpu.matmul %315, %302, %cst_137 {dimension_numbers = #tpu.dot_dimension_numbers<[2], [1], [1], [2], [0, 0, 0, 1, 1, 2], [0], [0]>} : vector<2x8x8xf32>, vector<2x8x8xf32>, vector<2x8x8xf32> -> vector<2x8x8xf32>
    "tpu.trace_stop"() : () -> ()
    %317 = vector.shape_cast %316 : vector<2x8x8xf32> to vector<16x8xf32>
    %c1_138 = arith.constant 1 : index
    %c3_139 = arith.constant 3 : index
    %c0_140 = arith.constant 0 : index
    %c0_141 = arith.constant 0 : index
    %318 = vector.load %arg5[%c1_138, %c3_139, %c0_140, %c0_141] : memref<6x4x8x32xf32, #tpu.memory_space<vmem>>, vector<1x1x8x32xf32>
    %319 = vector.shape_cast %318 : vector<1x1x8x32xf32> to vector<8x32xf32>
    %cst_142 = arith.constant dense<0.000000e+00> : vector<16x32xf32>
    %320 = tpu.matmul %317, %319, %cst_142 {dimension_numbers = #tpu.dot_dimension_numbers<[1], [0], [0], [1], [0, 0, 1, 1], [], []>} : vector<16x8xf32>, vector<8x32xf32>, vector<16x32xf32> -> vector<16x32xf32>
    %321 = arith.addf %299, %320 : vector<16x32xf32>
    %322 = arith.addf %193, %321 : vector<16x32xf32>
    %c1_143 = arith.constant 1 : index
    %c0_144 = arith.constant 0 : index
    %c0_145 = arith.constant 0 : index
    %323 = vector.load %arg6[%c1_143, %c0_144, %c0_145] : memref<6x1x32xf32, #tpu.memory_space<vmem>>, vector<1x1x32xf32>
    %324 = vector.shape_cast %323 : vector<1x1x32xf32> to vector<1x32xf32>
    %325 = vector.broadcast %324 : vector<1x32xf32> to vector<16x32xf32>
    %326 = arith.addf %322, %325 : vector<16x32xf32>
    %c1_146 = arith.constant 1 : index
    %c0_147 = arith.constant 0 : index
    %c0_148 = arith.constant 0 : index
    %327 = vector.load %arg7[%c1_146, %c0_147, %c0_148] : memref<6x1x32xf32, #tpu.memory_space<vmem>>, vector<1x1x32xf32>
    %328 = vector.shape_cast %327 : vector<1x1x32xf32> to vector<1x32xf32>
    %c1_149 = arith.constant 1 : index
    %c0_150 = arith.constant 0 : index
    %c0_151 = arith.constant 0 : index
    %329 = vector.load %arg8[%c1_149, %c0_150, %c0_151] : memref<6x1x32xf32, #tpu.memory_space<vmem>>, vector<1x1x32xf32>
    %330 = vector.shape_cast %329 : vector<1x1x32xf32> to vector<1x32xf32>
    %cst_152 = arith.constant dense<0.000000e+00> : vector<16xf32>
    %331 = vector.multi_reduction <add>, %326, %cst_152 [1] : vector<16x32xf32> to vector<16xf32>
    %332 = vector.shape_cast %331 : vector<16xf32> to vector<16x1xf32>
    %cst_153 = arith.constant 3.200000e+01 : f32
    %333 = vector.broadcast %cst_153 : f32 to vector<16x1xf32>
    %334 = arith.divf %332, %333 : vector<16x1xf32>
    %335 = vector.broadcast %334 : vector<16x1xf32> to vector<16x32xf32>
    %336 = arith.subf %326, %335 : vector<16x32xf32>
    %337 = arith.mulf %336, %336 : vector<16x32xf32>
    %cst_154 = arith.constant dense<0.000000e+00> : vector<16xf32>
    %338 = vector.multi_reduction <add>, %337, %cst_154 [1] : vector<16x32xf32> to vector<16xf32>
    %339 = vector.shape_cast %338 : vector<16xf32> to vector<16x1xf32>
    %cst_155 = arith.constant 3.200000e+01 : f32
    %340 = vector.broadcast %cst_155 : f32 to vector<16x1xf32>
    %341 = arith.divf %339, %340 : vector<16x1xf32>
    %342 = vector.broadcast %334 : vector<16x1xf32> to vector<16x32xf32>
    %343 = arith.subf %326, %342 : vector<16x32xf32>
    %cst_156 = arith.constant 9.99999974E-6 : f32
    %344 = vector.broadcast %cst_156 : f32 to vector<16x1xf32>
    %345 = arith.addf %341, %344 : vector<16x1xf32>
    %346 = math.rsqrt %345 : vector<16x1xf32>
    %347 = vector.broadcast %346 : vector<16x1xf32> to vector<16x32xf32>
    %348 = arith.mulf %343, %347 : vector<16x32xf32>
    %349 = vector.broadcast %328 : vector<1x32xf32> to vector<16x32xf32>
    %350 = arith.mulf %348, %349 : vector<16x32xf32>
    %351 = vector.broadcast %330 : vector<1x32xf32> to vector<16x32xf32>
    %352 = arith.addf %350, %351 : vector<16x32xf32>
    %c1_157 = arith.constant 1 : index
    %c0_158 = arith.constant 0 : index
    %c0_159 = arith.constant 0 : index
    %353 = vector.load %arg9[%c1_157, %c0_158, %c0_159] : memref<6x32x128xf32, #tpu.memory_space<vmem>>, vector<1x32x128xf32>
    %354 = vector.shape_cast %353 : vector<1x32x128xf32> to vector<32x128xf32>
    %cst_160 = arith.constant dense<0.000000e+00> : vector<16x128xf32>
    %355 = tpu.matmul %352, %354, %cst_160 {dimension_numbers = #tpu.dot_dimension_numbers<[1], [0], [0], [1], [0, 0, 1, 1], [], []>} : vector<16x32xf32>, vector<32x128xf32>, vector<16x128xf32> -> vector<16x128xf32>
    %c1_161 = arith.constant 1 : index
    %c0_162 = arith.constant 0 : index
    %c0_163 = arith.constant 0 : index
    %356 = vector.load %arg10[%c1_161, %c0_162, %c0_163] : memref<6x1x128xf32, #tpu.memory_space<vmem>>, vector<1x1x128xf32>
    %357 = vector.shape_cast %356 : vector<1x1x128xf32> to vector<1x128xf32>
    %358 = vector.broadcast %357 : vector<1x128xf32> to vector<16x128xf32>
    %359 = arith.addf %355, %358 : vector<16x128xf32>
    %cst_164 = arith.constant 5.000000e-01 : f32
    %360 = vector.broadcast %cst_164 : f32 to vector<16x128xf32>
    %361 = arith.mulf %360, %359 : vector<16x128xf32>
    %cst_165 = arith.constant 4.471500e-02 : f32
    %362 = vector.broadcast %cst_165 : f32 to vector<16x128xf32>
    %363 = arith.mulf %362, %359 : vector<16x128xf32>
    %364 = arith.mulf %363, %359 : vector<16x128xf32>
    %365 = arith.mulf %364, %359 : vector<16x128xf32>
    %366 = arith.addf %359, %365 : vector<16x128xf32>
    %cst_166 = arith.constant 0.797884583 : f32
    %367 = vector.broadcast %cst_166 : f32 to vector<16x128xf32>
    %368 = arith.mulf %367, %366 : vector<16x128xf32>
    %369 = math.tanh %368 : vector<16x128xf32>
    %cst_167 = arith.constant 1.000000e+00 : f32
    %370 = vector.broadcast %cst_167 : f32 to vector<16x128xf32>
    %371 = arith.addf %370, %369 : vector<16x128xf32>
    %372 = arith.mulf %361, %371 : vector<16x128xf32>
    %c1_168 = arith.constant 1 : index
    %c0_169 = arith.constant 0 : index
    %c0_170 = arith.constant 0 : index
    %373 = vector.load %arg11[%c1_168, %c0_169, %c0_170] : memref<6x128x32xf32, #tpu.memory_space<vmem>>, vector<1x128x32xf32>
    %374 = vector.shape_cast %373 : vector<1x128x32xf32> to vector<128x32xf32>
    %cst_171 = arith.constant dense<0.000000e+00> : vector<16x32xf32>
    %375 = tpu.matmul %372, %374, %cst_171 {dimension_numbers = #tpu.dot_dimension_numbers<[1], [0], [0], [1], [0, 0, 1, 1], [], []>} : vector<16x128xf32>, vector<128x32xf32>, vector<16x32xf32> -> vector<16x32xf32>
    %c1_172 = arith.constant 1 : index
    %c0_173 = arith.constant 0 : index
    %c0_174 = arith.constant 0 : index
    %376 = vector.load %arg12[%c1_172, %c0_173, %c0_174] : memref<6x1x32xf32, #tpu.memory_space<vmem>>, vector<1x1x32xf32>
    %377 = vector.shape_cast %376 : vector<1x1x32xf32> to vector<1x32xf32>
    %378 = vector.broadcast %377 : vector<1x32xf32> to vector<16x32xf32>
    %379 = arith.addf %375, %378 : vector<16x32xf32>
    %380 = arith.addf %326, %379 : vector<16x32xf32>
    %c2_175 = arith.constant 2 : index
    %c0_176 = arith.constant 0 : index
    %c0_177 = arith.constant 0 : index
    %381 = vector.load %arg1[%c2_175, %c0_176, %c0_177] : memref<6x1x32xf32, #tpu.memory_space<vmem>>, vector<1x1x32xf32>
    %382 = vector.shape_cast %381 : vector<1x1x32xf32> to vector<1x32xf32>
    %c2_178 = arith.constant 2 : index
    %c0_179 = arith.constant 0 : index
    %c0_180 = arith.constant 0 : index
    %383 = vector.load %arg2[%c2_178, %c0_179, %c0_180] : memref<6x1x32xf32, #tpu.memory_space<vmem>>, vector<1x1x32xf32>
    %384 = vector.shape_cast %383 : vector<1x1x32xf32> to vector<1x32xf32>
    %cst_181 = arith.constant dense<0.000000e+00> : vector<16xf32>
    %385 = vector.multi_reduction <add>, %380, %cst_181 [1] : vector<16x32xf32> to vector<16xf32>
    %386 = vector.shape_cast %385 : vector<16xf32> to vector<16x1xf32>
    %cst_182 = arith.constant 3.200000e+01 : f32
    %387 = vector.broadcast %cst_182 : f32 to vector<16x1xf32>
    %388 = arith.divf %386, %387 : vector<16x1xf32>
    %389 = vector.broadcast %388 : vector<16x1xf32> to vector<16x32xf32>
    %390 = arith.subf %380, %389 : vector<16x32xf32>
    %391 = arith.mulf %390, %390 : vector<16x32xf32>
    %cst_183 = arith.constant dense<0.000000e+00> : vector<16xf32>
    %392 = vector.multi_reduction <add>, %391, %cst_183 [1] : vector<16x32xf32> to vector<16xf32>
    %393 = vector.shape_cast %392 : vector<16xf32> to vector<16x1xf32>
    %cst_184 = arith.constant 3.200000e+01 : f32
    %394 = vector.broadcast %cst_184 : f32 to vector<16x1xf32>
    %395 = arith.divf %393, %394 : vector<16x1xf32>
    %396 = vector.broadcast %388 : vector<16x1xf32> to vector<16x32xf32>
    %397 = arith.subf %380, %396 : vector<16x32xf32>
    %cst_185 = arith.constant 9.99999974E-6 : f32
    %398 = vector.broadcast %cst_185 : f32 to vector<16x1xf32>
    %399 = arith.addf %395, %398 : vector<16x1xf32>
    %400 = math.rsqrt %399 : vector<16x1xf32>
    %401 = vector.broadcast %400 : vector<16x1xf32> to vector<16x32xf32>
    %402 = arith.mulf %397, %401 : vector<16x32xf32>
    %403 = vector.broadcast %382 : vector<1x32xf32> to vector<16x32xf32>
    %404 = arith.mulf %402, %403 : vector<16x32xf32>
    %405 = vector.broadcast %384 : vector<1x32xf32> to vector<16x32xf32>
    %406 = arith.addf %404, %405 : vector<16x32xf32>
    %c2_186 = arith.constant 2 : index
    %c0_187 = arith.constant 0 : index
    %c0_188 = arith.constant 0 : index
    %407 = vector.load %arg3[%c2_186, %c0_187, %c0_188] : memref<6x32x96xf32, #tpu.memory_space<vmem>>, vector<1x32x96xf32>
    %408 = vector.shape_cast %407 : vector<1x32x96xf32> to vector<32x96xf32>
    %cst_189 = arith.constant dense<0.000000e+00> : vector<16x96xf32>
    %409 = tpu.matmul %406, %408, %cst_189 {dimension_numbers = #tpu.dot_dimension_numbers<[1], [0], [0], [1], [0, 0, 1, 1], [], []>} : vector<16x32xf32>, vector<32x96xf32>, vector<16x96xf32> -> vector<16x96xf32>
    %c2_190 = arith.constant 2 : index
    %c0_191 = arith.constant 0 : index
    %c0_192 = arith.constant 0 : index
    %410 = vector.load %arg4[%c2_190, %c0_191, %c0_192] : memref<6x1x96xf32, #tpu.memory_space<vmem>>, vector<1x1x96xf32>
    %411 = vector.shape_cast %410 : vector<1x1x96xf32> to vector<1x96xf32>
    %412 = vector.broadcast %411 : vector<1x96xf32> to vector<16x96xf32>
    %413 = arith.addf %409, %412 : vector<16x96xf32>
    %414 = vector.shape_cast %413 : vector<16x96xf32> to vector<2x8x96xf32>
    %415 = vector.extract_strided_slice %414 {offsets = [0, 0, 0], sizes = [2, 8, 32], strides = [1, 1, 1]} : vector<2x8x96xf32> to vector<2x8x32xf32>
    %cst_193 = arith.constant 0.353553385 : f32
    %416 = vector.broadcast %cst_193 : f32 to vector<2x8x32xf32>
    %417 = arith.mulf %415, %416 : vector<2x8x32xf32>
    %418 = vector.extract_strided_slice %414 {offsets = [0, 0, 32], sizes = [2, 8, 32], strides = [1, 1, 1]} : vector<2x8x96xf32> to vector<2x8x32xf32>
    %419 = vector.extract_strided_slice %414 {offsets = [0, 0, 64], sizes = [2, 8, 32], strides = [1, 1, 1]} : vector<2x8x96xf32> to vector<2x8x32xf32>
    %cst_194 = arith.constant 0.000000e+00 : f32
    %420 = vector.broadcast %cst_194 : f32 to vector<16x32xf32>
    %421 = vector.extract_strided_slice %417 {offsets = [0, 0, 0], sizes = [2, 8, 8], strides = [1, 1, 1]} : vector<2x8x32xf32> to vector<2x8x8xf32>
    %422 = vector.extract_strided_slice %418 {offsets = [0, 0, 0], sizes = [2, 8, 8], strides = [1, 1, 1]} : vector<2x8x32xf32> to vector<2x8x8xf32>
    %423 = vector.extract_strided_slice %419 {offsets = [0, 0, 0], sizes = [2, 8, 8], strides = [1, 1, 1]} : vector<2x8x32xf32> to vector<2x8x8xf32>
    "tpu.trace_start"() <{level = 10 : i32, message = "bqd,bkd->bqk"}> : () -> ()
    %cst_195 = arith.constant dense<0.000000e+00> : vector<2x8x8xf32>
    %424 = tpu.matmul %421, %422, %cst_195 {dimension_numbers = #tpu.dot_dimension_numbers<[2], [2], [1], [1], [0, 0, 0, 1, 1, 1], [0], [0]>} : vector<2x8x8xf32>, vector<2x8x8xf32>, vector<2x8x8xf32> -> vector<2x8x8xf32>
    "tpu.trace_stop"() : () -> ()
    %425 = vector.shape_cast %6 : vector<8x8xf32> to vector<1x8x8xf32>
    %426 = vector.broadcast %425 : vector<1x8x8xf32> to vector<2x8x8xf32>
    %427 = arith.addf %424, %426 : vector<2x8x8xf32>
    %cst_196 = arith.constant dense<0xFF800000> : vector<2x8xf32>
    %428 = vector.multi_reduction <maximumf>, %427, %cst_196 [2] : vector<2x8x8xf32> to vector<2x8xf32>
    %429 = vector.shape_cast %428 : vector<2x8xf32> to vector<2x8x1xf32>
    %430 = vector.broadcast %429 : vector<2x8x1xf32> to vector<2x8x8xf32>
    %431 = arith.subf %427, %430 : vector<2x8x8xf32>
    %432 = math.exp %431 : vector<2x8x8xf32>
    %cst_197 = arith.constant dense<0.000000e+00> : vector<2x8xf32>
    %433 = vector.multi_reduction <add>, %432, %cst_197 [2] : vector<2x8x8xf32> to vector<2x8xf32>
    %434 = vector.shape_cast %433 : vector<2x8xf32> to vector<2x8x1xf32>
    %435 = vector.broadcast %434 : vector<2x8x1xf32> to vector<2x8x8xf32>
    %436 = arith.divf %432, %435 : vector<2x8x8xf32>
    "tpu.trace_start"() <{level = 10 : i32, message = "bqk,bkd->bqd"}> : () -> ()
    %cst_198 = arith.constant dense<0.000000e+00> : vector<2x8x8xf32>
    %437 = tpu.matmul %436, %423, %cst_198 {dimension_numbers = #tpu.dot_dimension_numbers<[2], [1], [1], [2], [0, 0, 0, 1, 1, 2], [0], [0]>} : vector<2x8x8xf32>, vector<2x8x8xf32>, vector<2x8x8xf32> -> vector<2x8x8xf32>
    "tpu.trace_stop"() : () -> ()
    %438 = vector.shape_cast %437 : vector<2x8x8xf32> to vector<16x8xf32>
    %c2_199 = arith.constant 2 : index
    %c0_200 = arith.constant 0 : index
    %c0_201 = arith.constant 0 : index
    %c0_202 = arith.constant 0 : index
    %439 = vector.load %arg5[%c2_199, %c0_200, %c0_201, %c0_202] : memref<6x4x8x32xf32, #tpu.memory_space<vmem>>, vector<1x1x8x32xf32>
    %440 = vector.shape_cast %439 : vector<1x1x8x32xf32> to vector<8x32xf32>
    %cst_203 = arith.constant dense<0.000000e+00> : vector<16x32xf32>
    %441 = tpu.matmul %438, %440, %cst_203 {dimension_numbers = #tpu.dot_dimension_numbers<[1], [0], [0], [1], [0, 0, 1, 1], [], []>} : vector<16x8xf32>, vector<8x32xf32>, vector<16x32xf32> -> vector<16x32xf32>
    %442 = arith.addf %420, %441 : vector<16x32xf32>
    %443 = vector.extract_strided_slice %417 {offsets = [0, 0, 8], sizes = [2, 8, 8], strides = [1, 1, 1]} : vector<2x8x32xf32> to vector<2x8x8xf32>
    %444 = vector.extract_strided_slice %418 {offsets = [0, 0, 8], sizes = [2, 8, 8], strides = [1, 1, 1]} : vector<2x8x32xf32> to vector<2x8x8xf32>
    %445 = vector.extract_strided_slice %419 {offsets = [0, 0, 8], sizes = [2, 8, 8], strides = [1, 1, 1]} : vector<2x8x32xf32> to vector<2x8x8xf32>
    "tpu.trace_start"() <{level = 10 : i32, message = "bqd,bkd->bqk"}> : () -> ()
    %cst_204 = arith.constant dense<0.000000e+00> : vector<2x8x8xf32>
    %446 = tpu.matmul %443, %444, %cst_204 {dimension_numbers = #tpu.dot_dimension_numbers<[2], [2], [1], [1], [0, 0, 0, 1, 1, 1], [0], [0]>} : vector<2x8x8xf32>, vector<2x8x8xf32>, vector<2x8x8xf32> -> vector<2x8x8xf32>
    "tpu.trace_stop"() : () -> ()
    %447 = vector.shape_cast %6 : vector<8x8xf32> to vector<1x8x8xf32>
    %448 = vector.broadcast %447 : vector<1x8x8xf32> to vector<2x8x8xf32>
    %449 = arith.addf %446, %448 : vector<2x8x8xf32>
    %cst_205 = arith.constant dense<0xFF800000> : vector<2x8xf32>
    %450 = vector.multi_reduction <maximumf>, %449, %cst_205 [2] : vector<2x8x8xf32> to vector<2x8xf32>
    %451 = vector.shape_cast %450 : vector<2x8xf32> to vector<2x8x1xf32>
    %452 = vector.broadcast %451 : vector<2x8x1xf32> to vector<2x8x8xf32>
    %453 = arith.subf %449, %452 : vector<2x8x8xf32>
    %454 = math.exp %453 : vector<2x8x8xf32>
    %cst_206 = arith.constant dense<0.000000e+00> : vector<2x8xf32>
    %455 = vector.multi_reduction <add>, %454, %cst_206 [2] : vector<2x8x8xf32> to vector<2x8xf32>
    %456 = vector.shape_cast %455 : vector<2x8xf32> to vector<2x8x1xf32>
    %457 = vector.broadcast %456 : vector<2x8x1xf32> to vector<2x8x8xf32>
    %458 = arith.divf %454, %457 : vector<2x8x8xf32>
    "tpu.trace_start"() <{level = 10 : i32, message = "bqk,bkd->bqd"}> : () -> ()
    %cst_207 = arith.constant dense<0.000000e+00> : vector<2x8x8xf32>
    %459 = tpu.matmul %458, %445, %cst_207 {dimension_numbers = #tpu.dot_dimension_numbers<[2], [1], [1], [2], [0, 0, 0, 1, 1, 2], [0], [0]>} : vector<2x8x8xf32>, vector<2x8x8xf32>, vector<2x8x8xf32> -> vector<2x8x8xf32>
    "tpu.trace_stop"() : () -> ()
    %460 = vector.shape_cast %459 : vector<2x8x8xf32> to vector<16x8xf32>
    %c2_208 = arith.constant 2 : index
    %c1_209 = arith.constant 1 : index
    %c0_210 = arith.constant 0 : index
    %c0_211 = arith.constant 0 : index
    %461 = vector.load %arg5[%c2_208, %c1_209, %c0_210, %c0_211] : memref<6x4x8x32xf32, #tpu.memory_space<vmem>>, vector<1x1x8x32xf32>
    %462 = vector.shape_cast %461 : vector<1x1x8x32xf32> to vector<8x32xf32>
    %cst_212 = arith.constant dense<0.000000e+00> : vector<16x32xf32>
    %463 = tpu.matmul %460, %462, %cst_212 {dimension_numbers = #tpu.dot_dimension_numbers<[1], [0], [0], [1], [0, 0, 1, 1], [], []>} : vector<16x8xf32>, vector<8x32xf32>, vector<16x32xf32> -> vector<16x32xf32>
    %464 = arith.addf %442, %463 : vector<16x32xf32>
    %465 = vector.extract_strided_slice %417 {offsets = [0, 0, 16], sizes = [2, 8, 8], strides = [1, 1, 1]} : vector<2x8x32xf32> to vector<2x8x8xf32>
    %466 = vector.extract_strided_slice %418 {offsets = [0, 0, 16], sizes = [2, 8, 8], strides = [1, 1, 1]} : vector<2x8x32xf32> to vector<2x8x8xf32>
    %467 = vector.extract_strided_slice %419 {offsets = [0, 0, 16], sizes = [2, 8, 8], strides = [1, 1, 1]} : vector<2x8x32xf32> to vector<2x8x8xf32>
    "tpu.trace_start"() <{level = 10 : i32, message = "bqd,bkd->bqk"}> : () -> ()
    %cst_213 = arith.constant dense<0.000000e+00> : vector<2x8x8xf32>
    %468 = tpu.matmul %465, %466, %cst_213 {dimension_numbers = #tpu.dot_dimension_numbers<[2], [2], [1], [1], [0, 0, 0, 1, 1, 1], [0], [0]>} : vector<2x8x8xf32>, vector<2x8x8xf32>, vector<2x8x8xf32> -> vector<2x8x8xf32>
    "tpu.trace_stop"() : () -> ()
    %469 = vector.shape_cast %6 : vector<8x8xf32> to vector<1x8x8xf32>
    %470 = vector.broadcast %469 : vector<1x8x8xf32> to vector<2x8x8xf32>
    %471 = arith.addf %468, %470 : vector<2x8x8xf32>
    %cst_214 = arith.constant dense<0xFF800000> : vector<2x8xf32>
    %472 = vector.multi_reduction <maximumf>, %471, %cst_214 [2] : vector<2x8x8xf32> to vector<2x8xf32>
    %473 = vector.shape_cast %472 : vector<2x8xf32> to vector<2x8x1xf32>
    %474 = vector.broadcast %473 : vector<2x8x1xf32> to vector<2x8x8xf32>
    %475 = arith.subf %471, %474 : vector<2x8x8xf32>
    %476 = math.exp %475 : vector<2x8x8xf32>
    %cst_215 = arith.constant dense<0.000000e+00> : vector<2x8xf32>
    %477 = vector.multi_reduction <add>, %476, %cst_215 [2] : vector<2x8x8xf32> to vector<2x8xf32>
    %478 = vector.shape_cast %477 : vector<2x8xf32> to vector<2x8x1xf32>
    %479 = vector.broadcast %478 : vector<2x8x1xf32> to vector<2x8x8xf32>
    %480 = arith.divf %476, %479 : vector<2x8x8xf32>
    "tpu.trace_start"() <{level = 10 : i32, message = "bqk,bkd->bqd"}> : () -> ()
    %cst_216 = arith.constant dense<0.000000e+00> : vector<2x8x8xf32>
    %481 = tpu.matmul %480, %467, %cst_216 {dimension_numbers = #tpu.dot_dimension_numbers<[2], [1], [1], [2], [0, 0, 0, 1, 1, 2], [0], [0]>} : vector<2x8x8xf32>, vector<2x8x8xf32>, vector<2x8x8xf32> -> vector<2x8x8xf32>
    "tpu.trace_stop"() : () -> ()
    %482 = vector.shape_cast %481 : vector<2x8x8xf32> to vector<16x8xf32>
    %c2_217 = arith.constant 2 : index
    %c2_218 = arith.constant 2 : index
    %c0_219 = arith.constant 0 : index
    %c0_220 = arith.constant 0 : index
    %483 = vector.load %arg5[%c2_217, %c2_218, %c0_219, %c0_220] : memref<6x4x8x32xf32, #tpu.memory_space<vmem>>, vector<1x1x8x32xf32>
    %484 = vector.shape_cast %483 : vector<1x1x8x32xf32> to vector<8x32xf32>
    %cst_221 = arith.constant dense<0.000000e+00> : vector<16x32xf32>
    %485 = tpu.matmul %482, %484, %cst_221 {dimension_numbers = #tpu.dot_dimension_numbers<[1], [0], [0], [1], [0, 0, 1, 1], [], []>} : vector<16x8xf32>, vector<8x32xf32>, vector<16x32xf32> -> vector<16x32xf32>
    %486 = arith.addf %464, %485 : vector<16x32xf32>
    %487 = vector.extract_strided_slice %417 {offsets = [0, 0, 24], sizes = [2, 8, 8], strides = [1, 1, 1]} : vector<2x8x32xf32> to vector<2x8x8xf32>
    %488 = vector.extract_strided_slice %418 {offsets = [0, 0, 24], sizes = [2, 8, 8], strides = [1, 1, 1]} : vector<2x8x32xf32> to vector<2x8x8xf32>
    %489 = vector.extract_strided_slice %419 {offsets = [0, 0, 24], sizes = [2, 8, 8], strides = [1, 1, 1]} : vector<2x8x32xf32> to vector<2x8x8xf32>
    "tpu.trace_start"() <{level = 10 : i32, message = "bqd,bkd->bqk"}> : () -> ()
    %cst_222 = arith.constant dense<0.000000e+00> : vector<2x8x8xf32>
    %490 = tpu.matmul %487, %488, %cst_222 {dimension_numbers = #tpu.dot_dimension_numbers<[2], [2], [1], [1], [0, 0, 0, 1, 1, 1], [0], [0]>} : vector<2x8x8xf32>, vector<2x8x8xf32>, vector<2x8x8xf32> -> vector<2x8x8xf32>
    "tpu.trace_stop"() : () -> ()
    %491 = vector.shape_cast %6 : vector<8x8xf32> to vector<1x8x8xf32>
    %492 = vector.broadcast %491 : vector<1x8x8xf32> to vector<2x8x8xf32>
    %493 = arith.addf %490, %492 : vector<2x8x8xf32>
    %cst_223 = arith.constant dense<0xFF800000> : vector<2x8xf32>
    %494 = vector.multi_reduction <maximumf>, %493, %cst_223 [2] : vector<2x8x8xf32> to vector<2x8xf32>
    %495 = vector.shape_cast %494 : vector<2x8xf32> to vector<2x8x1xf32>
    %496 = vector.broadcast %495 : vector<2x8x1xf32> to vector<2x8x8xf32>
    %497 = arith.subf %493, %496 : vector<2x8x8xf32>
    %498 = math.exp %497 : vector<2x8x8xf32>
    %cst_224 = arith.constant dense<0.000000e+00> : vector<2x8xf32>
    %499 = vector.multi_reduction <add>, %498, %cst_224 [2] : vector<2x8x8xf32> to vector<2x8xf32>
    %500 = vector.shape_cast %499 : vector<2x8xf32> to vector<2x8x1xf32>
    %501 = vector.broadcast %500 : vector<2x8x1xf32> to vector<2x8x8xf32>
    %502 = arith.divf %498, %501 : vector<2x8x8xf32>
    "tpu.trace_start"() <{level = 10 : i32, message = "bqk,bkd->bqd"}> : () -> ()
    %cst_225 = arith.constant dense<0.000000e+00> : vector<2x8x8xf32>
    %503 = tpu.matmul %502, %489, %cst_225 {dimension_numbers = #tpu.dot_dimension_numbers<[2], [1], [1], [2], [0, 0, 0, 1, 1, 2], [0], [0]>} : vector<2x8x8xf32>, vector<2x8x8xf32>, vector<2x8x8xf32> -> vector<2x8x8xf32>
    "tpu.trace_stop"() : () -> ()
    %504 = vector.shape_cast %503 : vector<2x8x8xf32> to vector<16x8xf32>
    %c2_226 = arith.constant 2 : index
    %c3_227 = arith.constant 3 : index
    %c0_228 = arith.constant 0 : index
    %c0_229 = arith.constant 0 : index
    %505 = vector.load %arg5[%c2_226, %c3_227, %c0_228, %c0_229] : memref<6x4x8x32xf32, #tpu.memory_space<vmem>>, vector<1x1x8x32xf32>
    %506 = vector.shape_cast %505 : vector<1x1x8x32xf32> to vector<8x32xf32>
    %cst_230 = arith.constant dense<0.000000e+00> : vector<16x32xf32>
    %507 = tpu.matmul %504, %506, %cst_230 {dimension_numbers = #tpu.dot_dimension_numbers<[1], [0], [0], [1], [0, 0, 1, 1], [], []>} : vector<16x8xf32>, vector<8x32xf32>, vector<16x32xf32> -> vector<16x32xf32>
    %508 = arith.addf %486, %507 : vector<16x32xf32>
    %509 = arith.addf %380, %508 : vector<16x32xf32>
    %c2_231 = arith.constant 2 : index
    %c0_232 = arith.constant 0 : index
    %c0_233 = arith.constant 0 : index
    %510 = vector.load %arg6[%c2_231, %c0_232, %c0_233] : memref<6x1x32xf32, #tpu.memory_space<vmem>>, vector<1x1x32xf32>
    %511 = vector.shape_cast %510 : vector<1x1x32xf32> to vector<1x32xf32>
    %512 = vector.broadcast %511 : vector<1x32xf32> to vector<16x32xf32>
    %513 = arith.addf %509, %512 : vector<16x32xf32>
    %c2_234 = arith.constant 2 : index
    %c0_235 = arith.constant 0 : index
    %c0_236 = arith.constant 0 : index
    %514 = vector.load %arg7[%c2_234, %c0_235, %c0_236] : memref<6x1x32xf32, #tpu.memory_space<vmem>>, vector<1x1x32xf32>
    %515 = vector.shape_cast %514 : vector<1x1x32xf32> to vector<1x32xf32>
    %c2_237 = arith.constant 2 : index
    %c0_238 = arith.constant 0 : index
    %c0_239 = arith.constant 0 : index
    %516 = vector.load %arg8[%c2_237, %c0_238, %c0_239] : memref<6x1x32xf32, #tpu.memory_space<vmem>>, vector<1x1x32xf32>
    %517 = vector.shape_cast %516 : vector<1x1x32xf32> to vector<1x32xf32>
    %cst_240 = arith.constant dense<0.000000e+00> : vector<16xf32>
    %518 = vector.multi_reduction <add>, %513, %cst_240 [1] : vector<16x32xf32> to vector<16xf32>
    %519 = vector.shape_cast %518 : vector<16xf32> to vector<16x1xf32>
    %cst_241 = arith.constant 3.200000e+01 : f32
    %520 = vector.broadcast %cst_241 : f32 to vector<16x1xf32>
    %521 = arith.divf %519, %520 : vector<16x1xf32>
    %522 = vector.broadcast %521 : vector<16x1xf32> to vector<16x32xf32>
    %523 = arith.subf %513, %522 : vector<16x32xf32>
    %524 = arith.mulf %523, %523 : vector<16x32xf32>
    %cst_242 = arith.constant dense<0.000000e+00> : vector<16xf32>
    %525 = vector.multi_reduction <add>, %524, %cst_242 [1] : vector<16x32xf32> to vector<16xf32>
    %526 = vector.shape_cast %525 : vector<16xf32> to vector<16x1xf32>
    %cst_243 = arith.constant 3.200000e+01 : f32
    %527 = vector.broadcast %cst_243 : f32 to vector<16x1xf32>
    %528 = arith.divf %526, %527 : vector<16x1xf32>
    %529 = vector.broadcast %521 : vector<16x1xf32> to vector<16x32xf32>
    %530 = arith.subf %513, %529 : vector<16x32xf32>
    %cst_244 = arith.constant 9.99999974E-6 : f32
    %531 = vector.broadcast %cst_244 : f32 to vector<16x1xf32>
    %532 = arith.addf %528, %531 : vector<16x1xf32>
    %533 = math.rsqrt %532 : vector<16x1xf32>
    %534 = vector.broadcast %533 : vector<16x1xf32> to vector<16x32xf32>
    %535 = arith.mulf %530, %534 : vector<16x32xf32>
    %536 = vector.broadcast %515 : vector<1x32xf32> to vector<16x32xf32>
    %537 = arith.mulf %535, %536 : vector<16x32xf32>
    %538 = vector.broadcast %517 : vector<1x32xf32> to vector<16x32xf32>
    %539 = arith.addf %537, %538 : vector<16x32xf32>
    %c2_245 = arith.constant 2 : index
    %c0_246 = arith.constant 0 : index
    %c0_247 = arith.constant 0 : index
    %540 = vector.load %arg9[%c2_245, %c0_246, %c0_247] : memref<6x32x128xf32, #tpu.memory_space<vmem>>, vector<1x32x128xf32>
    %541 = vector.shape_cast %540 : vector<1x32x128xf32> to vector<32x128xf32>
    %cst_248 = arith.constant dense<0.000000e+00> : vector<16x128xf32>
    %542 = tpu.matmul %539, %541, %cst_248 {dimension_numbers = #tpu.dot_dimension_numbers<[1], [0], [0], [1], [0, 0, 1, 1], [], []>} : vector<16x32xf32>, vector<32x128xf32>, vector<16x128xf32> -> vector<16x128xf32>
    %c2_249 = arith.constant 2 : index
    %c0_250 = arith.constant 0 : index
    %c0_251 = arith.constant 0 : index
    %543 = vector.load %arg10[%c2_249, %c0_250, %c0_251] : memref<6x1x128xf32, #tpu.memory_space<vmem>>, vector<1x1x128xf32>
    %544 = vector.shape_cast %543 : vector<1x1x128xf32> to vector<1x128xf32>
    %545 = vector.broadcast %544 : vector<1x128xf32> to vector<16x128xf32>
    %546 = arith.addf %542, %545 : vector<16x128xf32>
    %cst_252 = arith.constant 5.000000e-01 : f32
    %547 = vector.broadcast %cst_252 : f32 to vector<16x128xf32>
    %548 = arith.mulf %547, %546 : vector<16x128xf32>
    %cst_253 = arith.constant 4.471500e-02 : f32
    %549 = vector.broadcast %cst_253 : f32 to vector<16x128xf32>
    %550 = arith.mulf %549, %546 : vector<16x128xf32>
    %551 = arith.mulf %550, %546 : vector<16x128xf32>
    %552 = arith.mulf %551, %546 : vector<16x128xf32>
    %553 = arith.addf %546, %552 : vector<16x128xf32>
    %cst_254 = arith.constant 0.797884583 : f32
    %554 = vector.broadcast %cst_254 : f32 to vector<16x128xf32>
    %555 = arith.mulf %554, %553 : vector<16x128xf32>
    %556 = math.tanh %555 : vector<16x128xf32>
    %cst_255 = arith.constant 1.000000e+00 : f32
    %557 = vector.broadcast %cst_255 : f32 to vector<16x128xf32>
    %558 = arith.addf %557, %556 : vector<16x128xf32>
    %559 = arith.mulf %548, %558 : vector<16x128xf32>
    %c2_256 = arith.constant 2 : index
    %c0_257 = arith.constant 0 : index
    %c0_258 = arith.constant 0 : index
    %560 = vector.load %arg11[%c2_256, %c0_257, %c0_258] : memref<6x128x32xf32, #tpu.memory_space<vmem>>, vector<1x128x32xf32>
    %561 = vector.shape_cast %560 : vector<1x128x32xf32> to vector<128x32xf32>
    %cst_259 = arith.constant dense<0.000000e+00> : vector<16x32xf32>
    %562 = tpu.matmul %559, %561, %cst_259 {dimension_numbers = #tpu.dot_dimension_numbers<[1], [0], [0], [1], [0, 0, 1, 1], [], []>} : vector<16x128xf32>, vector<128x32xf32>, vector<16x32xf32> -> vector<16x32xf32>
    %c2_260 = arith.constant 2 : index
    %c0_261 = arith.constant 0 : index
    %c0_262 = arith.constant 0 : index
    %563 = vector.load %arg12[%c2_260, %c0_261, %c0_262] : memref<6x1x32xf32, #tpu.memory_space<vmem>>, vector<1x1x32xf32>
    %564 = vector.shape_cast %563 : vector<1x1x32xf32> to vector<1x32xf32>
    %565 = vector.broadcast %564 : vector<1x32xf32> to vector<16x32xf32>
    %566 = arith.addf %562, %565 : vector<16x32xf32>
    %567 = arith.addf %513, %566 : vector<16x32xf32>
    %c3_263 = arith.constant 3 : index
    %c0_264 = arith.constant 0 : index
    %c0_265 = arith.constant 0 : index
    %568 = vector.load %arg1[%c3_263, %c0_264, %c0_265] : memref<6x1x32xf32, #tpu.memory_space<vmem>>, vector<1x1x32xf32>
    %569 = vector.shape_cast %568 : vector<1x1x32xf32> to vector<1x32xf32>
    %c3_266 = arith.constant 3 : index
    %c0_267 = arith.constant 0 : index
    %c0_268 = arith.constant 0 : index
    %570 = vector.load %arg2[%c3_266, %c0_267, %c0_268] : memref<6x1x32xf32, #tpu.memory_space<vmem>>, vector<1x1x32xf32>
    %571 = vector.shape_cast %570 : vector<1x1x32xf32> to vector<1x32xf32>
    %cst_269 = arith.constant dense<0.000000e+00> : vector<16xf32>
    %572 = vector.multi_reduction <add>, %567, %cst_269 [1] : vector<16x32xf32> to vector<16xf32>
    %573 = vector.shape_cast %572 : vector<16xf32> to vector<16x1xf32>
    %cst_270 = arith.constant 3.200000e+01 : f32
    %574 = vector.broadcast %cst_270 : f32 to vector<16x1xf32>
    %575 = arith.divf %573, %574 : vector<16x1xf32>
    %576 = vector.broadcast %575 : vector<16x1xf32> to vector<16x32xf32>
    %577 = arith.subf %567, %576 : vector<16x32xf32>
    %578 = arith.mulf %577, %577 : vector<16x32xf32>
    %cst_271 = arith.constant dense<0.000000e+00> : vector<16xf32>
    %579 = vector.multi_reduction <add>, %578, %cst_271 [1] : vector<16x32xf32> to vector<16xf32>
    %580 = vector.shape_cast %579 : vector<16xf32> to vector<16x1xf32>
    %cst_272 = arith.constant 3.200000e+01 : f32
    %581 = vector.broadcast %cst_272 : f32 to vector<16x1xf32>
    %582 = arith.divf %580, %581 : vector<16x1xf32>
    %583 = vector.broadcast %575 : vector<16x1xf32> to vector<16x32xf32>
    %584 = arith.subf %567, %583 : vector<16x32xf32>
    %cst_273 = arith.constant 9.99999974E-6 : f32
    %585 = vector.broadcast %cst_273 : f32 to vector<16x1xf32>
    %586 = arith.addf %582, %585 : vector<16x1xf32>
    %587 = math.rsqrt %586 : vector<16x1xf32>
    %588 = vector.broadcast %587 : vector<16x1xf32> to vector<16x32xf32>
    %589 = arith.mulf %584, %588 : vector<16x32xf32>
    %590 = vector.broadcast %569 : vector<1x32xf32> to vector<16x32xf32>
    %591 = arith.mulf %589, %590 : vector<16x32xf32>
    %592 = vector.broadcast %571 : vector<1x32xf32> to vector<16x32xf32>
    %593 = arith.addf %591, %592 : vector<16x32xf32>
    %c3_274 = arith.constant 3 : index
    %c0_275 = arith.constant 0 : index
    %c0_276 = arith.constant 0 : index
    %594 = vector.load %arg3[%c3_274, %c0_275, %c0_276] : memref<6x32x96xf32, #tpu.memory_space<vmem>>, vector<1x32x96xf32>
    %595 = vector.shape_cast %594 : vector<1x32x96xf32> to vector<32x96xf32>
    %cst_277 = arith.constant dense<0.000000e+00> : vector<16x96xf32>
    %596 = tpu.matmul %593, %595, %cst_277 {dimension_numbers = #tpu.dot_dimension_numbers<[1], [0], [0], [1], [0, 0, 1, 1], [], []>} : vector<16x32xf32>, vector<32x96xf32>, vector<16x96xf32> -> vector<16x96xf32>
    %c3_278 = arith.constant 3 : index
    %c0_279 = arith.constant 0 : index
    %c0_280 = arith.constant 0 : index
    %597 = vector.load %arg4[%c3_278, %c0_279, %c0_280] : memref<6x1x96xf32, #tpu.memory_space<vmem>>, vector<1x1x96xf32>
    %598 = vector.shape_cast %597 : vector<1x1x96xf32> to vector<1x96xf32>
    %599 = vector.broadcast %598 : vector<1x96xf32> to vector<16x96xf32>
    %600 = arith.addf %596, %599 : vector<16x96xf32>
    %601 = vector.shape_cast %600 : vector<16x96xf32> to vector<2x8x96xf32>
    %602 = vector.extract_strided_slice %601 {offsets = [0, 0, 0], sizes = [2, 8, 32], strides = [1, 1, 1]} : vector<2x8x96xf32> to vector<2x8x32xf32>
    %cst_281 = arith.constant 0.353553385 : f32
    %603 = vector.broadcast %cst_281 : f32 to vector<2x8x32xf32>
    %604 = arith.mulf %602, %603 : vector<2x8x32xf32>
    %605 = vector.extract_strided_slice %601 {offsets = [0, 0, 32], sizes = [2, 8, 32], strides = [1, 1, 1]} : vector<2x8x96xf32> to vector<2x8x32xf32>
    %606 = vector.extract_strided_slice %601 {offsets = [0, 0, 64], sizes = [2, 8, 32], strides = [1, 1, 1]} : vector<2x8x96xf32> to vector<2x8x32xf32>
    %cst_282 = arith.constant 0.000000e+00 : f32
    %607 = vector.broadcast %cst_282 : f32 to vector<16x32xf32>
    %608 = vector.extract_strided_slice %604 {offsets = [0, 0, 0], sizes = [2, 8, 8], strides = [1, 1, 1]} : vector<2x8x32xf32> to vector<2x8x8xf32>
    %609 = vector.extract_strided_slice %605 {offsets = [0, 0, 0], sizes = [2, 8, 8], strides = [1, 1, 1]} : vector<2x8x32xf32> to vector<2x8x8xf32>
    %610 = vector.extract_strided_slice %606 {offsets = [0, 0, 0], sizes = [2, 8, 8], strides = [1, 1, 1]} : vector<2x8x32xf32> to vector<2x8x8xf32>
    "tpu.trace_start"() <{level = 10 : i32, message = "bqd,bkd->bqk"}> : () -> ()
    %cst_283 = arith.constant dense<0.000000e+00> : vector<2x8x8xf32>
    %611 = tpu.matmul %608, %609, %cst_283 {dimension_numbers = #tpu.dot_dimension_numbers<[2], [2], [1], [1], [0, 0, 0, 1, 1, 1], [0], [0]>} : vector<2x8x8xf32>, vector<2x8x8xf32>, vector<2x8x8xf32> -> vector<2x8x8xf32>
    "tpu.trace_stop"() : () -> ()
    %612 = vector.shape_cast %6 : vector<8x8xf32> to vector<1x8x8xf32>
    %613 = vector.broadcast %612 : vector<1x8x8xf32> to vector<2x8x8xf32>
    %614 = arith.addf %611, %613 : vector<2x8x8xf32>
    %cst_284 = arith.constant dense<0xFF800000> : vector<2x8xf32>
    %615 = vector.multi_reduction <maximumf>, %614, %cst_284 [2] : vector<2x8x8xf32> to vector<2x8xf32>
    %616 = vector.shape_cast %615 : vector<2x8xf32> to vector<2x8x1xf32>
    %617 = vector.broadcast %616 : vector<2x8x1xf32> to vector<2x8x8xf32>
    %618 = arith.subf %614, %617 : vector<2x8x8xf32>
    %619 = math.exp %618 : vector<2x8x8xf32>
    %cst_285 = arith.constant dense<0.000000e+00> : vector<2x8xf32>
    %620 = vector.multi_reduction <add>, %619, %cst_285 [2] : vector<2x8x8xf32> to vector<2x8xf32>
    %621 = vector.shape_cast %620 : vector<2x8xf32> to vector<2x8x1xf32>
    %622 = vector.broadcast %621 : vector<2x8x1xf32> to vector<2x8x8xf32>
    %623 = arith.divf %619, %622 : vector<2x8x8xf32>
    "tpu.trace_start"() <{level = 10 : i32, message = "bqk,bkd->bqd"}> : () -> ()
    %cst_286 = arith.constant dense<0.000000e+00> : vector<2x8x8xf32>
    %624 = tpu.matmul %623, %610, %cst_286 {dimension_numbers = #tpu.dot_dimension_numbers<[2], [1], [1], [2], [0, 0, 0, 1, 1, 2], [0], [0]>} : vector<2x8x8xf32>, vector<2x8x8xf32>, vector<2x8x8xf32> -> vector<2x8x8xf32>
    "tpu.trace_stop"() : () -> ()
    %625 = vector.shape_cast %624 : vector<2x8x8xf32> to vector<16x8xf32>
    %c3_287 = arith.constant 3 : index
    %c0_288 = arith.constant 0 : index
    %c0_289 = arith.constant 0 : index
    %c0_290 = arith.constant 0 : index
    %626 = vector.load %arg5[%c3_287, %c0_288, %c0_289, %c0_290] : memref<6x4x8x32xf32, #tpu.memory_space<vmem>>, vector<1x1x8x32xf32>
    %627 = vector.shape_cast %626 : vector<1x1x8x32xf32> to vector<8x32xf32>
    %cst_291 = arith.constant dense<0.000000e+00> : vector<16x32xf32>
    %628 = tpu.matmul %625, %627, %cst_291 {dimension_numbers = #tpu.dot_dimension_numbers<[1], [0], [0], [1], [0, 0, 1, 1], [], []>} : vector<16x8xf32>, vector<8x32xf32>, vector<16x32xf32> -> vector<16x32xf32>
    %629 = arith.addf %607, %628 : vector<16x32xf32>
    %630 = vector.extract_strided_slice %604 {offsets = [0, 0, 8], sizes = [2, 8, 8], strides = [1, 1, 1]} : vector<2x8x32xf32> to vector<2x8x8xf32>
    %631 = vector.extract_strided_slice %605 {offsets = [0, 0, 8], sizes = [2, 8, 8], strides = [1, 1, 1]} : vector<2x8x32xf32> to vector<2x8x8xf32>
    %632 = vector.extract_strided_slice %606 {offsets = [0, 0, 8], sizes = [2, 8, 8], strides = [1, 1, 1]} : vector<2x8x32xf32> to vector<2x8x8xf32>
    "tpu.trace_start"() <{level = 10 : i32, message = "bqd,bkd->bqk"}> : () -> ()
    %cst_292 = arith.constant dense<0.000000e+00> : vector<2x8x8xf32>
    %633 = tpu.matmul %630, %631, %cst_292 {dimension_numbers = #tpu.dot_dimension_numbers<[2], [2], [1], [1], [0, 0, 0, 1, 1, 1], [0], [0]>} : vector<2x8x8xf32>, vector<2x8x8xf32>, vector<2x8x8xf32> -> vector<2x8x8xf32>
    "tpu.trace_stop"() : () -> ()
    %634 = vector.shape_cast %6 : vector<8x8xf32> to vector<1x8x8xf32>
    %635 = vector.broadcast %634 : vector<1x8x8xf32> to vector<2x8x8xf32>
    %636 = arith.addf %633, %635 : vector<2x8x8xf32>
    %cst_293 = arith.constant dense<0xFF800000> : vector<2x8xf32>
    %637 = vector.multi_reduction <maximumf>, %636, %cst_293 [2] : vector<2x8x8xf32> to vector<2x8xf32>
    %638 = vector.shape_cast %637 : vector<2x8xf32> to vector<2x8x1xf32>
    %639 = vector.broadcast %638 : vector<2x8x1xf32> to vector<2x8x8xf32>
    %640 = arith.subf %636, %639 : vector<2x8x8xf32>
    %641 = math.exp %640 : vector<2x8x8xf32>
    %cst_294 = arith.constant dense<0.000000e+00> : vector<2x8xf32>
    %642 = vector.multi_reduction <add>, %641, %cst_294 [2] : vector<2x8x8xf32> to vector<2x8xf32>
    %643 = vector.shape_cast %642 : vector<2x8xf32> to vector<2x8x1xf32>
    %644 = vector.broadcast %643 : vector<2x8x1xf32> to vector<2x8x8xf32>
    %645 = arith.divf %641, %644 : vector<2x8x8xf32>
    "tpu.trace_start"() <{level = 10 : i32, message = "bqk,bkd->bqd"}> : () -> ()
    %cst_295 = arith.constant dense<0.000000e+00> : vector<2x8x8xf32>
    %646 = tpu.matmul %645, %632, %cst_295 {dimension_numbers = #tpu.dot_dimension_numbers<[2], [1], [1], [2], [0, 0, 0, 1, 1, 2], [0], [0]>} : vector<2x8x8xf32>, vector<2x8x8xf32>, vector<2x8x8xf32> -> vector<2x8x8xf32>
    "tpu.trace_stop"() : () -> ()
    %647 = vector.shape_cast %646 : vector<2x8x8xf32> to vector<16x8xf32>
    %c3_296 = arith.constant 3 : index
    %c1_297 = arith.constant 1 : index
    %c0_298 = arith.constant 0 : index
    %c0_299 = arith.constant 0 : index
    %648 = vector.load %arg5[%c3_296, %c1_297, %c0_298, %c0_299] : memref<6x4x8x32xf32, #tpu.memory_space<vmem>>, vector<1x1x8x32xf32>
    %649 = vector.shape_cast %648 : vector<1x1x8x32xf32> to vector<8x32xf32>
    %cst_300 = arith.constant dense<0.000000e+00> : vector<16x32xf32>
    %650 = tpu.matmul %647, %649, %cst_300 {dimension_numbers = #tpu.dot_dimension_numbers<[1], [0], [0], [1], [0, 0, 1, 1], [], []>} : vector<16x8xf32>, vector<8x32xf32>, vector<16x32xf32> -> vector<16x32xf32>
    %651 = arith.addf %629, %650 : vector<16x32xf32>
    %652 = vector.extract_strided_slice %604 {offsets = [0, 0, 16], sizes = [2, 8, 8], strides = [1, 1, 1]} : vector<2x8x32xf32> to vector<2x8x8xf32>
    %653 = vector.extract_strided_slice %605 {offsets = [0, 0, 16], sizes = [2, 8, 8], strides = [1, 1, 1]} : vector<2x8x32xf32> to vector<2x8x8xf32>
    %654 = vector.extract_strided_slice %606 {offsets = [0, 0, 16], sizes = [2, 8, 8], strides = [1, 1, 1]} : vector<2x8x32xf32> to vector<2x8x8xf32>
    "tpu.trace_start"() <{level = 10 : i32, message = "bqd,bkd->bqk"}> : () -> ()
    %cst_301 = arith.constant dense<0.000000e+00> : vector<2x8x8xf32>
    %655 = tpu.matmul %652, %653, %cst_301 {dimension_numbers = #tpu.dot_dimension_numbers<[2], [2], [1], [1], [0, 0, 0, 1, 1, 1], [0], [0]>} : vector<2x8x8xf32>, vector<2x8x8xf32>, vector<2x8x8xf32> -> vector<2x8x8xf32>
    "tpu.trace_stop"() : () -> ()
    %656 = vector.shape_cast %6 : vector<8x8xf32> to vector<1x8x8xf32>
    %657 = vector.broadcast %656 : vector<1x8x8xf32> to vector<2x8x8xf32>
    %658 = arith.addf %655, %657 : vector<2x8x8xf32>
    %cst_302 = arith.constant dense<0xFF800000> : vector<2x8xf32>
    %659 = vector.multi_reduction <maximumf>, %658, %cst_302 [2] : vector<2x8x8xf32> to vector<2x8xf32>
    %660 = vector.shape_cast %659 : vector<2x8xf32> to vector<2x8x1xf32>
    %661 = vector.broadcast %660 : vector<2x8x1xf32> to vector<2x8x8xf32>
    %662 = arith.subf %658, %661 : vector<2x8x8xf32>
    %663 = math.exp %662 : vector<2x8x8xf32>
    %cst_303 = arith.constant dense<0.000000e+00> : vector<2x8xf32>
    %664 = vector.multi_reduction <add>, %663, %cst_303 [2] : vector<2x8x8xf32> to vector<2x8xf32>
    %665 = vector.shape_cast %664 : vector<2x8xf32> to vector<2x8x1xf32>
    %666 = vector.broadcast %665 : vector<2x8x1xf32> to vector<2x8x8xf32>
    %667 = arith.divf %663, %666 : vector<2x8x8xf32>
    "tpu.trace_start"() <{level = 10 : i32, message = "bqk,bkd->bqd"}> : () -> ()
    %cst_304 = arith.constant dense<0.000000e+00> : vector<2x8x8xf32>
    %668 = tpu.matmul %667, %654, %cst_304 {dimension_numbers = #tpu.dot_dimension_numbers<[2], [1], [1], [2], [0, 0, 0, 1, 1, 2], [0], [0]>} : vector<2x8x8xf32>, vector<2x8x8xf32>, vector<2x8x8xf32> -> vector<2x8x8xf32>
    "tpu.trace_stop"() : () -> ()
    %669 = vector.shape_cast %668 : vector<2x8x8xf32> to vector<16x8xf32>
    %c3_305 = arith.constant 3 : index
    %c2_306 = arith.constant 2 : index
    %c0_307 = arith.constant 0 : index
    %c0_308 = arith.constant 0 : index
    %670 = vector.load %arg5[%c3_305, %c2_306, %c0_307, %c0_308] : memref<6x4x8x32xf32, #tpu.memory_space<vmem>>, vector<1x1x8x32xf32>
    %671 = vector.shape_cast %670 : vector<1x1x8x32xf32> to vector<8x32xf32>
    %cst_309 = arith.constant dense<0.000000e+00> : vector<16x32xf32>
    %672 = tpu.matmul %669, %671, %cst_309 {dimension_numbers = #tpu.dot_dimension_numbers<[1], [0], [0], [1], [0, 0, 1, 1], [], []>} : vector<16x8xf32>, vector<8x32xf32>, vector<16x32xf32> -> vector<16x32xf32>
    %673 = arith.addf %651, %672 : vector<16x32xf32>
    %674 = vector.extract_strided_slice %604 {offsets = [0, 0, 24], sizes = [2, 8, 8], strides = [1, 1, 1]} : vector<2x8x32xf32> to vector<2x8x8xf32>
    %675 = vector.extract_strided_slice %605 {offsets = [0, 0, 24], sizes = [2, 8, 8], strides = [1, 1, 1]} : vector<2x8x32xf32> to vector<2x8x8xf32>
    %676 = vector.extract_strided_slice %606 {offsets = [0, 0, 24], sizes = [2, 8, 8], strides = [1, 1, 1]} : vector<2x8x32xf32> to vector<2x8x8xf32>
    "tpu.trace_start"() <{level = 10 : i32, message = "bqd,bkd->bqk"}> : () -> ()
    %cst_310 = arith.constant dense<0.000000e+00> : vector<2x8x8xf32>
    %677 = tpu.matmul %674, %675, %cst_310 {dimension_numbers = #tpu.dot_dimension_numbers<[2], [2], [1], [1], [0, 0, 0, 1, 1, 1], [0], [0]>} : vector<2x8x8xf32>, vector<2x8x8xf32>, vector<2x8x8xf32> -> vector<2x8x8xf32>
    "tpu.trace_stop"() : () -> ()
    %678 = vector.shape_cast %6 : vector<8x8xf32> to vector<1x8x8xf32>
    %679 = vector.broadcast %678 : vector<1x8x8xf32> to vector<2x8x8xf32>
    %680 = arith.addf %677, %679 : vector<2x8x8xf32>
    %cst_311 = arith.constant dense<0xFF800000> : vector<2x8xf32>
    %681 = vector.multi_reduction <maximumf>, %680, %cst_311 [2] : vector<2x8x8xf32> to vector<2x8xf32>
    %682 = vector.shape_cast %681 : vector<2x8xf32> to vector<2x8x1xf32>
    %683 = vector.broadcast %682 : vector<2x8x1xf32> to vector<2x8x8xf32>
    %684 = arith.subf %680, %683 : vector<2x8x8xf32>
    %685 = math.exp %684 : vector<2x8x8xf32>
    %cst_312 = arith.constant dense<0.000000e+00> : vector<2x8xf32>
    %686 = vector.multi_reduction <add>, %685, %cst_312 [2] : vector<2x8x8xf32> to vector<2x8xf32>
    %687 = vector.shape_cast %686 : vector<2x8xf32> to vector<2x8x1xf32>
    %688 = vector.broadcast %687 : vector<2x8x1xf32> to vector<2x8x8xf32>
    %689 = arith.divf %685, %688 : vector<2x8x8xf32>
    "tpu.trace_start"() <{level = 10 : i32, message = "bqk,bkd->bqd"}> : () -> ()
    %cst_313 = arith.constant dense<0.000000e+00> : vector<2x8x8xf32>
    %690 = tpu.matmul %689, %676, %cst_313 {dimension_numbers = #tpu.dot_dimension_numbers<[2], [1], [1], [2], [0, 0, 0, 1, 1, 2], [0], [0]>} : vector<2x8x8xf32>, vector<2x8x8xf32>, vector<2x8x8xf32> -> vector<2x8x8xf32>
    "tpu.trace_stop"() : () -> ()
    %691 = vector.shape_cast %690 : vector<2x8x8xf32> to vector<16x8xf32>
    %c3_314 = arith.constant 3 : index
    %c3_315 = arith.constant 3 : index
    %c0_316 = arith.constant 0 : index
    %c0_317 = arith.constant 0 : index
    %692 = vector.load %arg5[%c3_314, %c3_315, %c0_316, %c0_317] : memref<6x4x8x32xf32, #tpu.memory_space<vmem>>, vector<1x1x8x32xf32>
    %693 = vector.shape_cast %692 : vector<1x1x8x32xf32> to vector<8x32xf32>
    %cst_318 = arith.constant dense<0.000000e+00> : vector<16x32xf32>
    %694 = tpu.matmul %691, %693, %cst_318 {dimension_numbers = #tpu.dot_dimension_numbers<[1], [0], [0], [1], [0, 0, 1, 1], [], []>} : vector<16x8xf32>, vector<8x32xf32>, vector<16x32xf32> -> vector<16x32xf32>
    %695 = arith.addf %673, %694 : vector<16x32xf32>
    %696 = arith.addf %567, %695 : vector<16x32xf32>
    %c3_319 = arith.constant 3 : index
    %c0_320 = arith.constant 0 : index
    %c0_321 = arith.constant 0 : index
    %697 = vector.load %arg6[%c3_319, %c0_320, %c0_321] : memref<6x1x32xf32, #tpu.memory_space<vmem>>, vector<1x1x32xf32>
    %698 = vector.shape_cast %697 : vector<1x1x32xf32> to vector<1x32xf32>
    %699 = vector.broadcast %698 : vector<1x32xf32> to vector<16x32xf32>
    %700 = arith.addf %696, %699 : vector<16x32xf32>
    %c3_322 = arith.constant 3 : index
    %c0_323 = arith.constant 0 : index
    %c0_324 = arith.constant 0 : index
    %701 = vector.load %arg7[%c3_322, %c0_323, %c0_324] : memref<6x1x32xf32, #tpu.memory_space<vmem>>, vector<1x1x32xf32>
    %702 = vector.shape_cast %701 : vector<1x1x32xf32> to vector<1x32xf32>
    %c3_325 = arith.constant 3 : index
    %c0_326 = arith.constant 0 : index
    %c0_327 = arith.constant 0 : index
    %703 = vector.load %arg8[%c3_325, %c0_326, %c0_327] : memref<6x1x32xf32, #tpu.memory_space<vmem>>, vector<1x1x32xf32>
    %704 = vector.shape_cast %703 : vector<1x1x32xf32> to vector<1x32xf32>
    %cst_328 = arith.constant dense<0.000000e+00> : vector<16xf32>
    %705 = vector.multi_reduction <add>, %700, %cst_328 [1] : vector<16x32xf32> to vector<16xf32>
    %706 = vector.shape_cast %705 : vector<16xf32> to vector<16x1xf32>
    %cst_329 = arith.constant 3.200000e+01 : f32
    %707 = vector.broadcast %cst_329 : f32 to vector<16x1xf32>
    %708 = arith.divf %706, %707 : vector<16x1xf32>
    %709 = vector.broadcast %708 : vector<16x1xf32> to vector<16x32xf32>
    %710 = arith.subf %700, %709 : vector<16x32xf32>
    %711 = arith.mulf %710, %710 : vector<16x32xf32>
    %cst_330 = arith.constant dense<0.000000e+00> : vector<16xf32>
    %712 = vector.multi_reduction <add>, %711, %cst_330 [1] : vector<16x32xf32> to vector<16xf32>
    %713 = vector.shape_cast %712 : vector<16xf32> to vector<16x1xf32>
    %cst_331 = arith.constant 3.200000e+01 : f32
    %714 = vector.broadcast %cst_331 : f32 to vector<16x1xf32>
    %715 = arith.divf %713, %714 : vector<16x1xf32>
    %716 = vector.broadcast %708 : vector<16x1xf32> to vector<16x32xf32>
    %717 = arith.subf %700, %716 : vector<16x32xf32>
    %cst_332 = arith.constant 9.99999974E-6 : f32
    %718 = vector.broadcast %cst_332 : f32 to vector<16x1xf32>
    %719 = arith.addf %715, %718 : vector<16x1xf32>
    %720 = math.rsqrt %719 : vector<16x1xf32>
    %721 = vector.broadcast %720 : vector<16x1xf32> to vector<16x32xf32>
    %722 = arith.mulf %717, %721 : vector<16x32xf32>
    %723 = vector.broadcast %702 : vector<1x32xf32> to vector<16x32xf32>
    %724 = arith.mulf %722, %723 : vector<16x32xf32>
    %725 = vector.broadcast %704 : vector<1x32xf32> to vector<16x32xf32>
    %726 = arith.addf %724, %725 : vector<16x32xf32>
    %c3_333 = arith.constant 3 : index
    %c0_334 = arith.constant 0 : index
    %c0_335 = arith.constant 0 : index
    %727 = vector.load %arg9[%c3_333, %c0_334, %c0_335] : memref<6x32x128xf32, #tpu.memory_space<vmem>>, vector<1x32x128xf32>
    %728 = vector.shape_cast %727 : vector<1x32x128xf32> to vector<32x128xf32>
    %cst_336 = arith.constant dense<0.000000e+00> : vector<16x128xf32>
    %729 = tpu.matmul %726, %728, %cst_336 {dimension_numbers = #tpu.dot_dimension_numbers<[1], [0], [0], [1], [0, 0, 1, 1], [], []>} : vector<16x32xf32>, vector<32x128xf32>, vector<16x128xf32> -> vector<16x128xf32>
    %c3_337 = arith.constant 3 : index
    %c0_338 = arith.constant 0 : index
    %c0_339 = arith.constant 0 : index
    %730 = vector.load %arg10[%c3_337, %c0_338, %c0_339] : memref<6x1x128xf32, #tpu.memory_space<vmem>>, vector<1x1x128xf32>
    %731 = vector.shape_cast %730 : vector<1x1x128xf32> to vector<1x128xf32>
    %732 = vector.broadcast %731 : vector<1x128xf32> to vector<16x128xf32>
    %733 = arith.addf %729, %732 : vector<16x128xf32>
    %cst_340 = arith.constant 5.000000e-01 : f32
    %734 = vector.broadcast %cst_340 : f32 to vector<16x128xf32>
    %735 = arith.mulf %734, %733 : vector<16x128xf32>
    %cst_341 = arith.constant 4.471500e-02 : f32
    %736 = vector.broadcast %cst_341 : f32 to vector<16x128xf32>
    %737 = arith.mulf %736, %733 : vector<16x128xf32>
    %738 = arith.mulf %737, %733 : vector<16x128xf32>
    %739 = arith.mulf %738, %733 : vector<16x128xf32>
    %740 = arith.addf %733, %739 : vector<16x128xf32>
    %cst_342 = arith.constant 0.797884583 : f32
    %741 = vector.broadcast %cst_342 : f32 to vector<16x128xf32>
    %742 = arith.mulf %741, %740 : vector<16x128xf32>
    %743 = math.tanh %742 : vector<16x128xf32>
    %cst_343 = arith.constant 1.000000e+00 : f32
    %744 = vector.broadcast %cst_343 : f32 to vector<16x128xf32>
    %745 = arith.addf %744, %743 : vector<16x128xf32>
    %746 = arith.mulf %735, %745 : vector<16x128xf32>
    %c3_344 = arith.constant 3 : index
    %c0_345 = arith.constant 0 : index
    %c0_346 = arith.constant 0 : index
    %747 = vector.load %arg11[%c3_344, %c0_345, %c0_346] : memref<6x128x32xf32, #tpu.memory_space<vmem>>, vector<1x128x32xf32>
    %748 = vector.shape_cast %747 : vector<1x128x32xf32> to vector<128x32xf32>
    %cst_347 = arith.constant dense<0.000000e+00> : vector<16x32xf32>
    %749 = tpu.matmul %746, %748, %cst_347 {dimension_numbers = #tpu.dot_dimension_numbers<[1], [0], [0], [1], [0, 0, 1, 1], [], []>} : vector<16x128xf32>, vector<128x32xf32>, vector<16x32xf32> -> vector<16x32xf32>
    %c3_348 = arith.constant 3 : index
    %c0_349 = arith.constant 0 : index
    %c0_350 = arith.constant 0 : index
    %750 = vector.load %arg12[%c3_348, %c0_349, %c0_350] : memref<6x1x32xf32, #tpu.memory_space<vmem>>, vector<1x1x32xf32>
    %751 = vector.shape_cast %750 : vector<1x1x32xf32> to vector<1x32xf32>
    %752 = vector.broadcast %751 : vector<1x32xf32> to vector<16x32xf32>
    %753 = arith.addf %749, %752 : vector<16x32xf32>
    %754 = arith.addf %700, %753 : vector<16x32xf32>
    %c4 = arith.constant 4 : index
    %c0_351 = arith.constant 0 : index
    %c0_352 = arith.constant 0 : index
    %755 = vector.load %arg1[%c4, %c0_351, %c0_352] : memref<6x1x32xf32, #tpu.memory_space<vmem>>, vector<1x1x32xf32>
    %756 = vector.shape_cast %755 : vector<1x1x32xf32> to vector<1x32xf32>
    %c4_353 = arith.constant 4 : index
    %c0_354 = arith.constant 0 : index
    %c0_355 = arith.constant 0 : index
    %757 = vector.load %arg2[%c4_353, %c0_354, %c0_355] : memref<6x1x32xf32, #tpu.memory_space<vmem>>, vector<1x1x32xf32>
    %758 = vector.shape_cast %757 : vector<1x1x32xf32> to vector<1x32xf32>
    %cst_356 = arith.constant dense<0.000000e+00> : vector<16xf32>
    %759 = vector.multi_reduction <add>, %754, %cst_356 [1] : vector<16x32xf32> to vector<16xf32>
    %760 = vector.shape_cast %759 : vector<16xf32> to vector<16x1xf32>
    %cst_357 = arith.constant 3.200000e+01 : f32
    %761 = vector.broadcast %cst_357 : f32 to vector<16x1xf32>
    %762 = arith.divf %760, %761 : vector<16x1xf32>
    %763 = vector.broadcast %762 : vector<16x1xf32> to vector<16x32xf32>
    %764 = arith.subf %754, %763 : vector<16x32xf32>
    %765 = arith.mulf %764, %764 : vector<16x32xf32>
    %cst_358 = arith.constant dense<0.000000e+00> : vector<16xf32>
    %766 = vector.multi_reduction <add>, %765, %cst_358 [1] : vector<16x32xf32> to vector<16xf32>
    %767 = vector.shape_cast %766 : vector<16xf32> to vector<16x1xf32>
    %cst_359 = arith.constant 3.200000e+01 : f32
    %768 = vector.broadcast %cst_359 : f32 to vector<16x1xf32>
    %769 = arith.divf %767, %768 : vector<16x1xf32>
    %770 = vector.broadcast %762 : vector<16x1xf32> to vector<16x32xf32>
    %771 = arith.subf %754, %770 : vector<16x32xf32>
    %cst_360 = arith.constant 9.99999974E-6 : f32
    %772 = vector.broadcast %cst_360 : f32 to vector<16x1xf32>
    %773 = arith.addf %769, %772 : vector<16x1xf32>
    %774 = math.rsqrt %773 : vector<16x1xf32>
    %775 = vector.broadcast %774 : vector<16x1xf32> to vector<16x32xf32>
    %776 = arith.mulf %771, %775 : vector<16x32xf32>
    %777 = vector.broadcast %756 : vector<1x32xf32> to vector<16x32xf32>
    %778 = arith.mulf %776, %777 : vector<16x32xf32>
    %779 = vector.broadcast %758 : vector<1x32xf32> to vector<16x32xf32>
    %780 = arith.addf %778, %779 : vector<16x32xf32>
    %c4_361 = arith.constant 4 : index
    %c0_362 = arith.constant 0 : index
    %c0_363 = arith.constant 0 : index
    %781 = vector.load %arg3[%c4_361, %c0_362, %c0_363] : memref<6x32x96xf32, #tpu.memory_space<vmem>>, vector<1x32x96xf32>
    %782 = vector.shape_cast %781 : vector<1x32x96xf32> to vector<32x96xf32>
    %cst_364 = arith.constant dense<0.000000e+00> : vector<16x96xf32>
    %783 = tpu.matmul %780, %782, %cst_364 {dimension_numbers = #tpu.dot_dimension_numbers<[1], [0], [0], [1], [0, 0, 1, 1], [], []>} : vector<16x32xf32>, vector<32x96xf32>, vector<16x96xf32> -> vector<16x96xf32>
    %c4_365 = arith.constant 4 : index
    %c0_366 = arith.constant 0 : index
    %c0_367 = arith.constant 0 : index
    %784 = vector.load %arg4[%c4_365, %c0_366, %c0_367] : memref<6x1x96xf32, #tpu.memory_space<vmem>>, vector<1x1x96xf32>
    %785 = vector.shape_cast %784 : vector<1x1x96xf32> to vector<1x96xf32>
    %786 = vector.broadcast %785 : vector<1x96xf32> to vector<16x96xf32>
    %787 = arith.addf %783, %786 : vector<16x96xf32>
    %788 = vector.shape_cast %787 : vector<16x96xf32> to vector<2x8x96xf32>
    %789 = vector.extract_strided_slice %788 {offsets = [0, 0, 0], sizes = [2, 8, 32], strides = [1, 1, 1]} : vector<2x8x96xf32> to vector<2x8x32xf32>
    %cst_368 = arith.constant 0.353553385 : f32
    %790 = vector.broadcast %cst_368 : f32 to vector<2x8x32xf32>
    %791 = arith.mulf %789, %790 : vector<2x8x32xf32>
    %792 = vector.extract_strided_slice %788 {offsets = [0, 0, 32], sizes = [2, 8, 32], strides = [1, 1, 1]} : vector<2x8x96xf32> to vector<2x8x32xf32>
    %793 = vector.extract_strided_slice %788 {offsets = [0, 0, 64], sizes = [2, 8, 32], strides = [1, 1, 1]} : vector<2x8x96xf32> to vector<2x8x32xf32>
    %cst_369 = arith.constant 0.000000e+00 : f32
    %794 = vector.broadcast %cst_369 : f32 to vector<16x32xf32>
    %795 = vector.extract_strided_slice %791 {offsets = [0, 0, 0], sizes = [2, 8, 8], strides = [1, 1, 1]} : vector<2x8x32xf32> to vector<2x8x8xf32>
    %796 = vector.extract_strided_slice %792 {offsets = [0, 0, 0], sizes = [2, 8, 8], strides = [1, 1, 1]} : vector<2x8x32xf32> to vector<2x8x8xf32>
    %797 = vector.extract_strided_slice %793 {offsets = [0, 0, 0], sizes = [2, 8, 8], strides = [1, 1, 1]} : vector<2x8x32xf32> to vector<2x8x8xf32>
    "tpu.trace_start"() <{level = 10 : i32, message = "bqd,bkd->bqk"}> : () -> ()
    %cst_370 = arith.constant dense<0.000000e+00> : vector<2x8x8xf32>
    %798 = tpu.matmul %795, %796, %cst_370 {dimension_numbers = #tpu.dot_dimension_numbers<[2], [2], [1], [1], [0, 0, 0, 1, 1, 1], [0], [0]>} : vector<2x8x8xf32>, vector<2x8x8xf32>, vector<2x8x8xf32> -> vector<2x8x8xf32>
    "tpu.trace_stop"() : () -> ()
    %799 = vector.shape_cast %6 : vector<8x8xf32> to vector<1x8x8xf32>
    %800 = vector.broadcast %799 : vector<1x8x8xf32> to vector<2x8x8xf32>
    %801 = arith.addf %798, %800 : vector<2x8x8xf32>
    %cst_371 = arith.constant dense<0xFF800000> : vector<2x8xf32>
    %802 = vector.multi_reduction <maximumf>, %801, %cst_371 [2] : vector<2x8x8xf32> to vector<2x8xf32>
    %803 = vector.shape_cast %802 : vector<2x8xf32> to vector<2x8x1xf32>
    %804 = vector.broadcast %803 : vector<2x8x1xf32> to vector<2x8x8xf32>
    %805 = arith.subf %801, %804 : vector<2x8x8xf32>
    %806 = math.exp %805 : vector<2x8x8xf32>
    %cst_372 = arith.constant dense<0.000000e+00> : vector<2x8xf32>
    %807 = vector.multi_reduction <add>, %806, %cst_372 [2] : vector<2x8x8xf32> to vector<2x8xf32>
    %808 = vector.shape_cast %807 : vector<2x8xf32> to vector<2x8x1xf32>
    %809 = vector.broadcast %808 : vector<2x8x1xf32> to vector<2x8x8xf32>
    %810 = arith.divf %806, %809 : vector<2x8x8xf32>
    "tpu.trace_start"() <{level = 10 : i32, message = "bqk,bkd->bqd"}> : () -> ()
    %cst_373 = arith.constant dense<0.000000e+00> : vector<2x8x8xf32>
    %811 = tpu.matmul %810, %797, %cst_373 {dimension_numbers = #tpu.dot_dimension_numbers<[2], [1], [1], [2], [0, 0, 0, 1, 1, 2], [0], [0]>} : vector<2x8x8xf32>, vector<2x8x8xf32>, vector<2x8x8xf32> -> vector<2x8x8xf32>
    "tpu.trace_stop"() : () -> ()
    %812 = vector.shape_cast %811 : vector<2x8x8xf32> to vector<16x8xf32>
    %c4_374 = arith.constant 4 : index
    %c0_375 = arith.constant 0 : index
    %c0_376 = arith.constant 0 : index
    %c0_377 = arith.constant 0 : index
    %813 = vector.load %arg5[%c4_374, %c0_375, %c0_376, %c0_377] : memref<6x4x8x32xf32, #tpu.memory_space<vmem>>, vector<1x1x8x32xf32>
    %814 = vector.shape_cast %813 : vector<1x1x8x32xf32> to vector<8x32xf32>
    %cst_378 = arith.constant dense<0.000000e+00> : vector<16x32xf32>
    %815 = tpu.matmul %812, %814, %cst_378 {dimension_numbers = #tpu.dot_dimension_numbers<[1], [0], [0], [1], [0, 0, 1, 1], [], []>} : vector<16x8xf32>, vector<8x32xf32>, vector<16x32xf32> -> vector<16x32xf32>
    %816 = arith.addf %794, %815 : vector<16x32xf32>
    %817 = vector.extract_strided_slice %791 {offsets = [0, 0, 8], sizes = [2, 8, 8], strides = [1, 1, 1]} : vector<2x8x32xf32> to vector<2x8x8xf32>
    %818 = vector.extract_strided_slice %792 {offsets = [0, 0, 8], sizes = [2, 8, 8], strides = [1, 1, 1]} : vector<2x8x32xf32> to vector<2x8x8xf32>
    %819 = vector.extract_strided_slice %793 {offsets = [0, 0, 8], sizes = [2, 8, 8], strides = [1, 1, 1]} : vector<2x8x32xf32> to vector<2x8x8xf32>
    "tpu.trace_start"() <{level = 10 : i32, message = "bqd,bkd->bqk"}> : () -> ()
    %cst_379 = arith.constant dense<0.000000e+00> : vector<2x8x8xf32>
    %820 = tpu.matmul %817, %818, %cst_379 {dimension_numbers = #tpu.dot_dimension_numbers<[2], [2], [1], [1], [0, 0, 0, 1, 1, 1], [0], [0]>} : vector<2x8x8xf32>, vector<2x8x8xf32>, vector<2x8x8xf32> -> vector<2x8x8xf32>
    "tpu.trace_stop"() : () -> ()
    %821 = vector.shape_cast %6 : vector<8x8xf32> to vector<1x8x8xf32>
    %822 = vector.broadcast %821 : vector<1x8x8xf32> to vector<2x8x8xf32>
    %823 = arith.addf %820, %822 : vector<2x8x8xf32>
    %cst_380 = arith.constant dense<0xFF800000> : vector<2x8xf32>
    %824 = vector.multi_reduction <maximumf>, %823, %cst_380 [2] : vector<2x8x8xf32> to vector<2x8xf32>
    %825 = vector.shape_cast %824 : vector<2x8xf32> to vector<2x8x1xf32>
    %826 = vector.broadcast %825 : vector<2x8x1xf32> to vector<2x8x8xf32>
    %827 = arith.subf %823, %826 : vector<2x8x8xf32>
    %828 = math.exp %827 : vector<2x8x8xf32>
    %cst_381 = arith.constant dense<0.000000e+00> : vector<2x8xf32>
    %829 = vector.multi_reduction <add>, %828, %cst_381 [2] : vector<2x8x8xf32> to vector<2x8xf32>
    %830 = vector.shape_cast %829 : vector<2x8xf32> to vector<2x8x1xf32>
    %831 = vector.broadcast %830 : vector<2x8x1xf32> to vector<2x8x8xf32>
    %832 = arith.divf %828, %831 : vector<2x8x8xf32>
    "tpu.trace_start"() <{level = 10 : i32, message = "bqk,bkd->bqd"}> : () -> ()
    %cst_382 = arith.constant dense<0.000000e+00> : vector<2x8x8xf32>
    %833 = tpu.matmul %832, %819, %cst_382 {dimension_numbers = #tpu.dot_dimension_numbers<[2], [1], [1], [2], [0, 0, 0, 1, 1, 2], [0], [0]>} : vector<2x8x8xf32>, vector<2x8x8xf32>, vector<2x8x8xf32> -> vector<2x8x8xf32>
    "tpu.trace_stop"() : () -> ()
    %834 = vector.shape_cast %833 : vector<2x8x8xf32> to vector<16x8xf32>
    %c4_383 = arith.constant 4 : index
    %c1_384 = arith.constant 1 : index
    %c0_385 = arith.constant 0 : index
    %c0_386 = arith.constant 0 : index
    %835 = vector.load %arg5[%c4_383, %c1_384, %c0_385, %c0_386] : memref<6x4x8x32xf32, #tpu.memory_space<vmem>>, vector<1x1x8x32xf32>
    %836 = vector.shape_cast %835 : vector<1x1x8x32xf32> to vector<8x32xf32>
    %cst_387 = arith.constant dense<0.000000e+00> : vector<16x32xf32>
    %837 = tpu.matmul %834, %836, %cst_387 {dimension_numbers = #tpu.dot_dimension_numbers<[1], [0], [0], [1], [0, 0, 1, 1], [], []>} : vector<16x8xf32>, vector<8x32xf32>, vector<16x32xf32> -> vector<16x32xf32>
    %838 = arith.addf %816, %837 : vector<16x32xf32>
    %839 = vector.extract_strided_slice %791 {offsets = [0, 0, 16], sizes = [2, 8, 8], strides = [1, 1, 1]} : vector<2x8x32xf32> to vector<2x8x8xf32>
    %840 = vector.extract_strided_slice %792 {offsets = [0, 0, 16], sizes = [2, 8, 8], strides = [1, 1, 1]} : vector<2x8x32xf32> to vector<2x8x8xf32>
    %841 = vector.extract_strided_slice %793 {offsets = [0, 0, 16], sizes = [2, 8, 8], strides = [1, 1, 1]} : vector<2x8x32xf32> to vector<2x8x8xf32>
    "tpu.trace_start"() <{level = 10 : i32, message = "bqd,bkd->bqk"}> : () -> ()
    %cst_388 = arith.constant dense<0.000000e+00> : vector<2x8x8xf32>
    %842 = tpu.matmul %839, %840, %cst_388 {dimension_numbers = #tpu.dot_dimension_numbers<[2], [2], [1], [1], [0, 0, 0, 1, 1, 1], [0], [0]>} : vector<2x8x8xf32>, vector<2x8x8xf32>, vector<2x8x8xf32> -> vector<2x8x8xf32>
    "tpu.trace_stop"() : () -> ()
    %843 = vector.shape_cast %6 : vector<8x8xf32> to vector<1x8x8xf32>
    %844 = vector.broadcast %843 : vector<1x8x8xf32> to vector<2x8x8xf32>
    %845 = arith.addf %842, %844 : vector<2x8x8xf32>
    %cst_389 = arith.constant dense<0xFF800000> : vector<2x8xf32>
    %846 = vector.multi_reduction <maximumf>, %845, %cst_389 [2] : vector<2x8x8xf32> to vector<2x8xf32>
    %847 = vector.shape_cast %846 : vector<2x8xf32> to vector<2x8x1xf32>
    %848 = vector.broadcast %847 : vector<2x8x1xf32> to vector<2x8x8xf32>
    %849 = arith.subf %845, %848 : vector<2x8x8xf32>
    %850 = math.exp %849 : vector<2x8x8xf32>
    %cst_390 = arith.constant dense<0.000000e+00> : vector<2x8xf32>
    %851 = vector.multi_reduction <add>, %850, %cst_390 [2] : vector<2x8x8xf32> to vector<2x8xf32>
    %852 = vector.shape_cast %851 : vector<2x8xf32> to vector<2x8x1xf32>
    %853 = vector.broadcast %852 : vector<2x8x1xf32> to vector<2x8x8xf32>
    %854 = arith.divf %850, %853 : vector<2x8x8xf32>
    "tpu.trace_start"() <{level = 10 : i32, message = "bqk,bkd->bqd"}> : () -> ()
    %cst_391 = arith.constant dense<0.000000e+00> : vector<2x8x8xf32>
    %855 = tpu.matmul %854, %841, %cst_391 {dimension_numbers = #tpu.dot_dimension_numbers<[2], [1], [1], [2], [0, 0, 0, 1, 1, 2], [0], [0]>} : vector<2x8x8xf32>, vector<2x8x8xf32>, vector<2x8x8xf32> -> vector<2x8x8xf32>
    "tpu.trace_stop"() : () -> ()
    %856 = vector.shape_cast %855 : vector<2x8x8xf32> to vector<16x8xf32>
    %c4_392 = arith.constant 4 : index
    %c2_393 = arith.constant 2 : index
    %c0_394 = arith.constant 0 : index
    %c0_395 = arith.constant 0 : index
    %857 = vector.load %arg5[%c4_392, %c2_393, %c0_394, %c0_395] : memref<6x4x8x32xf32, #tpu.memory_space<vmem>>, vector<1x1x8x32xf32>
    %858 = vector.shape_cast %857 : vector<1x1x8x32xf32> to vector<8x32xf32>
    %cst_396 = arith.constant dense<0.000000e+00> : vector<16x32xf32>
    %859 = tpu.matmul %856, %858, %cst_396 {dimension_numbers = #tpu.dot_dimension_numbers<[1], [0], [0], [1], [0, 0, 1, 1], [], []>} : vector<16x8xf32>, vector<8x32xf32>, vector<16x32xf32> -> vector<16x32xf32>
    %860 = arith.addf %838, %859 : vector<16x32xf32>
    %861 = vector.extract_strided_slice %791 {offsets = [0, 0, 24], sizes = [2, 8, 8], strides = [1, 1, 1]} : vector<2x8x32xf32> to vector<2x8x8xf32>
    %862 = vector.extract_strided_slice %792 {offsets = [0, 0, 24], sizes = [2, 8, 8], strides = [1, 1, 1]} : vector<2x8x32xf32> to vector<2x8x8xf32>
    %863 = vector.extract_strided_slice %793 {offsets = [0, 0, 24], sizes = [2, 8, 8], strides = [1, 1, 1]} : vector<2x8x32xf32> to vector<2x8x8xf32>
    "tpu.trace_start"() <{level = 10 : i32, message = "bqd,bkd->bqk"}> : () -> ()
    %cst_397 = arith.constant dense<0.000000e+00> : vector<2x8x8xf32>
    %864 = tpu.matmul %861, %862, %cst_397 {dimension_numbers = #tpu.dot_dimension_numbers<[2], [2], [1], [1], [0, 0, 0, 1, 1, 1], [0], [0]>} : vector<2x8x8xf32>, vector<2x8x8xf32>, vector<2x8x8xf32> -> vector<2x8x8xf32>
    "tpu.trace_stop"() : () -> ()
    %865 = vector.shape_cast %6 : vector<8x8xf32> to vector<1x8x8xf32>
    %866 = vector.broadcast %865 : vector<1x8x8xf32> to vector<2x8x8xf32>
    %867 = arith.addf %864, %866 : vector<2x8x8xf32>
    %cst_398 = arith.constant dense<0xFF800000> : vector<2x8xf32>
    %868 = vector.multi_reduction <maximumf>, %867, %cst_398 [2] : vector<2x8x8xf32> to vector<2x8xf32>
    %869 = vector.shape_cast %868 : vector<2x8xf32> to vector<2x8x1xf32>
    %870 = vector.broadcast %869 : vector<2x8x1xf32> to vector<2x8x8xf32>
    %871 = arith.subf %867, %870 : vector<2x8x8xf32>
    %872 = math.exp %871 : vector<2x8x8xf32>
    %cst_399 = arith.constant dense<0.000000e+00> : vector<2x8xf32>
    %873 = vector.multi_reduction <add>, %872, %cst_399 [2] : vector<2x8x8xf32> to vector<2x8xf32>
    %874 = vector.shape_cast %873 : vector<2x8xf32> to vector<2x8x1xf32>
    %875 = vector.broadcast %874 : vector<2x8x1xf32> to vector<2x8x8xf32>
    %876 = arith.divf %872, %875 : vector<2x8x8xf32>
    "tpu.trace_start"() <{level = 10 : i32, message = "bqk,bkd->bqd"}> : () -> ()
    %cst_400 = arith.constant dense<0.000000e+00> : vector<2x8x8xf32>
    %877 = tpu.matmul %876, %863, %cst_400 {dimension_numbers = #tpu.dot_dimension_numbers<[2], [1], [1], [2], [0, 0, 0, 1, 1, 2], [0], [0]>} : vector<2x8x8xf32>, vector<2x8x8xf32>, vector<2x8x8xf32> -> vector<2x8x8xf32>
    "tpu.trace_stop"() : () -> ()
    %878 = vector.shape_cast %877 : vector<2x8x8xf32> to vector<16x8xf32>
    %c4_401 = arith.constant 4 : index
    %c3_402 = arith.constant 3 : index
    %c0_403 = arith.constant 0 : index
    %c0_404 = arith.constant 0 : index
    %879 = vector.load %arg5[%c4_401, %c3_402, %c0_403, %c0_404] : memref<6x4x8x32xf32, #tpu.memory_space<vmem>>, vector<1x1x8x32xf32>
    %880 = vector.shape_cast %879 : vector<1x1x8x32xf32> to vector<8x32xf32>
    %cst_405 = arith.constant dense<0.000000e+00> : vector<16x32xf32>
    %881 = tpu.matmul %878, %880, %cst_405 {dimension_numbers = #tpu.dot_dimension_numbers<[1], [0], [0], [1], [0, 0, 1, 1], [], []>} : vector<16x8xf32>, vector<8x32xf32>, vector<16x32xf32> -> vector<16x32xf32>
    %882 = arith.addf %860, %881 : vector<16x32xf32>
    %883 = arith.addf %754, %882 : vector<16x32xf32>
    %c4_406 = arith.constant 4 : index
    %c0_407 = arith.constant 0 : index
    %c0_408 = arith.constant 0 : index
    %884 = vector.load %arg6[%c4_406, %c0_407, %c0_408] : memref<6x1x32xf32, #tpu.memory_space<vmem>>, vector<1x1x32xf32>
    %885 = vector.shape_cast %884 : vector<1x1x32xf32> to vector<1x32xf32>
    %886 = vector.broadcast %885 : vector<1x32xf32> to vector<16x32xf32>
    %887 = arith.addf %883, %886 : vector<16x32xf32>
    %c4_409 = arith.constant 4 : index
    %c0_410 = arith.constant 0 : index
    %c0_411 = arith.constant 0 : index
    %888 = vector.load %arg7[%c4_409, %c0_410, %c0_411] : memref<6x1x32xf32, #tpu.memory_space<vmem>>, vector<1x1x32xf32>
    %889 = vector.shape_cast %888 : vector<1x1x32xf32> to vector<1x32xf32>
    %c4_412 = arith.constant 4 : index
    %c0_413 = arith.constant 0 : index
    %c0_414 = arith.constant 0 : index
    %890 = vector.load %arg8[%c4_412, %c0_413, %c0_414] : memref<6x1x32xf32, #tpu.memory_space<vmem>>, vector<1x1x32xf32>
    %891 = vector.shape_cast %890 : vector<1x1x32xf32> to vector<1x32xf32>
    %cst_415 = arith.constant dense<0.000000e+00> : vector<16xf32>
    %892 = vector.multi_reduction <add>, %887, %cst_415 [1] : vector<16x32xf32> to vector<16xf32>
    %893 = vector.shape_cast %892 : vector<16xf32> to vector<16x1xf32>
    %cst_416 = arith.constant 3.200000e+01 : f32
    %894 = vector.broadcast %cst_416 : f32 to vector<16x1xf32>
    %895 = arith.divf %893, %894 : vector<16x1xf32>
    %896 = vector.broadcast %895 : vector<16x1xf32> to vector<16x32xf32>
    %897 = arith.subf %887, %896 : vector<16x32xf32>
    %898 = arith.mulf %897, %897 : vector<16x32xf32>
    %cst_417 = arith.constant dense<0.000000e+00> : vector<16xf32>
    %899 = vector.multi_reduction <add>, %898, %cst_417 [1] : vector<16x32xf32> to vector<16xf32>
    %900 = vector.shape_cast %899 : vector<16xf32> to vector<16x1xf32>
    %cst_418 = arith.constant 3.200000e+01 : f32
    %901 = vector.broadcast %cst_418 : f32 to vector<16x1xf32>
    %902 = arith.divf %900, %901 : vector<16x1xf32>
    %903 = vector.broadcast %895 : vector<16x1xf32> to vector<16x32xf32>
    %904 = arith.subf %887, %903 : vector<16x32xf32>
    %cst_419 = arith.constant 9.99999974E-6 : f32
    %905 = vector.broadcast %cst_419 : f32 to vector<16x1xf32>
    %906 = arith.addf %902, %905 : vector<16x1xf32>
    %907 = math.rsqrt %906 : vector<16x1xf32>
    %908 = vector.broadcast %907 : vector<16x1xf32> to vector<16x32xf32>
    %909 = arith.mulf %904, %908 : vector<16x32xf32>
    %910 = vector.broadcast %889 : vector<1x32xf32> to vector<16x32xf32>
    %911 = arith.mulf %909, %910 : vector<16x32xf32>
    %912 = vector.broadcast %891 : vector<1x32xf32> to vector<16x32xf32>
    %913 = arith.addf %911, %912 : vector<16x32xf32>
    %c4_420 = arith.constant 4 : index
    %c0_421 = arith.constant 0 : index
    %c0_422 = arith.constant 0 : index
    %914 = vector.load %arg9[%c4_420, %c0_421, %c0_422] : memref<6x32x128xf32, #tpu.memory_space<vmem>>, vector<1x32x128xf32>
    %915 = vector.shape_cast %914 : vector<1x32x128xf32> to vector<32x128xf32>
    %cst_423 = arith.constant dense<0.000000e+00> : vector<16x128xf32>
    %916 = tpu.matmul %913, %915, %cst_423 {dimension_numbers = #tpu.dot_dimension_numbers<[1], [0], [0], [1], [0, 0, 1, 1], [], []>} : vector<16x32xf32>, vector<32x128xf32>, vector<16x128xf32> -> vector<16x128xf32>
    %c4_424 = arith.constant 4 : index
    %c0_425 = arith.constant 0 : index
    %c0_426 = arith.constant 0 : index
    %917 = vector.load %arg10[%c4_424, %c0_425, %c0_426] : memref<6x1x128xf32, #tpu.memory_space<vmem>>, vector<1x1x128xf32>
    %918 = vector.shape_cast %917 : vector<1x1x128xf32> to vector<1x128xf32>
    %919 = vector.broadcast %918 : vector<1x128xf32> to vector<16x128xf32>
    %920 = arith.addf %916, %919 : vector<16x128xf32>
    %cst_427 = arith.constant 5.000000e-01 : f32
    %921 = vector.broadcast %cst_427 : f32 to vector<16x128xf32>
    %922 = arith.mulf %921, %920 : vector<16x128xf32>
    %cst_428 = arith.constant 4.471500e-02 : f32
    %923 = vector.broadcast %cst_428 : f32 to vector<16x128xf32>
    %924 = arith.mulf %923, %920 : vector<16x128xf32>
    %925 = arith.mulf %924, %920 : vector<16x128xf32>
    %926 = arith.mulf %925, %920 : vector<16x128xf32>
    %927 = arith.addf %920, %926 : vector<16x128xf32>
    %cst_429 = arith.constant 0.797884583 : f32
    %928 = vector.broadcast %cst_429 : f32 to vector<16x128xf32>
    %929 = arith.mulf %928, %927 : vector<16x128xf32>
    %930 = math.tanh %929 : vector<16x128xf32>
    %cst_430 = arith.constant 1.000000e+00 : f32
    %931 = vector.broadcast %cst_430 : f32 to vector<16x128xf32>
    %932 = arith.addf %931, %930 : vector<16x128xf32>
    %933 = arith.mulf %922, %932 : vector<16x128xf32>
    %c4_431 = arith.constant 4 : index
    %c0_432 = arith.constant 0 : index
    %c0_433 = arith.constant 0 : index
    %934 = vector.load %arg11[%c4_431, %c0_432, %c0_433] : memref<6x128x32xf32, #tpu.memory_space<vmem>>, vector<1x128x32xf32>
    %935 = vector.shape_cast %934 : vector<1x128x32xf32> to vector<128x32xf32>
    %cst_434 = arith.constant dense<0.000000e+00> : vector<16x32xf32>
    %936 = tpu.matmul %933, %935, %cst_434 {dimension_numbers = #tpu.dot_dimension_numbers<[1], [0], [0], [1], [0, 0, 1, 1], [], []>} : vector<16x128xf32>, vector<128x32xf32>, vector<16x32xf32> -> vector<16x32xf32>
    %c4_435 = arith.constant 4 : index
    %c0_436 = arith.constant 0 : index
    %c0_437 = arith.constant 0 : index
    %937 = vector.load %arg12[%c4_435, %c0_436, %c0_437] : memref<6x1x32xf32, #tpu.memory_space<vmem>>, vector<1x1x32xf32>
    %938 = vector.shape_cast %937 : vector<1x1x32xf32> to vector<1x32xf32>
    %939 = vector.broadcast %938 : vector<1x32xf32> to vector<16x32xf32>
    %940 = arith.addf %936, %939 : vector<16x32xf32>
    %941 = arith.addf %887, %940 : vector<16x32xf32>
    %c5 = arith.constant 5 : index
    %c0_438 = arith.constant 0 : index
    %c0_439 = arith.constant 0 : index
    %942 = vector.load %arg1[%c5, %c0_438, %c0_439] : memref<6x1x32xf32, #tpu.memory_space<vmem>>, vector<1x1x32xf32>
    %943 = vector.shape_cast %942 : vector<1x1x32xf32> to vector<1x32xf32>
    %c5_440 = arith.constant 5 : index
    %c0_441 = arith.constant 0 : index
    %c0_442 = arith.constant 0 : index
    %944 = vector.load %arg2[%c5_440, %c0_441, %c0_442] : memref<6x1x32xf32, #tpu.memory_space<vmem>>, vector<1x1x32xf32>
    %945 = vector.shape_cast %944 : vector<1x1x32xf32> to vector<1x32xf32>
    %cst_443 = arith.constant dense<0.000000e+00> : vector<16xf32>
    %946 = vector.multi_reduction <add>, %941, %cst_443 [1] : vector<16x32xf32> to vector<16xf32>
    %947 = vector.shape_cast %946 : vector<16xf32> to vector<16x1xf32>
    %cst_444 = arith.constant 3.200000e+01 : f32
    %948 = vector.broadcast %cst_444 : f32 to vector<16x1xf32>
    %949 = arith.divf %947, %948 : vector<16x1xf32>
    %950 = vector.broadcast %949 : vector<16x1xf32> to vector<16x32xf32>
    %951 = arith.subf %941, %950 : vector<16x32xf32>
    %952 = arith.mulf %951, %951 : vector<16x32xf32>
    %cst_445 = arith.constant dense<0.000000e+00> : vector<16xf32>
    %953 = vector.multi_reduction <add>, %952, %cst_445 [1] : vector<16x32xf32> to vector<16xf32>
    %954 = vector.shape_cast %953 : vector<16xf32> to vector<16x1xf32>
    %cst_446 = arith.constant 3.200000e+01 : f32
    %955 = vector.broadcast %cst_446 : f32 to vector<16x1xf32>
    %956 = arith.divf %954, %955 : vector<16x1xf32>
    %957 = vector.broadcast %949 : vector<16x1xf32> to vector<16x32xf32>
    %958 = arith.subf %941, %957 : vector<16x32xf32>
    %cst_447 = arith.constant 9.99999974E-6 : f32
    %959 = vector.broadcast %cst_447 : f32 to vector<16x1xf32>
    %960 = arith.addf %956, %959 : vector<16x1xf32>
    %961 = math.rsqrt %960 : vector<16x1xf32>
    %962 = vector.broadcast %961 : vector<16x1xf32> to vector<16x32xf32>
    %963 = arith.mulf %958, %962 : vector<16x32xf32>
    %964 = vector.broadcast %943 : vector<1x32xf32> to vector<16x32xf32>
    %965 = arith.mulf %963, %964 : vector<16x32xf32>
    %966 = vector.broadcast %945 : vector<1x32xf32> to vector<16x32xf32>
    %967 = arith.addf %965, %966 : vector<16x32xf32>
    %c5_448 = arith.constant 5 : index
    %c0_449 = arith.constant 0 : index
    %c0_450 = arith.constant 0 : index
    %968 = vector.load %arg3[%c5_448, %c0_449, %c0_450] : memref<6x32x96xf32, #tpu.memory_space<vmem>>, vector<1x32x96xf32>
    %969 = vector.shape_cast %968 : vector<1x32x96xf32> to vector<32x96xf32>
    %cst_451 = arith.constant dense<0.000000e+00> : vector<16x96xf32>
    %970 = tpu.matmul %967, %969, %cst_451 {dimension_numbers = #tpu.dot_dimension_numbers<[1], [0], [0], [1], [0, 0, 1, 1], [], []>} : vector<16x32xf32>, vector<32x96xf32>, vector<16x96xf32> -> vector<16x96xf32>
    %c5_452 = arith.constant 5 : index
    %c0_453 = arith.constant 0 : index
    %c0_454 = arith.constant 0 : index
    %971 = vector.load %arg4[%c5_452, %c0_453, %c0_454] : memref<6x1x96xf32, #tpu.memory_space<vmem>>, vector<1x1x96xf32>
    %972 = vector.shape_cast %971 : vector<1x1x96xf32> to vector<1x96xf32>
    %973 = vector.broadcast %972 : vector<1x96xf32> to vector<16x96xf32>
    %974 = arith.addf %970, %973 : vector<16x96xf32>
    %975 = vector.shape_cast %974 : vector<16x96xf32> to vector<2x8x96xf32>
    %976 = vector.extract_strided_slice %975 {offsets = [0, 0, 0], sizes = [2, 8, 32], strides = [1, 1, 1]} : vector<2x8x96xf32> to vector<2x8x32xf32>
    %cst_455 = arith.constant 0.353553385 : f32
    %977 = vector.broadcast %cst_455 : f32 to vector<2x8x32xf32>
    %978 = arith.mulf %976, %977 : vector<2x8x32xf32>
    %979 = vector.extract_strided_slice %975 {offsets = [0, 0, 32], sizes = [2, 8, 32], strides = [1, 1, 1]} : vector<2x8x96xf32> to vector<2x8x32xf32>
    %980 = vector.extract_strided_slice %975 {offsets = [0, 0, 64], sizes = [2, 8, 32], strides = [1, 1, 1]} : vector<2x8x96xf32> to vector<2x8x32xf32>
    %cst_456 = arith.constant 0.000000e+00 : f32
    %981 = vector.broadcast %cst_456 : f32 to vector<16x32xf32>
    %982 = vector.extract_strided_slice %978 {offsets = [0, 0, 0], sizes = [2, 8, 8], strides = [1, 1, 1]} : vector<2x8x32xf32> to vector<2x8x8xf32>
    %983 = vector.extract_strided_slice %979 {offsets = [0, 0, 0], sizes = [2, 8, 8], strides = [1, 1, 1]} : vector<2x8x32xf32> to vector<2x8x8xf32>
    %984 = vector.extract_strided_slice %980 {offsets = [0, 0, 0], sizes = [2, 8, 8], strides = [1, 1, 1]} : vector<2x8x32xf32> to vector<2x8x8xf32>
    "tpu.trace_start"() <{level = 10 : i32, message = "bqd,bkd->bqk"}> : () -> ()
    %cst_457 = arith.constant dense<0.000000e+00> : vector<2x8x8xf32>
    %985 = tpu.matmul %982, %983, %cst_457 {dimension_numbers = #tpu.dot_dimension_numbers<[2], [2], [1], [1], [0, 0, 0, 1, 1, 1], [0], [0]>} : vector<2x8x8xf32>, vector<2x8x8xf32>, vector<2x8x8xf32> -> vector<2x8x8xf32>
    "tpu.trace_stop"() : () -> ()
    %986 = vector.shape_cast %6 : vector<8x8xf32> to vector<1x8x8xf32>
    %987 = vector.broadcast %986 : vector<1x8x8xf32> to vector<2x8x8xf32>
    %988 = arith.addf %985, %987 : vector<2x8x8xf32>
    %cst_458 = arith.constant dense<0xFF800000> : vector<2x8xf32>
    %989 = vector.multi_reduction <maximumf>, %988, %cst_458 [2] : vector<2x8x8xf32> to vector<2x8xf32>
    %990 = vector.shape_cast %989 : vector<2x8xf32> to vector<2x8x1xf32>
    %991 = vector.broadcast %990 : vector<2x8x1xf32> to vector<2x8x8xf32>
    %992 = arith.subf %988, %991 : vector<2x8x8xf32>
    %993 = math.exp %992 : vector<2x8x8xf32>
    %cst_459 = arith.constant dense<0.000000e+00> : vector<2x8xf32>
    %994 = vector.multi_reduction <add>, %993, %cst_459 [2] : vector<2x8x8xf32> to vector<2x8xf32>
    %995 = vector.shape_cast %994 : vector<2x8xf32> to vector<2x8x1xf32>
    %996 = vector.broadcast %995 : vector<2x8x1xf32> to vector<2x8x8xf32>
    %997 = arith.divf %993, %996 : vector<2x8x8xf32>
    "tpu.trace_start"() <{level = 10 : i32, message = "bqk,bkd->bqd"}> : () -> ()
    %cst_460 = arith.constant dense<0.000000e+00> : vector<2x8x8xf32>
    %998 = tpu.matmul %997, %984, %cst_460 {dimension_numbers = #tpu.dot_dimension_numbers<[2], [1], [1], [2], [0, 0, 0, 1, 1, 2], [0], [0]>} : vector<2x8x8xf32>, vector<2x8x8xf32>, vector<2x8x8xf32> -> vector<2x8x8xf32>
    "tpu.trace_stop"() : () -> ()
    %999 = vector.shape_cast %998 : vector<2x8x8xf32> to vector<16x8xf32>
    %c5_461 = arith.constant 5 : index
    %c0_462 = arith.constant 0 : index
    %c0_463 = arith.constant 0 : index
    %c0_464 = arith.constant 0 : index
    %1000 = vector.load %arg5[%c5_461, %c0_462, %c0_463, %c0_464] : memref<6x4x8x32xf32, #tpu.memory_space<vmem>>, vector<1x1x8x32xf32>
    %1001 = vector.shape_cast %1000 : vector<1x1x8x32xf32> to vector<8x32xf32>
    %cst_465 = arith.constant dense<0.000000e+00> : vector<16x32xf32>
    %1002 = tpu.matmul %999, %1001, %cst_465 {dimension_numbers = #tpu.dot_dimension_numbers<[1], [0], [0], [1], [0, 0, 1, 1], [], []>} : vector<16x8xf32>, vector<8x32xf32>, vector<16x32xf32> -> vector<16x32xf32>
    %1003 = arith.addf %981, %1002 : vector<16x32xf32>
    %1004 = vector.extract_strided_slice %978 {offsets = [0, 0, 8], sizes = [2, 8, 8], strides = [1, 1, 1]} : vector<2x8x32xf32> to vector<2x8x8xf32>
    %1005 = vector.extract_strided_slice %979 {offsets = [0, 0, 8], sizes = [2, 8, 8], strides = [1, 1, 1]} : vector<2x8x32xf32> to vector<2x8x8xf32>
    %1006 = vector.extract_strided_slice %980 {offsets = [0, 0, 8], sizes = [2, 8, 8], strides = [1, 1, 1]} : vector<2x8x32xf32> to vector<2x8x8xf32>
    "tpu.trace_start"() <{level = 10 : i32, message = "bqd,bkd->bqk"}> : () -> ()
    %cst_466 = arith.constant dense<0.000000e+00> : vector<2x8x8xf32>
    %1007 = tpu.matmul %1004, %1005, %cst_466 {dimension_numbers = #tpu.dot_dimension_numbers<[2], [2], [1], [1], [0, 0, 0, 1, 1, 1], [0], [0]>} : vector<2x8x8xf32>, vector<2x8x8xf32>, vector<2x8x8xf32> -> vector<2x8x8xf32>
    "tpu.trace_stop"() : () -> ()
    %1008 = vector.shape_cast %6 : vector<8x8xf32> to vector<1x8x8xf32>
    %1009 = vector.broadcast %1008 : vector<1x8x8xf32> to vector<2x8x8xf32>
    %1010 = arith.addf %1007, %1009 : vector<2x8x8xf32>
    %cst_467 = arith.constant dense<0xFF800000> : vector<2x8xf32>
    %1011 = vector.multi_reduction <maximumf>, %1010, %cst_467 [2] : vector<2x8x8xf32> to vector<2x8xf32>
    %1012 = vector.shape_cast %1011 : vector<2x8xf32> to vector<2x8x1xf32>
    %1013 = vector.broadcast %1012 : vector<2x8x1xf32> to vector<2x8x8xf32>
    %1014 = arith.subf %1010, %1013 : vector<2x8x8xf32>
    %1015 = math.exp %1014 : vector<2x8x8xf32>
    %cst_468 = arith.constant dense<0.000000e+00> : vector<2x8xf32>
    %1016 = vector.multi_reduction <add>, %1015, %cst_468 [2] : vector<2x8x8xf32> to vector<2x8xf32>
    %1017 = vector.shape_cast %1016 : vector<2x8xf32> to vector<2x8x1xf32>
    %1018 = vector.broadcast %1017 : vector<2x8x1xf32> to vector<2x8x8xf32>
    %1019 = arith.divf %1015, %1018 : vector<2x8x8xf32>
    "tpu.trace_start"() <{level = 10 : i32, message = "bqk,bkd->bqd"}> : () -> ()
    %cst_469 = arith.constant dense<0.000000e+00> : vector<2x8x8xf32>
    %1020 = tpu.matmul %1019, %1006, %cst_469 {dimension_numbers = #tpu.dot_dimension_numbers<[2], [1], [1], [2], [0, 0, 0, 1, 1, 2], [0], [0]>} : vector<2x8x8xf32>, vector<2x8x8xf32>, vector<2x8x8xf32> -> vector<2x8x8xf32>
    "tpu.trace_stop"() : () -> ()
    %1021 = vector.shape_cast %1020 : vector<2x8x8xf32> to vector<16x8xf32>
    %c5_470 = arith.constant 5 : index
    %c1_471 = arith.constant 1 : index
    %c0_472 = arith.constant 0 : index
    %c0_473 = arith.constant 0 : index
    %1022 = vector.load %arg5[%c5_470, %c1_471, %c0_472, %c0_473] : memref<6x4x8x32xf32, #tpu.memory_space<vmem>>, vector<1x1x8x32xf32>
    %1023 = vector.shape_cast %1022 : vector<1x1x8x32xf32> to vector<8x32xf32>
    %cst_474 = arith.constant dense<0.000000e+00> : vector<16x32xf32>
    %1024 = tpu.matmul %1021, %1023, %cst_474 {dimension_numbers = #tpu.dot_dimension_numbers<[1], [0], [0], [1], [0, 0, 1, 1], [], []>} : vector<16x8xf32>, vector<8x32xf32>, vector<16x32xf32> -> vector<16x32xf32>
    %1025 = arith.addf %1003, %1024 : vector<16x32xf32>
    %1026 = vector.extract_strided_slice %978 {offsets = [0, 0, 16], sizes = [2, 8, 8], strides = [1, 1, 1]} : vector<2x8x32xf32> to vector<2x8x8xf32>
    %1027 = vector.extract_strided_slice %979 {offsets = [0, 0, 16], sizes = [2, 8, 8], strides = [1, 1, 1]} : vector<2x8x32xf32> to vector<2x8x8xf32>
    %1028 = vector.extract_strided_slice %980 {offsets = [0, 0, 16], sizes = [2, 8, 8], strides = [1, 1, 1]} : vector<2x8x32xf32> to vector<2x8x8xf32>
    "tpu.trace_start"() <{level = 10 : i32, message = "bqd,bkd->bqk"}> : () -> ()
    %cst_475 = arith.constant dense<0.000000e+00> : vector<2x8x8xf32>
    %1029 = tpu.matmul %1026, %1027, %cst_475 {dimension_numbers = #tpu.dot_dimension_numbers<[2], [2], [1], [1], [0, 0, 0, 1, 1, 1], [0], [0]>} : vector<2x8x8xf32>, vector<2x8x8xf32>, vector<2x8x8xf32> -> vector<2x8x8xf32>
    "tpu.trace_stop"() : () -> ()
    %1030 = vector.shape_cast %6 : vector<8x8xf32> to vector<1x8x8xf32>
    %1031 = vector.broadcast %1030 : vector<1x8x8xf32> to vector<2x8x8xf32>
    %1032 = arith.addf %1029, %1031 : vector<2x8x8xf32>
    %cst_476 = arith.constant dense<0xFF800000> : vector<2x8xf32>
    %1033 = vector.multi_reduction <maximumf>, %1032, %cst_476 [2] : vector<2x8x8xf32> to vector<2x8xf32>
    %1034 = vector.shape_cast %1033 : vector<2x8xf32> to vector<2x8x1xf32>
    %1035 = vector.broadcast %1034 : vector<2x8x1xf32> to vector<2x8x8xf32>
    %1036 = arith.subf %1032, %1035 : vector<2x8x8xf32>
    %1037 = math.exp %1036 : vector<2x8x8xf32>
    %cst_477 = arith.constant dense<0.000000e+00> : vector<2x8xf32>
    %1038 = vector.multi_reduction <add>, %1037, %cst_477 [2] : vector<2x8x8xf32> to vector<2x8xf32>
    %1039 = vector.shape_cast %1038 : vector<2x8xf32> to vector<2x8x1xf32>
    %1040 = vector.broadcast %1039 : vector<2x8x1xf32> to vector<2x8x8xf32>
    %1041 = arith.divf %1037, %1040 : vector<2x8x8xf32>
    "tpu.trace_start"() <{level = 10 : i32, message = "bqk,bkd->bqd"}> : () -> ()
    %cst_478 = arith.constant dense<0.000000e+00> : vector<2x8x8xf32>
    %1042 = tpu.matmul %1041, %1028, %cst_478 {dimension_numbers = #tpu.dot_dimension_numbers<[2], [1], [1], [2], [0, 0, 0, 1, 1, 2], [0], [0]>} : vector<2x8x8xf32>, vector<2x8x8xf32>, vector<2x8x8xf32> -> vector<2x8x8xf32>
    "tpu.trace_stop"() : () -> ()
    %1043 = vector.shape_cast %1042 : vector<2x8x8xf32> to vector<16x8xf32>
    %c5_479 = arith.constant 5 : index
    %c2_480 = arith.constant 2 : index
    %c0_481 = arith.constant 0 : index
    %c0_482 = arith.constant 0 : index
    %1044 = vector.load %arg5[%c5_479, %c2_480, %c0_481, %c0_482] : memref<6x4x8x32xf32, #tpu.memory_space<vmem>>, vector<1x1x8x32xf32>
    %1045 = vector.shape_cast %1044 : vector<1x1x8x32xf32> to vector<8x32xf32>
    %cst_483 = arith.constant dense<0.000000e+00> : vector<16x32xf32>
    %1046 = tpu.matmul %1043, %1045, %cst_483 {dimension_numbers = #tpu.dot_dimension_numbers<[1], [0], [0], [1], [0, 0, 1, 1], [], []>} : vector<16x8xf32>, vector<8x32xf32>, vector<16x32xf32> -> vector<16x32xf32>
    %1047 = arith.addf %1025, %1046 : vector<16x32xf32>
    %1048 = vector.extract_strided_slice %978 {offsets = [0, 0, 24], sizes = [2, 8, 8], strides = [1, 1, 1]} : vector<2x8x32xf32> to vector<2x8x8xf32>
    %1049 = vector.extract_strided_slice %979 {offsets = [0, 0, 24], sizes = [2, 8, 8], strides = [1, 1, 1]} : vector<2x8x32xf32> to vector<2x8x8xf32>
    %1050 = vector.extract_strided_slice %980 {offsets = [0, 0, 24], sizes = [2, 8, 8], strides = [1, 1, 1]} : vector<2x8x32xf32> to vector<2x8x8xf32>
    "tpu.trace_start"() <{level = 10 : i32, message = "bqd,bkd->bqk"}> : () -> ()
    %cst_484 = arith.constant dense<0.000000e+00> : vector<2x8x8xf32>
    %1051 = tpu.matmul %1048, %1049, %cst_484 {dimension_numbers = #tpu.dot_dimension_numbers<[2], [2], [1], [1], [0, 0, 0, 1, 1, 1], [0], [0]>} : vector<2x8x8xf32>, vector<2x8x8xf32>, vector<2x8x8xf32> -> vector<2x8x8xf32>
    "tpu.trace_stop"() : () -> ()
    %1052 = vector.shape_cast %6 : vector<8x8xf32> to vector<1x8x8xf32>
    %1053 = vector.broadcast %1052 : vector<1x8x8xf32> to vector<2x8x8xf32>
    %1054 = arith.addf %1051, %1053 : vector<2x8x8xf32>
    %cst_485 = arith.constant dense<0xFF800000> : vector<2x8xf32>
    %1055 = vector.multi_reduction <maximumf>, %1054, %cst_485 [2] : vector<2x8x8xf32> to vector<2x8xf32>
    %1056 = vector.shape_cast %1055 : vector<2x8xf32> to vector<2x8x1xf32>
    %1057 = vector.broadcast %1056 : vector<2x8x1xf32> to vector<2x8x8xf32>
    %1058 = arith.subf %1054, %1057 : vector<2x8x8xf32>
    %1059 = math.exp %1058 : vector<2x8x8xf32>
    %cst_486 = arith.constant dense<0.000000e+00> : vector<2x8xf32>
    %1060 = vector.multi_reduction <add>, %1059, %cst_486 [2] : vector<2x8x8xf32> to vector<2x8xf32>
    %1061 = vector.shape_cast %1060 : vector<2x8xf32> to vector<2x8x1xf32>
    %1062 = vector.broadcast %1061 : vector<2x8x1xf32> to vector<2x8x8xf32>
    %1063 = arith.divf %1059, %1062 : vector<2x8x8xf32>
    "tpu.trace_start"() <{level = 10 : i32, message = "bqk,bkd->bqd"}> : () -> ()
    %cst_487 = arith.constant dense<0.000000e+00> : vector<2x8x8xf32>
    %1064 = tpu.matmul %1063, %1050, %cst_487 {dimension_numbers = #tpu.dot_dimension_numbers<[2], [1], [1], [2], [0, 0, 0, 1, 1, 2], [0], [0]>} : vector<2x8x8xf32>, vector<2x8x8xf32>, vector<2x8x8xf32> -> vector<2x8x8xf32>
    "tpu.trace_stop"() : () -> ()
    %1065 = vector.shape_cast %1064 : vector<2x8x8xf32> to vector<16x8xf32>
    %c5_488 = arith.constant 5 : index
    %c3_489 = arith.constant 3 : index
    %c0_490 = arith.constant 0 : index
    %c0_491 = arith.constant 0 : index
    %1066 = vector.load %arg5[%c5_488, %c3_489, %c0_490, %c0_491] : memref<6x4x8x32xf32, #tpu.memory_space<vmem>>, vector<1x1x8x32xf32>
    %1067 = vector.shape_cast %1066 : vector<1x1x8x32xf32> to vector<8x32xf32>
    %cst_492 = arith.constant dense<0.000000e+00> : vector<16x32xf32>
    %1068 = tpu.matmul %1065, %1067, %cst_492 {dimension_numbers = #tpu.dot_dimension_numbers<[1], [0], [0], [1], [0, 0, 1, 1], [], []>} : vector<16x8xf32>, vector<8x32xf32>, vector<16x32xf32> -> vector<16x32xf32>
    %1069 = arith.addf %1047, %1068 : vector<16x32xf32>
    %1070 = arith.addf %941, %1069 : vector<16x32xf32>
    %c5_493 = arith.constant 5 : index
    %c0_494 = arith.constant 0 : index
    %c0_495 = arith.constant 0 : index
    %1071 = vector.load %arg6[%c5_493, %c0_494, %c0_495] : memref<6x1x32xf32, #tpu.memory_space<vmem>>, vector<1x1x32xf32>
    %1072 = vector.shape_cast %1071 : vector<1x1x32xf32> to vector<1x32xf32>
    %1073 = vector.broadcast %1072 : vector<1x32xf32> to vector<16x32xf32>
    %1074 = arith.addf %1070, %1073 : vector<16x32xf32>
    %c5_496 = arith.constant 5 : index
    %c0_497 = arith.constant 0 : index
    %c0_498 = arith.constant 0 : index
    %1075 = vector.load %arg7[%c5_496, %c0_497, %c0_498] : memref<6x1x32xf32, #tpu.memory_space<vmem>>, vector<1x1x32xf32>
    %1076 = vector.shape_cast %1075 : vector<1x1x32xf32> to vector<1x32xf32>
    %c5_499 = arith.constant 5 : index
    %c0_500 = arith.constant 0 : index
    %c0_501 = arith.constant 0 : index
    %1077 = vector.load %arg8[%c5_499, %c0_500, %c0_501] : memref<6x1x32xf32, #tpu.memory_space<vmem>>, vector<1x1x32xf32>
    %1078 = vector.shape_cast %1077 : vector<1x1x32xf32> to vector<1x32xf32>
    %cst_502 = arith.constant dense<0.000000e+00> : vector<16xf32>
    %1079 = vector.multi_reduction <add>, %1074, %cst_502 [1] : vector<16x32xf32> to vector<16xf32>
    %1080 = vector.shape_cast %1079 : vector<16xf32> to vector<16x1xf32>
    %cst_503 = arith.constant 3.200000e+01 : f32
    %1081 = vector.broadcast %cst_503 : f32 to vector<16x1xf32>
    %1082 = arith.divf %1080, %1081 : vector<16x1xf32>
    %1083 = vector.broadcast %1082 : vector<16x1xf32> to vector<16x32xf32>
    %1084 = arith.subf %1074, %1083 : vector<16x32xf32>
    %1085 = arith.mulf %1084, %1084 : vector<16x32xf32>
    %cst_504 = arith.constant dense<0.000000e+00> : vector<16xf32>
    %1086 = vector.multi_reduction <add>, %1085, %cst_504 [1] : vector<16x32xf32> to vector<16xf32>
    %1087 = vector.shape_cast %1086 : vector<16xf32> to vector<16x1xf32>
    %cst_505 = arith.constant 3.200000e+01 : f32
    %1088 = vector.broadcast %cst_505 : f32 to vector<16x1xf32>
    %1089 = arith.divf %1087, %1088 : vector<16x1xf32>
    %1090 = vector.broadcast %1082 : vector<16x1xf32> to vector<16x32xf32>
    %1091 = arith.subf %1074, %1090 : vector<16x32xf32>
    %cst_506 = arith.constant 9.99999974E-6 : f32
    %1092 = vector.broadcast %cst_506 : f32 to vector<16x1xf32>
    %1093 = arith.addf %1089, %1092 : vector<16x1xf32>
    %1094 = math.rsqrt %1093 : vector<16x1xf32>
    %1095 = vector.broadcast %1094 : vector<16x1xf32> to vector<16x32xf32>
    %1096 = arith.mulf %1091, %1095 : vector<16x32xf32>
    %1097 = vector.broadcast %1076 : vector<1x32xf32> to vector<16x32xf32>
    %1098 = arith.mulf %1096, %1097 : vector<16x32xf32>
    %1099 = vector.broadcast %1078 : vector<1x32xf32> to vector<16x32xf32>
    %1100 = arith.addf %1098, %1099 : vector<16x32xf32>
    %c5_507 = arith.constant 5 : index
    %c0_508 = arith.constant 0 : index
    %c0_509 = arith.constant 0 : index
    %1101 = vector.load %arg9[%c5_507, %c0_508, %c0_509] : memref<6x32x128xf32, #tpu.memory_space<vmem>>, vector<1x32x128xf32>
    %1102 = vector.shape_cast %1101 : vector<1x32x128xf32> to vector<32x128xf32>
    %cst_510 = arith.constant dense<0.000000e+00> : vector<16x128xf32>
    %1103 = tpu.matmul %1100, %1102, %cst_510 {dimension_numbers = #tpu.dot_dimension_numbers<[1], [0], [0], [1], [0, 0, 1, 1], [], []>} : vector<16x32xf32>, vector<32x128xf32>, vector<16x128xf32> -> vector<16x128xf32>
    %c5_511 = arith.constant 5 : index
    %c0_512 = arith.constant 0 : index
    %c0_513 = arith.constant 0 : index
    %1104 = vector.load %arg10[%c5_511, %c0_512, %c0_513] : memref<6x1x128xf32, #tpu.memory_space<vmem>>, vector<1x1x128xf32>
    %1105 = vector.shape_cast %1104 : vector<1x1x128xf32> to vector<1x128xf32>
    %1106 = vector.broadcast %1105 : vector<1x128xf32> to vector<16x128xf32>
    %1107 = arith.addf %1103, %1106 : vector<16x128xf32>
    %cst_514 = arith.constant 5.000000e-01 : f32
    %1108 = vector.broadcast %cst_514 : f32 to vector<16x128xf32>
    %1109 = arith.mulf %1108, %1107 : vector<16x128xf32>
    %cst_515 = arith.constant 4.471500e-02 : f32
    %1110 = vector.broadcast %cst_515 : f32 to vector<16x128xf32>
    %1111 = arith.mulf %1110, %1107 : vector<16x128xf32>
    %1112 = arith.mulf %1111, %1107 : vector<16x128xf32>
    %1113 = arith.mulf %1112, %1107 : vector<16x128xf32>
    %1114 = arith.addf %1107, %1113 : vector<16x128xf32>
    %cst_516 = arith.constant 0.797884583 : f32
    %1115 = vector.broadcast %cst_516 : f32 to vector<16x128xf32>
    %1116 = arith.mulf %1115, %1114 : vector<16x128xf32>
    %1117 = math.tanh %1116 : vector<16x128xf32>
    %cst_517 = arith.constant 1.000000e+00 : f32
    %1118 = vector.broadcast %cst_517 : f32 to vector<16x128xf32>
    %1119 = arith.addf %1118, %1117 : vector<16x128xf32>
    %1120 = arith.mulf %1109, %1119 : vector<16x128xf32>
    %c5_518 = arith.constant 5 : index
    %c0_519 = arith.constant 0 : index
    %c0_520 = arith.constant 0 : index
    %1121 = vector.load %arg11[%c5_518, %c0_519, %c0_520] : memref<6x128x32xf32, #tpu.memory_space<vmem>>, vector<1x128x32xf32>
    %1122 = vector.shape_cast %1121 : vector<1x128x32xf32> to vector<128x32xf32>
    %cst_521 = arith.constant dense<0.000000e+00> : vector<16x32xf32>
    %1123 = tpu.matmul %1120, %1122, %cst_521 {dimension_numbers = #tpu.dot_dimension_numbers<[1], [0], [0], [1], [0, 0, 1, 1], [], []>} : vector<16x128xf32>, vector<128x32xf32>, vector<16x32xf32> -> vector<16x32xf32>
    %c5_522 = arith.constant 5 : index
    %c0_523 = arith.constant 0 : index
    %c0_524 = arith.constant 0 : index
    %1124 = vector.load %arg12[%c5_522, %c0_523, %c0_524] : memref<6x1x32xf32, #tpu.memory_space<vmem>>, vector<1x1x32xf32>
    %1125 = vector.shape_cast %1124 : vector<1x1x32xf32> to vector<1x32xf32>
    %1126 = vector.broadcast %1125 : vector<1x32xf32> to vector<16x32xf32>
    %1127 = arith.addf %1123, %1126 : vector<16x32xf32>
    %1128 = arith.addf %1074, %1127 : vector<16x32xf32>
    %c0_525 = arith.constant 0 : index
    %c0_526 = arith.constant 0 : index
    %1129 = vector.load %arg13[%c0_525, %c0_526] : memref<16x32xf32, #tpu.memory_space<vmem>>, vector<16x32xf32>
    tpu.vector_store %arg13[%c0_525, %c0_526], %1128 {strides = array<i32>} : memref<16x32xf32, #tpu.memory_space<vmem>>, vector<16x32xf32>,
    return
  }
}

</mosaic_0001>

<bundles_post_ra>
// kernel: tpu_custom_call.1
= control target key start
LH: loop header
LB: loop body
LE: loop exit
PB: predicated region body
PF: predicated region fallthrough
CT: control target
= control target key end

     0   :  { %s16889_s0 = inlined_call_operand.vmem [shape: f32[16,32], index: 0, kind: input, shape index: {}]   ;;  %s16890_s1 = inlined_call_operand.vmem [shape: f32[6,1,32], index: 1, kind: input, shape index: {}]   ;;  %s16891_s2 = inlined_call_operand.vmem [shape: f32[6,1,32], index: 2, kind: input, shape index: {}]   ;;  %s16892_s3 = inlined_call_operand.vmem [shape: f32[6,32,96], index: 3, kind: input, shape index: {}]   ;;  %s16893_s4 = inlined_call_operand.vmem [shape: f32[6,1,96], index: 4, kind: input, shape index: {}]   ;;  %s16894_s5 = inlined_call_operand.vmem [shape: f32[6,4,8,32], index: 5, kind: input, shape index: {}]   ;;  %s16895_s6 = inlined_call_operand.vmem [shape: f32[6,1,32], index: 6, kind: input, shape index: {}]   ;;  %s16896_s7 = inlined_call_operand.vmem [shape: f32[6,1,32], index: 7, kind: input, shape index: {}]   ;;  %s16897_s8 = inlined_call_operand.vmem [shape: f32[6,1,32], index: 8, kind: input, shape index: {}]   ;;  %s16898_s9 = inlined_call_operand.vmem [shape: f32[6,32,128], index: 9, kind: input, shape index: {}]   ;;  %s16899_s10 = inlined_call_operand.vmem [shape: f32[6,1,128], index: 10, kind: input, shape index: {}]   ;;  %s16900_s11 = inlined_call_operand.vmem [shape: f32[6,128,32], index: 11, kind: input, shape index: {}]   ;;  %s16901_s12 = inlined_call_operand.vmem [shape: f32[6,1,32], index: 12, kind: input, shape index: {}]   ;;  %s16902_s13 = inlined_call_operand.hbm [shape: f32[16,32], index: 13, kind: output, shape index: {}]  }
   0x1   :  { %16928 = sst [smem:[#allocation5_spill]] %s16896_s7 }
   0x2   :  { %16929 = sst [smem:[#allocation6_spill]] %s16897_s8 }
   0x3   :  { %16930 = sst [smem:[#allocation7_spill]] %s16902_s13 }
   0x4   :  { %v15034_v0 = vld [vmem:[%s16889_s0] sm:$0xff]  ;;  %vm55_vm0 = vcmask 261120   ;;  %v15039_v1 = vld [vmem:[%s16889_s0 + $0x8] sm:$0xff] }
   0x5   :  { %18 = vsyncpa [#allocation3], 0  ;;  %v56_v2 = vsel %vm55_vm0, %v15034_v0, 0.0  ;;  %v59_v3 = vsel %vm55_vm0, %v15039_v1, 0.0  ;;  %v99_v14 = vld [vmem:[%s16892_s3] sm:$0xff]  ;;  %v100_v15 = vld [vmem:[%s16892_s3 + $0x8] sm:$0xff]  ;;  %v47_v46 = vlaneseq }
   0x6   :  { %57 = vadd.xlane.f32.xlu0 %v56_v2  ;;  %v101_v16 = vld [vmem:[%s16892_s3 + $0x10] sm:$0xff]  ;;  %v14315_v17 = vpack.c.bf16 %v100_v15, %v99_v14  ;;  %v102_v18 = vld [vmem:[%s16892_s3 + $0x18] sm:$0xff]  ;;  %v12482_v27 = vld [vmem:[%s16890_s1] ss:$0 sm:$0xff]  ;;  %v14944_v36 = vmov 0.0   ;;  %vm14945_vm1 = vmmov 0  }
   0x7   :  { %v14319_v19 = vpack.c.bf16 %v102_v18, %v101_v16  ;;  %v12483_v29 = vld [vmem:[%s16891_s2] ss:$0 sm:$0xff]  ;;  %13414 = vmatprep.subr.mxu0 %v14944_v36  ;;  %13416 = vmatprep.mubr.msk.f32.mxu0 %vm14945_vm1, %v14944_v36  ;;  %s16923_s25 = smov 96   ;;  %vm196_vm2 = vcmask 64512   ;;  %v48_v47 = vshrl.u32 %v47_v46, 7  ;;  %v50_v48 = vand.u32 127, %v47_v46 }
   0x8   :  { %14316 = vmatprep.subr.bf16.mxu1 %v14315_v17  ;;  %v12484_v37 = vld [vmem:[%s16893_s4] ss:$0 sm:$0xff]  ;;  %v14947_v49 = vmov -1e+09   ;;  %s16921_s26 = smov 64   ;;  %s16919_s27 = smov 88  }
   0x9   :  { %14318 = vmatpush3.bf16.msra.mxu1 %v14315_v17  ;;  %vm51_vm3 = vcmp.ge.s32.totalorder %v48_v47, %v50_v48  ;;  %s16917_s28 = smov 120   ;;  %s16915_s0 = smov 80  }
   0xa   :  { %60 = vadd.xlane.f32.xlu0 %v59_v3  ;;  %14320 = vmatprep.subr.bf16.mxu1 %v14319_v19  ;;  %v15104_v50 = vsel %vm51_vm3, 0.0, %v14947_v49  ;;  %s16913_s29 = smov 56   ;;  %s16911_s30 = smov 112  }
   0xb   :  { %s16909_s14 = smov 48   ;;  %s16907_s15 = smov 72  }
   0xc   :  { %s16905_s16 = smov 104   ;;  %s16903_s23 = smov 40  }
   0xd   :  { %14322 = vmatpush3.bf16.msra.mxu1 %v14319_v19  ;;  %s16931_s18 = smov 72   ;;  %s16932_s19 = smov 104  }
   0xe   :  { %13384 = vmatprep.subr.mxu1 %v14944_v36  ;;  %s16934_s21 = smov 56   ;;  %s16935_s22 = smov 112  }
   0xf   :  { %s16937_s24 = smov 88  }
  0x93   :  { %v58_v4 = vpop.xlane.xlu0 %57 }
  0x94   :  { %v63_v5 = vmul.f32 0.03125, %v58_v4 }
  0x96   :  { %v65_v6 = vsub.f32 %v15034_v0, %v63_v5 }
  0x97   :  { %v61_v7 = vpop.xlane.xlu0 %60 }
  0x98   :  { %v64_v8 = vmul.f32 0.03125, %v61_v7  ;;  %v67_v9 = vmul.f32 %v65_v6, %v65_v6 }
  0x9a   :  { %v66_v10 = vsub.f32 %v15039_v1, %v64_v8  ;;  %v69_v11 = vsel %vm55_vm0, %v67_v9, 0.0 }
  0x9b   :  { %70 = vadd.xlane.f32.xlu1 %v69_v11 }
  0x9c   :  { %v68_v12 = vmul.f32 %v66_v10, %v66_v10 }
  0x9e   :  { %v72_v13 = vsel %vm55_vm0, %v68_v12, 0.0 }
  0x9f   :  { %73 = vadd.xlane.f32.xlu1 %v72_v13 }
 0x128   :  { %v71_v20 = vpop.xlane.xlu1 %70 }
 0x129   :  { %v75_v21 = vmul.f32 0.03125, %v71_v20 }
 0x12b   :  { %v77_v22 = vadd.f32 1e-05, %v75_v21 }
 0x12c   :  { %v74_v23 = vpop.xlane.xlu1 %73 }
 0x12d   :  { %14656 = vrsqrt.f32 %v77_v22  ;;  %v76_v24 = vmul.f32 0.03125, %v74_v23 }
 0x12f   :  { %v78_v25 = vadd.f32 1e-05, %v76_v24 }
 0x131   :  { %14658 = vrsqrt.f32 %v78_v25 }
 0x137   :  { %v14657_v26 = vpop.eup %14656 }
 0x138   :  { %v81_v28 = vmul.f32 %v14657_v26, %v65_v6 }
 0x13a   :  { %v89_v30 = vmul.f32 %v12482_v27, %v81_v28 }
 0x13b   :  { %v14659_v31 = vpop.eup %14658 }
 0x13c   :  { %v82_v32 = vmul.f32 %v14659_v31, %v66_v10  ;;  %v97_v33 = vadd.f32 %v12483_v29, %v89_v30 }
 0x13e   :  { %v90_v34 = vmul.f32 %v12482_v27, %v82_v32  ;;  %13381 = vmatprep.mubr.msk.f32.mxu1 %vm55_vm0, %v97_v33 }
 0x140   :  { %v98_v35 = vadd.f32 %v12483_v29, %v90_v34 }
 0x142   :  { %13382 = vmatmul.mubr.msk.f32.vlgmr.msra.gmra.mrb[0].mxu1 %vm55_vm0, %v98_v35 }
 0x143   :  { %13386 = vmatprep.mubr.msk.f32.mxu1 %vm14945_vm1, %v14944_v36 }
 0x215   :  { %v13383_v38 = vpop.f32.mrb[0].mxu1 }
 0x216   :  { %v15078_v39 = vadd.f32 %v13383_v38, %v12484_v37  ;;  %v182_v40 = vpop.f32.mrb[1].mxu1 }
 0x217   :  { %v15080_v41 = vadd.f32 %v12484_v37, %v182_v40 }
 0x218   :  { %273 = vrot.lane.b32.xlu1 %v15078_v39, %s16923_s25  ;;  %v15097_v45 = vmul.f32 0.35355338, %v15078_v39 }
 0x219   :  { %194 = vrot.lane.b32.xlu0 %v15080_v41, %s16923_s25  ;;  %v15088_v43 = vmul.f32 0.35355338, %v15080_v41 }
 0x28a   :  { %v274_v44 = vpop.permute.xlu1 %273 }
 0x28b   :  { %v195_v42 = vpop.permute.xlu0 %194 }
 0x28c   :  { %13385 = vmatpush3.xpose.msk.msra.mxu1 %vm196_vm2, %v195_v42 }
 0x28d   :  { %13389 = vmatprep.subr.mxu1 %v14944_v36 }
 0x28f   :  { %13387 = vmatmul.mubr.msk.f32.vlgmr.msra.gmra.mrb[2].mxu1 %vm196_vm2, %v15088_v43 }
 0x290   :  { %13390 = vmatpush3.xpose.msk.msra.mxu1 %vm196_vm2, %v274_v44  ;;  %13391 = vmatprep.mubr.msk.f32.mxu1 %vm14945_vm1, %v14944_v36 }
 0x291   :  { %13394 = vmatprep.subr.mxu1 %v14944_v36 }
 0x293   :  { %13392 = vmatmul.mubr.msk.f32.vlgmr.msra.gmra.mrb[4].mxu1 %vm196_vm2, %v15097_v45 }
 0x294   :  { %13396 = vmatprep.mubr.msk.f32.mxu1 %vm14945_vm1, %v14944_v36 }
 0x362   :  { %v268_v51 = vpop.f32.mrb[2].mxu1 }
 0x363   :  { %v269_v52 = vadd.f32 %v268_v51, %v15104_v50  ;;  %v13388_v53 = vpop.f32.mrb[3].mxu1 }
 0x365   :  { %v350_v54 = vsel %vm196_vm2, %v269_v52, -inf }
 0x366   :  { %351 = vmax.xlane.f32.xlu1 %v350_v54  ;;  %v346_v55 = vpop.f32.mrb[4].mxu1 }
 0x367   :  { %v347_v56 = vadd.f32 %v346_v55, %v15104_v50  ;;  %v13393_v57 = vpop.f32.mrb[5].mxu1 }
 0x369   :  { %v353_v58 = vsel %vm196_vm2, %v347_v56, -inf }
 0x36a   :  { %354 = vmax.xlane.f32.xlu0 %v353_v58 }
 0x377   :  { %448 = vrot.lane.b32.xlu1 %v15078_v39, %s16921_s26 }
 0x37b   :  { %527 = vrot.lane.b32.xlu1 %v15080_v41, %s16919_s27 }
 0x37f   :  { %525 = vrot.lane.b32.xlu1 %v15088_v43, %s16917_s28 }
 0x3f3   :  { %v352_v59 = vpop.xlane.xlu1 %351 }
 0x3f4   :  { %v356_v60 = vsub.f32 %v269_v52, %v352_v59 }
 0x3f6   :  { %v358_v61 = vmul.f32 1.442695, %v356_v60 }
 0x3f7   :  { %v355_v62 = vpop.xlane.xlu0 %354  ;;  %v449_v7 = vpop.permute.xlu1 %448 }
 0x3f8   :  { %14660 = vpow2.f32 %v358_v61  ;;  %v357_v63 = vsub.f32 %v347_v56, %v355_v62 }
 0x3fa   :  { %v360_v2 = vmul.f32 1.442695, %v357_v63 }
 0x3fb   :  { %v528_v8 = vpop.permute.xlu1 %527 }
 0x3fc   :  { %14662 = vpow2.f32 %v360_v2 }
 0x3ff   :  { %v526_v9 = vpop.permute.xlu1 %525 }
 0x402   :  { %v14661_v3 = vpop.eup %14660 }
 0x403   :  { %v362_v4 = vsel %vm196_vm2, %v14661_v3, 0.0 }
 0x404   :  { %363 = vadd.xlane.f32.xlu0 %v362_v4 }
 0x406   :  { %v14663_v5 = vpop.eup %14662 }
 0x407   :  { %v365_v6 = vsel %vm196_vm2, %v14663_v5, 0.0 }
 0x408   :  { %366 = vadd.xlane.f32.xlu1 %v365_v6 }
 0x419   :  { %603 = vrot.lane.b32.xlu1 %v15097_v45, %s16917_s28 }
 0x41a   :  { %372 = vrot.lane.b32.xlu0 %v15080_v41, %s16921_s26 }
 0x41d   :  { %1021 = vrot.lane.b32.xlu1 %v15080_v41, %s16915_s0 }
 0x41e   :  { %605 = vrot.lane.b32.xlu0 %v15078_v39, %s16919_s27 }
 0x491   :  { %v364_v10 = vpop.xlane.xlu0 %363 }
 0x492   :  { %14664 = vrcp.f32 %v364_v10 }
 0x495   :  { %v367_v11 = vpop.xlane.xlu1 %366  ;;  %v373_v12 = vpop.permute.xlu0 %372 }
 0x496   :  { %14666 = vrcp.f32 %v367_v11  ;;  %13395 = vmatpush3.msra.mxu1 %v373_v12 }
 0x497   :  { %13399 = vmatprep.subr.mxu1 %v14944_v36 }
 0x499   :  { %v606_v17 = vpop.permute.xlu0 %605  ;;  %v604_v18 = vpop.permute.xlu1 %603 }
 0x49c   :  { %v14665_v13 = vpop.eup %14664 }
 0x49d   :  { %v369_v14 = vmul.f32 %v14665_v13, %v14661_v3  ;;  %v1022_v38 = vpop.permute.xlu1 %1021 }
 0x49f   :  { %13397 = vmatmul.mubr.msk.f32.vlgmr.msra.gmra.mrb[6].mxu1 %vm196_vm2, %v369_v14 }
 0x4a0   :  { %v14667_v15 = vpop.eup %14666  ;;  %13400 = vmatpush3.msra.mxu1 %v449_v7  ;;  %13401 = vmatprep.mubr.msk.f32.mxu1 %vm14945_vm1, %v14944_v36  ;;  %v12499_v7 = vld [vmem:[%s16894_s5 + $0x8] sm:$0xff] }
 0x4a1   :  { %v371_v16 = vmul.f32 %v14667_v15, %v14663_v5  ;;  %13404 = vmatprep.subr.mxu1 %v14944_v36 }
 0x4a3   :  { %13402 = vmatmul.mubr.msk.f32.vlgmr.msra.gmra.mrb[8].mxu1 %vm196_vm2, %v371_v16 }
 0x4a4   :  { %13406 = vmatprep.mubr.msk.f32.mxu1 %vm14945_vm1, %v14944_v36 }
 0x4a7   :  { %13405 = vmatpush3.xpose.msk.msra.mxu1 %vm196_vm2, %v528_v8  ;;  %v524_v8 = vld [vmem:[%s16894_s5] sm:$0xff] }
 0x4a8   :  { %13409 = vmatprep.subr.mxu1 %v14944_v36 }
 0x4aa   :  { %13407 = vmatmul.mubr.msk.f32.vlgmr.msra.gmra.mrb[10].mxu1 %vm196_vm2, %v526_v9 }
 0x4ab   :  { %13410 = vmatpush3.xpose.msk.msra.mxu1 %vm196_vm2, %v606_v17  ;;  %13411 = vmatprep.mubr.msk.f32.mxu1 %vm14945_vm1, %v14944_v36 }
 0x4ac   :  { %13419 = vmatprep.subr.mxu1 %v14944_v36 }
 0x4ae   :  { %13412 = vmatmul.mubr.msk.f32.vlgmr.msra.gmra.mrb[12].mxu1 %vm196_vm2, %v604_v18 }
 0x4af   :  { %13421 = vmatprep.mubr.msk.f32.mxu1 %vm14945_vm1, %v14944_v36 }
 0x572   :  { %v15144_v19 = vpop.f32.mrb[6].mxu1 }
 0x573   :  { %v13398_v20 = vpop.f32.mrb[7].mxu1 }
 0x576   :  { %v15146_v21 = vpop.f32.mrb[8].mxu1 }
 0x577   :  { %v13403_v22 = vpop.f32.mrb[9].mxu1 }
 0x57d   :  { %v599_v23 = vpop.f32.mrb[10].mxu1 }
 0x57e   :  { %v13408_v24 = vpop.f32.mrb[11].mxu1  ;;  %v600_v35 = vadd.f32 %v599_v23, %v15104_v50 }
 0x57f   :  { %v12510_v24 = vld [vmem:[%s16894_s5 + $0x10] sm:$0xff] }
 0x580   :  { %v681_v37 = vsel %vm196_vm2, %v600_v35, -inf }
 0x581   :  { %v677_v25 = vpop.f32.mrb[12].mxu1 }
 0x582   :  { %v678_v26 = vadd.f32 %v677_v25, %v15104_v50  ;;  %v13413_v27 = vpop.f32.mrb[13].mxu1 }
 0x584   :  { %v684_v28 = vsel %vm196_vm2, %v678_v26, -inf }
 0x585   :  { %685 = vmax.xlane.f32.xlu0 %v684_v28 }
 0x59b   :  { %779 = vrot.lane.b32.xlu0 %v15078_v39, %s16913_s29 }
 0x59f   :  { %1019 = vrot.lane.b32.xlu0 %v15088_v43, %s16911_s30 }
 0x5a3   :  { %1097 = vrot.lane.b32.xlu0 %v15097_v45, %s16911_s30 }
 0x612   :  { %v686_v29 = vpop.xlane.xlu0 %685 }
 0x613   :  { %v688_v30 = vsub.f32 %v678_v26, %v686_v29 }
 0x615   :  { %v691_v31 = vmul.f32 1.442695, %v688_v30 }
 0x616   :  { %v780_v32 = vpop.permute.xlu0 %779 }
 0x617   :  { %14668 = vpow2.f32 %v691_v31  ;;  %13420 = vmatpush3.msra.mxu1 %v780_v32 }
 0x618   :  { %13434 = vmatprep.subr.mxu1 %v14944_v36 }
 0x61a   :  { %v1020_v46 = vpop.permute.xlu0 %1019 }
 0x61e   :  { %v1098_v48 = vpop.permute.xlu0 %1097 }
 0x621   :  { %v14669_v33 = vpop.eup %14668 }
 0x622   :  { %v696_v34 = vsel %vm196_vm2, %v14669_v33, 0.0 }
 0x623   :  { %697 = vadd.xlane.f32.xlu1 %v696_v34 }
 0x634   :  { %1099 = vrot.lane.b32.xlu1 %v15078_v39, %s16915_s0 }
 0x658   :  { %682 = vmax.xlane.f32.xlu1 %v681_v37 }
 0x6b0   :  { %v698_v40 = vpop.xlane.xlu1 %697 }
 0x6b1   :  { %14670 = vrcp.f32 %v698_v40 }
 0x6b4   :  { %v1100_v47 = vpop.permute.xlu1 %1099 }
 0x6bb   :  { %v14671_v42 = vpop.eup %14670 }
 0x6bc   :  { %v702_v44 = vmul.f32 %v14671_v42, %v14669_v33 }
 0x6be   :  { %13422 = vmatmul.mubr.msk.f32.vlgmr.msra.gmra.mrb[14].mxu1 %vm196_vm2, %v702_v44 }
 0x6bf   :  { %13435 = vmatpush3.xpose.msk.msra.mxu1 %vm196_vm2, %v1022_v38  ;;  %13436 = vmatprep.mubr.msk.f32.mxu1 %vm14945_vm1, %v14944_v36 }
 0x6c0   :  { %13439 = vmatprep.subr.mxu1 %v14944_v36 }
 0x6c2   :  { %13437 = vmatmul.mubr.msk.f32.vlgmr.msra.gmra.mrb[16].mxu1 %vm196_vm2, %v1020_v46 }
 0x6c3   :  { %13440 = vmatpush3.xpose.msk.msra.mxu1 %vm196_vm2, %v1100_v47  ;;  %13441 = vmatprep.mubr.msk.f32.mxu1 %vm14945_vm1, %v14944_v36 }
 0x6c4   :  { %13449 = vmatprep.subr.mxu1 %v14944_v36 }
 0x6c6   :  { %13442 = vmatmul.mubr.msk.f32.vlgmr.msra.gmra.mrb[18].mxu1 %vm196_vm2, %v1098_v48 }
 0x6c7   :  { %13451 = vmatprep.mubr.msk.f32.mxu1 %vm14945_vm1, %v14944_v36 }
 0x6e5   :  { %v683_v49 = vpop.xlane.xlu1 %682 }
 0x6e6   :  { %v687_v51 = vsub.f32 %v600_v35, %v683_v49 }
 0x6e8   :  { %v689_v52 = vmul.f32 1.442695, %v687_v51 }
 0x6ea   :  { %14672 = vpow2.f32 %v689_v52 }
 0x6f4   :  { %v14673_v53 = vpop.eup %14672 }
 0x6f5   :  { %v693_v54 = vsel %vm196_vm2, %v14673_v53, 0.0 }
 0x6f6   :  { %694 = vadd.xlane.f32.xlu0 %v693_v54 }
 0x70c   :  { %703 = vrot.lane.b32.xlu0 %v15080_v41, %s16913_s29 }
 0x710   :  { %1273 = vrot.lane.b32.xlu0 %v15078_v39, %s16909_s14 }
 0x714   :  { %1436 = vrot.lane.b32.xlu0 %v15080_v41, %s16907_s15 }
 0x718   :  { %1514 = vrot.lane.b32.xlu0 %v15078_v39, %s16907_s15  ;;  %s16936_s15 = smov 48  }
 0x71c   :  { %1434 = vrot.lane.b32.xlu0 %v15088_v43, %s16905_s16 }
 0x783   :  { %v695_v55 = vpop.xlane.xlu0 %694 }
 0x784   :  { %14674 = vrcp.f32 %v695_v55 }
 0x787   :  { %v704_v56 = vpop.permute.xlu0 %703 }
 0x788   :  { %13415 = vmatpush3.msra.mxu0 %v704_v56 }
 0x789   :  { %13424 = vmatprep.subr.mxu0 %v12499_v7 }
 0x78b   :  { %v1274_v57 = vpop.permute.xlu0 %1273 }
 0x78c   :  { %13450 = vmatpush3.msra.mxu1 %v1274_v57 }
 0x78d   :  { %13459 = vmatprep.subr.mxu1 %v14944_v36 }
 0x78e   :  { %v14675_v58 = vpop.eup %14674 }
 0x78f   :  { %v700_v59 = vmul.f32 %v14675_v58, %v14673_v53  ;;  %v1437_v26 = vpop.permute.xlu0 %1436 }
 0x791   :  { %13417 = vmatmul.mubr.msk.f32.vlgmr.msra.gmra.mrb[0].mxu0 %vm196_vm2, %v700_v59  ;;  %v851_v60 = vpop.f32.mrb[14].mxu1 }
 0x792   :  { %v13423_v61 = vpop.f32.mrb[15].mxu1  ;;  %13425 = vmatpush3.msra.mxu0 %v12499_v7 }
 0x793   :  { %13429 = vmatprep.subr.mxu0 %v524_v8  ;;  %v1515_v28 = vpop.permute.xlu0 %1514 }
 0x795   :  { %v1093_v62 = vpop.f32.mrb[16].mxu1 }
 0x796   :  { %v1094_v63 = vadd.f32 %v1093_v62, %v15104_v50  ;;  %v13438_v2 = vpop.f32.mrb[17].mxu1 }
 0x797   :  { %v1435_v30 = vpop.permute.xlu0 %1434 }
 0x798   :  { %v1175_v43 = vsel %vm196_vm2, %v1094_v63, -inf }
 0x799   :  { %1176 = vmax.xlane.f32.xlu1 %v1175_v43  ;;  %v1171_v3 = vpop.f32.mrb[18].mxu1 }
 0x79a   :  { %v1172_v4 = vadd.f32 %v1171_v3, %v15104_v50  ;;  %v13443_v5 = vpop.f32.mrb[19].mxu1 }
 0x79c   :  { %v1178_v6 = vsel %vm196_vm2, %v1172_v4, -inf }
 0x79d   :  { %1179 = vmax.xlane.f32.xlu1 %v1178_v6 }
 0x826   :  { %v1177_v9 = vpop.xlane.xlu1 %1176 }
 0x827   :  { %v1181_v10 = vsub.f32 %v1094_v63, %v1177_v9  ;;  %v12522_v9 = vld [vmem:[%s16895_s6] ss:$0 sm:$0xff] }
 0x829   :  { %v1183_v11 = vmul.f32 1.442695, %v1181_v10 }
 0x82a   :  { %v1180_v12 = vpop.xlane.xlu1 %1179 }
 0x82b   :  { %14676 = vpow2.f32 %v1183_v11  ;;  %v1182_v13 = vsub.f32 %v1172_v4, %v1180_v12  ;;  %v12519_v4 = vld [vmem:[%s16894_s5 + $0x18] sm:$0xff] }
 0x82d   :  { %v1185_v14 = vmul.f32 1.442695, %v1182_v13 }
 0x82f   :  { %14678 = vpow2.f32 %v1185_v14 }
 0x835   :  { %v14677_v15 = vpop.eup %14676 }
 0x836   :  { %v1187_v16 = vsel %vm196_vm2, %v14677_v15, 0.0 }
 0x837   :  { %1188 = vadd.xlane.f32.xlu1 %v1187_v16 }
 0x839   :  { %v14679_v17 = vpop.eup %14678 }
 0x83a   :  { %v1190_v18 = vsel %vm196_vm2, %v14679_v17, 0.0 }
 0x83b   :  { %1191 = vadd.xlane.f32.xlu1 %v1190_v18 }
 0x84c   :  { %1197 = vrot.lane.b32.xlu1 %v15080_v41, %s16909_s14 }
 0x850   :  { %1512 = vrot.lane.b32.xlu1 %v15097_v45, %s16905_s16 }
 0x864   :  { %v775_v20 = vpop.f32.mrb[0].mxu0 }
 0x865   :  { %v13418_v22 = vpop.f32.mrb[1].mxu0  ;;  %13426 = vmatprep.mubr.msk.f32.mxu0 %vm196_vm2, %v775_v20 }
 0x866   :  { %13427 = vmatmul.mubr.msk.f32.vlgmr.msra.gmra.mrb[2].mxu0 %vm196_vm2, %v851_v60 }
 0x867   :  { %13431 = vmatprep.mubr.msk.f32.mxu0 %vm196_vm2, %v15144_v19  ;;  %13430 = vmatpush3.msra.mxu0 %v524_v8 }
 0x868   :  { %13444 = vmatprep.subr.mxu0 %v14944_v36 }
 0x86e   :  { %13432 = vmatmul.mubr.msk.f32.vlgmr.msra.gmra.mrb[2].mxu0 %vm196_vm2, %v15146_v21 }
 0x86f   :  { %13446 = vmatprep.mubr.msk.f32.mxu0 %vm14945_vm1, %v14944_v36 }
 0x8c4   :  { %v1189_v23 = vpop.xlane.xlu1 %1188 }
 0x8c5   :  { %14680 = vrcp.f32 %v1189_v23 }
 0x8c8   :  { %v1192_v45 = vpop.xlane.xlu1 %1191 }
 0x8c9   :  { %14682 = vrcp.f32 %v1192_v45 }
 0x8cc   :  { %v1198_v25 = vpop.permute.xlu1 %1197 }
 0x8cd   :  { %13445 = vmatpush3.msra.mxu0 %v1198_v25 }
 0x8ce   :  { %13454 = vmatprep.subr.mxu0 %v12510_v24 }
 0x8cf   :  { %v14681_v19 = vpop.eup %14680 }
 0x8d0   :  { %v1194_v27 = vmul.f32 %v14681_v19, %v14677_v15  ;;  %v1513_v35 = vpop.permute.xlu1 %1512  ;;  %v1905_v19 = vld [vmem:[%s16898_s9 + $0x8] sm:$0xff] }
 0x8d2   :  { %13447 = vmatmul.mubr.msk.f32.vlgmr.msra.gmra.mrb[4].mxu0 %vm196_vm2, %v1194_v27  ;;  %v1906_v27 = vld [vmem:[%s16898_s9 + $0x10] sm:$0xff] }
 0x8d3   :  { %v14683_v21 = vpop.eup %14682  ;;  %13455 = vmatpush3.msra.mxu0 %v12510_v24 }
 0x8d4   :  { %v1196_v29 = vmul.f32 %v14683_v21, %v14679_v17  ;;  %13464 = vmatprep.subr.mxu0 %v14944_v36 }
 0x8d6   :  { %13452 = vmatmul.mubr.msk.f32.vlgmr.msra.gmra.mrb[20].mxu1 %vm196_vm2, %v1196_v29 }
 0x8d7   :  { %13460 = vmatpush3.xpose.msk.msra.mxu1 %vm196_vm2, %v1437_v26  ;;  %13461 = vmatprep.mubr.msk.f32.mxu1 %vm14945_vm1, %v14944_v36  ;;  %v1904_v26 = vld [vmem:[%s16898_s9] sm:$0xff] }
 0x8d8   :  { %13469 = vmatprep.subr.mxu1 %v14944_v36  ;;  %v14323_v21 = vpack.c.bf16 %v1905_v19, %v1904_v26 }
 0x8da   :  { %13462 = vmatmul.mubr.msk.f32.vlgmr.msra.gmra.mrb[22].mxu1 %vm196_vm2, %v1435_v30  ;;  %v2014_v30 = vld [vmem:[%s16900_s11] sm:$0xff] }
 0x8db   :  { %13471 = vmatprep.mubr.msk.f32.mxu1 %vm14945_vm1, %v14944_v36 }
 0x9a5   :  { %v1269_v31 = vpop.f32.mrb[4].mxu0 }
 0x9a6   :  { %v13448_v32 = vpop.f32.mrb[5].mxu0  ;;  %13456 = vmatprep.mubr.msk.f32.mxu0 %vm196_vm2, %v1269_v31  ;;  %v2015_v31 = vld [vmem:[%s16900_s11 + $0x8] sm:$0xff] }
 0x9a7   :  { %v14331_v32 = vpack.c.bf16 %v2015_v31, %v2014_v30 }
 0x9a9   :  { %v1345_v33 = vpop.f32.mrb[20].mxu1 }
 0x9aa   :  { %v13453_v34 = vpop.f32.mrb[21].mxu1  ;;  %13457 = vmatmul.mubr.msk.f32.vlgmr.msra.gmra.mrb[2].mxu0 %vm196_vm2, %v1345_v33 }
 0x9ab   :  { %13465 = vmatpush3.xpose.msk.msra.mxu0 %vm196_vm2, %v1515_v28  ;;  %13466 = vmatprep.mubr.msk.f32.mxu0 %vm14945_vm1, %v14944_v36  ;;  %v1907_v28 = vld [vmem:[%s16898_s9 + $0x18] sm:$0xff] }
 0x9ac   :  { %13474 = vmatprep.subr.mxu0 %v14944_v36  ;;  %v14327_v29 = vpack.c.bf16 %v1907_v28, %v1906_v27 }
 0x9ad   :  { %v1508_v37 = vpop.f32.mrb[22].mxu1 }
 0x9ae   :  { %v1509_v38 = vadd.f32 %v1508_v37, %v15104_v50  ;;  %v13463_v40 = vpop.f32.mrb[23].mxu1  ;;  %13467 = vmatmul.mubr.msk.f32.vlgmr.msra.gmra.mrb[6].mxu0 %vm196_vm2, %v1513_v35 }
 0x9af   :  { %13476 = vmatprep.mubr.msk.f32.mxu0 %vm14945_vm1, %v14944_v36 }
 0x9b0   :  { %v1590_v42 = vsel %vm196_vm2, %v1509_v38, -inf }
 0x9b1   :  { %1591 = vmax.xlane.f32.xlu0 %v1590_v42 }
 0xa3e   :  { %v1592_v44 = vpop.xlane.xlu0 %1591 }
 0xa3f   :  { %v1596_v46 = vsub.f32 %v1509_v38, %v1592_v44  ;;  %v12523_v44 = vld [vmem:[%s16896_s7] ss:$0 sm:$0xff] }
 0xa41   :  { %v1598_v47 = vmul.f32 1.442695, %v1596_v46 }
 0xa43   :  { %14684 = vpow2.f32 %v1598_v47 }
 0xa4d   :  { %v14685_v48 = vpop.eup %14684 }
 0xa4e   :  { %v1602_v49 = vsel %vm196_vm2, %v14685_v48, 0.0 }
 0xa4f   :  { %1603 = vadd.xlane.f32.xlu0 %v1602_v49  ;;  %v12524_v49 = vld [vmem:[%s16897_s8] ss:$0 sm:$0xff] }
 0xa81   :  { %v1586_v51 = vpop.f32.mrb[6].mxu0 }
 0xa82   :  { %v1587_v52 = vadd.f32 %v1586_v51, %v15104_v50  ;;  %v13468_v53 = vpop.f32.mrb[7].mxu0 }
 0xa84   :  { %v1593_v54 = vsel %vm196_vm2, %v1587_v52, -inf }
 0xa85   :  { %1594 = vmax.xlane.f32.xlu1 %v1593_v54 }
 0xa96   :  { %1688 = vrot.lane.b32.xlu1 %v15078_v39, %s16903_s23 }
 0xadc   :  { %v1604_v61 = vpop.xlane.xlu0 %1603 }
 0xb12   :  { %v1595_v55 = vpop.xlane.xlu1 %1594 }
 0xb13   :  { %v1597_v56 = vsub.f32 %v1587_v52, %v1595_v55  ;;  %v2016_v55 = vld [vmem:[%s16900_s11 + $0x10] sm:$0xff] }
 0xb15   :  { %v1600_v57 = vmul.f32 1.442695, %v1597_v56  ;;  %v2017_v56 = vld [vmem:[%s16900_s11 + $0x18] sm:$0xff] }
 0xb16   :  { %v1689_v58 = vpop.permute.xlu1 %1688 }
 0xb17   :  { %14686 = vpow2.f32 %v1600_v57  ;;  %13475 = vmatpush3.msra.mxu0 %v1689_v58  ;;  %v14335_v57 = vpack.c.bf16 %v2017_v56, %v2016_v55  ;;  %v2018_v58 = vld [vmem:[%s16900_s11 + $0x20] sm:$0xff] }
 0xb18   :  { %14688 = vrcp.f32 %v1604_v61  ;;  %13479 = vmatprep.subr.mxu0 %v12519_v4  ;;  %v2020_v61 = vld [vmem:[%s16900_s11 + $0x30] sm:$0xff]  ;;  %v12533_v56 = vld [vmem:[%s16892_s3 + $0x20] sm:$0xff] }
 0xb21   :  { %v14687_v59 = vpop.eup %14686 }
 0xb22   :  { %v1605_v60 = vsel %vm196_vm2, %v14687_v59, 0.0  ;;  %v14689_v63 = vpop.eup %14688 }
 0xb23   :  { %1606 = vadd.xlane.f32.xlu0 %v1605_v60  ;;  %v1609_v39 = vmul.f32 %v14689_v63, %v14685_v48 }
 0xb39   :  { %1612 = vrot.lane.b32.xlu0 %v15080_v41, %s16903_s23  ;;  %s16933_s23 = smov 40  }
 0xbb0   :  { %v1607_v62 = vpop.xlane.xlu0 %1606 }
 0xbb1   :  { %14690 = vrcp.f32 %v1607_v62  ;;  %v2021_v62 = vld [vmem:[%s16900_s11 + $0x38] sm:$0xff] }
 0xbb2   :  { %v14343_v63 = vpack.c.bf16 %v2021_v62, %v2020_v61 }
 0xbb4   :  { %v1613_v2 = vpop.permute.xlu0 %1612 }
 0xbb5   :  { %13470 = vmatpush3.msra.mxu1 %v1613_v2  ;;  %v2022_v2 = vld [vmem:[%s16900_s11 + $0x40] sm:$0xff] }
 0xbb6   :  { %13472 = vmatmul.mubr.msk.f32.vlgmr.msra.gmra.mrb[24].mxu1 %vm196_vm2, %v1609_v39  ;;  %14324 = vmatprep.subr.bf16.mxu1 %v14323_v21  ;;  %v2023_v39 = vld [vmem:[%s16900_s11 + $0x48] sm:$0xff] }
 0xbb7   :  { %14326 = vmatpush3.bf16.msra.mxu1 %v14323_v21 }
 0xbb8   :  { %14328 = vmatprep.subr.bf16.mxu1 %v14327_v29 }
 0xbbb   :  { %v14691_v43 = vpop.eup %14690  ;;  %14330 = vmatpush3.bf16.msra.mxu1 %v14327_v29 }
 0xbbc   :  { %v1611_v3 = vmul.f32 %v14691_v43, %v14687_v59  ;;  %v2019_v59 = vld [vmem:[%s16900_s11 + $0x28] sm:$0xff]  ;;  %v14347_v43 = vpack.c.bf16 %v2023_v39, %v2022_v2 }
 0xbbd   :  { %v14339_v60 = vpack.c.bf16 %v2019_v59, %v2018_v58  ;;  %v12535_v58 = vld [vmem:[%s16892_s3 + $0x30] sm:$0xff] }
 0xbbe   :  { %13477 = vmatmul.mubr.msk.f32.vlgmr.msra.gmra.mrb[8].mxu0 %vm196_vm2, %v1611_v3  ;;  %v2024_v3 = vld [vmem:[%s16900_s11 + $0x50] sm:$0xff] }
 0xbbf   :  { %13480 = vmatpush3.msra.mxu0 %v12519_v4  ;;  %v2025_v4 = vld [vmem:[%s16900_s11 + $0x58] sm:$0xff] }
 0xbc0   :  { %14332 = vmatprep.subr.bf16.mxu0 %v14331_v32 }
 0xc89   :  { %v1684_v41 = vpop.f32.mrb[24].mxu1 }
 0xc8a   :  { %v13473_v5 = vpop.f32.mrb[25].mxu1  ;;  %13481 = vmatprep.mubr.msk.f32.mxu0 %vm196_vm2, %v1684_v41  ;;  %v14351_v41 = vpack.c.bf16 %v2025_v4, %v2024_v3 }
 0xc8b   :  { %v2026_v5 = vld [vmem:[%s16900_s11 + $0x60] sm:$0xff] }
 0xc91   :  { %v1760_v6 = vpop.f32.mrb[8].mxu0 }
 0xc92   :  { %v13478_v7 = vpop.f32.mrb[9].mxu0  ;;  %13482 = vmatmul.mubr.msk.f32.vlgmr.msra.gmra.mrb[2].mxu0 %vm196_vm2, %v1760_v6  ;;  %v2027_v6 = vld [vmem:[%s16900_s11 + $0x68] sm:$0xff] }
 0xc93   :  { %14334 = vmatpush3.bf16.msra.mxu0 %v14331_v32  ;;  %v14355_v7 = vpack.c.bf16 %v2027_v6, %v2026_v5 }
 0xc94   :  { %14336 = vmatprep.subr.bf16.mxu0 %v14335_v57 }
 0xc97   :  { %14338 = vmatpush3.bf16.msra.mxu0 %v14335_v57  ;;  %v12534_v57 = vld [vmem:[%s16892_s3 + $0x28] sm:$0xff] }
 0xc98   :  { %14340 = vmatprep.subr.bf16.mxu0 %v14339_v60  ;;  %v14363_v59 = vpack.c.bf16 %v12534_v57, %v12533_v56 }
 0xc9a   :  { %14364 = vmatprep.subr.bf16.mxu1 %v14363_v59 }
 0xc9b   :  { %14342 = vmatpush3.bf16.msra.mxu0 %v14339_v60  ;;  %v12536_v60 = vld [vmem:[%s16892_s3 + $0x38] sm:$0xff] }
 0xc9c   :  { %14344 = vmatprep.subr.bf16.mxu0 %v14343_v63  ;;  %v14367_v61 = vpack.c.bf16 %v12536_v60, %v12535_v58 }
 0xc9f   :  { %14346 = vmatpush3.bf16.msra.mxu0 %v14343_v63 }
 0xca0   :  { %14348 = vmatprep.subr.bf16.mxu0 %v14347_v43 }
 0xca3   :  { %14350 = vmatpush3.bf16.msra.mxu0 %v14347_v43 }
 0xca4   :  { %14352 = vmatprep.subr.bf16.mxu0 %v14351_v41 }
 0xca7   :  { %14354 = vmatpush3.bf16.msra.mxu0 %v14351_v41  ;;  %v12531_v41 = vld [vmem:[%s16890_s1 + $0x1] ss:$0 sm:$0xff] }
 0xca8   :  { %14356 = vmatprep.subr.bf16.mxu0 %v14355_v7 }
 0xcab   :  { %14358 = vmatpush3.bf16.msra.mxu0 %v14355_v7 }
 0xd65   :  { %v13483_v8 = vpop.f32.mrb[2].mxu0 }
 0xd66   :  { %v1850_v10 = vadd.f32 %v13483_v8, %v15039_v1  ;;  %v1838_v11 = vpop.f32.mrb[3].mxu0  ;;  %v2028_v8 = vld [vmem:[%s16900_s11 + $0x70] sm:$0xff] }
 0xd67   :  { %v1849_v12 = vadd.f32 %v1838_v11, %v15034_v0  ;;  %v12525_v11 = vld [vmem:[%s16899_s10] ss:$0 sm:$0xff] }
 0xd68   :  { %v15257_v13 = vadd.f32 %v12522_v9, %v1850_v10 }
 0xd69   :  { %v15259_v14 = vadd.f32 %v12522_v9, %v1849_v12  ;;  %v2029_v9 = vld [vmem:[%s16900_s11 + $0x78] sm:$0xff] }
 0xd6a   :  { %v1865_v15 = vsel %vm55_vm0, %v15257_v13, 0.0  ;;  %v14359_v10 = vpack.c.bf16 %v2029_v9, %v2028_v8  ;;  %v12532_v8 = vld [vmem:[%s16891_s2 + $0x1] ss:$0 sm:$0xff] }
 0xd6b   :  { %1866 = vadd.xlane.f32.xlu0 %v1865_v15  ;;  %v1862_v16 = vsel %vm55_vm0, %v15259_v14, 0.0 }
 0xd6c   :  { %1863 = vadd.xlane.f32.xlu1 %v1862_v16  ;;  %14360 = vmatprep.subr.bf16.mxu0 %v14359_v10 }
 0xd6d   :  { %14362 = vmatpush3.bf16.msra.mxu0 %v14359_v10 }
 0xd6e   :  { %13571 = vmatprep.subr.mxu0 %v14944_v36 }
 0xdf8   :  { %v1867_v17 = vpop.xlane.xlu0 %1866 }
 0xdf9   :  { %v1869_v18 = vmul.f32 0.03125, %v1867_v17  ;;  %v1864_v20 = vpop.xlane.xlu1 %1863 }
 0xdfa   :  { %v1868_v22 = vmul.f32 0.03125, %v1864_v20 }
 0xdfb   :  { %v1871_v1 = vsub.f32 %v15257_v13, %v1869_v18 }
 0xdfc   :  { %v1870_v0 = vsub.f32 %v15259_v14, %v1868_v22 }
 0xdfd   :  { %v1873_v23 = vmul.f32 %v1871_v1, %v1871_v1 }
 0xdfe   :  { %v1872_v45 = vmul.f32 %v1870_v0, %v1870_v0 }
 0xdff   :  { %v1877_v24 = vsel %vm55_vm0, %v1873_v23, 0.0 }
 0xe00   :  { %1878 = vadd.xlane.f32.xlu1 %v1877_v24  ;;  %v1874_v25 = vsel %vm55_vm0, %v1872_v45, 0.0 }
 0xe01   :  { %1875 = vadd.xlane.f32.xlu0 %v1874_v25 }
 0xe8d   :  { %v1879_v33 = vpop.xlane.xlu1 %1878 }
 0xe8e   :  { %v1881_v34 = vmul.f32 0.03125, %v1879_v33  ;;  %v1876_v35 = vpop.xlane.xlu0 %1875  ;;  %v12528_v33 = vld [vmem:[%s16901_s12] ss:$0 sm:$0xff] }
 0xe8f   :  { %v1880_v37 = vmul.f32 0.03125, %v1876_v35 }
 0xe90   :  { %v1883_v38 = vadd.f32 1e-05, %v1881_v34 }
 0xe91   :  { %v1882_v40 = vadd.f32 1e-05, %v1880_v37 }
 0xe92   :  { %14692 = vrsqrt.f32 %v1883_v38 }
 0xe93   :  { %14694 = vrsqrt.f32 %v1882_v40 }
 0xe9c   :  { %v14693_v42 = vpop.eup %14692 }
 0xe9d   :  { %v14695_v46 = vpop.eup %14694  ;;  %v1887_v47 = vmul.f32 %v14693_v42, %v1871_v1 }
 0xe9e   :  { %v1886_v48 = vmul.f32 %v14695_v46, %v1870_v0 }
 0xe9f   :  { %v1895_v51 = vmul.f32 %v12523_v44, %v1887_v47 }
 0xea0   :  { %v1894_v52 = vmul.f32 %v12523_v44, %v1886_v48 }
 0xea1   :  { %v1903_v54 = vadd.f32 %v12524_v49, %v1895_v51 }
 0xea2   :  { %v1902_v53 = vadd.f32 %v12524_v49, %v1894_v52 }
 0xea4   :  { %13492 = vmatprep.mubr.msk.f32.mxu1 %vm55_vm0, %v1902_v53 }
 0xea5   :  { %13493 = vmatmul.mubr.msk.f32.vlgmr.msra.gmra.mrb[26].mxu1 %vm55_vm0, %v1903_v54 }
 0xea6   :  { %14366 = vmatpush3.bf16.msra.mxu1 %v14363_v59 }
 0xea7   :  { %14368 = vmatprep.subr.bf16.mxu1 %v14367_v61 }
 0xeaa   :  { %14370 = vmatpush3.bf16.msra.mxu1 %v14367_v61 }
 0xeab   :  { %13541 = vmatprep.subr.mxu1 %v14944_v36 }
 0xf78   :  { %v13494_v12 = vpop.f32.mrb[26].mxu1 }
 0xf79   :  { %v1993_v15 = vadd.f32 %v13494_v12, %v12525_v11  ;;  %v1987_v16 = vpop.f32.mrb[27].mxu1 }
 0xf7a   :  { %v1988_v17 = vadd.f32 %v12525_v11, %v1987_v16 }
 0xf7b   :  { %v1999_v18 = vmul.f32 0.044715, %v1993_v15  ;;  %v1997_v30 = vmul.f32 0.5, %v1993_v15 }
 0xf7c   :  { %v1998_v20 = vmul.f32 0.044715, %v1988_v17  ;;  %v1996_v28 = vmul.f32 0.5, %v1988_v17 }
 0xf7d   :  { %v2001_v22 = vmul.f32 %v1999_v18, %v1993_v15 }
 0xf7e   :  { %v2000_v1 = vmul.f32 %v1998_v20, %v1988_v17 }
 0xf7f   :  { %v2003_v0 = vmul.f32 %v2001_v22, %v1993_v15 }
 0xf80   :  { %v2002_v23 = vmul.f32 %v2000_v1, %v1988_v17 }
 0xf81   :  { %v2005_v45 = vadd.f32 %v2003_v0, %v1993_v15  ;;  %v12538_v15 = vld [vmem:[%s16893_s4 + $0x1] ss:$0 sm:$0xff] }
 0xf82   :  { %v2004_v24 = vadd.f32 %v2002_v23, %v1988_v17 }
 0xf83   :  { %v2007_v25 = vmul.f32 0.7978846, %v2005_v45 }
 0xf84   :  { %v2006_v26 = vmul.f32 0.7978846, %v2004_v24 }
 0xf85   :  { %14696 = vtanh.f32 %v2007_v25 }
 0xf86   :  { %14698 = vtanh.f32 %v2006_v26 }
 0xf8f   :  { %v14697_v19 = vpop.eup %14696 }
 0xf90   :  { %v14699_v27 = vpop.eup %14698  ;;  %v2011_v21 = vadd.f32 1.0, %v14697_v19 }
 0xf91   :  { %v2010_v29 = vadd.f32 1.0, %v14699_v27 }
 0xf92   :  { %v2013_v32 = vmul.f32 %v2011_v21, %v1997_v30 }
 0xf93   :  { %v2012_v31 = vmul.f32 %v2010_v29, %v1996_v28 }
 0xf95   :  { %13527 = vmatprep.mubr.f32.mxu0 %v2012_v31 }
 0xf96   :  { %13528 = vmatmul.mubr.f32.vlgmr.msra.gmra.mrb[10].mxu0 %v2013_v32 }
 0xf97   :  { %13573 = vmatprep.mubr.msk.f32.mxu0 %vm14945_vm1, %v14944_v36 }
0x1069   :  { %v13529_v34 = vpop.f32.mrb[10].mxu0 }
0x106a   :  { %v2109_v35 = vadd.f32 %v13529_v34, %v12528_v33  ;;  %v2103_v37 = vpop.f32.mrb[11].mxu0 }
0x106b   :  { %v2104_v38 = vadd.f32 %v12528_v33, %v2103_v37 }
0x106c   :  { %v15347_v40 = vadd.f32 %v2109_v35, %v15257_v13 }
0x106d   :  { %v15350_v42 = vadd.f32 %v2104_v38, %v15259_v14 }
0x106e   :  { %v2121_v44 = vsel %vm55_vm0, %v15347_v40, 0.0 }
0x106f   :  { %2122 = vadd.xlane.f32.xlu1 %v2121_v44  ;;  %v2118_v46 = vsel %vm55_vm0, %v15350_v42, 0.0 }
0x1070   :  { %2119 = vadd.xlane.f32.xlu0 %v2118_v46 }
0x10fc   :  { %v2123_v47 = vpop.xlane.xlu1 %2122 }
0x10fd   :  { %v2125_v48 = vmul.f32 0.03125, %v2123_v47  ;;  %v2120_v49 = vpop.xlane.xlu0 %2119 }
0x10fe   :  { %v2124_v51 = vmul.f32 0.03125, %v2120_v49 }
0x10ff   :  { %v2127_v52 = vsub.f32 %v15347_v40, %v2125_v48 }
0x1100   :  { %v2126_v13 = vsub.f32 %v15350_v42, %v2124_v51 }
0x1101   :  { %v2129_v53 = vmul.f32 %v2127_v52, %v2127_v52 }
0x1102   :  { %v2128_v54 = vmul.f32 %v2126_v13, %v2126_v13 }
0x1103   :  { %v2133_v14 = vsel %vm55_vm0, %v2129_v53, 0.0 }
0x1104   :  { %2134 = vadd.xlane.f32.xlu1 %v2133_v14  ;;  %v2130_v55 = vsel %vm55_vm0, %v2128_v54, 0.0 }
0x1105   :  { %2131 = vadd.xlane.f32.xlu0 %v2130_v55 }
0x1191   :  { %v2135_v62 = vpop.xlane.xlu1 %2134 }
0x1192   :  { %v2137_v63 = vmul.f32 0.03125, %v2135_v62  ;;  %v2132_v2 = vpop.xlane.xlu0 %2131 }
0x1193   :  { %v2136_v39 = vmul.f32 0.03125, %v2132_v2 }
0x1194   :  { %v2139_v43 = vadd.f32 1e-05, %v2137_v63 }
0x1195   :  { %v2138_v3 = vadd.f32 1e-05, %v2136_v39 }
0x1196   :  { %14700 = vrsqrt.f32 %v2139_v43 }
0x1197   :  { %14702 = vrsqrt.f32 %v2138_v3 }
0x11a0   :  { %v14701_v4 = vpop.eup %14700 }
0x11a1   :  { %v14703_v5 = vpop.eup %14702  ;;  %v2143_v6 = vmul.f32 %v14701_v4, %v2127_v52 }
0x11a2   :  { %v2142_v7 = vmul.f32 %v14703_v5, %v2126_v13 }
0x11a3   :  { %v2151_v9 = vmul.f32 %v12531_v41, %v2143_v6 }
0x11a4   :  { %v2150_v10 = vmul.f32 %v12531_v41, %v2142_v7 }
0x11a5   :  { %v2159_v12 = vadd.f32 %v12532_v8, %v2151_v9 }
0x11a6   :  { %v2158_v11 = vadd.f32 %v12532_v8, %v2150_v10 }
0x11a8   :  { %13538 = vmatprep.mubr.msk.f32.mxu1 %vm55_vm0, %v2158_v11 }
0x11a9   :  { %13539 = vmatmul.mubr.msk.f32.vlgmr.msra.gmra.mrb[28].mxu1 %vm55_vm0, %v2159_v12 }
0x11aa   :  { %13543 = vmatprep.mubr.msk.f32.mxu1 %vm14945_vm1, %v14944_v36 }
0x127c   :  { %v13540_v16 = vpop.f32.mrb[28].mxu1 }
0x127d   :  { %v15386_v17 = vadd.f32 %v13540_v16, %v12538_v15  ;;  %v2245_v18 = vpop.f32.mrb[29].mxu1 }
0x127e   :  { %v15388_v20 = vadd.f32 %v12538_v15, %v2245_v18 }
0x127f   :  { %2335 = vrot.lane.b32.xlu1 %v15386_v17, %s16923_s25  ;;  %v15405_v23 = vmul.f32 0.35355338, %v15386_v17 }
0x1280   :  { %2257 = vrot.lane.b32.xlu0 %v15388_v20, %s16923_s25  ;;  %v15396_v1 = vmul.f32 0.35355338, %v15388_v20 }
0x12f1   :  { %v2336_v0 = vpop.permute.xlu1 %2335 }
0x12f2   :  { %v2258_v22 = vpop.permute.xlu0 %2257 }
0x12f3   :  { %13542 = vmatpush3.xpose.msk.msra.mxu1 %vm196_vm2, %v2258_v22 }
0x12f4   :  { %13546 = vmatprep.subr.mxu1 %v14944_v36 }
0x12f6   :  { %13544 = vmatmul.mubr.msk.f32.vlgmr.msra.gmra.mrb[30].mxu1 %vm196_vm2, %v15396_v1 }
0x12f7   :  { %13547 = vmatpush3.xpose.msk.msra.mxu1 %vm196_vm2, %v2336_v0  ;;  %13548 = vmatprep.mubr.msk.f32.mxu1 %vm14945_vm1, %v14944_v36 }
0x12f8   :  { %13551 = vmatprep.subr.mxu1 %v14944_v36 }
0x12fa   :  { %13549 = vmatmul.mubr.msk.f32.vlgmr.msra.gmra.mrb[32].mxu1 %vm196_vm2, %v15405_v23 }
0x12fb   :  { %13553 = vmatprep.mubr.msk.f32.mxu1 %vm14945_vm1, %v14944_v36 }
0x13c9   :  { %v2330_v45 = vpop.f32.mrb[30].mxu1 }
0x13ca   :  { %v2331_v24 = vadd.f32 %v2330_v45, %v15104_v50  ;;  %v13545_v25 = vpop.f32.mrb[31].mxu1 }
0x13cc   :  { %v2412_v26 = vsel %vm196_vm2, %v2331_v24, -inf }
0x13cd   :  { %2413 = vmax.xlane.f32.xlu1 %v2412_v26  ;;  %v2408_v19 = vpop.f32.mrb[32].mxu1 }
0x13ce   :  { %v2409_v27 = vadd.f32 %v2408_v19, %v15104_v50  ;;  %v13550_v21 = vpop.f32.mrb[33].mxu1 }
0x13d0   :  { %v2415_v28 = vsel %vm196_vm2, %v2409_v27, -inf }
0x13d1   :  { %2416 = vmax.xlane.f32.xlu0 %v2415_v28 }
0x13de   :  { %2510 = vrot.lane.b32.xlu1 %v15386_v17, %s16921_s26 }
0x13e2   :  { %2590 = vrot.lane.b32.xlu1 %v15388_v20, %s16919_s27 }
0x13e6   :  { %2588 = vrot.lane.b32.xlu1 %v15396_v1, %s16917_s28 }
0x145a   :  { %v2414_v29 = vpop.xlane.xlu1 %2413 }
0x145b   :  { %v2418_v30 = vsub.f32 %v2331_v24, %v2414_v29 }
0x145d   :  { %v2420_v31 = vmul.f32 1.442695, %v2418_v30 }
0x145e   :  { %v2417_v32 = vpop.xlane.xlu0 %2416  ;;  %v2511_v46 = vpop.permute.xlu1 %2510 }
0x145f   :  { %14704 = vpow2.f32 %v2420_v31  ;;  %v2419_v33 = vsub.f32 %v2409_v27, %v2417_v32 }
0x1461   :  { %v2422_v34 = vmul.f32 1.442695, %v2419_v33 }
0x1462   :  { %v2591_v47 = vpop.permute.xlu1 %2590 }
0x1463   :  { %14706 = vpow2.f32 %v2422_v34 }
0x1466   :  { %v2589_v48 = vpop.permute.xlu1 %2588 }
0x1469   :  { %v14705_v35 = vpop.eup %14704 }
0x146a   :  { %v2424_v37 = vsel %vm196_vm2, %v14705_v35, 0.0 }
0x146b   :  { %2425 = vadd.xlane.f32.xlu0 %v2424_v37 }
0x146d   :  { %v14707_v38 = vpop.eup %14706 }
0x146e   :  { %v2427_v44 = vsel %vm196_vm2, %v14707_v38, 0.0 }
0x146f   :  { %2428 = vadd.xlane.f32.xlu1 %v2427_v44 }
0x1480   :  { %2666 = vrot.lane.b32.xlu1 %v15405_v23, %s16917_s28 }
0x1481   :  { %2434 = vrot.lane.b32.xlu0 %v15388_v20, %s16921_s26 }
0x1484   :  { %3084 = vrot.lane.b32.xlu1 %v15388_v20, %s16915_s0 }
0x1485   :  { %2668 = vrot.lane.b32.xlu0 %v15386_v17, %s16919_s27 }
0x14f8   :  { %v2426_v49 = vpop.xlane.xlu0 %2425 }
0x14f9   :  { %14708 = vrcp.f32 %v2426_v49 }
0x14fc   :  { %v2429_v51 = vpop.xlane.xlu1 %2428  ;;  %v2435_v52 = vpop.permute.xlu0 %2434 }
0x14fd   :  { %14710 = vrcp.f32 %v2429_v51  ;;  %13552 = vmatpush3.msra.mxu1 %v2435_v52 }
0x14fe   :  { %13556 = vmatprep.subr.mxu1 %v14944_v36 }
0x1500   :  { %v2669_v55 = vpop.permute.xlu0 %2668  ;;  %v2667_v56 = vpop.permute.xlu1 %2666 }
0x1503   :  { %v14709_v13 = vpop.eup %14708 }
0x1504   :  { %v2431_v53 = vmul.f32 %v14709_v13, %v14705_v35  ;;  %v3085_v10 = vpop.permute.xlu1 %3084 }
0x1506   :  { %13554 = vmatmul.mubr.msk.f32.vlgmr.msra.gmra.mrb[34].mxu1 %vm196_vm2, %v2431_v53 }
0x1507   :  { %v14711_v54 = vpop.eup %14710  ;;  %13557 = vmatpush3.msra.mxu1 %v2511_v46  ;;  %13558 = vmatprep.mubr.msk.f32.mxu1 %vm14945_vm1, %v14944_v36  ;;  %v12554_v46 = vld [vmem:[%s16894_s5 + $0x28] sm:$0xff] }
0x1508   :  { %v2433_v14 = vmul.f32 %v14711_v54, %v14707_v38  ;;  %13561 = vmatprep.subr.mxu1 %v14944_v36 }
0x150a   :  { %13559 = vmatmul.mubr.msk.f32.vlgmr.msra.gmra.mrb[36].mxu1 %vm196_vm2, %v2433_v14 }
0x150b   :  { %13563 = vmatprep.mubr.msk.f32.mxu1 %vm14945_vm1, %v14944_v36 }
0x150e   :  { %13562 = vmatpush3.xpose.msk.msra.mxu1 %vm196_vm2, %v2591_v47  ;;  %v12547_v47 = vld [vmem:[%s16894_s5 + $0x20] sm:$0xff] }
0x150f   :  { %13566 = vmatprep.subr.mxu1 %v14944_v36 }
0x1511   :  { %13564 = vmatmul.mubr.msk.f32.vlgmr.msra.gmra.mrb[38].mxu1 %vm196_vm2, %v2589_v48 }
0x1512   :  { %13567 = vmatpush3.xpose.msk.msra.mxu1 %vm196_vm2, %v2669_v55  ;;  %13568 = vmatprep.mubr.msk.f32.mxu1 %vm14945_vm1, %v14944_v36 }
0x1513   :  { %13576 = vmatprep.subr.mxu1 %v14944_v36 }
0x1515   :  { %13569 = vmatmul.mubr.msk.f32.vlgmr.msra.gmra.mrb[40].mxu1 %vm196_vm2, %v2667_v56 }
0x1516   :  { %13578 = vmatprep.mubr.msk.f32.mxu1 %vm14945_vm1, %v14944_v36 }
0x15d9   :  { %v15450_v57 = vpop.f32.mrb[34].mxu1 }
0x15da   :  { %v13555_v58 = vpop.f32.mrb[35].mxu1 }
0x15dd   :  { %v15452_v59 = vpop.f32.mrb[36].mxu1 }
0x15de   :  { %v13560_v60 = vpop.f32.mrb[37].mxu1 }
0x15e4   :  { %v2662_v61 = vpop.f32.mrb[38].mxu1 }
0x15e5   :  { %v13565_v62 = vpop.f32.mrb[39].mxu1  ;;  %v2663_v8 = vadd.f32 %v2662_v61, %v15104_v50 }
0x15e6   :  { %v12565_v62 = vld [vmem:[%s16894_s5 + $0x30] sm:$0xff] }
0x15e7   :  { %v2744_v9 = vsel %vm196_vm2, %v2663_v8, -inf }
0x15e8   :  { %v2740_v63 = vpop.f32.mrb[40].mxu1 }
0x15e9   :  { %v2741_v2 = vadd.f32 %v2740_v63, %v15104_v50  ;;  %v13570_v39 = vpop.f32.mrb[41].mxu1 }
0x15eb   :  { %v2747_v43 = vsel %vm196_vm2, %v2741_v2, -inf }
0x15ec   :  { %2748 = vmax.xlane.f32.xlu0 %v2747_v43 }
0x1602   :  { %2842 = vrot.lane.b32.xlu0 %v15386_v17, %s16913_s29 }
0x1606   :  { %3082 = vrot.lane.b32.xlu0 %v15396_v1, %s16911_s30 }
0x160a   :  { %3160 = vrot.lane.b32.xlu0 %v15405_v23, %s16911_s30  ;;  %s16939_s30 = smov 80  }
0x1679   :  { %v2749_v3 = vpop.xlane.xlu0 %2748 }
0x167a   :  { %v2751_v4 = vsub.f32 %v2741_v2, %v2749_v3 }
0x167c   :  { %v2754_v41 = vmul.f32 1.442695, %v2751_v4 }
0x167d   :  { %v2843_v5 = vpop.permute.xlu0 %2842 }
0x167e   :  { %14712 = vpow2.f32 %v2754_v41  ;;  %13577 = vmatpush3.msra.mxu1 %v2843_v5 }
0x167f   :  { %13591 = vmatprep.subr.mxu1 %v14944_v36 }
0x1681   :  { %v3083_v16 = vpop.permute.xlu0 %3082 }
0x1685   :  { %v3161_v22 = vpop.permute.xlu0 %3160 }
0x1688   :  { %v14713_v6 = vpop.eup %14712 }
0x1689   :  { %v2759_v7 = vsel %vm196_vm2, %v14713_v6, 0.0 }
0x168a   :  { %2760 = vadd.xlane.f32.xlu1 %v2759_v7 }
0x169b   :  { %3162 = vrot.lane.b32.xlu1 %v15386_v17, %s16915_s0 }
0x16bf   :  { %2745 = vmax.xlane.f32.xlu1 %v2744_v9 }
0x1717   :  { %v2761_v11 = vpop.xlane.xlu1 %2760 }
0x1718   :  { %14714 = vrcp.f32 %v2761_v11 }
0x171b   :  { %v3163_v18 = vpop.permute.xlu1 %3162 }
0x1722   :  { %v14715_v12 = vpop.eup %14714 }
0x1723   :  { %v2765_v15 = vmul.f32 %v14715_v12, %v14713_v6 }
0x1725   :  { %13579 = vmatmul.mubr.msk.f32.vlgmr.msra.gmra.mrb[42].mxu1 %vm196_vm2, %v2765_v15 }
0x1726   :  { %13592 = vmatpush3.xpose.msk.msra.mxu1 %vm196_vm2, %v3085_v10  ;;  %13593 = vmatprep.mubr.msk.f32.mxu1 %vm14945_vm1, %v14944_v36 }
0x1727   :  { %13596 = vmatprep.subr.mxu1 %v14944_v36 }
0x1729   :  { %13594 = vmatmul.mubr.msk.f32.vlgmr.msra.gmra.mrb[44].mxu1 %vm196_vm2, %v3083_v16 }
0x172a   :  { %13597 = vmatpush3.xpose.msk.msra.mxu1 %vm196_vm2, %v3163_v18  ;;  %13598 = vmatprep.mubr.msk.f32.mxu1 %vm14945_vm1, %v14944_v36 }
0x172b   :  { %13606 = vmatprep.subr.mxu1 %v14944_v36 }
0x172d   :  { %13599 = vmatmul.mubr.msk.f32.vlgmr.msra.gmra.mrb[46].mxu1 %vm196_vm2, %v3161_v22 }
0x172e   :  { %13608 = vmatprep.mubr.msk.f32.mxu1 %vm14945_vm1, %v14944_v36 }
0x174c   :  { %v2746_v0 = vpop.xlane.xlu1 %2745 }
0x174d   :  { %v2750_v45 = vsub.f32 %v2663_v8, %v2746_v0 }
0x174f   :  { %v2752_v24 = vmul.f32 1.442695, %v2750_v45 }
0x1751   :  { %14716 = vpow2.f32 %v2752_v24 }
0x175b   :  { %v14717_v25 = vpop.eup %14716 }
0x175c   :  { %v2756_v26 = vsel %vm196_vm2, %v14717_v25, 0.0 }
0x175d   :  { %2757 = vadd.xlane.f32.xlu0 %v2756_v26 }
0x1773   :  { %2766 = vrot.lane.b32.xlu0 %v15388_v20, %s16913_s29  ;;  %s16938_s29 = smov 120  }
0x1777   :  { %3336 = vrot.lane.b32.xlu0 %v15386_v17, %s16909_s14 }
0x177b   :  { %3499 = vrot.lane.b32.xlu0 %v15388_v20, %s16931_s18 }
0x177f   :  { %3577 = vrot.lane.b32.xlu0 %v15386_v17, %s16931_s18 }
0x1783   :  { %3497 = vrot.lane.b32.xlu0 %v15396_v1, %s16932_s19 }
0x17ea   :  { %v2758_v19 = vpop.xlane.xlu0 %2757 }
0x17eb   :  { %14718 = vrcp.f32 %v2758_v19 }
0x17ee   :  { %v2767_v27 = vpop.permute.xlu0 %2766 }
0x17ef   :  { %13572 = vmatpush3.msra.mxu0 %v2767_v27 }
0x17f0   :  { %13581 = vmatprep.subr.mxu0 %v12554_v46 }
0x17f2   :  { %v3337_v21 = vpop.permute.xlu0 %3336 }
0x17f3   :  { %13607 = vmatpush3.msra.mxu1 %v3337_v21 }
0x17f4   :  { %13616 = vmatprep.subr.mxu1 %v14944_v36 }
0x17f5   :  { %v14719_v28 = vpop.eup %14718 }
0x17f6   :  { %v2763_v29 = vmul.f32 %v14719_v28, %v14717_v25  ;;  %v3500_v2 = vpop.permute.xlu0 %3499 }
0x17f8   :  { %13574 = vmatmul.mubr.msk.f32.vlgmr.msra.gmra.mrb[12].mxu0 %vm196_vm2, %v2763_v29  ;;  %v2914_v30 = vpop.f32.mrb[42].mxu1 }
0x17f9   :  { %v13580_v31 = vpop.f32.mrb[43].mxu1  ;;  %13582 = vmatpush3.msra.mxu0 %v12554_v46 }
0x17fa   :  { %13586 = vmatprep.subr.mxu0 %v12547_v47  ;;  %v3578_v43 = vpop.permute.xlu0 %3577 }
0x17fc   :  { %v3156_v32 = vpop.f32.mrb[44].mxu1 }
0x17fd   :  { %v3157_v33 = vadd.f32 %v3156_v32, %v15104_v50  ;;  %v13595_v34 = vpop.f32.mrb[45].mxu1 }
0x17fe   :  { %v3498_v4 = vpop.permute.xlu0 %3497 }
0x17ff   :  { %v3238_v1 = vsel %vm196_vm2, %v3157_v33, -inf }
0x1800   :  { %3239 = vmax.xlane.f32.xlu1 %v3238_v1  ;;  %v3234_v35 = vpop.f32.mrb[46].mxu1 }
0x1801   :  { %v3235_v37 = vadd.f32 %v3234_v35, %v15104_v50  ;;  %v13600_v38 = vpop.f32.mrb[47].mxu1 }
0x1803   :  { %v3241_v44 = vsel %vm196_vm2, %v3235_v37, -inf }
0x1804   :  { %3242 = vmax.xlane.f32.xlu1 %v3241_v44 }
0x188d   :  { %v3240_v48 = vpop.xlane.xlu1 %3239 }
0x188e   :  { %v3244_v49 = vsub.f32 %v3157_v33, %v3240_v48  ;;  %v12578_v48 = vld [vmem:[%s16895_s6 + $0x1] ss:$0 sm:$0xff] }
0x1890   :  { %v3246_v51 = vmul.f32 1.442695, %v3244_v49 }
0x1891   :  { %v3243_v52 = vpop.xlane.xlu1 %3242 }
0x1892   :  { %14720 = vpow2.f32 %v3246_v51  ;;  %v3245_v13 = vsub.f32 %v3235_v37, %v3243_v52  ;;  %v12574_v37 = vld [vmem:[%s16894_s5 + $0x38] sm:$0xff] }
0x1894   :  { %v3248_v53 = vmul.f32 1.442695, %v3245_v13 }
0x1896   :  { %14722 = vpow2.f32 %v3248_v53 }
0x189c   :  { %v14721_v54 = vpop.eup %14720 }
0x189d   :  { %v3250_v14 = vsel %vm196_vm2, %v14721_v54, 0.0 }
0x189e   :  { %3251 = vadd.xlane.f32.xlu1 %v3250_v14 }
0x18a0   :  { %v14723_v55 = vpop.eup %14722 }
0x18a1   :  { %v3253_v56 = vsel %vm196_vm2, %v14723_v55, 0.0 }
0x18a2   :  { %3254 = vadd.xlane.f32.xlu1 %v3253_v56 }
0x18b3   :  { %3260 = vrot.lane.b32.xlu1 %v15388_v20, %s16909_s14  ;;  %s16940_s14 = smov 96  }
0x18b7   :  { %3575 = vrot.lane.b32.xlu1 %v15405_v23, %s16932_s19 }
0x18cb   :  { %v2838_v58 = vpop.f32.mrb[12].mxu0 }
0x18cc   :  { %v13575_v60 = vpop.f32.mrb[13].mxu0  ;;  %13583 = vmatprep.mubr.msk.f32.mxu0 %vm196_vm2, %v2838_v58 }
0x18cd   :  { %13584 = vmatmul.mubr.msk.f32.vlgmr.msra.gmra.mrb[14].mxu0 %vm196_vm2, %v2914_v30 }
0x18ce   :  { %13588 = vmatprep.mubr.msk.f32.mxu0 %vm196_vm2, %v15450_v57  ;;  %13587 = vmatpush3.msra.mxu0 %v12547_v47 }
0x18cf   :  { %13601 = vmatprep.subr.mxu0 %v14944_v36 }
0x18d5   :  { %13589 = vmatmul.mubr.msk.f32.vlgmr.msra.gmra.mrb[14].mxu0 %vm196_vm2, %v15452_v59 }
0x18d6   :  { %13603 = vmatprep.mubr.msk.f32.mxu0 %vm14945_vm1, %v14944_v36 }
0x192b   :  { %v3252_v61 = vpop.xlane.xlu1 %3251 }
0x192c   :  { %14724 = vrcp.f32 %v3252_v61 }
0x192f   :  { %v3255_v23 = vpop.xlane.xlu1 %3254 }
0x1930   :  { %14726 = vrcp.f32 %v3255_v23 }
0x1933   :  { %v3261_v63 = vpop.permute.xlu1 %3260 }
0x1934   :  { %13602 = vmatpush3.msra.mxu0 %v3261_v63 }
0x1935   :  { %13611 = vmatprep.subr.mxu0 %v12565_v62 }
0x1936   :  { %v14725_v57 = vpop.eup %14724 }
0x1937   :  { %v3257_v39 = vmul.f32 %v14725_v57, %v14721_v54  ;;  %v3576_v8 = vpop.permute.xlu1 %3575  ;;  %v12584_v57 = vld [vmem:[%s16898_s9 + $0x28] sm:$0xff] }
0x1939   :  { %13604 = vmatmul.mubr.msk.f32.vlgmr.msra.gmra.mrb[16].mxu0 %vm196_vm2, %v3257_v39  ;;  %v12585_v39 = vld [vmem:[%s16898_s9 + $0x30] sm:$0xff] }
0x193a   :  { %v14727_v59 = vpop.eup %14726  ;;  %13612 = vmatpush3.msra.mxu0 %v12565_v62 }
0x193b   :  { %v3259_v3 = vmul.f32 %v14727_v59, %v14723_v55  ;;  %13621 = vmatprep.subr.mxu0 %v14944_v36 }
0x193d   :  { %13609 = vmatmul.mubr.msk.f32.vlgmr.msra.gmra.mrb[48].mxu1 %vm196_vm2, %v3259_v3 }
0x193e   :  { %13617 = vmatpush3.xpose.msk.msra.mxu1 %vm196_vm2, %v3500_v2  ;;  %13618 = vmatprep.mubr.msk.f32.mxu1 %vm14945_vm1, %v14944_v36  ;;  %v12583_v2 = vld [vmem:[%s16898_s9 + $0x20] sm:$0xff] }
0x193f   :  { %13626 = vmatprep.subr.mxu1 %v14944_v36  ;;  %v14371_v59 = vpack.c.bf16 %v12584_v57, %v12583_v2 }
0x1941   :  { %13619 = vmatmul.mubr.msk.f32.vlgmr.msra.gmra.mrb[50].mxu1 %vm196_vm2, %v3498_v4  ;;  %v12591_v4 = vld [vmem:[%s16900_s11 + $0x80] sm:$0xff] }
0x1942   :  { %13628 = vmatprep.mubr.msk.f32.mxu1 %vm14945_vm1, %v14944_v36 }
0x1a0c   :  { %v3332_v41 = vpop.f32.mrb[16].mxu0 }
0x1a0d   :  { %v13605_v5 = vpop.f32.mrb[17].mxu0  ;;  %13613 = vmatprep.mubr.msk.f32.mxu0 %vm196_vm2, %v3332_v41  ;;  %v12592_v41 = vld [vmem:[%s16900_s11 + $0x88] sm:$0xff] }
0x1a0e   :  { %v14379_v5 = vpack.c.bf16 %v12592_v41, %v12591_v4 }
0x1a10   :  { %v3408_v6 = vpop.f32.mrb[48].mxu1 }
0x1a11   :  { %v13610_v7 = vpop.f32.mrb[49].mxu1  ;;  %13614 = vmatmul.mubr.msk.f32.vlgmr.msra.gmra.mrb[14].mxu0 %vm196_vm2, %v3408_v6 }
0x1a12   :  { %13622 = vmatpush3.xpose.msk.msra.mxu0 %vm196_vm2, %v3578_v43  ;;  %13623 = vmatprep.mubr.msk.f32.mxu0 %vm14945_vm1, %v14944_v36  ;;  %v12586_v43 = vld [vmem:[%s16898_s9 + $0x38] sm:$0xff] }
0x1a13   :  { %13631 = vmatprep.subr.mxu0 %v14944_v36  ;;  %v14375_v3 = vpack.c.bf16 %v12586_v43, %v12585_v39 }
0x1a14   :  { %v3571_v9 = vpop.f32.mrb[50].mxu1 }
0x1a15   :  { %v3572_v10 = vadd.f32 %v3571_v9, %v15104_v50  ;;  %v13620_v11 = vpop.f32.mrb[51].mxu1  ;;  %13624 = vmatmul.mubr.msk.f32.vlgmr.msra.gmra.mrb[18].mxu0 %vm196_vm2, %v3576_v8 }
0x1a16   :  { %13633 = vmatprep.mubr.msk.f32.mxu0 %vm14945_vm1, %v14944_v36 }
0x1a17   :  { %v3653_v12 = vsel %vm196_vm2, %v3572_v10, -inf }
0x1a18   :  { %3654 = vmax.xlane.f32.xlu0 %v3653_v12 }
0x1aa5   :  { %v3655_v15 = vpop.xlane.xlu0 %3654 }
0x1aa6   :  { %v3659_v16 = vsub.f32 %v3572_v10, %v3655_v15  ;;  %v12581_v15 = vld [vmem:[%s16896_s7 + $0x1] ss:$0 sm:$0xff] }
0x1aa8   :  { %v3661_v18 = vmul.f32 1.442695, %v3659_v16 }
0x1aaa   :  { %14728 = vpow2.f32 %v3661_v18 }
0x1ab4   :  { %v14729_v22 = vpop.eup %14728 }
0x1ab5   :  { %v3665_v0 = vsel %vm196_vm2, %v14729_v22, 0.0 }
0x1ab6   :  { %3666 = vadd.xlane.f32.xlu0 %v3665_v0  ;;  %v12582_v0 = vld [vmem:[%s16897_s8 + $0x1] ss:$0 sm:$0xff] }
0x1ae8   :  { %v3649_v45 = vpop.f32.mrb[18].mxu0 }
0x1ae9   :  { %v3650_v24 = vadd.f32 %v3649_v45, %v15104_v50  ;;  %v13625_v25 = vpop.f32.mrb[19].mxu0 }
0x1aeb   :  { %v3656_v26 = vsel %vm196_vm2, %v3650_v24, -inf }
0x1aec   :  { %3657 = vmax.xlane.f32.xlu1 %v3656_v26 }
0x1afd   :  { %3751 = vrot.lane.b32.xlu1 %v15386_v17, %s16933_s23 }
0x1b43   :  { %v3667_v31 = vpop.xlane.xlu0 %3666 }
0x1b79   :  { %v3658_v19 = vpop.xlane.xlu1 %3657 }
0x1b7a   :  { %v3660_v27 = vsub.f32 %v3650_v24, %v3658_v19  ;;  %v12593_v19 = vld [vmem:[%s16900_s11 + $0x90] sm:$0xff] }
0x1b7c   :  { %v3663_v21 = vmul.f32 1.442695, %v3660_v27  ;;  %v12594_v27 = vld [vmem:[%s16900_s11 + $0x98] sm:$0xff] }
0x1b7d   :  { %v3752_v28 = vpop.permute.xlu1 %3751 }
0x1b7e   :  { %14730 = vpow2.f32 %v3663_v21  ;;  %13632 = vmatpush3.msra.mxu0 %v3752_v28  ;;  %v14383_v21 = vpack.c.bf16 %v12594_v27, %v12593_v19  ;;  %v12595_v28 = vld [vmem:[%s16900_s11 + $0xa0] sm:$0xff] }
0x1b7f   :  { %14732 = vrcp.f32 %v3667_v31  ;;  %13636 = vmatprep.subr.mxu0 %v12574_v37  ;;  %v12597_v31 = vld [vmem:[%s16900_s11 + $0xb0] sm:$0xff]  ;;  %v12613_v27 = vld [vmem:[%s16892_s3 + $0x40] sm:$0xff] }
0x1b88   :  { %v14731_v29 = vpop.eup %14730 }
0x1b89   :  { %v3668_v30 = vsel %vm196_vm2, %v14731_v29, 0.0  ;;  %v14733_v33 = vpop.eup %14732 }
0x1b8a   :  { %3669 = vadd.xlane.f32.xlu0 %v3668_v30  ;;  %v3672_v17 = vmul.f32 %v14733_v33, %v14729_v22 }
0x1ba0   :  { %3675 = vrot.lane.b32.xlu0 %v15388_v20, %s16933_s23 }
0x1c17   :  { %v3670_v32 = vpop.xlane.xlu0 %3669 }
0x1c18   :  { %14734 = vrcp.f32 %v3670_v32  ;;  %v12598_v32 = vld [vmem:[%s16900_s11 + $0xb8] sm:$0xff] }
0x1c19   :  { %v14391_v33 = vpack.c.bf16 %v12598_v32, %v12597_v31 }
0x1c1b   :  { %v3676_v34 = vpop.permute.xlu0 %3675 }
0x1c1c   :  { %13627 = vmatpush3.msra.mxu1 %v3676_v34  ;;  %v12599_v34 = vld [vmem:[%s16900_s11 + $0xc0] sm:$0xff] }
0x1c1d   :  { %13629 = vmatmul.mubr.msk.f32.vlgmr.msra.gmra.mrb[52].mxu1 %vm196_vm2, %v3672_v17  ;;  %14372 = vmatprep.subr.bf16.mxu1 %v14371_v59  ;;  %v12600_v17 = vld [vmem:[%s16900_s11 + $0xc8] sm:$0xff] }
0x1c1e   :  { %14374 = vmatpush3.bf16.msra.mxu1 %v14371_v59 }
0x1c1f   :  { %14376 = vmatprep.subr.bf16.mxu1 %v14375_v3 }
0x1c22   :  { %v14735_v1 = vpop.eup %14734  ;;  %14378 = vmatpush3.bf16.msra.mxu1 %v14375_v3 }
0x1c23   :  { %v3674_v35 = vmul.f32 %v14735_v1, %v14731_v29  ;;  %v12596_v29 = vld [vmem:[%s16900_s11 + $0xa8] sm:$0xff]  ;;  %v14395_v1 = vpack.c.bf16 %v12600_v17, %v12599_v34 }
0x1c24   :  { %v14387_v30 = vpack.c.bf16 %v12596_v29, %v12595_v28  ;;  %v12615_v28 = vld [vmem:[%s16892_s3 + $0x50] sm:$0xff] }
0x1c25   :  { %13634 = vmatmul.mubr.msk.f32.vlgmr.msra.gmra.mrb[20].mxu0 %vm196_vm2, %v3674_v35  ;;  %v12601_v35 = vld [vmem:[%s16900_s11 + $0xd0] sm:$0xff] }
0x1c26   :  { %13637 = vmatpush3.msra.mxu0 %v12574_v37  ;;  %v12602_v37 = vld [vmem:[%s16900_s11 + $0xd8] sm:$0xff] }
0x1c27   :  { %14380 = vmatprep.subr.bf16.mxu0 %v14379_v5 }
0x1cf0   :  { %v3747_v20 = vpop.f32.mrb[52].mxu1 }
0x1cf1   :  { %v13630_v38 = vpop.f32.mrb[53].mxu1  ;;  %13638 = vmatprep.mubr.msk.f32.mxu0 %vm196_vm2, %v3747_v20  ;;  %v14399_v20 = vpack.c.bf16 %v12602_v37, %v12601_v35 }
0x1cf2   :  { %v12603_v38 = vld [vmem:[%s16900_s11 + $0xe0] sm:$0xff] }
0x1cf8   :  { %v3823_v44 = vpop.f32.mrb[20].mxu0 }
0x1cf9   :  { %v13635_v46 = vpop.f32.mrb[21].mxu0  ;;  %13639 = vmatmul.mubr.msk.f32.vlgmr.msra.gmra.mrb[14].mxu0 %vm196_vm2, %v3823_v44  ;;  %v12604_v44 = vld [vmem:[%s16900_s11 + $0xe8] sm:$0xff] }
0x1cfa   :  { %14382 = vmatpush3.bf16.msra.mxu0 %v14379_v5  ;;  %v14403_v46 = vpack.c.bf16 %v12604_v44, %v12603_v38 }
0x1cfb   :  { %14384 = vmatprep.subr.bf16.mxu0 %v14383_v21 }
0x1cfe   :  { %14386 = vmatpush3.bf16.msra.mxu0 %v14383_v21  ;;  %v12614_v21 = vld [vmem:[%s16892_s3 + $0x48] sm:$0xff] }
0x1cff   :  { %14388 = vmatprep.subr.bf16.mxu0 %v14387_v30  ;;  %v14411_v29 = vpack.c.bf16 %v12614_v21, %v12613_v27 }
0x1d01   :  { %14412 = vmatprep.subr.bf16.mxu1 %v14411_v29 }
0x1d02   :  { %14390 = vmatpush3.bf16.msra.mxu0 %v14387_v30  ;;  %v12616_v30 = vld [vmem:[%s16892_s3 + $0x58] sm:$0xff] }
0x1d03   :  { %14392 = vmatprep.subr.bf16.mxu0 %v14391_v33  ;;  %v14415_v31 = vpack.c.bf16 %v12616_v30, %v12615_v28 }
0x1d06   :  { %14394 = vmatpush3.bf16.msra.mxu0 %v14391_v33 }
0x1d07   :  { %14396 = vmatprep.subr.bf16.mxu0 %v14395_v1 }
0x1d0a   :  { %14398 = vmatpush3.bf16.msra.mxu0 %v14395_v1 }
0x1d0b   :  { %14400 = vmatprep.subr.bf16.mxu0 %v14399_v20 }
0x1d0e   :  { %14402 = vmatpush3.bf16.msra.mxu0 %v14399_v20  ;;  %v12611_v20 = vld [vmem:[%s16890_s1 + $0x2] ss:$0 sm:$0xff] }
0x1d0f   :  { %14404 = vmatprep.subr.bf16.mxu0 %v14403_v46 }
0x1d12   :  { %14406 = vmatpush3.bf16.msra.mxu0 %v14403_v46 }
0x1dcc   :  { %v13640_v47 = vpop.f32.mrb[14].mxu0 }
0x1dcd   :  { %v3913_v49 = vadd.f32 %v13640_v47, %v15347_v40  ;;  %v3901_v51 = vpop.f32.mrb[15].mxu0  ;;  %v12605_v47 = vld [vmem:[%s16900_s11 + $0xf0] sm:$0xff] }
0x1dce   :  { %v3912_v52 = vadd.f32 %v3901_v51, %v15350_v42  ;;  %v12588_v51 = vld [vmem:[%s16899_s10 + $0x1] ss:$0 sm:$0xff] }
0x1dcf   :  { %v15563_v13 = vadd.f32 %v12578_v48, %v3913_v49 }
0x1dd0   :  { %v15565_v53 = vadd.f32 %v12578_v48, %v3912_v52  ;;  %v12606_v48 = vld [vmem:[%s16900_s11 + $0xf8] sm:$0xff] }
0x1dd1   :  { %v3931_v54 = vsel %vm55_vm0, %v15563_v13, 0.0  ;;  %v14407_v49 = vpack.c.bf16 %v12606_v48, %v12605_v47  ;;  %v12612_v47 = vld [vmem:[%s16891_s2 + $0x2] ss:$0 sm:$0xff] }
0x1dd2   :  { %3932 = vadd.xlane.f32.xlu0 %v3931_v54  ;;  %v3928_v14 = vsel %vm55_vm0, %v15565_v53, 0.0 }
0x1dd3   :  { %3929 = vadd.xlane.f32.xlu1 %v3928_v14  ;;  %14408 = vmatprep.subr.bf16.mxu0 %v14407_v49 }
0x1dd4   :  { %14410 = vmatpush3.bf16.msra.mxu0 %v14407_v49 }
0x1dd5   :  { %13728 = vmatprep.subr.mxu0 %v14944_v36 }
0x1e5f   :  { %v3933_v55 = vpop.xlane.xlu0 %3932 }
0x1e60   :  { %v3935_v56 = vmul.f32 0.03125, %v3933_v55  ;;  %v3930_v58 = vpop.xlane.xlu1 %3929 }
0x1e61   :  { %v3934_v60 = vmul.f32 0.03125, %v3930_v58 }
0x1e62   :  { %v3937_v40 = vsub.f32 %v15563_v13, %v3935_v56 }
0x1e63   :  { %v3936_v42 = vsub.f32 %v15565_v53, %v3934_v60 }
0x1e64   :  { %v3939_v61 = vmul.f32 %v3937_v40, %v3937_v40 }
0x1e65   :  { %v3938_v23 = vmul.f32 %v3936_v42, %v3936_v42 }
0x1e66   :  { %v3943_v62 = vsel %vm55_vm0, %v3939_v61, 0.0 }
0x1e67   :  { %3944 = vadd.xlane.f32.xlu1 %v3943_v62  ;;  %v3940_v63 = vsel %vm55_vm0, %v3938_v23, 0.0 }
0x1e68   :  { %3941 = vadd.xlane.f32.xlu0 %v3940_v63 }
0x1ef4   :  { %v3945_v6 = vpop.xlane.xlu1 %3944 }
0x1ef5   :  { %v3947_v7 = vmul.f32 0.03125, %v3945_v6  ;;  %v3942_v8 = vpop.xlane.xlu0 %3941  ;;  %v12608_v6 = vld [vmem:[%s16901_s12 + $0x1] ss:$0 sm:$0xff] }
0x1ef6   :  { %v3946_v9 = vmul.f32 0.03125, %v3942_v8 }
0x1ef7   :  { %v3949_v10 = vadd.f32 1e-05, %v3947_v7 }
0x1ef8   :  { %v3948_v11 = vadd.f32 1e-05, %v3946_v9 }
0x1ef9   :  { %14736 = vrsqrt.f32 %v3949_v10 }
0x1efa   :  { %14738 = vrsqrt.f32 %v3948_v11 }
0x1f03   :  { %v14737_v12 = vpop.eup %14736 }
0x1f04   :  { %v14739_v16 = vpop.eup %14738  ;;  %v3953_v18 = vmul.f32 %v14737_v12, %v3937_v40 }
0x1f05   :  { %v3952_v22 = vmul.f32 %v14739_v16, %v3936_v42 }
0x1f06   :  { %v3961_v45 = vmul.f32 %v12581_v15, %v3953_v18 }
0x1f07   :  { %v3960_v24 = vmul.f32 %v12581_v15, %v3952_v22 }
0x1f08   :  { %v3969_v26 = vadd.f32 %v12582_v0, %v3961_v45 }
0x1f09   :  { %v3968_v25 = vadd.f32 %v12582_v0, %v3960_v24 }
0x1f0b   :  { %13649 = vmatprep.mubr.msk.f32.mxu1 %vm55_vm0, %v3968_v25 }
0x1f0c   :  { %13650 = vmatmul.mubr.msk.f32.vlgmr.msra.gmra.mrb[54].mxu1 %vm55_vm0, %v3969_v26 }
0x1f0d   :  { %14414 = vmatpush3.bf16.msra.mxu1 %v14411_v29 }
0x1f0e   :  { %14416 = vmatprep.subr.bf16.mxu1 %v14415_v31 }
0x1f11   :  { %14418 = vmatpush3.bf16.msra.mxu1 %v14415_v31 }
0x1f12   :  { %13698 = vmatprep.subr.mxu1 %v14944_v36 }
0x1fdf   :  { %v13651_v52 = vpop.f32.mrb[54].mxu1 }
0x1fe0   :  { %v4061_v54 = vadd.f32 %v13651_v52, %v12588_v51  ;;  %v4055_v14 = vpop.f32.mrb[55].mxu1 }
0x1fe1   :  { %v4056_v55 = vadd.f32 %v12588_v51, %v4055_v14 }
0x1fe2   :  { %v4067_v56 = vmul.f32 0.044715, %v4061_v54  ;;  %v4065_v4 = vmul.f32 0.5, %v4061_v54 }
0x1fe3   :  { %v4066_v58 = vmul.f32 0.044715, %v4056_v55  ;;  %v4064_v43 = vmul.f32 0.5, %v4056_v55 }
0x1fe4   :  { %v4069_v60 = vmul.f32 %v4067_v56, %v4061_v54 }
0x1fe5   :  { %v4068_v40 = vmul.f32 %v4066_v58, %v4056_v55 }
0x1fe6   :  { %v4071_v42 = vmul.f32 %v4069_v60, %v4061_v54 }
0x1fe7   :  { %v4070_v61 = vmul.f32 %v4068_v40, %v4056_v55 }
0x1fe8   :  { %v4073_v23 = vadd.f32 %v4071_v42, %v4061_v54  ;;  %v12618_v54 = vld [vmem:[%s16893_s4 + $0x2] ss:$0 sm:$0xff] }
0x1fe9   :  { %v4072_v62 = vadd.f32 %v4070_v61, %v4056_v55 }
0x1fea   :  { %v4075_v63 = vmul.f32 0.7978846, %v4073_v23 }
0x1feb   :  { %v4074_v2 = vmul.f32 0.7978846, %v4072_v62 }
0x1fec   :  { %14740 = vtanh.f32 %v4075_v63 }
0x1fed   :  { %14742 = vtanh.f32 %v4074_v2 }
0x1ff6   :  { %v14741_v57 = vpop.eup %14740 }
0x1ff7   :  { %v14743_v39 = vpop.eup %14742  ;;  %v4079_v59 = vadd.f32 1.0, %v14741_v57 }
0x1ff8   :  { %v4078_v3 = vadd.f32 1.0, %v14743_v39 }
0x1ff9   :  { %v4081_v5 = vmul.f32 %v4079_v59, %v4065_v4 }
0x1ffa   :  { %v4080_v41 = vmul.f32 %v4078_v3, %v4064_v43 }
0x1ffc   :  { %13684 = vmatprep.mubr.f32.mxu0 %v4080_v41 }
0x1ffd   :  { %13685 = vmatmul.mubr.f32.vlgmr.msra.gmra.mrb[22].mxu0 %v4081_v5 }
0x1ffe   :  { %13730 = vmatprep.mubr.msk.f32.mxu0 %vm14945_vm1, %v14944_v36 }
0x20d0   :  { %v13686_v7 = vpop.f32.mrb[22].mxu0 }
0x20d1   :  { %v4179_v8 = vadd.f32 %v13686_v7, %v12608_v6  ;;  %v4173_v9 = vpop.f32.mrb[23].mxu0 }
0x20d2   :  { %v4174_v10 = vadd.f32 %v12608_v6, %v4173_v9 }
0x20d3   :  { %v15653_v11 = vadd.f32 %v4179_v8, %v15563_v13 }
0x20d4   :  { %v15656_v12 = vadd.f32 %v4174_v10, %v15565_v53 }
0x20d5   :  { %v4191_v15 = vsel %vm55_vm0, %v15653_v11, 0.0 }
0x20d6   :  { %4192 = vadd.xlane.f32.xlu1 %v4191_v15  ;;  %v4188_v16 = vsel %vm55_vm0, %v15656_v12, 0.0 }
0x20d7   :  { %4189 = vadd.xlane.f32.xlu0 %v4188_v16 }
0x2163   :  { %v4193_v18 = vpop.xlane.xlu1 %4192 }
0x2164   :  { %v4195_v22 = vmul.f32 0.03125, %v4193_v18  ;;  %v4190_v0 = vpop.xlane.xlu0 %4189 }
0x2165   :  { %v4194_v45 = vmul.f32 0.03125, %v4190_v0 }
0x2166   :  { %v4197_v24 = vsub.f32 %v15653_v11, %v4195_v22 }
0x2167   :  { %v4196_v13 = vsub.f32 %v15656_v12, %v4194_v45 }
0x2168   :  { %v4199_v25 = vmul.f32 %v4197_v24, %v4197_v24 }
0x2169   :  { %v4198_v26 = vmul.f32 %v4196_v13, %v4196_v13 }
0x216a   :  { %v4203_v53 = vsel %vm55_vm0, %v4199_v25, 0.0 }
0x216b   :  { %4204 = vadd.xlane.f32.xlu1 %v4203_v53  ;;  %v4200_v19 = vsel %vm55_vm0, %v4198_v26, 0.0 }
0x216c   :  { %4201 = vadd.xlane.f32.xlu0 %v4200_v19 }
0x21f8   :  { %v4205_v32 = vpop.xlane.xlu1 %4204 }
0x21f9   :  { %v4207_v33 = vmul.f32 0.03125, %v4205_v32  ;;  %v4202_v34 = vpop.xlane.xlu0 %4201 }
0x21fa   :  { %v4206_v17 = vmul.f32 0.03125, %v4202_v34 }
0x21fb   :  { %v4209_v1 = vadd.f32 1e-05, %v4207_v33 }
0x21fc   :  { %v4208_v35 = vadd.f32 1e-05, %v4206_v17 }
0x21fd   :  { %14744 = vrsqrt.f32 %v4209_v1 }
0x21fe   :  { %14746 = vrsqrt.f32 %v4208_v35 }
0x2207   :  { %v14745_v37 = vpop.eup %14744 }
0x2208   :  { %v14747_v38 = vpop.eup %14746  ;;  %v4213_v44 = vmul.f32 %v14745_v37, %v4197_v24 }
0x2209   :  { %v4212_v46 = vmul.f32 %v14747_v38, %v4196_v13 }
0x220a   :  { %v4221_v48 = vmul.f32 %v12611_v20, %v4213_v44 }
0x220b   :  { %v4220_v49 = vmul.f32 %v12611_v20, %v4212_v46 }
0x220c   :  { %v4229_v52 = vadd.f32 %v12612_v47, %v4221_v48 }
0x220d   :  { %v4228_v51 = vadd.f32 %v12612_v47, %v4220_v49 }
0x220f   :  { %13695 = vmatprep.mubr.msk.f32.mxu1 %vm55_vm0, %v4228_v51 }
0x2210   :  { %13696 = vmatmul.mubr.msk.f32.vlgmr.msra.gmra.mrb[56].mxu1 %vm55_vm0, %v4229_v52 }
0x2211   :  { %13700 = vmatprep.mubr.msk.f32.mxu1 %vm14945_vm1, %v14944_v36 }
0x22e3   :  { %v13697_v14 = vpop.f32.mrb[56].mxu1 }
0x22e4   :  { %v15692_v55 = vadd.f32 %v13697_v14, %v12618_v54  ;;  %v4315_v56 = vpop.f32.mrb[57].mxu1 }
0x22e5   :  { %v15694_v58 = vadd.f32 %v12618_v54, %v4315_v56 }
0x22e6   :  { %4405 = vrot.lane.b32.xlu1 %v15692_v55, %s16923_s25  ;;  %v15711_v61 = vmul.f32 0.35355338, %v15692_v55 }
0x22e7   :  { %4327 = vrot.lane.b32.xlu0 %v15694_v58, %s16923_s25  ;;  %v15702_v40 = vmul.f32 0.35355338, %v15694_v58 }
0x2358   :  { %v4406_v42 = vpop.permute.xlu1 %4405 }
0x2359   :  { %v4328_v60 = vpop.permute.xlu0 %4327 }
0x235a   :  { %13699 = vmatpush3.xpose.msk.msra.mxu1 %vm196_vm2, %v4328_v60 }
0x235b   :  { %13703 = vmatprep.subr.mxu1 %v14944_v36 }
0x235d   :  { %13701 = vmatmul.mubr.msk.f32.vlgmr.msra.gmra.mrb[58].mxu1 %vm196_vm2, %v15702_v40 }
0x235e   :  { %13704 = vmatpush3.xpose.msk.msra.mxu1 %vm196_vm2, %v4406_v42  ;;  %13705 = vmatprep.mubr.msk.f32.mxu1 %vm14945_vm1, %v14944_v36 }
0x235f   :  { %13708 = vmatprep.subr.mxu1 %v14944_v36 }
0x2361   :  { %13706 = vmatmul.mubr.msk.f32.vlgmr.msra.gmra.mrb[60].mxu1 %vm196_vm2, %v15711_v61 }
0x2362   :  { %13710 = vmatprep.mubr.msk.f32.mxu1 %vm14945_vm1, %v14944_v36 }
0x2430   :  { %v4400_v23 = vpop.f32.mrb[58].mxu1 }
0x2431   :  { %v4401_v62 = vadd.f32 %v4400_v23, %v15104_v50  ;;  %v13702_v63 = vpop.f32.mrb[59].mxu1 }
0x2433   :  { %v4482_v2 = vsel %vm196_vm2, %v4401_v62, -inf }
0x2434   :  { %4483 = vmax.xlane.f32.xlu1 %v4482_v2  ;;  %v4478_v57 = vpop.f32.mrb[60].mxu1 }
0x2435   :  { %v4479_v39 = vadd.f32 %v4478_v57, %v15104_v50  ;;  %v13707_v59 = vpop.f32.mrb[61].mxu1 }
0x2437   :  { %v4485_v43 = vsel %vm196_vm2, %v4479_v39, -inf }
0x2438   :  { %4486 = vmax.xlane.f32.xlu0 %v4485_v43 }
0x2445   :  { %4580 = vrot.lane.b32.xlu1 %v15692_v55, %s16921_s26 }
0x2449   :  { %4660 = vrot.lane.b32.xlu1 %v15694_v58, %s16919_s27 }
0x244d   :  { %4658 = vrot.lane.b32.xlu1 %v15702_v40, %s16917_s28 }
0x24c1   :  { %v4484_v3 = vpop.xlane.xlu1 %4483 }
0x24c2   :  { %v4488_v4 = vsub.f32 %v4401_v62, %v4484_v3 }
0x24c4   :  { %v4490_v41 = vmul.f32 1.442695, %v4488_v4 }
0x24c5   :  { %v4487_v5 = vpop.xlane.xlu0 %4486  ;;  %v4581_v16 = vpop.permute.xlu1 %4580 }
0x24c6   :  { %14748 = vpow2.f32 %v4490_v41  ;;  %v4489_v6 = vsub.f32 %v4479_v39, %v4487_v5 }
0x24c8   :  { %v4492_v7 = vmul.f32 1.442695, %v4489_v6 }
0x24c9   :  { %v4661_v18 = vpop.permute.xlu1 %4660 }
0x24ca   :  { %14750 = vpow2.f32 %v4492_v7 }
0x24cd   :  { %v4659_v22 = vpop.permute.xlu1 %4658 }
0x24d0   :  { %v14749_v8 = vpop.eup %14748 }
0x24d1   :  { %v4494_v9 = vsel %vm196_vm2, %v14749_v8, 0.0 }
0x24d2   :  { %4495 = vadd.xlane.f32.xlu0 %v4494_v9 }
0x24d4   :  { %v14751_v10 = vpop.eup %14750 }
0x24d5   :  { %v4497_v15 = vsel %vm196_vm2, %v14751_v10, 0.0 }
0x24d6   :  { %4498 = vadd.xlane.f32.xlu1 %v4497_v15 }
0x24e7   :  { %4736 = vrot.lane.b32.xlu1 %v15711_v61, %s16917_s28 }
0x24e8   :  { %4504 = vrot.lane.b32.xlu0 %v15694_v58, %s16921_s26 }
0x24eb   :  { %5154 = vrot.lane.b32.xlu1 %v15694_v58, %s16915_s0 }
0x24ec   :  { %4738 = vrot.lane.b32.xlu0 %v15692_v55, %s16919_s27  ;;  %s16941_s27 = smov 64  }
0x255f   :  { %v4496_v0 = vpop.xlane.xlu0 %4495 }
0x2560   :  { %14752 = vrcp.f32 %v4496_v0 }
0x2563   :  { %v4499_v45 = vpop.xlane.xlu1 %4498  ;;  %v4505_v24 = vpop.permute.xlu0 %4504 }
0x2564   :  { %14754 = vrcp.f32 %v4499_v45  ;;  %13709 = vmatpush3.msra.mxu1 %v4505_v24 }
0x2565   :  { %13713 = vmatprep.subr.mxu1 %v14944_v36 }
0x2567   :  { %v4739_v19 = vpop.permute.xlu0 %4738  ;;  %v4737_v27 = vpop.permute.xlu1 %4736 }
0x256a   :  { %v14753_v13 = vpop.eup %14752 }
0x256b   :  { %v4501_v25 = vmul.f32 %v14753_v13, %v14749_v8  ;;  %v5155_v49 = vpop.permute.xlu1 %5154 }
0x256d   :  { %13711 = vmatmul.mubr.msk.f32.vlgmr.msra.gmra.mrb[62].mxu1 %vm196_vm2, %v4501_v25 }
0x256e   :  { %v14755_v26 = vpop.eup %14754  ;;  %13714 = vmatpush3.msra.mxu1 %v4581_v16  ;;  %13715 = vmatprep.mubr.msk.f32.mxu1 %vm14945_vm1, %v14944_v36  ;;  %v12634_v16 = vld [vmem:[%s16894_s5 + $0x48] sm:$0xff] }
0x256f   :  { %v4503_v53 = vmul.f32 %v14755_v26, %v14751_v10  ;;  %13718 = vmatprep.subr.mxu1 %v14944_v36 }
0x2571   :  { %13716 = vmatmul.mubr.msk.f32.vlgmr.msra.gmra.mrb[64].mxu1 %vm196_vm2, %v4503_v53 }
0x2572   :  { %13720 = vmatprep.mubr.msk.f32.mxu1 %vm14945_vm1, %v14944_v36 }
0x2575   :  { %13719 = vmatpush3.xpose.msk.msra.mxu1 %vm196_vm2, %v4661_v18  ;;  %v12627_v18 = vld [vmem:[%s16894_s5 + $0x40] sm:$0xff] }
0x2576   :  { %13723 = vmatprep.subr.mxu1 %v14944_v36 }
0x2578   :  { %13721 = vmatmul.mubr.msk.f32.vlgmr.msra.gmra.mrb[66].mxu1 %vm196_vm2, %v4659_v22 }
0x2579   :  { %13724 = vmatpush3.xpose.msk.msra.mxu1 %vm196_vm2, %v4739_v19  ;;  %13725 = vmatprep.mubr.msk.f32.mxu1 %vm14945_vm1, %v14944_v36 }
0x257a   :  { %13733 = vmatprep.subr.mxu1 %v14944_v36 }
0x257c   :  { %13726 = vmatmul.mubr.msk.f32.vlgmr.msra.gmra.mrb[68].mxu1 %vm196_vm2, %v4737_v27 }
0x257d   :  { %13735 = vmatprep.mubr.msk.f32.mxu1 %vm14945_vm1, %v14944_v36 }
0x2640   :  { %v15756_v21 = vpop.f32.mrb[62].mxu1 }
0x2641   :  { %v13712_v28 = vpop.f32.mrb[63].mxu1 }
0x2644   :  { %v15758_v29 = vpop.f32.mrb[64].mxu1 }
0x2645   :  { %v13717_v30 = vpop.f32.mrb[65].mxu1 }
0x264b   :  { %v4732_v31 = vpop.f32.mrb[66].mxu1 }
0x264c   :  { %v13722_v32 = vpop.f32.mrb[67].mxu1  ;;  %v4733_v47 = vadd.f32 %v4732_v31, %v15104_v50 }
0x264d   :  { %v12645_v32 = vld [vmem:[%s16894_s5 + $0x50] sm:$0xff] }
0x264e   :  { %v4814_v48 = vsel %vm196_vm2, %v4733_v47, -inf }
0x264f   :  { %v4810_v33 = vpop.f32.mrb[68].mxu1 }
0x2650   :  { %v4811_v34 = vadd.f32 %v4810_v33, %v15104_v50  ;;  %v13727_v17 = vpop.f32.mrb[69].mxu1 }
0x2652   :  { %v4817_v1 = vsel %vm196_vm2, %v4811_v34, -inf }
0x2653   :  { %4818 = vmax.xlane.f32.xlu0 %v4817_v1 }
0x2669   :  { %4912 = vrot.lane.b32.xlu0 %v15692_v55, %s16934_s21 }
0x266d   :  { %5152 = vrot.lane.b32.xlu0 %v15702_v40, %s16935_s22 }
0x2671   :  { %5230 = vrot.lane.b32.xlu0 %v15711_v61, %s16935_s22 }
0x26e0   :  { %v4819_v35 = vpop.xlane.xlu0 %4818 }
0x26e1   :  { %v4821_v37 = vsub.f32 %v4811_v34, %v4819_v35 }
0x26e3   :  { %v4824_v20 = vmul.f32 1.442695, %v4821_v37 }
0x26e4   :  { %v4913_v38 = vpop.permute.xlu0 %4912 }
0x26e5   :  { %14756 = vpow2.f32 %v4824_v20  ;;  %13734 = vmatpush3.msra.mxu1 %v4913_v38 }
0x26e6   :  { %13748 = vmatprep.subr.mxu1 %v14944_v36 }
0x26e8   :  { %v5153_v14 = vpop.permute.xlu0 %5152 }
0x26ec   :  { %v5231_v60 = vpop.permute.xlu0 %5230 }
0x26ef   :  { %v14757_v44 = vpop.eup %14756 }
0x26f0   :  { %v4829_v46 = vsel %vm196_vm2, %v14757_v44, 0.0 }
0x26f1   :  { %4830 = vadd.xlane.f32.xlu1 %v4829_v46 }
0x2702   :  { %5232 = vrot.lane.b32.xlu1 %v15692_v55, %s16915_s0 }
0x2726   :  { %4815 = vmax.xlane.f32.xlu1 %v4814_v48 }
0x277e   :  { %v4831_v51 = vpop.xlane.xlu1 %4830 }
0x277f   :  { %14758 = vrcp.f32 %v4831_v51 }
0x2782   :  { %v5233_v56 = vpop.permute.xlu1 %5232 }
0x2789   :  { %v14759_v52 = vpop.eup %14758 }
0x278a   :  { %v4835_v54 = vmul.f32 %v14759_v52, %v14757_v44 }
0x278c   :  { %13736 = vmatmul.mubr.msk.f32.vlgmr.msra.gmra.mrb[70].mxu1 %vm196_vm2, %v4835_v54 }
0x278d   :  { %13749 = vmatpush3.xpose.msk.msra.mxu1 %vm196_vm2, %v5155_v49  ;;  %13750 = vmatprep.mubr.msk.f32.mxu1 %vm14945_vm1, %v14944_v36 }
0x278e   :  { %13753 = vmatprep.subr.mxu1 %v14944_v36 }
0x2790   :  { %13751 = vmatmul.mubr.msk.f32.vlgmr.msra.gmra.mrb[72].mxu1 %vm196_vm2, %v5153_v14 }
0x2791   :  { %13754 = vmatpush3.xpose.msk.msra.mxu1 %vm196_vm2, %v5233_v56  ;;  %13755 = vmatprep.mubr.msk.f32.mxu1 %vm14945_vm1, %v14944_v36 }
0x2792   :  { %13763 = vmatprep.subr.mxu1 %v14944_v36 }
0x2794   :  { %13756 = vmatmul.mubr.msk.f32.vlgmr.msra.gmra.mrb[74].mxu1 %vm196_vm2, %v5231_v60 }
0x2795   :  { %13765 = vmatprep.mubr.msk.f32.mxu1 %vm14945_vm1, %v14944_v36 }
0x27b3   :  { %v4816_v42 = vpop.xlane.xlu1 %4815 }
0x27b4   :  { %v4820_v23 = vsub.f32 %v4733_v47, %v4816_v42 }
0x27b6   :  { %v4822_v62 = vmul.f32 1.442695, %v4820_v23 }
0x27b8   :  { %14760 = vpow2.f32 %v4822_v62 }
0x27c2   :  { %v14761_v63 = vpop.eup %14760 }
0x27c3   :  { %v4826_v2 = vsel %vm196_vm2, %v14761_v63, 0.0 }
0x27c4   :  { %4827 = vadd.xlane.f32.xlu0 %v4826_v2 }
0x27da   :  { %4836 = vrot.lane.b32.xlu0 %v15694_v58, %s16934_s21 }
0x27de   :  { %5406 = vrot.lane.b32.xlu0 %v15692_v55, %s16936_s15 }
0x27e2   :  { %5569 = vrot.lane.b32.xlu0 %v15694_v58, %s16931_s18 }
0x27e6   :  { %5647 = vrot.lane.b32.xlu0 %v15692_v55, %s16931_s18 }
0x27ea   :  { %5567 = vrot.lane.b32.xlu0 %v15702_v40, %s16932_s19 }
0x2851   :  { %v4828_v57 = vpop.xlane.xlu0 %4827 }
0x2852   :  { %14762 = vrcp.f32 %v4828_v57 }
0x2855   :  { %v4837_v39 = vpop.permute.xlu0 %4836 }
0x2856   :  { %13729 = vmatpush3.msra.mxu0 %v4837_v39 }
0x2857   :  { %13738 = vmatprep.subr.mxu0 %v12634_v16 }
0x2859   :  { %v5407_v59 = vpop.permute.xlu0 %5406 }
0x285a   :  { %13764 = vmatpush3.msra.mxu1 %v5407_v59 }
0x285b   :  { %13773 = vmatprep.subr.mxu1 %v14944_v36 }
0x285c   :  { %v14763_v43 = vpop.eup %14762 }
0x285d   :  { %v4833_v3 = vmul.f32 %v14763_v43, %v14761_v63  ;;  %v5570_v34 = vpop.permute.xlu0 %5569 }
0x285f   :  { %13731 = vmatmul.mubr.msk.f32.vlgmr.msra.gmra.mrb[24].mxu0 %vm196_vm2, %v4833_v3  ;;  %v4984_v4 = vpop.f32.mrb[70].mxu1 }
0x2860   :  { %v13737_v41 = vpop.f32.mrb[71].mxu1  ;;  %13739 = vmatpush3.msra.mxu0 %v12634_v16 }
0x2861   :  { %13743 = vmatprep.subr.mxu0 %v12627_v18  ;;  %v5648_v1 = vpop.permute.xlu0 %5647 }
0x2863   :  { %v5226_v5 = vpop.f32.mrb[72].mxu1 }
0x2864   :  { %v5227_v6 = vadd.f32 %v5226_v5, %v15104_v50  ;;  %v13752_v7 = vpop.f32.mrb[73].mxu1 }
0x2865   :  { %v5568_v37 = vpop.permute.xlu0 %5567 }
0x2866   :  { %v5308_v40 = vsel %vm196_vm2, %v5227_v6, -inf }
0x2867   :  { %5309 = vmax.xlane.f32.xlu1 %v5308_v40  ;;  %v5304_v8 = vpop.f32.mrb[74].mxu1 }
0x2868   :  { %v5305_v9 = vadd.f32 %v5304_v8, %v15104_v50  ;;  %v13757_v10 = vpop.f32.mrb[75].mxu1 }
0x286a   :  { %v5311_v15 = vsel %vm196_vm2, %v5305_v9, -inf }
0x286b   :  { %5312 = vmax.xlane.f32.xlu1 %v5311_v15 }
0x28f4   :  { %v5310_v22 = vpop.xlane.xlu1 %5309 }
0x28f5   :  { %v5314_v0 = vsub.f32 %v5227_v6, %v5310_v22  ;;  %v12658_v22 = vld [vmem:[%s16895_s6 + $0x2] ss:$0 sm:$0xff] }
0x28f7   :  { %v5316_v45 = vmul.f32 1.442695, %v5314_v0 }
0x28f8   :  { %v5313_v24 = vpop.xlane.xlu1 %5312 }
0x28f9   :  { %14764 = vpow2.f32 %v5316_v45  ;;  %v5315_v13 = vsub.f32 %v5305_v9, %v5313_v24  ;;  %v12654_v9 = vld [vmem:[%s16894_s5 + $0x58] sm:$0xff] }
0x28fb   :  { %v5318_v25 = vmul.f32 1.442695, %v5315_v13 }
0x28fd   :  { %14766 = vpow2.f32 %v5318_v25 }
0x2903   :  { %v14765_v26 = vpop.eup %14764 }
0x2904   :  { %v5320_v53 = vsel %vm196_vm2, %v14765_v26, 0.0 }
0x2905   :  { %5321 = vadd.xlane.f32.xlu1 %v5320_v53 }
0x2907   :  { %v14767_v19 = vpop.eup %14766 }
0x2908   :  { %v5323_v27 = vsel %vm196_vm2, %v14767_v19, 0.0 }
0x2909   :  { %5324 = vadd.xlane.f32.xlu1 %v5323_v27 }
0x291a   :  { %5330 = vrot.lane.b32.xlu1 %v15694_v58, %s16936_s15 }
0x291e   :  { %5645 = vrot.lane.b32.xlu1 %v15711_v61, %s16932_s19 }
0x2932   :  { %v4908_v28 = vpop.f32.mrb[24].mxu0 }
0x2933   :  { %v13732_v30 = vpop.f32.mrb[25].mxu0  ;;  %13740 = vmatprep.mubr.msk.f32.mxu0 %vm196_vm2, %v4908_v28 }
0x2934   :  { %13741 = vmatmul.mubr.msk.f32.vlgmr.msra.gmra.mrb[26].mxu0 %vm196_vm2, %v4984_v4 }
0x2935   :  { %13745 = vmatprep.mubr.msk.f32.mxu0 %vm196_vm2, %v15756_v21  ;;  %13744 = vmatpush3.msra.mxu0 %v12627_v18 }
0x2936   :  { %13758 = vmatprep.subr.mxu0 %v14944_v36 }
0x293c   :  { %13746 = vmatmul.mubr.msk.f32.vlgmr.msra.gmra.mrb[26].mxu0 %vm196_vm2, %v15758_v29 }
0x293d   :  { %13760 = vmatprep.mubr.msk.f32.mxu0 %vm14945_vm1, %v14944_v36 }
0x2992   :  { %v5322_v31 = vpop.xlane.xlu1 %5321 }
0x2993   :  { %14768 = vrcp.f32 %v5322_v31 }
0x2996   :  { %v5325_v61 = vpop.xlane.xlu1 %5324 }
0x2997   :  { %14770 = vrcp.f32 %v5325_v61 }
0x299a   :  { %v5331_v33 = vpop.permute.xlu1 %5330 }
0x299b   :  { %13759 = vmatpush3.msra.mxu0 %v5331_v33 }
0x299c   :  { %13768 = vmatprep.subr.mxu0 %v12645_v32 }
0x299d   :  { %v14769_v21 = vpop.eup %14768 }
0x299e   :  { %v5327_v17 = vmul.f32 %v14769_v21, %v14765_v26  ;;  %v5646_v47 = vpop.permute.xlu1 %5645  ;;  %v12664_v21 = vld [vmem:[%s16898_s9 + $0x48] sm:$0xff] }
0x29a0   :  { %13761 = vmatmul.mubr.msk.f32.vlgmr.msra.gmra.mrb[28].mxu0 %vm196_vm2, %v5327_v17  ;;  %v12665_v17 = vld [vmem:[%s16898_s9 + $0x50] sm:$0xff] }
0x29a1   :  { %v14771_v29 = vpop.eup %14770  ;;  %13769 = vmatpush3.msra.mxu0 %v12645_v32 }
0x29a2   :  { %v5329_v35 = vmul.f32 %v14771_v29, %v14767_v19  ;;  %13778 = vmatprep.subr.mxu0 %v14944_v36 }
0x29a4   :  { %13766 = vmatmul.mubr.msk.f32.vlgmr.msra.gmra.mrb[76].mxu1 %vm196_vm2, %v5329_v35 }
0x29a5   :  { %13774 = vmatpush3.xpose.msk.msra.mxu1 %vm196_vm2, %v5570_v34  ;;  %13775 = vmatprep.mubr.msk.f32.mxu1 %vm14945_vm1, %v14944_v36  ;;  %v12663_v34 = vld [vmem:[%s16898_s9 + $0x40] sm:$0xff] }
0x29a6   :  { %13783 = vmatprep.subr.mxu1 %v14944_v36  ;;  %v14419_v29 = vpack.c.bf16 %v12664_v21, %v12663_v34 }
0x29a8   :  { %13776 = vmatmul.mubr.msk.f32.vlgmr.msra.gmra.mrb[78].mxu1 %vm196_vm2, %v5568_v37  ;;  %v12671_v37 = vld [vmem:[%s16900_s11 + $0x100] sm:$0xff] }
0x29a9   :  { %13785 = vmatprep.mubr.msk.f32.mxu1 %vm14945_vm1, %v14944_v36 }
0x2a73   :  { %v5402_v20 = vpop.f32.mrb[28].mxu0 }
0x2a74   :  { %v13762_v38 = vpop.f32.mrb[29].mxu0  ;;  %13770 = vmatprep.mubr.msk.f32.mxu0 %vm196_vm2, %v5402_v20  ;;  %v12672_v20 = vld [vmem:[%s16900_s11 + $0x108] sm:$0xff] }
0x2a75   :  { %v14427_v38 = vpack.c.bf16 %v12672_v20, %v12671_v37 }
0x2a77   :  { %v5478_v44 = vpop.f32.mrb[76].mxu1 }
0x2a78   :  { %v13767_v46 = vpop.f32.mrb[77].mxu1  ;;  %13771 = vmatmul.mubr.msk.f32.vlgmr.msra.gmra.mrb[26].mxu0 %vm196_vm2, %v5478_v44 }
0x2a79   :  { %13779 = vmatpush3.xpose.msk.msra.mxu0 %vm196_vm2, %v5648_v1  ;;  %13780 = vmatprep.mubr.msk.f32.mxu0 %vm14945_vm1, %v14944_v36  ;;  %v12666_v1 = vld [vmem:[%s16898_s9 + $0x58] sm:$0xff] }
0x2a7a   :  { %13788 = vmatprep.subr.mxu0 %v14944_v36  ;;  %v14423_v35 = vpack.c.bf16 %v12666_v1, %v12665_v17 }
0x2a7b   :  { %v5641_v48 = vpop.f32.mrb[78].mxu1 }
0x2a7c   :  { %v5642_v49 = vadd.f32 %v5641_v48, %v15104_v50  ;;  %v13777_v51 = vpop.f32.mrb[79].mxu1  ;;  %13781 = vmatmul.mubr.msk.f32.vlgmr.msra.gmra.mrb[30].mxu0 %vm196_vm2, %v5646_v47 }
0x2a7d   :  { %13790 = vmatprep.mubr.msk.f32.mxu0 %vm14945_vm1, %v14944_v36 }
0x2a7e   :  { %v5723_v52 = vsel %vm196_vm2, %v5642_v49, -inf }
0x2a7f   :  { %5724 = vmax.xlane.f32.xlu0 %v5723_v52 }
0x2b0c   :  { %v5725_v54 = vpop.xlane.xlu0 %5724 }
0x2b0d   :  { %v5729_v14 = vsub.f32 %v5642_v49, %v5725_v54  ;;  %v12661_v54 = vld [vmem:[%s16896_s7 + $0x2] ss:$0 sm:$0xff] }
0x2b0f   :  { %v5731_v56 = vmul.f32 1.442695, %v5729_v14 }
0x2b11   :  { %14772 = vpow2.f32 %v5731_v56 }
0x2b1b   :  { %v14773_v60 = vpop.eup %14772 }
0x2b1c   :  { %v5735_v42 = vsel %vm196_vm2, %v14773_v60, 0.0 }
0x2b1d   :  { %5736 = vadd.xlane.f32.xlu0 %v5735_v42  ;;  %v12662_v42 = vld [vmem:[%s16897_s8 + $0x2] ss:$0 sm:$0xff] }
0x2b4f   :  { %v5719_v23 = vpop.f32.mrb[30].mxu0 }
0x2b50   :  { %v5720_v62 = vadd.f32 %v5719_v23, %v15104_v50  ;;  %v13782_v63 = vpop.f32.mrb[31].mxu0 }
0x2b52   :  { %v5726_v2 = vsel %vm196_vm2, %v5720_v62, -inf }
0x2b53   :  { %5727 = vmax.xlane.f32.xlu1 %v5726_v2 }
0x2b64   :  { %5821 = vrot.lane.b32.xlu1 %v15692_v55, %s16933_s23 }
0x2baa   :  { %v5737_v41 = vpop.xlane.xlu0 %5736 }
0x2be0   :  { %v5728_v57 = vpop.xlane.xlu1 %5727 }
0x2be1   :  { %v5730_v39 = vsub.f32 %v5720_v62, %v5728_v57  ;;  %v12673_v57 = vld [vmem:[%s16900_s11 + $0x110] sm:$0xff] }
0x2be3   :  { %v5733_v59 = vmul.f32 1.442695, %v5730_v39  ;;  %v12674_v39 = vld [vmem:[%s16900_s11 + $0x118] sm:$0xff] }
0x2be4   :  { %v5822_v43 = vpop.permute.xlu1 %5821 }
0x2be5   :  { %14774 = vpow2.f32 %v5733_v59  ;;  %13789 = vmatpush3.msra.mxu0 %v5822_v43  ;;  %v14431_v59 = vpack.c.bf16 %v12674_v39, %v12673_v57  ;;  %v12675_v43 = vld [vmem:[%s16900_s11 + $0x120] sm:$0xff] }
0x2be6   :  { %14776 = vrcp.f32 %v5737_v41  ;;  %13793 = vmatprep.subr.mxu0 %v12654_v9  ;;  %v12677_v41 = vld [vmem:[%s16900_s11 + $0x130] sm:$0xff]  ;;  %v12693_v39 = vld [vmem:[%s16892_s3 + $0x60] sm:$0xff] }
0x2bef   :  { %v14775_v3 = vpop.eup %14774 }
0x2bf0   :  { %v5738_v4 = vsel %vm196_vm2, %v14775_v3, 0.0  ;;  %v14777_v6 = vpop.eup %14776 }
0x2bf1   :  { %5739 = vadd.xlane.f32.xlu0 %v5738_v4  ;;  %v5742_v55 = vmul.f32 %v14777_v6, %v14773_v60 }
0x2c07   :  { %5745 = vrot.lane.b32.xlu0 %v15694_v58, %s16933_s23 }
0x2c7e   :  { %v5740_v5 = vpop.xlane.xlu0 %5739 }
0x2c7f   :  { %14778 = vrcp.f32 %v5740_v5  ;;  %v12678_v5 = vld [vmem:[%s16900_s11 + $0x138] sm:$0xff] }
0x2c80   :  { %v14439_v6 = vpack.c.bf16 %v12678_v5, %v12677_v41 }
0x2c82   :  { %v5746_v7 = vpop.permute.xlu0 %5745 }
0x2c83   :  { %13784 = vmatpush3.msra.mxu1 %v5746_v7  ;;  %v12679_v7 = vld [vmem:[%s16900_s11 + $0x140] sm:$0xff] }
0x2c84   :  { %13786 = vmatmul.mubr.msk.f32.vlgmr.msra.gmra.mrb[80].mxu1 %vm196_vm2, %v5742_v55  ;;  %14420 = vmatprep.subr.bf16.mxu1 %v14419_v29  ;;  %v12680_v55 = vld [vmem:[%s16900_s11 + $0x148] sm:$0xff] }
0x2c85   :  { %14422 = vmatpush3.bf16.msra.mxu1 %v14419_v29 }
0x2c86   :  { %14424 = vmatprep.subr.bf16.mxu1 %v14423_v35 }
0x2c89   :  { %v14779_v40 = vpop.eup %14778  ;;  %14426 = vmatpush3.bf16.msra.mxu1 %v14423_v35 }
0x2c8a   :  { %v5744_v8 = vmul.f32 %v14779_v40, %v14775_v3  ;;  %v12676_v3 = vld [vmem:[%s16900_s11 + $0x128] sm:$0xff]  ;;  %v14443_v40 = vpack.c.bf16 %v12680_v55, %v12679_v7 }
0x2c8b   :  { %v14435_v4 = vpack.c.bf16 %v12676_v3, %v12675_v43  ;;  %v12695_v43 = vld [vmem:[%s16892_s3 + $0x70] sm:$0xff] }
0x2c8c   :  { %13791 = vmatmul.mubr.msk.f32.vlgmr.msra.gmra.mrb[32].mxu0 %vm196_vm2, %v5744_v8  ;;  %v12681_v8 = vld [vmem:[%s16900_s11 + $0x150] sm:$0xff] }
0x2c8d   :  { %13794 = vmatpush3.msra.mxu0 %v12654_v9  ;;  %v12682_v9 = vld [vmem:[%s16900_s11 + $0x158] sm:$0xff] }
0x2c8e   :  { %14428 = vmatprep.subr.bf16.mxu0 %v14427_v38 }
0x2d57   :  { %v5817_v58 = vpop.f32.mrb[80].mxu1 }
0x2d58   :  { %v13787_v10 = vpop.f32.mrb[81].mxu1  ;;  %13795 = vmatprep.mubr.msk.f32.mxu0 %vm196_vm2, %v5817_v58  ;;  %v14447_v58 = vpack.c.bf16 %v12682_v9, %v12681_v8 }
0x2d59   :  { %v12683_v10 = vld [vmem:[%s16900_s11 + $0x160] sm:$0xff] }
0x2d5f   :  { %v5893_v15 = vpop.f32.mrb[32].mxu0 }
0x2d60   :  { %v13792_v16 = vpop.f32.mrb[33].mxu0  ;;  %13796 = vmatmul.mubr.msk.f32.vlgmr.msra.gmra.mrb[26].mxu0 %vm196_vm2, %v5893_v15  ;;  %v12684_v15 = vld [vmem:[%s16900_s11 + $0x168] sm:$0xff] }
0x2d61   :  { %14430 = vmatpush3.bf16.msra.mxu0 %v14427_v38  ;;  %v14451_v16 = vpack.c.bf16 %v12684_v15, %v12683_v10 }
0x2d62   :  { %14432 = vmatprep.subr.bf16.mxu0 %v14431_v59 }
0x2d65   :  { %14434 = vmatpush3.bf16.msra.mxu0 %v14431_v59  ;;  %v12694_v59 = vld [vmem:[%s16892_s3 + $0x68] sm:$0xff] }
0x2d66   :  { %14436 = vmatprep.subr.bf16.mxu0 %v14435_v4  ;;  %v14459_v3 = vpack.c.bf16 %v12694_v59, %v12693_v39 }
0x2d68   :  { %14460 = vmatprep.subr.bf16.mxu1 %v14459_v3 }
0x2d69   :  { %14438 = vmatpush3.bf16.msra.mxu0 %v14435_v4  ;;  %v12696_v4 = vld [vmem:[%s16892_s3 + $0x78] sm:$0xff] }
0x2d6a   :  { %14440 = vmatprep.subr.bf16.mxu0 %v14439_v6  ;;  %v14463_v41 = vpack.c.bf16 %v12696_v4, %v12695_v43 }
0x2d6d   :  { %14442 = vmatpush3.bf16.msra.mxu0 %v14439_v6 }
0x2d6e   :  { %14444 = vmatprep.subr.bf16.mxu0 %v14443_v40 }
0x2d71   :  { %14446 = vmatpush3.bf16.msra.mxu0 %v14443_v40 }
0x2d72   :  { %14448 = vmatprep.subr.bf16.mxu0 %v14447_v58 }
0x2d75   :  { %14450 = vmatpush3.bf16.msra.mxu0 %v14447_v58  ;;  %v12691_v58 = vld [vmem:[%s16890_s1 + $0x3] ss:$0 sm:$0xff] }
0x2d76   :  { %14452 = vmatprep.subr.bf16.mxu0 %v14451_v16 }
0x2d79   :  { %14454 = vmatpush3.bf16.msra.mxu0 %v14451_v16 }
0x2e33   :  { %v13797_v18 = vpop.f32.mrb[26].mxu0 }
0x2e34   :  { %v5983_v0 = vadd.f32 %v13797_v18, %v15653_v11  ;;  %v5971_v45 = vpop.f32.mrb[27].mxu0  ;;  %v12685_v18 = vld [vmem:[%s16900_s11 + $0x170] sm:$0xff] }
0x2e35   :  { %v5982_v24 = vadd.f32 %v5971_v45, %v15656_v12  ;;  %v12668_v45 = vld [vmem:[%s16899_s10 + $0x2] ss:$0 sm:$0xff] }
0x2e36   :  { %v15869_v13 = vadd.f32 %v12658_v22, %v5983_v0 }
0x2e37   :  { %v15871_v25 = vadd.f32 %v12658_v22, %v5982_v24  ;;  %v12686_v22 = vld [vmem:[%s16900_s11 + $0x178] sm:$0xff] }
0x2e38   :  { %v6001_v26 = vsel %vm55_vm0, %v15869_v13, 0.0  ;;  %v14455_v0 = vpack.c.bf16 %v12686_v22, %v12685_v18  ;;  %v12692_v18 = vld [vmem:[%s16891_s2 + $0x3] ss:$0 sm:$0xff] }
0x2e39   :  { %6002 = vadd.xlane.f32.xlu0 %v6001_v26  ;;  %v5998_v53 = vsel %vm55_vm0, %v15871_v25, 0.0 }
0x2e3a   :  { %5999 = vadd.xlane.f32.xlu1 %v5998_v53  ;;  %14456 = vmatprep.subr.bf16.mxu0 %v14455_v0 }
0x2e3b   :  { %14458 = vmatpush3.bf16.msra.mxu0 %v14455_v0 }
0x2e3c   :  { %13885 = vmatprep.subr.mxu0 %v14944_v36 }
0x2ec6   :  { %v6003_v19 = vpop.xlane.xlu0 %6002 }
0x2ec7   :  { %v6005_v27 = vmul.f32 0.03125, %v6003_v19  ;;  %v6000_v28 = vpop.xlane.xlu1 %5999 }
0x2ec8   :  { %v6004_v30 = vmul.f32 0.03125, %v6000_v28 }
0x2ec9   :  { %v6007_v11 = vsub.f32 %v15869_v13, %v6005_v27 }
0x2eca   :  { %v6006_v12 = vsub.f32 %v15871_v25, %v6004_v30 }
0x2ecb   :  { %v6009_v31 = vmul.f32 %v6007_v11, %v6007_v11 }
0x2ecc   :  { %v6008_v61 = vmul.f32 %v6006_v12, %v6006_v12 }
0x2ecd   :  { %v6013_v32 = vsel %vm55_vm0, %v6009_v31, 0.0 }
0x2ece   :  { %6014 = vadd.xlane.f32.xlu1 %v6013_v32  ;;  %v6010_v33 = vsel %vm55_vm0, %v6008_v61, 0.0 }
0x2ecf   :  { %6011 = vadd.xlane.f32.xlu0 %v6010_v33 }
0x2f5b   :  { %v6015_v44 = vpop.xlane.xlu1 %6014 }
0x2f5c   :  { %v6017_v46 = vmul.f32 0.03125, %v6015_v44  ;;  %v6012_v47 = vpop.xlane.xlu0 %6011  ;;  %v12688_v44 = vld [vmem:[%s16901_s12 + $0x2] ss:$0 sm:$0xff] }
0x2f5d   :  { %v6016_v48 = vmul.f32 0.03125, %v6012_v47 }
0x2f5e   :  { %v6019_v49 = vadd.f32 1e-05, %v6017_v46 }
0x2f5f   :  { %v6018_v51 = vadd.f32 1e-05, %v6016_v48 }
0x2f60   :  { %14780 = vrsqrt.f32 %v6019_v49 }
0x2f61   :  { %14782 = vrsqrt.f32 %v6018_v51 }
0x2f6a   :  { %v14781_v52 = vpop.eup %14780 }
0x2f6b   :  { %v14783_v14 = vpop.eup %14782  ;;  %v6023_v56 = vmul.f32 %v14781_v52, %v6007_v11 }
0x2f6c   :  { %v6022_v60 = vmul.f32 %v14783_v14, %v6006_v12 }
0x2f6d   :  { %v6031_v23 = vmul.f32 %v12661_v54, %v6023_v56 }
0x2f6e   :  { %v6030_v62 = vmul.f32 %v12661_v54, %v6022_v60 }
0x2f6f   :  { %v6039_v2 = vadd.f32 %v12662_v42, %v6031_v23 }
0x2f70   :  { %v6038_v63 = vadd.f32 %v12662_v42, %v6030_v62 }
0x2f72   :  { %13806 = vmatprep.mubr.msk.f32.mxu1 %vm55_vm0, %v6038_v63 }
0x2f73   :  { %13807 = vmatmul.mubr.msk.f32.vlgmr.msra.gmra.mrb[82].mxu1 %vm55_vm0, %v6039_v2 }
0x2f74   :  { %14462 = vmatpush3.bf16.msra.mxu1 %v14459_v3 }
0x2f75   :  { %14464 = vmatprep.subr.bf16.mxu1 %v14463_v41 }
0x2f78   :  { %14466 = vmatpush3.bf16.msra.mxu1 %v14463_v41 }
0x2f79   :  { %13855 = vmatprep.subr.mxu1 %v14944_v36 }
0x3046   :  { %v13808_v24 = vpop.f32.mrb[82].mxu1 }
0x3047   :  { %v6131_v26 = vadd.f32 %v13808_v24, %v12668_v45  ;;  %v6125_v53 = vpop.f32.mrb[83].mxu1 }
0x3048   :  { %v6126_v19 = vadd.f32 %v12668_v45, %v6125_v53 }
0x3049   :  { %v6137_v27 = vmul.f32 0.044715, %v6131_v26  ;;  %v6135_v37 = vmul.f32 0.5, %v6131_v26 }
0x304a   :  { %v6136_v28 = vmul.f32 0.044715, %v6126_v19  ;;  %v6134_v1 = vmul.f32 0.5, %v6126_v19 }
0x304b   :  { %v6139_v30 = vmul.f32 %v6137_v27, %v6131_v26 }
0x304c   :  { %v6138_v11 = vmul.f32 %v6136_v28, %v6126_v19 }
0x304d   :  { %v6141_v12 = vmul.f32 %v6139_v30, %v6131_v26 }
0x304e   :  { %v6140_v31 = vmul.f32 %v6138_v11, %v6126_v19 }
0x304f   :  { %v6143_v61 = vadd.f32 %v6141_v12, %v6131_v26  ;;  %v12698_v26 = vld [vmem:[%s16893_s4 + $0x3] ss:$0 sm:$0xff] }
0x3050   :  { %v6142_v32 = vadd.f32 %v6140_v31, %v6126_v19 }
0x3051   :  { %v6145_v33 = vmul.f32 0.7978846, %v6143_v61 }
0x3052   :  { %v6144_v34 = vmul.f32 0.7978846, %v6142_v32 }
0x3053   :  { %14784 = vtanh.f32 %v6145_v33 }
0x3054   :  { %14786 = vtanh.f32 %v6144_v34 }
0x305d   :  { %v14785_v21 = vpop.eup %14784 }
0x305e   :  { %v14787_v17 = vpop.eup %14786  ;;  %v6149_v29 = vadd.f32 1.0, %v14785_v21 }
0x305f   :  { %v6148_v35 = vadd.f32 1.0, %v14787_v17 }
0x3060   :  { %v6151_v38 = vmul.f32 %v6149_v29, %v6135_v37 }
0x3061   :  { %v6150_v20 = vmul.f32 %v6148_v35, %v6134_v1 }
0x3063   :  { %13841 = vmatprep.mubr.f32.mxu0 %v6150_v20 }
0x3064   :  { %13842 = vmatmul.mubr.f32.vlgmr.msra.gmra.mrb[34].mxu0 %v6151_v38 }
0x3065   :  { %13887 = vmatprep.mubr.msk.f32.mxu0 %vm14945_vm1, %v14944_v36 }
0x3137   :  { %v13843_v46 = vpop.f32.mrb[34].mxu0 }
0x3138   :  { %v6249_v47 = vadd.f32 %v13843_v46, %v12688_v44  ;;  %v6243_v48 = vpop.f32.mrb[35].mxu0 }
0x3139   :  { %v6244_v49 = vadd.f32 %v12688_v44, %v6243_v48 }
0x313a   :  { %v15959_v51 = vadd.f32 %v6249_v47, %v15869_v13 }
0x313b   :  { %v15962_v52 = vadd.f32 %v6244_v49, %v15871_v25 }
0x313c   :  { %v6261_v54 = vsel %vm55_vm0, %v15959_v51, 0.0 }
0x313d   :  { %6262 = vadd.xlane.f32.xlu1 %v6261_v54  ;;  %v6258_v14 = vsel %vm55_vm0, %v15962_v52, 0.0 }
0x313e   :  { %6259 = vadd.xlane.f32.xlu0 %v6258_v14 }
0x31ca   :  { %v6263_v56 = vpop.xlane.xlu1 %6262 }
0x31cb   :  { %v6265_v60 = vmul.f32 0.03125, %v6263_v56  ;;  %v6260_v42 = vpop.xlane.xlu0 %6259 }
0x31cc   :  { %v6264_v23 = vmul.f32 0.03125, %v6260_v42 }
0x31cd   :  { %v6267_v62 = vsub.f32 %v15959_v51, %v6265_v60 }
0x31ce   :  { %v6266_v13 = vsub.f32 %v15962_v52, %v6264_v23 }
0x31cf   :  { %v6269_v63 = vmul.f32 %v6267_v62, %v6267_v62 }
0x31d0   :  { %v6268_v2 = vmul.f32 %v6266_v13, %v6266_v13 }
0x31d1   :  { %v6273_v25 = vsel %vm55_vm0, %v6269_v63, 0.0 }
0x31d2   :  { %6274 = vadd.xlane.f32.xlu1 %v6273_v25  ;;  %v6270_v57 = vsel %vm55_vm0, %v6268_v2, 0.0 }
0x31d3   :  { %6271 = vadd.xlane.f32.xlu0 %v6270_v57 }
0x325f   :  { %v6275_v5 = vpop.xlane.xlu1 %6274 }
0x3260   :  { %v6277_v6 = vmul.f32 0.03125, %v6275_v5  ;;  %v6272_v7 = vpop.xlane.xlu0 %6271 }
0x3261   :  { %v6276_v55 = vmul.f32 0.03125, %v6272_v7 }
0x3262   :  { %v6279_v40 = vadd.f32 1e-05, %v6277_v6 }
0x3263   :  { %v6278_v8 = vadd.f32 1e-05, %v6276_v55 }
0x3264   :  { %14788 = vrsqrt.f32 %v6279_v40 }
0x3265   :  { %14790 = vrsqrt.f32 %v6278_v8 }
0x326e   :  { %v14789_v9 = vpop.eup %14788 }
0x326f   :  { %v14791_v10 = vpop.eup %14790  ;;  %v6283_v15 = vmul.f32 %v14789_v9, %v6267_v62 }
0x3270   :  { %v6282_v16 = vmul.f32 %v14791_v10, %v6266_v13 }
0x3271   :  { %v6291_v22 = vmul.f32 %v12691_v58, %v6283_v15 }
0x3272   :  { %v6290_v0 = vmul.f32 %v12691_v58, %v6282_v16 }
0x3273   :  { %v6299_v24 = vadd.f32 %v12692_v18, %v6291_v22 }
0x3274   :  { %v6298_v45 = vadd.f32 %v12692_v18, %v6290_v0 }
0x3276   :  { %13852 = vmatprep.mubr.msk.f32.mxu1 %vm55_vm0, %v6298_v45 }
0x3277   :  { %13853 = vmatmul.mubr.msk.f32.vlgmr.msra.gmra.mrb[84].mxu1 %vm55_vm0, %v6299_v24 }
0x3278   :  { %13857 = vmatprep.mubr.msk.f32.mxu1 %vm14945_vm1, %v14944_v36 }
0x334a   :  { %v13854_v53 = vpop.f32.mrb[84].mxu1 }
0x334b   :  { %v15998_v19 = vadd.f32 %v13854_v53, %v12698_v26  ;;  %v6385_v27 = vpop.f32.mrb[85].mxu1 }
0x334c   :  { %v16000_v28 = vadd.f32 %v12698_v26, %v6385_v27 }
0x334d   :  { %6475 = vrot.lane.b32.xlu1 %v15998_v19, %s16923_s25  ;;  %v16017_v31 = vmul.f32 0.35355338, %v15998_v19 }
0x334e   :  { %6397 = vrot.lane.b32.xlu0 %v16000_v28, %s16923_s25  ;;  %v16008_v11 = vmul.f32 0.35355338, %v16000_v28 }
0x33bf   :  { %v6476_v12 = vpop.permute.xlu1 %6475 }
0x33c0   :  { %v6398_v30 = vpop.permute.xlu0 %6397 }
0x33c1   :  { %13856 = vmatpush3.xpose.msk.msra.mxu1 %vm196_vm2, %v6398_v30 }
0x33c2   :  { %13860 = vmatprep.subr.mxu1 %v14944_v36 }
0x33c4   :  { %13858 = vmatmul.mubr.msk.f32.vlgmr.msra.gmra.mrb[86].mxu1 %vm196_vm2, %v16008_v11 }
0x33c5   :  { %13861 = vmatpush3.xpose.msk.msra.mxu1 %vm196_vm2, %v6476_v12  ;;  %13862 = vmatprep.mubr.msk.f32.mxu1 %vm14945_vm1, %v14944_v36 }
0x33c6   :  { %13865 = vmatprep.subr.mxu1 %v14944_v36 }
0x33c8   :  { %13863 = vmatmul.mubr.msk.f32.vlgmr.msra.gmra.mrb[88].mxu1 %vm196_vm2, %v16017_v31 }
0x33c9   :  { %13867 = vmatprep.mubr.msk.f32.mxu1 %vm14945_vm1, %v14944_v36 }
0x3497   :  { %v6470_v61 = vpop.f32.mrb[86].mxu1 }
0x3498   :  { %v6471_v32 = vadd.f32 %v6470_v61, %v15104_v50  ;;  %v13859_v33 = vpop.f32.mrb[87].mxu1 }
0x349a   :  { %v6552_v34 = vsel %vm196_vm2, %v6471_v32, -inf }
0x349b   :  { %6553 = vmax.xlane.f32.xlu1 %v6552_v34  ;;  %v6548_v21 = vpop.f32.mrb[88].mxu1 }
0x349c   :  { %v6549_v17 = vadd.f32 %v6548_v21, %v15104_v50  ;;  %v13864_v29 = vpop.f32.mrb[89].mxu1 }
0x349e   :  { %v6555_v1 = vsel %vm196_vm2, %v6549_v17, -inf }
0x349f   :  { %6556 = vmax.xlane.f32.xlu0 %v6555_v1 }
0x34ac   :  { %6650 = vrot.lane.b32.xlu1 %v15998_v19, %s16921_s26 }
0x34b0   :  { %6730 = vrot.lane.b32.xlu1 %v16000_v28, %s16937_s24 }
0x34b4   :  { %6728 = vrot.lane.b32.xlu1 %v16008_v11, %s16938_s29 }
0x3528   :  { %v6554_v35 = vpop.xlane.xlu1 %6553 }
0x3529   :  { %v6558_v37 = vsub.f32 %v6471_v32, %v6554_v35 }
0x352b   :  { %v6560_v20 = vmul.f32 1.442695, %v6558_v37 }
0x352c   :  { %v6557_v38 = vpop.xlane.xlu0 %6556  ;;  %v6651_v14 = vpop.permute.xlu1 %6650 }
0x352d   :  { %14792 = vpow2.f32 %v6560_v20  ;;  %v6559_v44 = vsub.f32 %v6549_v17, %v6557_v38 }
0x352f   :  { %v6562_v46 = vmul.f32 1.442695, %v6559_v44 }
0x3530   :  { %v6731_v56 = vpop.permute.xlu1 %6730 }
0x3531   :  { %14794 = vpow2.f32 %v6562_v46 }
0x3534   :  { %v6729_v60 = vpop.permute.xlu1 %6728 }
0x3537   :  { %v14793_v47 = vpop.eup %14792 }
0x3538   :  { %v6564_v48 = vsel %vm196_vm2, %v14793_v47, 0.0 }
0x3539   :  { %6565 = vadd.xlane.f32.xlu0 %v6564_v48 }
0x353b   :  { %v14795_v49 = vpop.eup %14794 }
0x353c   :  { %v6567_v54 = vsel %vm196_vm2, %v14795_v49, 0.0 }
0x353d   :  { %6568 = vadd.xlane.f32.xlu1 %v6567_v54 }
0x354e   :  { %6806 = vrot.lane.b32.xlu1 %v16017_v31, %s16938_s29 }
0x354f   :  { %6574 = vrot.lane.b32.xlu0 %v16000_v28, %s16921_s26 }
0x3552   :  { %7224 = vrot.lane.b32.xlu1 %v16000_v28, %s16939_s30 }
0x3553   :  { %6808 = vrot.lane.b32.xlu0 %v15998_v19, %s16937_s24 }
0x35c6   :  { %v6566_v42 = vpop.xlane.xlu0 %6565 }
0x35c7   :  { %14796 = vrcp.f32 %v6566_v42 }
0x35ca   :  { %v6569_v23 = vpop.xlane.xlu1 %6568  ;;  %v6575_v62 = vpop.permute.xlu0 %6574 }
0x35cb   :  { %14798 = vrcp.f32 %v6569_v23  ;;  %13866 = vmatpush3.msra.mxu1 %v6575_v62 }
0x35cc   :  { %13870 = vmatprep.subr.mxu1 %v14944_v36 }
0x35ce   :  { %v6809_v57 = vpop.permute.xlu0 %6808  ;;  %v6807_v39 = vpop.permute.xlu1 %6806 }
0x35d1   :  { %v14797_v13 = vpop.eup %14796 }
0x35d2   :  { %v6571_v63 = vmul.f32 %v14797_v13, %v14793_v47  ;;  %v7225_v0 = vpop.permute.xlu1 %7224 }
0x35d4   :  { %13868 = vmatmul.mubr.msk.f32.vlgmr.msra.gmra.mrb[90].mxu1 %vm196_vm2, %v6571_v63 }
0x35d5   :  { %v14799_v2 = vpop.eup %14798  ;;  %13871 = vmatpush3.msra.mxu1 %v6651_v14  ;;  %13872 = vmatprep.mubr.msk.f32.mxu1 %vm14945_vm1, %v14944_v36  ;;  %v12714_v14 = vld [vmem:[%s16894_s5 + $0x68] sm:$0xff] }
0x35d6   :  { %v6573_v25 = vmul.f32 %v14799_v2, %v14795_v49  ;;  %13875 = vmatprep.subr.mxu1 %v14944_v36 }
0x35d8   :  { %13873 = vmatmul.mubr.msk.f32.vlgmr.msra.gmra.mrb[92].mxu1 %vm196_vm2, %v6573_v25 }
0x35d9   :  { %13877 = vmatprep.mubr.msk.f32.mxu1 %vm14945_vm1, %v14944_v36 }
0x35dc   :  { %13876 = vmatpush3.xpose.msk.msra.mxu1 %vm196_vm2, %v6731_v56  ;;  %v12707_v56 = vld [vmem:[%s16894_s5 + $0x60] sm:$0xff] }
0x35dd   :  { %13880 = vmatprep.subr.mxu1 %v14944_v36 }
0x35df   :  { %13878 = vmatmul.mubr.msk.f32.vlgmr.msra.gmra.mrb[94].mxu1 %vm196_vm2, %v6729_v60 }
0x35e0   :  { %13881 = vmatpush3.xpose.msk.msra.mxu1 %vm196_vm2, %v6809_v57  ;;  %13882 = vmatprep.mubr.msk.f32.mxu1 %vm14945_vm1, %v14944_v36 }
0x35e1   :  { %13890 = vmatprep.subr.mxu1 %v14944_v36 }
0x35e3   :  { %13883 = vmatmul.mubr.msk.f32.vlgmr.msra.gmra.mrb[96].mxu1 %vm196_vm2, %v6807_v39 }
0x35e4   :  { %13892 = vmatprep.mubr.msk.f32.mxu1 %vm14945_vm1, %v14944_v36 }
0x36a7   :  { %v16062_v59 = vpop.f32.mrb[90].mxu1 }
0x36a8   :  { %v13869_v43 = vpop.f32.mrb[91].mxu1 }
0x36ab   :  { %v16064_v3 = vpop.f32.mrb[92].mxu1 }
0x36ac   :  { %v13874_v4 = vpop.f32.mrb[93].mxu1 }
0x36b2   :  { %v6802_v41 = vpop.f32.mrb[94].mxu1 }
0x36b3   :  { %v13879_v5 = vpop.f32.mrb[95].mxu1  ;;  %v6803_v18 = vadd.f32 %v6802_v41, %v15104_v50 }
0x36b4   :  { %v12725_v5 = vld [vmem:[%s16894_s5 + $0x70] sm:$0xff] }
0x36b5   :  { %v6884_v22 = vsel %vm196_vm2, %v6803_v18, -inf }
0x36b6   :  { %v6880_v6 = vpop.f32.mrb[96].mxu1 }
0x36b7   :  { %v6881_v7 = vadd.f32 %v6880_v6, %v15104_v50  ;;  %v13884_v55 = vpop.f32.mrb[97].mxu1 }
0x36b9   :  { %v6887_v40 = vsel %vm196_vm2, %v6881_v7, -inf }
0x36ba   :  { %6888 = vmax.xlane.f32.xlu0 %v6887_v40 }
0x36d0   :  { %6982 = vrot.lane.b32.xlu0 %v15998_v19, %s16934_s21 }
0x36d4   :  { %7222 = vrot.lane.b32.xlu0 %v16008_v11, %s16935_s22 }
0x36d8   :  { %7300 = vrot.lane.b32.xlu0 %v16017_v31, %s16935_s22 }
0x3747   :  { %v6889_v8 = vpop.xlane.xlu0 %6888 }
0x3748   :  { %v6891_v9 = vsub.f32 %v6881_v7, %v6889_v8 }
0x374a   :  { %v6894_v58 = vmul.f32 1.442695, %v6891_v9 }
0x374b   :  { %v6983_v10 = vpop.permute.xlu0 %6982 }
0x374c   :  { %14800 = vpow2.f32 %v6894_v58  ;;  %13891 = vmatpush3.msra.mxu1 %v6983_v10 }
0x374d   :  { %13905 = vmatprep.subr.mxu1 %v14944_v36 }
0x374f   :  { %v7223_v53 = vpop.permute.xlu0 %7222 }
0x3753   :  { %v7301_v30 = vpop.permute.xlu0 %7300 }
0x3756   :  { %v14801_v15 = vpop.eup %14800 }
0x3757   :  { %v6899_v16 = vsel %vm196_vm2, %v14801_v15, 0.0 }
0x3758   :  { %6900 = vadd.xlane.f32.xlu1 %v6899_v16 }
0x3769   :  { %7302 = vrot.lane.b32.xlu1 %v15998_v19, %s16939_s30 }
0x378d   :  { %6885 = vmax.xlane.f32.xlu1 %v6884_v22 }
0x37e5   :  { %v6901_v45 = vpop.xlane.xlu1 %6900 }
0x37e6   :  { %14802 = vrcp.f32 %v6901_v45 }
0x37e9   :  { %v7303_v27 = vpop.permute.xlu1 %7302 }
0x37f0   :  { %v14803_v24 = vpop.eup %14802 }
0x37f1   :  { %v6905_v26 = vmul.f32 %v14803_v24, %v14801_v15 }
0x37f3   :  { %13893 = vmatmul.mubr.msk.f32.vlgmr.msra.gmra.mrb[98].mxu1 %vm196_vm2, %v6905_v26 }
0x37f4   :  { %13906 = vmatpush3.xpose.msk.msra.mxu1 %vm196_vm2, %v7225_v0  ;;  %13907 = vmatprep.mubr.msk.f32.mxu1 %vm14945_vm1, %v14944_v36 }
0x37f5   :  { %13910 = vmatprep.subr.mxu1 %v14944_v36 }
0x37f7   :  { %13908 = vmatmul.mubr.msk.f32.vlgmr.msra.gmra.mrb[100].mxu1 %vm196_vm2, %v7223_v53 }
0x37f8   :  { %13911 = vmatpush3.xpose.msk.msra.mxu1 %vm196_vm2, %v7303_v27  ;;  %13912 = vmatprep.mubr.msk.f32.mxu1 %vm14945_vm1, %v14944_v36 }
0x37f9   :  { %13920 = vmatprep.subr.mxu1 %v14944_v36 }
0x37fb   :  { %13913 = vmatmul.mubr.msk.f32.vlgmr.msra.gmra.mrb[102].mxu1 %vm196_vm2, %v7301_v30 }
0x37fc   :  { %13922 = vmatprep.mubr.msk.f32.mxu1 %vm14945_vm1, %v14944_v36 }
0x381a   :  { %v6886_v12 = vpop.xlane.xlu1 %6885 }
0x381b   :  { %v6890_v61 = vsub.f32 %v6803_v18, %v6886_v12 }
0x381d   :  { %v6892_v32 = vmul.f32 1.442695, %v6890_v61 }
0x381f   :  { %14804 = vpow2.f32 %v6892_v32 }
0x3829   :  { %v14805_v33 = vpop.eup %14804 }
0x382a   :  { %v6896_v34 = vsel %vm196_vm2, %v14805_v33, 0.0 }
0x382b   :  { %6897 = vadd.xlane.f32.xlu0 %v6896_v34 }
0x3841   :  { %6906 = vrot.lane.b32.xlu0 %v16000_v28, %s16934_s21 }
0x3845   :  { %7476 = vrot.lane.b32.xlu0 %v15998_v19, %s16936_s15 }
0x3849   :  { %7639 = vrot.lane.b32.xlu0 %v16000_v28, %s16931_s18 }
0x384d   :  { %7717 = vrot.lane.b32.xlu0 %v15998_v19, %s16931_s18 }
0x3851   :  { %7637 = vrot.lane.b32.xlu0 %v16008_v11, %s16932_s19 }
0x38b8   :  { %v6898_v21 = vpop.xlane.xlu0 %6897 }
0x38b9   :  { %14806 = vrcp.f32 %v6898_v21 }
0x38bc   :  { %v6907_v17 = vpop.permute.xlu0 %6906 }
0x38bd   :  { %13886 = vmatpush3.msra.mxu0 %v6907_v17 }
0x38be   :  { %13895 = vmatprep.subr.mxu0 %v12714_v14 }
0x38c0   :  { %v7477_v29 = vpop.permute.xlu0 %7476 }
0x38c1   :  { %13921 = vmatpush3.msra.mxu1 %v7477_v29 }
0x38c2   :  { %13930 = vmatprep.subr.mxu1 %v14944_v36 }
0x38c3   :  { %v14807_v1 = vpop.eup %14806 }
0x38c4   :  { %v6903_v35 = vmul.f32 %v14807_v1, %v14805_v33  ;;  %v7640_v7 = vpop.permute.xlu0 %7639 }
0x38c6   :  { %13888 = vmatmul.mubr.msk.f32.vlgmr.msra.gmra.mrb[36].mxu0 %vm196_vm2, %v6903_v35  ;;  %v7054_v37 = vpop.f32.mrb[98].mxu1 }
0x38c7   :  { %v13894_v20 = vpop.f32.mrb[99].mxu1  ;;  %13896 = vmatpush3.msra.mxu0 %v12714_v14 }
0x38c8   :  { %13900 = vmatprep.subr.mxu0 %v12707_v56  ;;  %v7718_v40 = vpop.permute.xlu0 %7717 }
0x38ca   :  { %v7296_v38 = vpop.f32.mrb[100].mxu1 }
0x38cb   :  { %v7297_v44 = vadd.f32 %v7296_v38, %v15104_v50  ;;  %v13909_v46 = vpop.f32.mrb[101].mxu1 }
0x38cc   :  { %v7638_v9 = vpop.permute.xlu0 %7637 }
0x38cd   :  { %v7378_v11 = vsel %vm196_vm2, %v7297_v44, -inf }
0x38ce   :  { %7379 = vmax.xlane.f32.xlu1 %v7378_v11  ;;  %v7374_v47 = vpop.f32.mrb[102].mxu1 }
0x38cf   :  { %v7375_v48 = vadd.f32 %v7374_v47, %v15104_v50  ;;  %v13914_v49 = vpop.f32.mrb[103].mxu1 }
0x38d1   :  { %v7381_v54 = vsel %vm196_vm2, %v7375_v48, -inf }
0x38d2   :  { %7382 = vmax.xlane.f32.xlu1 %v7381_v54 }
0x395b   :  { %v7380_v60 = vpop.xlane.xlu1 %7379 }
0x395c   :  { %v7384_v42 = vsub.f32 %v7297_v44, %v7380_v60  ;;  %v12738_v60 = vld [vmem:[%s16895_s6 + $0x3] ss:$0 sm:$0xff] }
0x395e   :  { %v7386_v23 = vmul.f32 1.442695, %v7384_v42 }
0x395f   :  { %v7383_v62 = vpop.xlane.xlu1 %7382 }
0x3960   :  { %14808 = vpow2.f32 %v7386_v23  ;;  %v7385_v13 = vsub.f32 %v7375_v48, %v7383_v62  ;;  %v12734_v48 = vld [vmem:[%s16894_s5 + $0x78] sm:$0xff] }
0x3962   :  { %v7388_v63 = vmul.f32 1.442695, %v7385_v13 }
0x3964   :  { %14810 = vpow2.f32 %v7388_v63 }
0x396a   :  { %v14809_v2 = vpop.eup %14808 }
0x396b   :  { %v7390_v25 = vsel %vm196_vm2, %v14809_v2, 0.0 }
0x396c   :  { %7391 = vadd.xlane.f32.xlu1 %v7390_v25 }
0x396e   :  { %v14811_v57 = vpop.eup %14810 }
0x396f   :  { %v7393_v39 = vsel %vm196_vm2, %v14811_v57, 0.0 }
0x3970   :  { %7394 = vadd.xlane.f32.xlu1 %v7393_v39 }
0x3981   :  { %7400 = vrot.lane.b32.xlu1 %v16000_v28, %s16936_s15 }
0x3985   :  { %7715 = vrot.lane.b32.xlu1 %v16017_v31, %s16932_s19 }
0x3999   :  { %v6978_v43 = vpop.f32.mrb[36].mxu0 }
0x399a   :  { %v13889_v4 = vpop.f32.mrb[37].mxu0  ;;  %13897 = vmatprep.mubr.msk.f32.mxu0 %vm196_vm2, %v6978_v43 }
0x399b   :  { %13898 = vmatmul.mubr.msk.f32.vlgmr.msra.gmra.mrb[38].mxu0 %vm196_vm2, %v7054_v37 }
0x399c   :  { %13902 = vmatprep.mubr.msk.f32.mxu0 %vm196_vm2, %v16062_v59  ;;  %13901 = vmatpush3.msra.mxu0 %v12707_v56 }
0x399d   :  { %13915 = vmatprep.subr.mxu0 %v14944_v36 }
0x39a3   :  { %13903 = vmatmul.mubr.msk.f32.vlgmr.msra.gmra.mrb[38].mxu0 %vm196_vm2, %v16064_v3 }
0x39a4   :  { %13917 = vmatprep.mubr.msk.f32.mxu0 %vm14945_vm1, %v14944_v36 }
0x39f9   :  { %v7392_v41 = vpop.xlane.xlu1 %7391 }
0x39fa   :  { %14812 = vrcp.f32 %v7392_v41 }
0x39fd   :  { %v7395_v31 = vpop.xlane.xlu1 %7394 }
0x39fe   :  { %14814 = vrcp.f32 %v7395_v31 }
0x3a01   :  { %v7401_v6 = vpop.permute.xlu1 %7400 }
0x3a02   :  { %13916 = vmatpush3.msra.mxu0 %v7401_v6 }
0x3a03   :  { %13925 = vmatprep.subr.mxu0 %v12725_v5 }
0x3a04   :  { %v14813_v59 = vpop.eup %14812 }
0x3a05   :  { %v7397_v55 = vmul.f32 %v14813_v59, %v14809_v2  ;;  %v7716_v18 = vpop.permute.xlu1 %7715  ;;  %v12744_v59 = vld [vmem:[%s16898_s9 + $0x68] sm:$0xff] }
0x3a07   :  { %13918 = vmatmul.mubr.msk.f32.vlgmr.msra.gmra.mrb[40].mxu0 %vm196_vm2, %v7397_v55 }
0x3a08   :  { %v14815_v3 = vpop.eup %14814  ;;  %13926 = vmatpush3.msra.mxu0 %v12725_v5 }
0x3a09   :  { %v7399_v8 = vmul.f32 %v14815_v3, %v14811_v57  ;;  %13935 = vmatprep.subr.mxu0 %v14944_v36  ;;  %v12745_v3 = vld [vmem:[%s16898_s9 + $0x70] sm:$0xff] }
0x3a0b   :  { %13923 = vmatmul.mubr.msk.f32.vlgmr.msra.gmra.mrb[104].mxu1 %vm196_vm2, %v7399_v8 }
0x3a0c   :  { %13931 = vmatpush3.xpose.msk.msra.mxu1 %vm196_vm2, %v7640_v7  ;;  %13932 = vmatprep.mubr.msk.f32.mxu1 %vm14945_vm1, %v14944_v36  ;;  %v12743_v7 = vld [vmem:[%s16898_s9 + $0x60] sm:$0xff] }
0x3a0d   :  { %13940 = vmatprep.subr.mxu1 %v14944_v36  ;;  %v14467_v55 = vpack.c.bf16 %v12744_v59, %v12743_v7 }
0x3a0f   :  { %13933 = vmatmul.mubr.msk.f32.vlgmr.msra.gmra.mrb[106].mxu1 %vm196_vm2, %v7638_v9  ;;  %v12751_v9 = vld [vmem:[%s16900_s11 + $0x180] sm:$0xff] }
0x3a10   :  { %13942 = vmatprep.mubr.msk.f32.mxu1 %vm14945_vm1, %v14944_v36 }
0x3ada   :  { %v7472_v58 = vpop.f32.mrb[40].mxu0 }
0x3adb   :  { %v13919_v10 = vpop.f32.mrb[41].mxu0  ;;  %13927 = vmatprep.mubr.msk.f32.mxu0 %vm196_vm2, %v7472_v58  ;;  %v12752_v58 = vld [vmem:[%s16900_s11 + $0x188] sm:$0xff] }
0x3adc   :  { %v14475_v10 = vpack.c.bf16 %v12752_v58, %v12751_v9 }
0x3ade   :  { %v7548_v15 = vpop.f32.mrb[104].mxu1 }
0x3adf   :  { %v13924_v16 = vpop.f32.mrb[105].mxu1  ;;  %13928 = vmatmul.mubr.msk.f32.vlgmr.msra.gmra.mrb[38].mxu0 %vm196_vm2, %v7548_v15 }
0x3ae0   :  { %13936 = vmatpush3.xpose.msk.msra.mxu0 %vm196_vm2, %v7718_v40  ;;  %13937 = vmatprep.mubr.msk.f32.mxu0 %vm14945_vm1, %v14944_v36  ;;  %v12746_v40 = vld [vmem:[%s16898_s9 + $0x78] sm:$0xff] }
0x3ae1   :  { %13945 = vmatprep.subr.mxu0 %v14944_v36  ;;  %v14471_v8 = vpack.c.bf16 %v12746_v40, %v12745_v3 }
0x3ae2   :  { %v7711_v22 = vpop.f32.mrb[106].mxu1 }
0x3ae3   :  { %v7712_v0 = vadd.f32 %v7711_v22, %v15104_v50  ;;  %v13934_v45 = vpop.f32.mrb[107].mxu1  ;;  %13938 = vmatmul.mubr.msk.f32.vlgmr.msra.gmra.mrb[42].mxu0 %vm196_vm2, %v7716_v18 }
0x3ae4   :  { %13947 = vmatprep.mubr.msk.f32.mxu0 %vm14945_vm1, %v14944_v36 }
0x3ae5   :  { %v7793_v24 = vsel %vm196_vm2, %v7712_v0, -inf }
0x3ae6   :  { %7794 = vmax.xlane.f32.xlu0 %v7793_v24 }
0x3b73   :  { %v7795_v26 = vpop.xlane.xlu0 %7794 }
0x3b74   :  { %v7799_v53 = vsub.f32 %v7712_v0, %v7795_v26  ;;  %v12741_v26 = vld [vmem:[%s16896_s7 + $0x3] ss:$0 sm:$0xff] }
0x3b76   :  { %v7801_v27 = vmul.f32 1.442695, %v7799_v53 }
0x3b78   :  { %14816 = vpow2.f32 %v7801_v27 }
0x3b82   :  { %v14817_v30 = vpop.eup %14816 }
0x3b83   :  { %v7805_v12 = vsel %vm196_vm2, %v14817_v30, 0.0 }
0x3b84   :  { %7806 = vadd.xlane.f32.xlu0 %v7805_v12  ;;  %v12742_v12 = vld [vmem:[%s16897_s8 + $0x3] ss:$0 sm:$0xff] }
0x3bb6   :  { %v7789_v61 = vpop.f32.mrb[42].mxu0 }
0x3bb7   :  { %v7790_v32 = vadd.f32 %v7789_v61, %v15104_v50  ;;  %v13939_v33 = vpop.f32.mrb[43].mxu0 }
0x3bb9   :  { %v7796_v34 = vsel %vm196_vm2, %v7790_v32, -inf }
0x3bba   :  { %7797 = vmax.xlane.f32.xlu1 %v7796_v34 }
0x3bcb   :  { %7891 = vrot.lane.b32.xlu1 %v15998_v19, %s16933_s23 }
0x3c11   :  { %v7807_v20 = vpop.xlane.xlu0 %7806 }
0x3c47   :  { %v7798_v21 = vpop.xlane.xlu1 %7797 }
0x3c48   :  { %v7800_v17 = vsub.f32 %v7790_v32, %v7798_v21  ;;  %v12753_v21 = vld [vmem:[%s16900_s11 + $0x190] sm:$0xff] }
0x3c4a   :  { %v7803_v29 = vmul.f32 1.442695, %v7800_v17  ;;  %v12754_v17 = vld [vmem:[%s16900_s11 + $0x198] sm:$0xff] }
0x3c4b   :  { %v7892_v1 = vpop.permute.xlu1 %7891 }
0x3c4c   :  { %14818 = vpow2.f32 %v7803_v29  ;;  %13946 = vmatpush3.msra.mxu0 %v7892_v1  ;;  %v14479_v29 = vpack.c.bf16 %v12754_v17, %v12753_v21  ;;  %v12755_v1 = vld [vmem:[%s16900_s11 + $0x1a0] sm:$0xff] }
0x3c4d   :  { %14820 = vrcp.f32 %v7807_v20  ;;  %13950 = vmatprep.subr.mxu0 %v12734_v48  ;;  %v12757_v20 = vld [vmem:[%s16900_s11 + $0x1b0] sm:$0xff]  ;;  %v12773_v17 = vld [vmem:[%s16892_s3 + $0x80] sm:$0xff] }
0x3c56   :  { %v14819_v35 = vpop.eup %14818 }
0x3c57   :  { %v7808_v37 = vsel %vm196_vm2, %v14819_v35, 0.0  ;;  %v14821_v44 = vpop.eup %14820 }
0x3c58   :  { %7809 = vadd.xlane.f32.xlu0 %v7808_v37  ;;  %v7812_v19 = vmul.f32 %v14821_v44, %v14817_v30 }
0x3c6e   :  { %7815 = vrot.lane.b32.xlu0 %v16000_v28, %s16933_s23 }
0x3ce5   :  { %v7810_v38 = vpop.xlane.xlu0 %7809 }
0x3ce6   :  { %14822 = vrcp.f32 %v7810_v38  ;;  %v12758_v38 = vld [vmem:[%s16900_s11 + $0x1b8] sm:$0xff] }
0x3ce7   :  { %v14487_v44 = vpack.c.bf16 %v12758_v38, %v12757_v20 }
0x3ce9   :  { %v7816_v46 = vpop.permute.xlu0 %7815 }
0x3cea   :  { %13941 = vmatpush3.msra.mxu1 %v7816_v46  ;;  %v12759_v46 = vld [vmem:[%s16900_s11 + $0x1c0] sm:$0xff] }
0x3ceb   :  { %13943 = vmatmul.mubr.msk.f32.vlgmr.msra.gmra.mrb[108].mxu1 %vm196_vm2, %v7812_v19  ;;  %14468 = vmatprep.subr.bf16.mxu1 %v14467_v55  ;;  %v12760_v19 = vld [vmem:[%s16900_s11 + $0x1c8] sm:$0xff] }
0x3cec   :  { %14470 = vmatpush3.bf16.msra.mxu1 %v14467_v55 }
0x3ced   :  { %14472 = vmatprep.subr.bf16.mxu1 %v14471_v8 }
0x3cf0   :  { %v14823_v11 = vpop.eup %14822  ;;  %14474 = vmatpush3.bf16.msra.mxu1 %v14471_v8 }
0x3cf1   :  { %v7814_v47 = vmul.f32 %v14823_v11, %v14819_v35  ;;  %v12756_v35 = vld [vmem:[%s16900_s11 + $0x1a8] sm:$0xff]  ;;  %v14491_v11 = vpack.c.bf16 %v12760_v19, %v12759_v46 }
0x3cf2   :  { %v14483_v37 = vpack.c.bf16 %v12756_v35, %v12755_v1  ;;  %v12775_v35 = vld [vmem:[%s16892_s3 + $0x90] sm:$0xff] }
0x3cf3   :  { %13948 = vmatmul.mubr.msk.f32.vlgmr.msra.gmra.mrb[44].mxu0 %vm196_vm2, %v7814_v47  ;;  %v12761_v47 = vld [vmem:[%s16900_s11 + $0x1d0] sm:$0xff] }
0x3cf4   :  { %13951 = vmatpush3.msra.mxu0 %v12734_v48  ;;  %v12762_v48 = vld [vmem:[%s16900_s11 + $0x1d8] sm:$0xff] }
0x3cf5   :  { %14476 = vmatprep.subr.bf16.mxu0 %v14475_v10 }
0x3dbe   :  { %v7887_v28 = vpop.f32.mrb[108].mxu1 }
0x3dbf   :  { %v13944_v49 = vpop.f32.mrb[109].mxu1  ;;  %13952 = vmatprep.mubr.msk.f32.mxu0 %vm196_vm2, %v7887_v28  ;;  %v14495_v28 = vpack.c.bf16 %v12762_v48, %v12761_v47 }
0x3dc0   :  { %v12763_v49 = vld [vmem:[%s16900_s11 + $0x1e0] sm:$0xff] }
0x3dc6   :  { %v7963_v54 = vpop.f32.mrb[44].mxu0 }
0x3dc7   :  { %v13949_v14 = vpop.f32.mrb[45].mxu0  ;;  %13953 = vmatmul.mubr.msk.f32.vlgmr.msra.gmra.mrb[38].mxu0 %vm196_vm2, %v7963_v54  ;;  %v12764_v54 = vld [vmem:[%s16900_s11 + $0x1e8] sm:$0xff] }
0x3dc8   :  { %14478 = vmatpush3.bf16.msra.mxu0 %v14475_v10  ;;  %v14499_v14 = vpack.c.bf16 %v12764_v54, %v12763_v49 }
0x3dc9   :  { %14480 = vmatprep.subr.bf16.mxu0 %v14479_v29 }
0x3dcc   :  { %14482 = vmatpush3.bf16.msra.mxu0 %v14479_v29  ;;  %v12774_v29 = vld [vmem:[%s16892_s3 + $0x88] sm:$0xff] }
0x3dcd   :  { %14484 = vmatprep.subr.bf16.mxu0 %v14483_v37  ;;  %v14507_v1 = vpack.c.bf16 %v12774_v29, %v12773_v17 }
0x3dcf   :  { %14508 = vmatprep.subr.bf16.mxu1 %v14507_v1 }
0x3dd0   :  { %14486 = vmatpush3.bf16.msra.mxu0 %v14483_v37  ;;  %v12776_v37 = vld [vmem:[%s16892_s3 + $0x98] sm:$0xff] }
0x3dd1   :  { %14488 = vmatprep.subr.bf16.mxu0 %v14487_v44  ;;  %v14511_v20 = vpack.c.bf16 %v12776_v37, %v12775_v35 }
0x3dd4   :  { %14490 = vmatpush3.bf16.msra.mxu0 %v14487_v44 }
0x3dd5   :  { %14492 = vmatprep.subr.bf16.mxu0 %v14491_v11 }
0x3dd8   :  { %14494 = vmatpush3.bf16.msra.mxu0 %v14491_v11 }
0x3dd9   :  { %14496 = vmatprep.subr.bf16.mxu0 %v14495_v28 }
0x3ddc   :  { %14498 = vmatpush3.bf16.msra.mxu0 %v14495_v28  ;;  %v12771_v28 = vld [vmem:[%s16890_s1 + $0x4] ss:$0 sm:$0xff] }
0x3ddd   :  { %14500 = vmatprep.subr.bf16.mxu0 %v14499_v14 }
0x3de0   :  { %14502 = vmatpush3.bf16.msra.mxu0 %v14499_v14 }
0x3e9a   :  { %v13954_v56 = vpop.f32.mrb[38].mxu0 }
0x3e9b   :  { %v8053_v42 = vadd.f32 %v13954_v56, %v15959_v51  ;;  %v8041_v23 = vpop.f32.mrb[39].mxu0  ;;  %v12765_v56 = vld [vmem:[%s16900_s11 + $0x1f0] sm:$0xff] }
0x3e9c   :  { %v8052_v62 = vadd.f32 %v8041_v23, %v15962_v52  ;;  %v12748_v23 = vld [vmem:[%s16899_s10 + $0x3] ss:$0 sm:$0xff] }
0x3e9d   :  { %v16175_v13 = vadd.f32 %v12738_v60, %v8053_v42 }
0x3e9e   :  { %v16177_v63 = vadd.f32 %v12738_v60, %v8052_v62  ;;  %v12766_v60 = vld [vmem:[%s16900_s11 + $0x1f8] sm:$0xff] }
0x3e9f   :  { %v8071_v2 = vsel %vm55_vm0, %v16175_v13, 0.0  ;;  %v14503_v42 = vpack.c.bf16 %v12766_v60, %v12765_v56  ;;  %v12772_v56 = vld [vmem:[%s16891_s2 + $0x4] ss:$0 sm:$0xff] }
0x3ea0   :  { %8072 = vadd.xlane.f32.xlu0 %v8071_v2  ;;  %v8068_v25 = vsel %vm55_vm0, %v16177_v63, 0.0 }
0x3ea1   :  { %8069 = vadd.xlane.f32.xlu1 %v8068_v25  ;;  %14504 = vmatprep.subr.bf16.mxu0 %v14503_v42 }
0x3ea2   :  { %14506 = vmatpush3.bf16.msra.mxu0 %v14503_v42 }
0x3ea3   :  { %14042 = vmatprep.subr.mxu0 %v14944_v36 }
0x3f2d   :  { %v8073_v57 = vpop.xlane.xlu0 %8072 }
0x3f2e   :  { %v8075_v39 = vmul.f32 0.03125, %v8073_v57  ;;  %v8070_v43 = vpop.xlane.xlu1 %8069 }
0x3f2f   :  { %v8074_v4 = vmul.f32 0.03125, %v8070_v43 }
0x3f30   :  { %v8077_v51 = vsub.f32 %v16175_v13, %v8075_v39 }
0x3f31   :  { %v8076_v52 = vsub.f32 %v16177_v63, %v8074_v4 }
0x3f32   :  { %v8079_v41 = vmul.f32 %v8077_v51, %v8077_v51 }
0x3f33   :  { %v8078_v31 = vmul.f32 %v8076_v52, %v8076_v52 }
0x3f34   :  { %v8083_v5 = vsel %vm55_vm0, %v8079_v41, 0.0 }
0x3f35   :  { %8084 = vadd.xlane.f32.xlu1 %v8083_v5  ;;  %v8080_v6 = vsel %vm55_vm0, %v8078_v31, 0.0 }
0x3f36   :  { %8081 = vadd.xlane.f32.xlu0 %v8080_v6 }
0x3fc2   :  { %v8085_v15 = vpop.xlane.xlu1 %8084 }
0x3fc3   :  { %v8087_v16 = vmul.f32 0.03125, %v8085_v15  ;;  %v8082_v18 = vpop.xlane.xlu0 %8081  ;;  %v12768_v15 = vld [vmem:[%s16901_s12 + $0x3] ss:$0 sm:$0xff] }
0x3fc4   :  { %v8086_v22 = vmul.f32 0.03125, %v8082_v18 }
0x3fc5   :  { %v8089_v0 = vadd.f32 1e-05, %v8087_v16 }
0x3fc6   :  { %v8088_v45 = vadd.f32 1e-05, %v8086_v22 }
0x3fc7   :  { %14824 = vrsqrt.f32 %v8089_v0 }
0x3fc8   :  { %14826 = vrsqrt.f32 %v8088_v45 }
0x3fd1   :  { %v14825_v24 = vpop.eup %14824 }
0x3fd2   :  { %v14827_v53 = vpop.eup %14826  ;;  %v8093_v27 = vmul.f32 %v14825_v24, %v8077_v51 }
0x3fd3   :  { %v8092_v30 = vmul.f32 %v14827_v53, %v8076_v52 }
0x3fd4   :  { %v8101_v61 = vmul.f32 %v12741_v26, %v8093_v27 }
0x3fd5   :  { %v8100_v32 = vmul.f32 %v12741_v26, %v8092_v30 }
0x3fd6   :  { %v8109_v34 = vadd.f32 %v12742_v12, %v8101_v61 }
0x3fd7   :  { %v8108_v33 = vadd.f32 %v12742_v12, %v8100_v32 }
0x3fd9   :  { %13963 = vmatprep.mubr.msk.f32.mxu1 %vm55_vm0, %v8108_v33 }
0x3fda   :  { %13964 = vmatmul.mubr.msk.f32.vlgmr.msra.gmra.mrb[110].mxu1 %vm55_vm0, %v8109_v34 }
0x3fdb   :  { %14510 = vmatpush3.bf16.msra.mxu1 %v14507_v1 }
0x3fdc   :  { %14512 = vmatprep.subr.bf16.mxu1 %v14511_v20 }
0x3fdf   :  { %14514 = vmatpush3.bf16.msra.mxu1 %v14511_v20 }
0x3fe0   :  { %14012 = vmatprep.subr.mxu1 %v14944_v36 }
0x40ad   :  { %v13965_v62 = vpop.f32.mrb[110].mxu1 }
0x40ae   :  { %v8201_v2 = vadd.f32 %v13965_v62, %v12748_v23  ;;  %v8195_v25 = vpop.f32.mrb[111].mxu1 }
0x40af   :  { %v8196_v57 = vadd.f32 %v12748_v23, %v8195_v25 }
0x40b0   :  { %v8207_v39 = vmul.f32 0.044715, %v8201_v2  ;;  %v8205_v9 = vmul.f32 0.5, %v8201_v2 }
0x40b1   :  { %v8206_v43 = vmul.f32 0.044715, %v8196_v57  ;;  %v8204_v40 = vmul.f32 0.5, %v8196_v57 }
0x40b2   :  { %v8209_v4 = vmul.f32 %v8207_v39, %v8201_v2 }
0x40b3   :  { %v8208_v51 = vmul.f32 %v8206_v43, %v8196_v57 }
0x40b4   :  { %v8211_v52 = vmul.f32 %v8209_v4, %v8201_v2 }
0x40b5   :  { %v8210_v41 = vmul.f32 %v8208_v51, %v8196_v57 }
0x40b6   :  { %v8213_v31 = vadd.f32 %v8211_v52, %v8201_v2  ;;  %v12778_v2 = vld [vmem:[%s16893_s4 + $0x4] ss:$0 sm:$0xff] }
0x40b7   :  { %v8212_v5 = vadd.f32 %v8210_v41, %v8196_v57 }
0x40b8   :  { %v8215_v6 = vmul.f32 0.7978846, %v8213_v31 }
0x40b9   :  { %v8214_v7 = vmul.f32 0.7978846, %v8212_v5 }
0x40ba   :  { %14828 = vtanh.f32 %v8215_v6 }
0x40bb   :  { %14830 = vtanh.f32 %v8214_v7 }
0x40c4   :  { %v14829_v59 = vpop.eup %14828 }
0x40c5   :  { %v14831_v55 = vpop.eup %14830  ;;  %v8219_v3 = vadd.f32 1.0, %v14829_v59 }
0x40c6   :  { %v8218_v8 = vadd.f32 1.0, %v14831_v55 }
0x40c7   :  { %v8221_v10 = vmul.f32 %v8219_v3, %v8205_v9 }
0x40c8   :  { %v8220_v58 = vmul.f32 %v8218_v8, %v8204_v40 }
0x40ca   :  { %13998 = vmatprep.mubr.f32.mxu0 %v8220_v58 }
0x40cb   :  { %13999 = vmatmul.mubr.f32.vlgmr.msra.gmra.mrb[46].mxu0 %v8221_v10 }
0x40cc   :  { %14044 = vmatprep.mubr.msk.f32.mxu0 %vm14945_vm1, %v14944_v36 }
0x419e   :  { %v14000_v16 = vpop.f32.mrb[46].mxu0 }
0x419f   :  { %v8319_v18 = vadd.f32 %v14000_v16, %v12768_v15  ;;  %v8313_v22 = vpop.f32.mrb[47].mxu0 }
0x41a0   :  { %v8314_v0 = vadd.f32 %v12768_v15, %v8313_v22 }
0x41a1   :  { %v16265_v45 = vadd.f32 %v8319_v18, %v16175_v13 }
0x41a2   :  { %v16268_v24 = vadd.f32 %v8314_v0, %v16177_v63 }
0x41a3   :  { %v8331_v26 = vsel %vm55_vm0, %v16265_v45, 0.0 }
0x41a4   :  { %8332 = vadd.xlane.f32.xlu1 %v8331_v26  ;;  %v8328_v53 = vsel %vm55_vm0, %v16268_v24, 0.0 }
0x41a5   :  { %8329 = vadd.xlane.f32.xlu0 %v8328_v53 }
0x4231   :  { %v8333_v27 = vpop.xlane.xlu1 %8332 }
0x4232   :  { %v8335_v30 = vmul.f32 0.03125, %v8333_v27  ;;  %v8330_v12 = vpop.xlane.xlu0 %8329 }
0x4233   :  { %v8334_v61 = vmul.f32 0.03125, %v8330_v12 }
0x4234   :  { %v8337_v32 = vsub.f32 %v16265_v45, %v8335_v30 }
0x4235   :  { %v8336_v13 = vsub.f32 %v16268_v24, %v8334_v61 }
0x4236   :  { %v8339_v33 = vmul.f32 %v8337_v32, %v8337_v32 }
0x4237   :  { %v8338_v34 = vmul.f32 %v8336_v13, %v8336_v13 }
0x4238   :  { %v8343_v63 = vsel %vm55_vm0, %v8339_v33, 0.0 }
0x4239   :  { %8344 = vadd.xlane.f32.xlu1 %v8343_v63  ;;  %v8340_v21 = vsel %vm55_vm0, %v8338_v34, 0.0 }
0x423a   :  { %8341 = vadd.xlane.f32.xlu0 %v8340_v21 }
0x42c6   :  { %v8345_v38 = vpop.xlane.xlu1 %8344 }
0x42c7   :  { %v8347_v44 = vmul.f32 0.03125, %v8345_v38  ;;  %v8342_v46 = vpop.xlane.xlu0 %8341 }
0x42c8   :  { %v8346_v19 = vmul.f32 0.03125, %v8342_v46 }
0x42c9   :  { %v8349_v11 = vadd.f32 1e-05, %v8347_v44 }
0x42ca   :  { %v8348_v47 = vadd.f32 1e-05, %v8346_v19 }
0x42cb   :  { %14832 = vrsqrt.f32 %v8349_v11 }
0x42cc   :  { %14834 = vrsqrt.f32 %v8348_v47 }
0x42d5   :  { %v14833_v48 = vpop.eup %14832 }
0x42d6   :  { %v14835_v49 = vpop.eup %14834  ;;  %v8353_v54 = vmul.f32 %v14833_v48, %v8337_v32 }
0x42d7   :  { %v8352_v14 = vmul.f32 %v14835_v49, %v8336_v13 }
0x42d8   :  { %v8361_v60 = vmul.f32 %v12771_v28, %v8353_v54 }
0x42d9   :  { %v8360_v42 = vmul.f32 %v12771_v28, %v8352_v14 }
0x42da   :  { %v8369_v62 = vadd.f32 %v12772_v56, %v8361_v60 }
0x42db   :  { %v8368_v23 = vadd.f32 %v12772_v56, %v8360_v42 }
0x42dd   :  { %14009 = vmatprep.mubr.msk.f32.mxu1 %vm55_vm0, %v8368_v23 }
0x42de   :  { %14010 = vmatmul.mubr.msk.f32.vlgmr.msra.gmra.mrb[112].mxu1 %vm55_vm0, %v8369_v62 }
0x42df   :  { %14014 = vmatprep.mubr.msk.f32.mxu1 %vm14945_vm1, %v14944_v36 }
0x43b1   :  { %v14011_v25 = vpop.f32.mrb[112].mxu1 }
0x43b2   :  { %v16304_v57 = vadd.f32 %v14011_v25, %v12778_v2  ;;  %v8455_v39 = vpop.f32.mrb[113].mxu1 }
0x43b3   :  { %v16306_v43 = vadd.f32 %v12778_v2, %v8455_v39 }
0x43b4   :  { %8545 = vrot.lane.b32.xlu1 %v16304_v57, %s16940_s14  ;;  %v16323_v41 = vmul.f32 0.35355338, %v16304_v57 }
0x43b5   :  { %8467 = vrot.lane.b32.xlu0 %v16306_v43, %s16940_s14  ;;  %v16314_v51 = vmul.f32 0.35355338, %v16306_v43 }
0x4426   :  { %v8546_v52 = vpop.permute.xlu1 %8545 }
0x4427   :  { %v8468_v4 = vpop.permute.xlu0 %8467 }
0x4428   :  { %14013 = vmatpush3.xpose.msk.msra.mxu1 %vm196_vm2, %v8468_v4 }
0x4429   :  { %14017 = vmatprep.subr.mxu1 %v14944_v36 }
0x442b   :  { %14015 = vmatmul.mubr.msk.f32.vlgmr.msra.gmra.mrb[114].mxu1 %vm196_vm2, %v16314_v51 }
0x442c   :  { %14018 = vmatpush3.xpose.msk.msra.mxu1 %vm196_vm2, %v8546_v52  ;;  %14019 = vmatprep.mubr.msk.f32.mxu1 %vm14945_vm1, %v14944_v36 }
0x442d   :  { %14022 = vmatprep.subr.mxu1 %v14944_v36 }
0x442f   :  { %14020 = vmatmul.mubr.msk.f32.vlgmr.msra.gmra.mrb[116].mxu1 %vm196_vm2, %v16323_v41 }
0x4430   :  { %14024 = vmatprep.mubr.msk.f32.mxu1 %vm14945_vm1, %v14944_v36 }
0x44fe   :  { %v8540_v31 = vpop.f32.mrb[114].mxu1 }
0x44ff   :  { %v8541_v5 = vadd.f32 %v8540_v31, %v15104_v50  ;;  %v14016_v6 = vpop.f32.mrb[115].mxu1 }
0x4501   :  { %v8622_v7 = vsel %vm196_vm2, %v8541_v5, -inf }
0x4502   :  { %8623 = vmax.xlane.f32.xlu1 %v8622_v7  ;;  %v8618_v59 = vpop.f32.mrb[116].mxu1 }
0x4503   :  { %v8619_v55 = vadd.f32 %v8618_v59, %v15104_v50  ;;  %v14021_v3 = vpop.f32.mrb[117].mxu1 }
0x4505   :  { %v8625_v40 = vsel %vm196_vm2, %v8619_v55, -inf }
0x4506   :  { %8626 = vmax.xlane.f32.xlu0 %v8625_v40 }
0x4513   :  { %8720 = vrot.lane.b32.xlu1 %v16304_v57, %s16941_s27 }
0x4517   :  { %8800 = vrot.lane.b32.xlu1 %v16306_v43, %s16937_s24 }
0x451b   :  { %8798 = vrot.lane.b32.xlu1 %v16314_v51, %s16938_s29 }
0x458f   :  { %v8624_v8 = vpop.xlane.xlu1 %8623 }
0x4590   :  { %v8628_v9 = vsub.f32 %v8541_v5, %v8624_v8 }
0x4592   :  { %v8630_v58 = vmul.f32 1.442695, %v8628_v9 }
0x4593   :  { %v8627_v10 = vpop.xlane.xlu0 %8626  ;;  %v8721_v53 = vpop.permute.xlu1 %8720 }
0x4594   :  { %14836 = vpow2.f32 %v8630_v58  ;;  %v8629_v15 = vsub.f32 %v8619_v55, %v8627_v10 }
0x4596   :  { %v8632_v16 = vmul.f32 1.442695, %v8629_v15 }
0x4597   :  { %v8801_v27 = vpop.permute.xlu1 %8800 }
0x4598   :  { %14838 = vpow2.f32 %v8632_v16 }
0x459b   :  { %v8799_v30 = vpop.permute.xlu1 %8798 }
0x459e   :  { %v14837_v18 = vpop.eup %14836 }
0x459f   :  { %v8634_v22 = vsel %vm196_vm2, %v14837_v18, 0.0 }
0x45a0   :  { %8635 = vadd.xlane.f32.xlu0 %v8634_v22 }
0x45a2   :  { %v14839_v0 = vpop.eup %14838 }
0x45a3   :  { %v8637_v26 = vsel %vm196_vm2, %v14839_v0, 0.0 }
0x45a4   :  { %8638 = vadd.xlane.f32.xlu1 %v8637_v26 }
0x45b5   :  { %8876 = vrot.lane.b32.xlu1 %v16323_v41, %s16938_s29 }
0x45b6   :  { %8644 = vrot.lane.b32.xlu0 %v16306_v43, %s16941_s27 }
0x45b9   :  { %9294 = vrot.lane.b32.xlu1 %v16306_v43, %s16939_s30 }
0x45ba   :  { %8878 = vrot.lane.b32.xlu0 %v16304_v57, %s16937_s24 }
0x462d   :  { %v8636_v12 = vpop.xlane.xlu0 %8635 }
0x462e   :  { %14840 = vrcp.f32 %v8636_v12 }
0x4631   :  { %v8639_v61 = vpop.xlane.xlu1 %8638  ;;  %v8645_v32 = vpop.permute.xlu0 %8644 }
0x4632   :  { %14842 = vrcp.f32 %v8639_v61  ;;  %14023 = vmatpush3.msra.mxu1 %v8645_v32 }
0x4633   :  { %14027 = vmatprep.subr.mxu1 %v14944_v36 }
0x4635   :  { %v8879_v21 = vpop.permute.xlu0 %8878  ;;  %v8877_v17 = vpop.permute.xlu1 %8876 }
0x4638   :  { %v14841_v13 = vpop.eup %14840 }
0x4639   :  { %v8641_v33 = vmul.f32 %v14841_v13, %v14837_v18  ;;  %v9295_v42 = vpop.permute.xlu1 %9294 }
0x463b   :  { %14025 = vmatmul.mubr.msk.f32.vlgmr.msra.gmra.mrb[118].mxu1 %vm196_vm2, %v8641_v33 }
0x463c   :  { %v14843_v34 = vpop.eup %14842  ;;  %14028 = vmatpush3.msra.mxu1 %v8721_v53  ;;  %14029 = vmatprep.mubr.msk.f32.mxu1 %vm14945_vm1, %v14944_v36  ;;  %v12794_v53 = vld [vmem:[%s16894_s5 + $0x88] sm:$0xff] }
0x463d   :  { %v8643_v63 = vmul.f32 %v14843_v34, %v14839_v0  ;;  %14032 = vmatprep.subr.mxu1 %v14944_v36 }
0x463f   :  { %14030 = vmatmul.mubr.msk.f32.vlgmr.msra.gmra.mrb[120].mxu1 %vm196_vm2, %v8643_v63 }
0x4640   :  { %14034 = vmatprep.mubr.msk.f32.mxu1 %vm14945_vm1, %v14944_v36 }
0x4643   :  { %14033 = vmatpush3.xpose.msk.msra.mxu1 %vm196_vm2, %v8801_v27  ;;  %v12787_v27 = vld [vmem:[%s16894_s5 + $0x80] sm:$0xff] }
0x4644   :  { %14037 = vmatprep.subr.mxu1 %v14944_v36 }
0x4646   :  { %14035 = vmatmul.mubr.msk.f32.vlgmr.msra.gmra.mrb[122].mxu1 %vm196_vm2, %v8799_v30 }
0x4647   :  { %14038 = vmatpush3.xpose.msk.msra.mxu1 %vm196_vm2, %v8879_v21  ;;  %14039 = vmatprep.mubr.msk.f32.mxu1 %vm14945_vm1, %v14944_v36 }
0x4648   :  { %14047 = vmatprep.subr.mxu1 %v14944_v36 }
0x464a   :  { %14040 = vmatmul.mubr.msk.f32.vlgmr.msra.gmra.mrb[124].mxu1 %vm196_vm2, %v8877_v17 }
0x464b   :  { %14049 = vmatprep.mubr.msk.f32.mxu1 %vm14945_vm1, %v14944_v36 }
0x470e   :  { %v16368_v29 = vpop.f32.mrb[118].mxu1 }
0x470f   :  { %v14026_v1 = vpop.f32.mrb[119].mxu1 }
0x4712   :  { %v16370_v35 = vpop.f32.mrb[120].mxu1 }
0x4713   :  { %v14031_v37 = vpop.f32.mrb[121].mxu1 }
0x4719   :  { %v8872_v20 = vpop.f32.mrb[122].mxu1 }
0x471a   :  { %v14036_v38 = vpop.f32.mrb[123].mxu1  ;;  %v8873_v56 = vadd.f32 %v8872_v20, %v15104_v50 }
0x471b   :  { %v12805_v38 = vld [vmem:[%s16894_s5 + $0x90] sm:$0xff] }
0x471c   :  { %v8954_v60 = vsel %vm196_vm2, %v8873_v56, -inf }
0x471d   :  { %v8950_v44 = vpop.f32.mrb[124].mxu1 }
0x471e   :  { %v8951_v46 = vadd.f32 %v8950_v44, %v15104_v50  ;;  %v14041_v19 = vpop.f32.mrb[125].mxu1 }
0x4720   :  { %v8957_v11 = vsel %vm196_vm2, %v8951_v46, -inf }
0x4721   :  { %8958 = vmax.xlane.f32.xlu0 %v8957_v11 }
0x4737   :  { %9052 = vrot.lane.b32.xlu0 %v16304_v57, %s16934_s21 }
0x473b   :  { %9292 = vrot.lane.b32.xlu0 %v16314_v51, %s16935_s22 }
0x473f   :  { %9370 = vrot.lane.b32.xlu0 %v16323_v41, %s16935_s22 }
0x47ae   :  { %v8959_v47 = vpop.xlane.xlu0 %8958 }
0x47af   :  { %v8961_v48 = vsub.f32 %v8951_v46, %v8959_v47 }
0x47b1   :  { %v8964_v28 = vmul.f32 1.442695, %v8961_v48 }
0x47b2   :  { %v9053_v49 = vpop.permute.xlu0 %9052 }
0x47b3   :  { %14844 = vpow2.f32 %v8964_v28  ;;  %14048 = vmatpush3.msra.mxu1 %v9053_v49 }
0x47b4   :  { %14062 = vmatprep.subr.mxu1 %v14944_v36 }
0x47b6   :  { %v9293_v25 = vpop.permute.xlu0 %9292 }
0x47ba   :  { %v9371_v4 = vpop.permute.xlu0 %9370 }
0x47bd   :  { %v14845_v54 = vpop.eup %14844 }
0x47be   :  { %v8969_v14 = vsel %vm196_vm2, %v14845_v54, 0.0 }
0x47bf   :  { %8970 = vadd.xlane.f32.xlu1 %v8969_v14 }
0x47d0   :  { %9372 = vrot.lane.b32.xlu1 %v16304_v57, %s16939_s30 }
0x47f4   :  { %8955 = vmax.xlane.f32.xlu1 %v8954_v60 }
0x484c   :  { %v8971_v23 = vpop.xlane.xlu1 %8970 }
0x484d   :  { %14846 = vrcp.f32 %v8971_v23 }
0x4850   :  { %v9373_v39 = vpop.permute.xlu1 %9372 }
0x4857   :  { %v14847_v62 = vpop.eup %14846 }
0x4858   :  { %v8975_v2 = vmul.f32 %v14847_v62, %v14845_v54 }
0x485a   :  { %14050 = vmatmul.mubr.msk.f32.vlgmr.msra.gmra.mrb[126].mxu1 %vm196_vm2, %v8975_v2 }
0x485b   :  { %14063 = vmatpush3.xpose.msk.msra.mxu1 %vm196_vm2, %v9295_v42  ;;  %14064 = vmatprep.mubr.msk.f32.mxu1 %vm14945_vm1, %v14944_v36 }
0x485c   :  { %14067 = vmatprep.subr.mxu1 %v14944_v36 }
0x485e   :  { %14065 = vmatmul.mubr.msk.f32.vlgmr.msra.gmra.mrb[128].mxu1 %vm196_vm2, %v9293_v25 }
0x485f   :  { %14068 = vmatpush3.xpose.msk.msra.mxu1 %vm196_vm2, %v9373_v39  ;;  %14069 = vmatprep.mubr.msk.f32.mxu1 %vm14945_vm1, %v14944_v36 }
0x4860   :  { %14077 = vmatprep.subr.mxu1 %v14944_v36 }
0x4862   :  { %14070 = vmatmul.mubr.msk.f32.vlgmr.msra.gmra.mrb[130].mxu1 %vm196_vm2, %v9371_v4 }
0x4863   :  { %14079 = vmatprep.mubr.msk.f32.mxu1 %vm14945_vm1, %v14944_v36 }
0x4881   :  { %v8956_v52 = vpop.xlane.xlu1 %8955 }
0x4882   :  { %v8960_v31 = vsub.f32 %v8873_v56, %v8956_v52 }
0x4884   :  { %v8962_v5 = vmul.f32 1.442695, %v8960_v31 }
0x4886   :  { %14848 = vpow2.f32 %v8962_v5 }
0x4890   :  { %v14849_v6 = vpop.eup %14848 }
0x4891   :  { %v8966_v7 = vsel %vm196_vm2, %v14849_v6, 0.0 }
0x4892   :  { %8967 = vadd.xlane.f32.xlu0 %v8966_v7 }
0x48a8   :  { %8976 = vrot.lane.b32.xlu0 %v16306_v43, %s16934_s21 }
0x48ac   :  { %9546 = vrot.lane.b32.xlu0 %v16304_v57, %s16936_s15 }
0x48b0   :  { %9709 = vrot.lane.b32.xlu0 %v16306_v43, %s16931_s18 }
0x48b4   :  { %9787 = vrot.lane.b32.xlu0 %v16304_v57, %s16931_s18 }
0x48b8   :  { %9707 = vrot.lane.b32.xlu0 %v16314_v51, %s16932_s19 }
0x491f   :  { %v8968_v59 = vpop.xlane.xlu0 %8967 }
0x4920   :  { %14850 = vrcp.f32 %v8968_v59 }
0x4923   :  { %v8977_v55 = vpop.permute.xlu0 %8976 }
0x4924   :  { %14043 = vmatpush3.msra.mxu0 %v8977_v55 }
0x4925   :  { %14052 = vmatprep.subr.mxu0 %v12794_v53 }
0x4927   :  { %v9547_v3 = vpop.permute.xlu0 %9546 }
0x4928   :  { %14078 = vmatpush3.msra.mxu1 %v9547_v3 }
0x4929   :  { %14087 = vmatprep.subr.mxu1 %v14944_v36 }
0x492a   :  { %v14851_v40 = vpop.eup %14850 }
0x492b   :  { %v8973_v8 = vmul.f32 %v14851_v40, %v14849_v6  ;;  %v9710_v46 = vpop.permute.xlu0 %9709 }
0x492d   :  { %14045 = vmatmul.mubr.msk.f32.vlgmr.msra.gmra.mrb[48].mxu0 %vm196_vm2, %v8973_v8  ;;  %v9124_v9 = vpop.f32.mrb[126].mxu1 }
0x492e   :  { %v14051_v58 = vpop.f32.mrb[127].mxu1  ;;  %14053 = vmatpush3.msra.mxu0 %v12794_v53 }
0x492f   :  { %14057 = vmatprep.subr.mxu0 %v12787_v27  ;;  %v9788_v11 = vpop.permute.xlu0 %9787 }
0x4931   :  { %v9366_v10 = vpop.f32.mrb[128].mxu1 }
0x4932   :  { %v9367_v15 = vadd.f32 %v9366_v10, %v15104_v50  ;;  %v14066_v16 = vpop.f32.mrb[129].mxu1 }
0x4933   :  { %v9708_v48 = vpop.permute.xlu0 %9707 }
0x4934   :  { %v9448_v51 = vsel %vm196_vm2, %v9367_v15, -inf }
0x4935   :  { %9449 = vmax.xlane.f32.xlu1 %v9448_v51  ;;  %v9444_v18 = vpop.f32.mrb[130].mxu1 }
0x4936   :  { %v9445_v22 = vadd.f32 %v9444_v18, %v15104_v50  ;;  %v14071_v0 = vpop.f32.mrb[131].mxu1 }
0x4938   :  { %v9451_v26 = vsel %vm196_vm2, %v9445_v22, -inf }
0x4939   :  { %9452 = vmax.xlane.f32.xlu1 %v9451_v26 }
0x49c2   :  { %v9450_v30 = vpop.xlane.xlu1 %9449 }
0x49c3   :  { %v9454_v12 = vsub.f32 %v9367_v15, %v9450_v30  ;;  %v12818_v30 = vld [vmem:[%s16895_s6 + $0x4] ss:$0 sm:$0xff] }
0x49c5   :  { %v9456_v61 = vmul.f32 1.442695, %v9454_v12 }
0x49c6   :  { %v9453_v32 = vpop.xlane.xlu1 %9452 }
0x49c7   :  { %14852 = vpow2.f32 %v9456_v61  ;;  %v9455_v13 = vsub.f32 %v9445_v22, %v9453_v32  ;;  %v12814_v22 = vld [vmem:[%s16894_s5 + $0x98] sm:$0xff] }
0x49c9   :  { %v9458_v33 = vmul.f32 1.442695, %v9455_v13 }
0x49cb   :  { %14854 = vpow2.f32 %v9458_v33 }
0x49d1   :  { %v14853_v34 = vpop.eup %14852 }
0x49d2   :  { %v9460_v63 = vsel %vm196_vm2, %v14853_v34, 0.0 }
0x49d3   :  { %9461 = vadd.xlane.f32.xlu1 %v9460_v63 }
0x49d5   :  { %v14855_v21 = vpop.eup %14854 }
0x49d6   :  { %v9463_v17 = vsel %vm196_vm2, %v14855_v21, 0.0 }
0x49d7   :  { %9464 = vadd.xlane.f32.xlu1 %v9463_v17 }
0x49e8   :  { %9470 = vrot.lane.b32.xlu1 %v16306_v43, %s16936_s15 }
0x49ec   :  { %9785 = vrot.lane.b32.xlu1 %v16323_v41, %s16932_s19 }
0x4a00   :  { %v9048_v1 = vpop.f32.mrb[48].mxu0 }
0x4a01   :  { %v14046_v37 = vpop.f32.mrb[49].mxu0  ;;  %14054 = vmatprep.mubr.msk.f32.mxu0 %vm196_vm2, %v9048_v1 }
0x4a02   :  { %14055 = vmatmul.mubr.msk.f32.vlgmr.msra.gmra.mrb[50].mxu0 %vm196_vm2, %v9124_v9 }
0x4a03   :  { %14059 = vmatprep.mubr.msk.f32.mxu0 %vm196_vm2, %v16368_v29  ;;  %14058 = vmatpush3.msra.mxu0 %v12787_v27 }
0x4a04   :  { %14072 = vmatprep.subr.mxu0 %v14944_v36 }
0x4a0a   :  { %14060 = vmatmul.mubr.msk.f32.vlgmr.msra.gmra.mrb[50].mxu0 %vm196_vm2, %v16370_v35 }
0x4a0b   :  { %14074 = vmatprep.mubr.msk.f32.mxu0 %vm14945_vm1, %v14944_v36 }
0x4a60   :  { %v9462_v20 = vpop.xlane.xlu1 %9461 }
0x4a61   :  { %14856 = vrcp.f32 %v9462_v20 }
0x4a64   :  { %v9465_v41 = vpop.xlane.xlu1 %9464 }
0x4a65   :  { %14858 = vrcp.f32 %v9465_v41 }
0x4a68   :  { %v9471_v44 = vpop.permute.xlu1 %9470 }
0x4a69   :  { %14073 = vmatpush3.msra.mxu0 %v9471_v44 }
0x4a6a   :  { %14082 = vmatprep.subr.mxu0 %v12805_v38 }
0x4a6b   :  { %v14857_v29 = vpop.eup %14856 }
0x4a6c   :  { %v9467_v19 = vmul.f32 %v14857_v29, %v14853_v34  ;;  %v9786_v56 = vpop.permute.xlu1 %9785  ;;  %v12824_v29 = vld [vmem:[%s16898_s9 + $0x88] sm:$0xff] }
0x4a6e   :  { %14075 = vmatmul.mubr.msk.f32.vlgmr.msra.gmra.mrb[52].mxu0 %vm196_vm2, %v9467_v19 }
0x4a6f   :  { %v14859_v35 = vpop.eup %14858  ;;  %14083 = vmatpush3.msra.mxu0 %v12805_v38 }
0x4a70   :  { %v9469_v47 = vmul.f32 %v14859_v35, %v14855_v21  ;;  %14092 = vmatprep.subr.mxu0 %v14944_v36  ;;  %v12825_v35 = vld [vmem:[%s16898_s9 + $0x90] sm:$0xff] }
0x4a72   :  { %14080 = vmatmul.mubr.msk.f32.vlgmr.msra.gmra.mrb[132].mxu1 %vm196_vm2, %v9469_v47 }
0x4a73   :  { %14088 = vmatpush3.xpose.msk.msra.mxu1 %vm196_vm2, %v9710_v46  ;;  %14089 = vmatprep.mubr.msk.f32.mxu1 %vm14945_vm1, %v14944_v36  ;;  %v12823_v46 = vld [vmem:[%s16898_s9 + $0x80] sm:$0xff] }
0x4a74   :  { %14097 = vmatprep.subr.mxu1 %v14944_v36  ;;  %v14515_v19 = vpack.c.bf16 %v12824_v29, %v12823_v46 }
0x4a76   :  { %14090 = vmatmul.mubr.msk.f32.vlgmr.msra.gmra.mrb[134].mxu1 %vm196_vm2, %v9708_v48  ;;  %v12831_v48 = vld [vmem:[%s16900_s11 + $0x200] sm:$0xff] }
0x4a77   :  { %14099 = vmatprep.mubr.msk.f32.mxu1 %vm14945_vm1, %v14944_v36 }
0x4b41   :  { %v9542_v28 = vpop.f32.mrb[52].mxu0 }
0x4b42   :  { %v14076_v49 = vpop.f32.mrb[53].mxu0  ;;  %14084 = vmatprep.mubr.msk.f32.mxu0 %vm196_vm2, %v9542_v28  ;;  %v12832_v28 = vld [vmem:[%s16900_s11 + $0x208] sm:$0xff] }
0x4b43   :  { %v14523_v49 = vpack.c.bf16 %v12832_v28, %v12831_v48 }
0x4b45   :  { %v9618_v54 = vpop.f32.mrb[132].mxu1 }
0x4b46   :  { %v14081_v14 = vpop.f32.mrb[133].mxu1  ;;  %14085 = vmatmul.mubr.msk.f32.vlgmr.msra.gmra.mrb[50].mxu0 %vm196_vm2, %v9618_v54 }
0x4b47   :  { %14093 = vmatpush3.xpose.msk.msra.mxu0 %vm196_vm2, %v9788_v11  ;;  %14094 = vmatprep.mubr.msk.f32.mxu0 %vm14945_vm1, %v14944_v36  ;;  %v12826_v11 = vld [vmem:[%s16898_s9 + $0x98] sm:$0xff] }
0x4b48   :  { %14102 = vmatprep.subr.mxu0 %v14944_v36  ;;  %v14519_v47 = vpack.c.bf16 %v12826_v11, %v12825_v35 }
0x4b49   :  { %v9781_v60 = vpop.f32.mrb[134].mxu1 }
0x4b4a   :  { %v9782_v42 = vadd.f32 %v9781_v60, %v15104_v50  ;;  %v14091_v23 = vpop.f32.mrb[135].mxu1  ;;  %14095 = vmatmul.mubr.msk.f32.vlgmr.msra.gmra.mrb[54].mxu0 %vm196_vm2, %v9786_v56 }
0x4b4b   :  { %14104 = vmatprep.mubr.msk.f32.mxu0 %vm14945_vm1, %v14944_v36 }
0x4b4c   :  { %v9863_v62 = vsel %vm196_vm2, %v9782_v42, -inf }
0x4b4d   :  { %9864 = vmax.xlane.f32.xlu0 %v9863_v62 }
0x4bda   :  { %v9865_v2 = vpop.xlane.xlu0 %9864 }
0x4bdb   :  { %v9869_v25 = vsub.f32 %v9782_v42, %v9865_v2  ;;  %v12821_v2 = vld [vmem:[%s16896_s7 + $0x4] ss:$0 sm:$0xff] }
0x4bdd   :  { %v9871_v39 = vmul.f32 1.442695, %v9869_v25 }
0x4bdf   :  { %14860 = vpow2.f32 %v9871_v39 }
0x4be9   :  { %v14861_v4 = vpop.eup %14860 }
0x4bea   :  { %v9875_v52 = vsel %vm196_vm2, %v14861_v4, 0.0 }
0x4beb   :  { %9876 = vadd.xlane.f32.xlu0 %v9875_v52  ;;  %v12822_v52 = vld [vmem:[%s16897_s8 + $0x4] ss:$0 sm:$0xff] }
0x4c1d   :  { %v9859_v31 = vpop.f32.mrb[54].mxu0 }
0x4c1e   :  { %v9860_v5 = vadd.f32 %v9859_v31, %v15104_v50  ;;  %v14096_v6 = vpop.f32.mrb[55].mxu0 }
0x4c20   :  { %v9866_v7 = vsel %vm196_vm2, %v9860_v5, -inf }
0x4c21   :  { %9867 = vmax.xlane.f32.xlu1 %v9866_v7 }
0x4c32   :  { %9961 = vrot.lane.b32.xlu1 %v16304_v57, %s16933_s23 }
0x4c78   :  { %v9877_v58 = vpop.xlane.xlu0 %9876 }
0x4cae   :  { %v9868_v59 = vpop.xlane.xlu1 %9867 }
0x4caf   :  { %v9870_v55 = vsub.f32 %v9860_v5, %v9868_v59  ;;  %v12833_v59 = vld [vmem:[%s16900_s11 + $0x210] sm:$0xff] }
0x4cb1   :  { %v9873_v3 = vmul.f32 1.442695, %v9870_v55  ;;  %v12834_v55 = vld [vmem:[%s16900_s11 + $0x218] sm:$0xff] }
0x4cb2   :  { %v9962_v40 = vpop.permute.xlu1 %9961 }
0x4cb3   :  { %14862 = vpow2.f32 %v9873_v3  ;;  %14103 = vmatpush3.msra.mxu0 %v9962_v40  ;;  %v14527_v3 = vpack.c.bf16 %v12834_v55, %v12833_v59  ;;  %v12835_v40 = vld [vmem:[%s16900_s11 + $0x220] sm:$0xff] }
0x4cb4   :  { %14864 = vrcp.f32 %v9877_v58  ;;  %14107 = vmatprep.subr.mxu0 %v12814_v22  ;;  %v12837_v58 = vld [vmem:[%s16900_s11 + $0x230] sm:$0xff]  ;;  %v12853_v55 = vld [vmem:[%s16892_s3 + $0xa0] sm:$0xff] }
0x4cbd   :  { %v14863_v8 = vpop.eup %14862 }
0x4cbe   :  { %v9878_v9 = vsel %vm196_vm2, %v14863_v8, 0.0  ;;  %v14865_v15 = vpop.eup %14864 }
0x4cbf   :  { %9879 = vadd.xlane.f32.xlu0 %v9878_v9  ;;  %v9882_v16 = vmul.f32 %v14865_v15, %v14861_v4 }
0x4cd5   :  { %9885 = vrot.lane.b32.xlu0 %v16306_v43, %s16933_s23 }
0x4d4c   :  { %v9880_v10 = vpop.xlane.xlu0 %9879 }
0x4d4d   :  { %14866 = vrcp.f32 %v9880_v10  ;;  %v12838_v10 = vld [vmem:[%s16900_s11 + $0x238] sm:$0xff] }
0x4d4e   :  { %v14535_v15 = vpack.c.bf16 %v12838_v10, %v12837_v58 }
0x4d50   :  { %v9886_v57 = vpop.permute.xlu0 %9885 }
0x4d51   :  { %14098 = vmatpush3.msra.mxu1 %v9886_v57  ;;  %v12840_v57 = vld [vmem:[%s16900_s11 + $0x248] sm:$0xff] }
0x4d52   :  { %14100 = vmatmul.mubr.msk.f32.vlgmr.msra.gmra.mrb[136].mxu1 %vm196_vm2, %v9882_v16  ;;  %14516 = vmatprep.subr.bf16.mxu1 %v14515_v19  ;;  %v12839_v16 = vld [vmem:[%s16900_s11 + $0x240] sm:$0xff] }
0x4d53   :  { %14518 = vmatpush3.bf16.msra.mxu1 %v14515_v19 }
0x4d54   :  { %14520 = vmatprep.subr.bf16.mxu1 %v14519_v47 }
0x4d57   :  { %v14867_v51 = vpop.eup %14866  ;;  %14522 = vmatpush3.bf16.msra.mxu1 %v14519_v47 }
0x4d58   :  { %v9884_v18 = vmul.f32 %v14867_v51, %v14863_v8  ;;  %v12836_v8 = vld [vmem:[%s16900_s11 + $0x228] sm:$0xff]  ;;  %v14539_v51 = vpack.c.bf16 %v12840_v57, %v12839_v16 }
0x4d59   :  { %v14531_v9 = vpack.c.bf16 %v12836_v8, %v12835_v40  ;;  %v12855_v8 = vld [vmem:[%s16892_s3 + $0xb0] sm:$0xff] }
0x4d5a   :  { %14105 = vmatmul.mubr.msk.f32.vlgmr.msra.gmra.mrb[56].mxu0 %vm196_vm2, %v9884_v18  ;;  %v12841_v18 = vld [vmem:[%s16900_s11 + $0x250] sm:$0xff] }
0x4d5b   :  { %14108 = vmatpush3.msra.mxu0 %v12814_v22  ;;  %v12842_v22 = vld [vmem:[%s16900_s11 + $0x258] sm:$0xff] }
0x4d5c   :  { %14524 = vmatprep.subr.bf16.mxu0 %v14523_v49 }
0x4e25   :  { %v9957_v43 = vpop.f32.mrb[136].mxu1 }
0x4e26   :  { %v14101_v0 = vpop.f32.mrb[137].mxu1  ;;  %14109 = vmatprep.mubr.msk.f32.mxu0 %vm196_vm2, %v9957_v43  ;;  %v14543_v43 = vpack.c.bf16 %v12842_v22, %v12841_v18 }
0x4e27   :  { %v12843_v0 = vld [vmem:[%s16900_s11 + $0x260] sm:$0xff] }
0x4e2d   :  { %v10033_v26 = vpop.f32.mrb[56].mxu0 }
0x4e2e   :  { %v14106_v53 = vpop.f32.mrb[57].mxu0  ;;  %14110 = vmatmul.mubr.msk.f32.vlgmr.msra.gmra.mrb[50].mxu0 %vm196_vm2, %v10033_v26  ;;  %v12844_v26 = vld [vmem:[%s16900_s11 + $0x268] sm:$0xff] }
0x4e2f   :  { %14526 = vmatpush3.bf16.msra.mxu0 %v14523_v49  ;;  %v14547_v53 = vpack.c.bf16 %v12844_v26, %v12843_v0 }
0x4e30   :  { %14528 = vmatprep.subr.bf16.mxu0 %v14527_v3 }
0x4e33   :  { %14530 = vmatpush3.bf16.msra.mxu0 %v14527_v3  ;;  %v12854_v3 = vld [vmem:[%s16892_s3 + $0xa8] sm:$0xff] }
0x4e34   :  { %14532 = vmatprep.subr.bf16.mxu0 %v14531_v9  ;;  %v14555_v40 = vpack.c.bf16 %v12854_v3, %v12853_v55 }
0x4e36   :  { %14556 = vmatprep.subr.bf16.mxu1 %v14555_v40 }
0x4e37   :  { %14534 = vmatpush3.bf16.msra.mxu0 %v14531_v9  ;;  %v12856_v9 = vld [vmem:[%s16892_s3 + $0xb8] sm:$0xff]  ;;  %s16942_s3 = sld [smem:[#allocation5_spill]] }
0x4e38   :  { %14536 = vmatprep.subr.bf16.mxu0 %v14535_v15  ;;  %v14559_v58 = vpack.c.bf16 %v12856_v9, %v12855_v8 }
0x4e3b   :  { %14538 = vmatpush3.bf16.msra.mxu0 %v14535_v15 }
0x4e3c   :  { %14540 = vmatprep.subr.bf16.mxu0 %v14539_v51 }
0x4e3f   :  { %14542 = vmatpush3.bf16.msra.mxu0 %v14539_v51 }
0x4e40   :  { %14544 = vmatprep.subr.bf16.mxu0 %v14543_v43 }
0x4e43   :  { %14546 = vmatpush3.bf16.msra.mxu0 %v14543_v43  ;;  %v12851_v43 = vld [vmem:[%s16890_s1 + $0x5] ss:$0 sm:$0xff]  ;;  %s16943_s1 = sld [smem:[#allocation6_spill]] }
0x4e44   :  { %14548 = vmatprep.subr.bf16.mxu0 %v14547_v53 }
0x4e47   :  { %14550 = vmatpush3.bf16.msra.mxu0 %v14547_v53 }
0x4f01   :  { %v14111_v27 = vpop.f32.mrb[50].mxu0 }
0x4f02   :  { %v10123_v12 = vadd.f32 %v14111_v27, %v16265_v45  ;;  %v10111_v61 = vpop.f32.mrb[51].mxu0  ;;  %v12845_v27 = vld [vmem:[%s16900_s11 + $0x270] sm:$0xff] }
0x4f03   :  { %v10122_v32 = vadd.f32 %v10111_v61, %v16268_v24  ;;  %v12828_v61 = vld [vmem:[%s16899_s10 + $0x4] ss:$0 sm:$0xff] }
0x4f04   :  { %v16481_v13 = vadd.f32 %v12818_v30, %v10123_v12 }
0x4f05   :  { %v16483_v33 = vadd.f32 %v12818_v30, %v10122_v32  ;;  %v12846_v30 = vld [vmem:[%s16900_s11 + $0x278] sm:$0xff] }
0x4f06   :  { %v10141_v34 = vsel %vm55_vm0, %v16481_v13, 0.0  ;;  %v14551_v12 = vpack.c.bf16 %v12846_v30, %v12845_v27  ;;  %v12852_v27 = vld [vmem:[%s16891_s2 + $0x5] ss:$0 sm:$0xff] }
0x4f07   :  { %10142 = vadd.xlane.f32.xlu0 %v10141_v34  ;;  %v10138_v63 = vsel %vm55_vm0, %v16483_v33, 0.0 }
0x4f08   :  { %10139 = vadd.xlane.f32.xlu1 %v10138_v63  ;;  %14552 = vmatprep.subr.bf16.mxu0 %v14551_v12 }
0x4f09   :  { %14554 = vmatpush3.bf16.msra.mxu0 %v14551_v12 }
0x4f0a   :  { %14199 = vmatprep.subr.mxu0 %v14944_v36 }
0x4f94   :  { %v10143_v21 = vpop.xlane.xlu0 %10142 }
0x4f95   :  { %v10145_v17 = vmul.f32 0.03125, %v10143_v21  ;;  %v10140_v1 = vpop.xlane.xlu1 %10139 }
0x4f96   :  { %v10144_v37 = vmul.f32 0.03125, %v10140_v1 }
0x4f97   :  { %v10147_v45 = vsub.f32 %v16481_v13, %v10145_v17 }
0x4f98   :  { %v10146_v24 = vsub.f32 %v16483_v33, %v10144_v37 }
0x4f99   :  { %v10149_v20 = vmul.f32 %v10147_v45, %v10147_v45 }
0x4f9a   :  { %v10148_v41 = vmul.f32 %v10146_v24, %v10146_v24 }
0x4f9b   :  { %v10153_v38 = vsel %vm55_vm0, %v10149_v20, 0.0 }
0x4f9c   :  { %10154 = vadd.xlane.f32.xlu1 %v10153_v38  ;;  %v10150_v44 = vsel %vm55_vm0, %v10148_v41, 0.0 }
0x4f9d   :  { %10151 = vadd.xlane.f32.xlu0 %v10150_v44 }
0x5029   :  { %v10155_v54 = vpop.xlane.xlu1 %10154 }
0x502a   :  { %v10157_v14 = vmul.f32 0.03125, %v10155_v54  ;;  %v10152_v56 = vpop.xlane.xlu0 %10151  ;;  %v12848_v54 = vld [vmem:[%s16901_s12 + $0x4] ss:$0 sm:$0xff] }
0x502b   :  { %v10156_v60 = vmul.f32 0.03125, %v10152_v56 }
0x502c   :  { %v10159_v42 = vadd.f32 1e-05, %v10157_v14 }
0x502d   :  { %v10158_v23 = vadd.f32 1e-05, %v10156_v60 }
0x502e   :  { %14868 = vrsqrt.f32 %v10159_v42 }
0x502f   :  { %14870 = vrsqrt.f32 %v10158_v23 }
0x5038   :  { %v14869_v62 = vpop.eup %14868 }
0x5039   :  { %v14871_v25 = vpop.eup %14870  ;;  %v10163_v39 = vmul.f32 %v14869_v62, %v10147_v45 }
0x503a   :  { %v10162_v4 = vmul.f32 %v14871_v25, %v10146_v24 }
0x503b   :  { %v10171_v31 = vmul.f32 %v12821_v2, %v10163_v39 }
0x503c   :  { %v10170_v5 = vmul.f32 %v12821_v2, %v10162_v4 }
0x503d   :  { %v10179_v7 = vadd.f32 %v12822_v52, %v10171_v31 }
0x503e   :  { %v10178_v6 = vadd.f32 %v12822_v52, %v10170_v5 }
0x5040   :  { %14120 = vmatprep.mubr.msk.f32.mxu1 %vm55_vm0, %v10178_v6 }
0x5041   :  { %14121 = vmatmul.mubr.msk.f32.vlgmr.msra.gmra.mrb[138].mxu1 %vm55_vm0, %v10179_v7 }
0x5042   :  { %14558 = vmatpush3.bf16.msra.mxu1 %v14555_v40 }
0x5043   :  { %14560 = vmatprep.subr.bf16.mxu1 %v14559_v58 }
0x5046   :  { %14562 = vmatpush3.bf16.msra.mxu1 %v14559_v58 }
0x5047   :  { %14169 = vmatprep.subr.mxu1 %v14944_v36 }
0x5114   :  { %v14122_v32 = vpop.f32.mrb[138].mxu1 }
0x5115   :  { %v10271_v34 = vadd.f32 %v14122_v32, %v12828_v61  ;;  %v10265_v63 = vpop.f32.mrb[139].mxu1 }
0x5116   :  { %v10266_v21 = vadd.f32 %v12828_v61, %v10265_v63 }
0x5117   :  { %v10277_v17 = vmul.f32 0.044715, %v10271_v34  ;;  %v10275_v48 = vmul.f32 0.5, %v10271_v34 }
0x5118   :  { %v10276_v1 = vmul.f32 0.044715, %v10266_v21  ;;  %v10274_v11 = vmul.f32 0.5, %v10266_v21 }
0x5119   :  { %v10279_v37 = vmul.f32 %v10277_v17, %v10271_v34 }
0x511a   :  { %v10278_v45 = vmul.f32 %v10276_v1, %v10266_v21 }
0x511b   :  { %v10281_v24 = vmul.f32 %v10279_v37, %v10271_v34 }
0x511c   :  { %v10280_v20 = vmul.f32 %v10278_v45, %v10266_v21 }
0x511d   :  { %v10283_v41 = vadd.f32 %v10281_v24, %v10271_v34  ;;  %v12858_v34 = vld [vmem:[%s16893_s4 + $0x5] ss:$0 sm:$0xff] }
0x511e   :  { %v10282_v38 = vadd.f32 %v10280_v20, %v10266_v21 }
0x511f   :  { %v10285_v44 = vmul.f32 0.7978846, %v10283_v41 }
0x5120   :  { %v10284_v46 = vmul.f32 0.7978846, %v10282_v38 }
0x5121   :  { %14872 = vtanh.f32 %v10285_v44 }
0x5122   :  { %14874 = vtanh.f32 %v10284_v46 }
0x512b   :  { %v14873_v29 = vpop.eup %14872 }
0x512c   :  { %v14875_v19 = vpop.eup %14874  ;;  %v10289_v35 = vadd.f32 1.0, %v14873_v29 }
0x512d   :  { %v10288_v47 = vadd.f32 1.0, %v14875_v19 }
0x512e   :  { %v10291_v49 = vmul.f32 %v10289_v35, %v10275_v48 }
0x512f   :  { %v10290_v28 = vmul.f32 %v10288_v47, %v10274_v11 }
0x5131   :  { %14155 = vmatprep.mubr.f32.mxu0 %v10290_v28 }
0x5132   :  { %14156 = vmatmul.mubr.f32.vlgmr.msra.gmra.mrb[58].mxu0 %v10291_v49 }
0x5133   :  { %14201 = vmatprep.mubr.msk.f32.mxu0 %vm14945_vm1, %v14944_v36 }
0x5205   :  { %v14157_v14 = vpop.f32.mrb[58].mxu0 }
0x5206   :  { %v10389_v56 = vadd.f32 %v14157_v14, %v12848_v54  ;;  %v10383_v60 = vpop.f32.mrb[59].mxu0 }
0x5207   :  { %v10384_v42 = vadd.f32 %v12848_v54, %v10383_v60 }
0x5208   :  { %v16571_v23 = vadd.f32 %v10389_v56, %v16481_v13 }
0x5209   :  { %v16574_v62 = vadd.f32 %v10384_v42, %v16483_v33 }
0x520a   :  { %v10401_v2 = vsel %vm55_vm0, %v16571_v23, 0.0 }
0x520b   :  { %10402 = vadd.xlane.f32.xlu1 %v10401_v2  ;;  %v10398_v25 = vsel %vm55_vm0, %v16574_v62, 0.0 }
0x520c   :  { %10399 = vadd.xlane.f32.xlu0 %v10398_v25 }
0x5298   :  { %v10403_v39 = vpop.xlane.xlu1 %10402 }
0x5299   :  { %v10405_v4 = vmul.f32 0.03125, %v10403_v39  ;;  %v10400_v52 = vpop.xlane.xlu0 %10399 }
0x529a   :  { %v10404_v31 = vmul.f32 0.03125, %v10400_v52 }
0x529b   :  { %v10407_v5 = vsub.f32 %v16571_v23, %v10405_v4 }
0x529c   :  { %v10406_v13 = vsub.f32 %v16574_v62, %v10404_v31 }
0x529d   :  { %v10409_v6 = vmul.f32 %v10407_v5, %v10407_v5 }
0x529e   :  { %v10408_v7 = vmul.f32 %v10406_v13, %v10406_v13 }
0x529f   :  { %v10413_v33 = vsel %vm55_vm0, %v10409_v6, 0.0 }
0x52a0   :  { %10414 = vadd.xlane.f32.xlu1 %v10413_v33  ;;  %v10410_v59 = vsel %vm55_vm0, %v10408_v7, 0.0 }
0x52a1   :  { %10411 = vadd.xlane.f32.xlu0 %v10410_v59 }
0x532d   :  { %v10415_v10 = vpop.xlane.xlu1 %10414 }
0x532e   :  { %v10417_v15 = vmul.f32 0.03125, %v10415_v10  ;;  %v10412_v16 = vpop.xlane.xlu0 %10411 }
0x532f   :  { %v10416_v57 = vmul.f32 0.03125, %v10412_v16 }
0x5330   :  { %v10419_v51 = vadd.f32 1e-05, %v10417_v15 }
0x5331   :  { %v10418_v18 = vadd.f32 1e-05, %v10416_v57 }
0x5332   :  { %14876 = vrsqrt.f32 %v10419_v51 }
0x5333   :  { %14878 = vrsqrt.f32 %v10418_v18 }
0x533c   :  { %v14877_v22 = vpop.eup %14876 }
0x533d   :  { %v14879_v0 = vpop.eup %14878  ;;  %v10423_v26 = vmul.f32 %v14877_v22, %v10407_v5 }
0x533e   :  { %v10422_v53 = vmul.f32 %v14879_v0, %v10406_v13 }
0x533f   :  { %v10431_v30 = vmul.f32 %v12851_v43, %v10423_v26 }
0x5340   :  { %v10430_v12 = vmul.f32 %v12851_v43, %v10422_v53 }
0x5341   :  { %v10439_v32 = vadd.f32 %v12852_v27, %v10431_v30 }
0x5342   :  { %v10438_v61 = vadd.f32 %v12852_v27, %v10430_v12 }
0x5344   :  { %14166 = vmatprep.mubr.msk.f32.mxu1 %vm55_vm0, %v10438_v61 }
0x5345   :  { %14167 = vmatmul.mubr.msk.f32.vlgmr.msra.gmra.mrb[140].mxu1 %vm55_vm0, %v10439_v32 }
0x5346   :  { %14171 = vmatprep.mubr.msk.f32.mxu1 %vm14945_vm1, %v14944_v36 }
0x5418   :  { %v14168_v63 = vpop.f32.mrb[140].mxu1 }
0x5419   :  { %v16610_v21 = vadd.f32 %v14168_v63, %v12858_v34  ;;  %v10525_v17 = vpop.f32.mrb[141].mxu1 }
0x541a   :  { %v16612_v1 = vadd.f32 %v12858_v34, %v10525_v17 }
0x541b   :  { %10615 = vrot.lane.b32.xlu1 %v16610_v21, %s16940_s14  ;;  %v16629_v20 = vmul.f32 0.35355338, %v16610_v21 }
0x541c   :  { %10537 = vrot.lane.b32.xlu0 %v16612_v1, %s16940_s14  ;;  %v16620_v45 = vmul.f32 0.35355338, %v16612_v1 }
0x548d   :  { %v10616_v24 = vpop.permute.xlu1 %10615 }
0x548e   :  { %v10538_v37 = vpop.permute.xlu0 %10537 }
0x548f   :  { %14170 = vmatpush3.xpose.msk.msra.mxu1 %vm196_vm2, %v10538_v37 }
0x5490   :  { %14174 = vmatprep.subr.mxu1 %v14944_v36 }
0x5492   :  { %14172 = vmatmul.mubr.msk.f32.vlgmr.msra.gmra.mrb[142].mxu1 %vm196_vm2, %v16620_v45 }
0x5493   :  { %14175 = vmatpush3.xpose.msk.msra.mxu1 %vm196_vm2, %v10616_v24  ;;  %14176 = vmatprep.mubr.msk.f32.mxu1 %vm14945_vm1, %v14944_v36 }
0x5494   :  { %14179 = vmatprep.subr.mxu1 %v14944_v36 }
0x5496   :  { %14177 = vmatmul.mubr.msk.f32.vlgmr.msra.gmra.mrb[144].mxu1 %vm196_vm2, %v16629_v20 }
0x5497   :  { %14181 = vmatprep.mubr.msk.f32.mxu1 %vm14945_vm1, %v14944_v36 }
0x5565   :  { %v10610_v41 = vpop.f32.mrb[142].mxu1 }
0x5566   :  { %v10611_v38 = vadd.f32 %v10610_v41, %v15104_v50  ;;  %v14173_v44 = vpop.f32.mrb[143].mxu1 }
0x5568   :  { %v10692_v46 = vsel %vm196_vm2, %v10611_v38, -inf }
0x5569   :  { %10693 = vmax.xlane.f32.xlu1 %v10692_v46  ;;  %v10688_v29 = vpop.f32.mrb[144].mxu1 }
0x556a   :  { %v10689_v19 = vadd.f32 %v10688_v29, %v15104_v50  ;;  %v14178_v35 = vpop.f32.mrb[145].mxu1 }
0x556c   :  { %v10695_v11 = vsel %vm196_vm2, %v10689_v19, -inf }
0x556d   :  { %10696 = vmax.xlane.f32.xlu0 %v10695_v11 }
0x557a   :  { %10790 = vrot.lane.b32.xlu1 %v16610_v21, %s16941_s27 }
0x557e   :  { %10870 = vrot.lane.b32.xlu1 %v16612_v1, %s16937_s24 }
0x5582   :  { %10868 = vrot.lane.b32.xlu1 %v16620_v45, %s16938_s29 }
0x55f6   :  { %v10694_v47 = vpop.xlane.xlu1 %10693 }
0x55f7   :  { %v10698_v48 = vsub.f32 %v10611_v38, %v10694_v47 }
0x55f9   :  { %v10700_v28 = vmul.f32 1.442695, %v10698_v48 }
0x55fa   :  { %v10697_v49 = vpop.xlane.xlu0 %10696  ;;  %v10791_v25 = vpop.permute.xlu1 %10790 }
0x55fb   :  { %14880 = vpow2.f32 %v10700_v28  ;;  %v10699_v54 = vsub.f32 %v10689_v19, %v10697_v49 }
0x55fd   :  { %v10702_v14 = vmul.f32 1.442695, %v10699_v54 }
0x55fe   :  { %v10871_v39 = vpop.permute.xlu1 %10870 }
0x55ff   :  { %14882 = vpow2.f32 %v10702_v14 }
0x5602   :  { %v10869_v4 = vpop.permute.xlu1 %10868 }
0x5605   :  { %v14881_v56 = vpop.eup %14880 }
0x5606   :  { %v10704_v60 = vsel %vm196_vm2, %v14881_v56, 0.0 }
0x5607   :  { %10705 = vadd.xlane.f32.xlu0 %v10704_v60 }
0x5609   :  { %v14883_v42 = vpop.eup %14882 }
0x560a   :  { %v10707_v2 = vsel %vm196_vm2, %v14883_v42, 0.0 }
0x560b   :  { %10708 = vadd.xlane.f32.xlu1 %v10707_v2 }
0x561c   :  { %10946 = vrot.lane.b32.xlu1 %v16629_v20, %s16938_s29 }
0x561d   :  { %10714 = vrot.lane.b32.xlu0 %v16612_v1, %s16941_s27 }
0x5620   :  { %11364 = vrot.lane.b32.xlu1 %v16612_v1, %s16939_s30 }
0x5621   :  { %10948 = vrot.lane.b32.xlu0 %v16610_v21, %s16937_s24 }
0x5694   :  { %v10706_v52 = vpop.xlane.xlu0 %10705 }
0x5695   :  { %14884 = vrcp.f32 %v10706_v52 }
0x5698   :  { %v10709_v31 = vpop.xlane.xlu1 %10708  ;;  %v10715_v5 = vpop.permute.xlu0 %10714 }
0x5699   :  { %14886 = vrcp.f32 %v10709_v31  ;;  %14180 = vmatpush3.msra.mxu1 %v10715_v5 }
0x569a   :  { %14184 = vmatprep.subr.mxu1 %v14944_v36 }
0x569c   :  { %v10949_v59 = vpop.permute.xlu0 %10948  ;;  %v10947_v55 = vpop.permute.xlu1 %10946 }
0x569f   :  { %v14885_v13 = vpop.eup %14884 }
0x56a0   :  { %v10711_v6 = vmul.f32 %v14885_v13, %v14881_v56  ;;  %v11365_v12 = vpop.permute.xlu1 %11364 }
0x56a2   :  { %14182 = vmatmul.mubr.msk.f32.vlgmr.msra.gmra.mrb[146].mxu1 %vm196_vm2, %v10711_v6 }
0x56a3   :  { %v14887_v7 = vpop.eup %14886  ;;  %14185 = vmatpush3.msra.mxu1 %v10791_v25  ;;  %14186 = vmatprep.mubr.msk.f32.mxu1 %vm14945_vm1, %v14944_v36  ;;  %v12874_v25 = vld [vmem:[%s16894_s5 + $0xa8] sm:$0xff] }
0x56a4   :  { %v10713_v33 = vmul.f32 %v14887_v7, %v14883_v42  ;;  %14189 = vmatprep.subr.mxu1 %v14944_v36 }
0x56a6   :  { %14187 = vmatmul.mubr.msk.f32.vlgmr.msra.gmra.mrb[148].mxu1 %vm196_vm2, %v10713_v33 }
0x56a7   :  { %14191 = vmatprep.mubr.msk.f32.mxu1 %vm14945_vm1, %v14944_v36 }
0x56aa   :  { %14190 = vmatpush3.xpose.msk.msra.mxu1 %vm196_vm2, %v10871_v39  ;;  %v12867_v39 = vld [vmem:[%s16894_s5 + $0xa0] sm:$0xff] }
0x56ab   :  { %14194 = vmatprep.subr.mxu1 %v14944_v36 }
0x56ad   :  { %14192 = vmatmul.mubr.msk.f32.vlgmr.msra.gmra.mrb[150].mxu1 %vm196_vm2, %v10869_v4 }
0x56ae   :  { %14195 = vmatpush3.xpose.msk.msra.mxu1 %vm196_vm2, %v10949_v59  ;;  %14196 = vmatprep.mubr.msk.f32.mxu1 %vm14945_vm1, %v14944_v36 }
0x56af   :  { %14204 = vmatprep.subr.mxu1 %v14944_v36 }
0x56b1   :  { %14197 = vmatmul.mubr.msk.f32.vlgmr.msra.gmra.mrb[152].mxu1 %vm196_vm2, %v10947_v55 }
0x56b2   :  { %14206 = vmatprep.mubr.msk.f32.mxu1 %vm14945_vm1, %v14944_v36 }
0x5775   :  { %v16674_v3 = vpop.f32.mrb[146].mxu1 }
0x5776   :  { %v14183_v40 = vpop.f32.mrb[147].mxu1 }
0x5779   :  { %v16676_v8 = vpop.f32.mrb[148].mxu1 }
0x577a   :  { %v14188_v9 = vpop.f32.mrb[149].mxu1 }
0x5780   :  { %v10942_v58 = vpop.f32.mrb[150].mxu1 }
0x5781   :  { %v14193_v10 = vpop.f32.mrb[151].mxu1  ;;  %v10943_v27 = vadd.f32 %v10942_v58, %v15104_v50 }
0x5782   :  { %v12885_v10 = vld [vmem:[%s16894_s5 + $0xb0] sm:$0xff] }
0x5783   :  { %v11024_v30 = vsel %vm196_vm2, %v10943_v27, -inf }
0x5784   :  { %v11020_v15 = vpop.f32.mrb[152].mxu1 }
0x5785   :  { %v11021_v16 = vadd.f32 %v11020_v15, %v15104_v50  ;;  %v14198_v57 = vpop.f32.mrb[153].mxu1 }
0x5787   :  { %v11027_v51 = vsel %vm196_vm2, %v11021_v16, -inf }
0x5788   :  { %11028 = vmax.xlane.f32.xlu0 %v11027_v51 }
0x579e   :  { %11122 = vrot.lane.b32.xlu0 %v16610_v21, %s16934_s21 }
0x57a2   :  { %11362 = vrot.lane.b32.xlu0 %v16620_v45, %s16935_s22 }
0x57a6   :  { %11440 = vrot.lane.b32.xlu0 %v16629_v20, %s16935_s22 }
0x5815   :  { %v11029_v18 = vpop.xlane.xlu0 %11028 }
0x5816   :  { %v11031_v22 = vsub.f32 %v11021_v16, %v11029_v18 }
0x5818   :  { %v11034_v43 = vmul.f32 1.442695, %v11031_v22 }
0x5819   :  { %v11123_v0 = vpop.permute.xlu0 %11122 }
0x581a   :  { %14888 = vpow2.f32 %v11034_v43  ;;  %14205 = vmatpush3.msra.mxu1 %v11123_v0 }
0x581b   :  { %14219 = vmatprep.subr.mxu1 %v14944_v36 }
0x581d   :  { %v11363_v63 = vpop.permute.xlu0 %11362 }
0x5821   :  { %v11441_v37 = vpop.permute.xlu0 %11440 }
0x5824   :  { %v14889_v26 = vpop.eup %14888 }
0x5825   :  { %v11039_v53 = vsel %vm196_vm2, %v14889_v26, 0.0 }
0x5826   :  { %11040 = vadd.xlane.f32.xlu1 %v11039_v53 }
0x5837   :  { %11442 = vrot.lane.b32.xlu1 %v16610_v21, %s16939_s30 }
0x585b   :  { %11025 = vmax.xlane.f32.xlu1 %v11024_v30 }
0x58b3   :  { %v11041_v61 = vpop.xlane.xlu1 %11040 }
0x58b4   :  { %14890 = vrcp.f32 %v11041_v61 }
0x58b7   :  { %v11443_v17 = vpop.permute.xlu1 %11442 }
0x58be   :  { %v14891_v32 = vpop.eup %14890 }
0x58bf   :  { %v11045_v34 = vmul.f32 %v14891_v32, %v14889_v26 }
0x58c1   :  { %14207 = vmatmul.mubr.msk.f32.vlgmr.msra.gmra.mrb[154].mxu1 %vm196_vm2, %v11045_v34 }
0x58c2   :  { %14220 = vmatpush3.xpose.msk.msra.mxu1 %vm196_vm2, %v11365_v12  ;;  %14221 = vmatprep.mubr.msk.f32.mxu1 %vm14945_vm1, %v14944_v36 }
0x58c3   :  { %14224 = vmatprep.subr.mxu1 %v14944_v36 }
0x58c5   :  { %14222 = vmatmul.mubr.msk.f32.vlgmr.msra.gmra.mrb[156].mxu1 %vm196_vm2, %v11363_v63 }
0x58c6   :  { %14225 = vmatpush3.xpose.msk.msra.mxu1 %vm196_vm2, %v11443_v17  ;;  %14226 = vmatprep.mubr.msk.f32.mxu1 %vm14945_vm1, %v14944_v36 }
0x58c7   :  { %14234 = vmatprep.subr.mxu1 %v14944_v36 }
0x58c9   :  { %14227 = vmatmul.mubr.msk.f32.vlgmr.msra.gmra.mrb[158].mxu1 %vm196_vm2, %v11441_v37 }
0x58ca   :  { %14236 = vmatprep.mubr.msk.f32.mxu1 %vm14945_vm1, %v14944_v36 }
0x58e8   :  { %v11026_v24 = vpop.xlane.xlu1 %11025 }
0x58e9   :  { %v11030_v41 = vsub.f32 %v10943_v27, %v11026_v24 }
0x58eb   :  { %v11032_v38 = vmul.f32 1.442695, %v11030_v41 }
0x58ed   :  { %14892 = vpow2.f32 %v11032_v38 }
0x58f7   :  { %v14893_v44 = vpop.eup %14892 }
0x58f8   :  { %v11036_v46 = vsel %vm196_vm2, %v14893_v44, 0.0 }
0x58f9   :  { %11037 = vadd.xlane.f32.xlu0 %v11036_v46 }
0x590f   :  { %11046 = vrot.lane.b32.xlu0 %v16612_v1, %s16934_s21 }
0x5913   :  { %11616 = vrot.lane.b32.xlu0 %v16610_v21, %s16936_s15 }
0x5917   :  { %11779 = vrot.lane.b32.xlu0 %v16612_v1, %s16931_s18 }
0x591b   :  { %11857 = vrot.lane.b32.xlu0 %v16610_v21, %s16931_s18  ;;  %s14958_s18 = smov [#allocation2]  }
0x591c   :  { %s12471_s21 = sshll.u32 %s14958_s18, 4  ;;  %s12472_s21 = int_to_ptr.vmem [resolvable:$true] %s12471_s21 }
0x591d   :  { %p14925_p1 = scmp.lt.s32.totalorder %s12472_s21, %s12472_s21 }
0x591f   :  { %11777 = vrot.lane.b32.xlu0 %v16620_v45, %s16932_s19 }
0x5986   :  { %v11038_v29 = vpop.xlane.xlu0 %11037 }
0x5987   :  { %14894 = vrcp.f32 %v11038_v29 }
0x598a   :  { %v11047_v19 = vpop.permute.xlu0 %11046 }
0x598b   :  { %14200 = vmatpush3.msra.mxu0 %v11047_v19 }
0x598c   :  { %14209 = vmatprep.subr.mxu0 %v12874_v25 }
0x598e   :  { %v11617_v35 = vpop.permute.xlu0 %11616 }
0x598f   :  { %14235 = vmatpush3.msra.mxu1 %v11617_v35 }
0x5990   :  { %14244 = vmatprep.subr.mxu1 %v14944_v36 }
0x5991   :  { %v14895_v11 = vpop.eup %14894 }
0x5992   :  { %v11043_v47 = vmul.f32 %v14895_v11, %v14893_v44  ;;  %v11780_v16 = vpop.permute.xlu0 %11779 }
0x5994   :  { %14202 = vmatmul.mubr.msk.f32.vlgmr.msra.gmra.mrb[60].mxu0 %vm196_vm2, %v11043_v47  ;;  %v11194_v48 = vpop.f32.mrb[154].mxu1 }
0x5995   :  { %v14208_v28 = vpop.f32.mrb[155].mxu1  ;;  %14210 = vmatpush3.msra.mxu0 %v12874_v25  ;;  %v12898_v25 = vld [vmem:[%s16895_s6 + $0x5] ss:$0 sm:$0xff] }
0x5996   :  { %14214 = vmatprep.subr.mxu0 %v12867_v39  ;;  %v11858_v51 = vpop.permute.xlu0 %11857 }
0x5998   :  { %v11436_v49 = vpop.f32.mrb[156].mxu1 }
0x5999   :  { %v11437_v54 = vadd.f32 %v11436_v49, %v15104_v50  ;;  %v14223_v14 = vpop.f32.mrb[157].mxu1 }
0x599a   :  { %v11778_v22 = vpop.permute.xlu0 %11777 }
0x599b   :  { %v11518_v45 = vsel %vm196_vm2, %v11437_v54, -inf }
0x599c   :  { %11519 = vmax.xlane.f32.xlu1 %v11518_v45  ;;  %v11514_v56 = vpop.f32.mrb[158].mxu1  ;;  %v12894_v45 = vld [vmem:[%s16894_s5 + $0xb8] sm:$0xff] }
0x599d   :  { %v11515_v60 = vadd.f32 %v11514_v56, %v15104_v50  ;;  %v14228_v42 = vpop.f32.mrb[159].mxu1 }
0x599f   :  { %v11521_v2 = vsel %vm196_vm2, %v11515_v60, -inf }
0x59a0   :  { %11522 = vmax.xlane.f32.xlu1 %v11521_v2 }
0x5a29   :  { %v11520_v4 = vpop.xlane.xlu1 %11519 }
0x5a2a   :  { %v11524_v52 = vsub.f32 %v11437_v54, %v11520_v4 }
0x5a2c   :  { %v11526_v31 = vmul.f32 1.442695, %v11524_v52 }
0x5a2d   :  { %v11523_v5 = vpop.xlane.xlu1 %11522 }
0x5a2e   :  { %14896 = vpow2.f32 %v11526_v31  ;;  %v11525_v13 = vsub.f32 %v11515_v60, %v11523_v5 }
0x5a30   :  { %v11528_v6 = vmul.f32 1.442695, %v11525_v13 }
0x5a32   :  { %14898 = vpow2.f32 %v11528_v6 }
0x5a38   :  { %v14897_v7 = vpop.eup %14896 }
0x5a39   :  { %v11530_v33 = vsel %vm196_vm2, %v14897_v7, 0.0 }
0x5a3a   :  { %11531 = vadd.xlane.f32.xlu1 %v11530_v33 }
0x5a3c   :  { %v14899_v59 = vpop.eup %14898 }
0x5a3d   :  { %v11533_v55 = vsel %vm196_vm2, %v14899_v59, 0.0 }
0x5a3e   :  { %11534 = vadd.xlane.f32.xlu1 %v11533_v55 }
0x5a4f   :  { %11540 = vrot.lane.b32.xlu1 %v16612_v1, %s16936_s15 }
0x5a53   :  { %11855 = vrot.lane.b32.xlu1 %v16629_v20, %s16932_s19  ;;  %s14920_s19 = scalar_lea.vmem %s12472_s21, 256 }
0x5a54   :  { %p14921_p0 = scmp.ne.s32.totalorder %s12472_s21, %s14920_s19  ;;  %p14926_p2 = scmp.lt.s32.totalorder %s14920_s19, %s14920_s19 }
0x5a56   :  { %p14927_p3 = por %p14926_p2, %p14925_p1 }
0x5a58   :  { %p14928_p4 = pnand %p14927_p3, %p14921_p0 }
0x5a67   :  { %v11118_v40 = vpop.f32.mrb[60].mxu0 }
0x5a68   :  { %v14203_v9 = vpop.f32.mrb[61].mxu0  ;;  %14211 = vmatprep.mubr.msk.f32.mxu0 %vm196_vm2, %v11118_v40 }
0x5a69   :  { %14212 = vmatmul.mubr.msk.f32.vlgmr.msra.gmra.mrb[62].mxu0 %vm196_vm2, %v11194_v48 }
0x5a6a   :  { %14216 = vmatprep.mubr.msk.f32.mxu0 %vm196_vm2, %v16674_v3  ;;  %14215 = vmatpush3.msra.mxu0 %v12867_v39 }
0x5a6b   :  { %14229 = vmatprep.subr.mxu0 %v14944_v36 }
0x5a71   :  { %14217 = vmatmul.mubr.msk.f32.vlgmr.msra.gmra.mrb[62].mxu0 %vm196_vm2, %v16676_v8 }
0x5a72   :  { %14231 = vmatprep.mubr.msk.f32.mxu0 %vm14945_vm1, %v14944_v36 }
0x5ac7   :  { %v11532_v58 = vpop.xlane.xlu1 %11531 }
0x5ac8   :  { %14900 = vrcp.f32 %v11532_v58 }
0x5acb   :  { %v11535_v20 = vpop.xlane.xlu1 %11534 }
0x5acc   :  { %14902 = vrcp.f32 %v11535_v20 }
0x5acf   :  { %v11541_v15 = vpop.permute.xlu1 %11540 }
0x5ad0   :  { %14230 = vmatpush3.msra.mxu0 %v11541_v15  ;;  %v12904_v15 = vld [vmem:[%s16898_s9 + $0xa8] sm:$0xff] }
0x5ad1   :  { %14239 = vmatprep.subr.mxu0 %v12885_v10 }
0x5ad2   :  { %v14901_v3 = vpop.eup %14900 }
0x5ad3   :  { %v11537_v57 = vmul.f32 %v14901_v3, %v14897_v7  ;;  %v11856_v27 = vpop.permute.xlu1 %11855  ;;  %v12905_v3 = vld [vmem:[%s16898_s9 + $0xb0] sm:$0xff] }
0x5ad5   :  { %14232 = vmatmul.mubr.msk.f32.vlgmr.msra.gmra.mrb[64].mxu0 %vm196_vm2, %v11537_v57  ;;  %v12906_v57 = vld [vmem:[%s16898_s9 + $0xb8] sm:$0xff] }
0x5ad6   :  { %v14903_v8 = vpop.eup %14902  ;;  %14240 = vmatpush3.msra.mxu0 %v12885_v10  ;;  %v12903_v10 = vld [vmem:[%s16898_s9 + $0xa0] sm:$0xff] }
0x5ad7   :  { %v11539_v18 = vmul.f32 %v14903_v8, %v14899_v59  ;;  %14249 = vmatprep.subr.mxu0 %v14944_v36  ;;  %v14567_v8 = vpack.c.bf16 %v12906_v57, %v12905_v3 }
0x5ad9   :  { %14237 = vmatmul.mubr.msk.f32.vlgmr.msra.gmra.mrb[160].mxu1 %vm196_vm2, %v11539_v18  ;;  %v12912_v18 = vld [vmem:[%s16900_s11 + $0x288] sm:$0xff] }
0x5ada   :  { %14245 = vmatpush3.xpose.msk.msra.mxu1 %vm196_vm2, %v11780_v16  ;;  %14246 = vmatprep.mubr.msk.f32.mxu1 %vm14945_vm1, %v14944_v36  ;;  %v14563_v16 = vpack.c.bf16 %v12904_v15, %v12903_v10 }
0x5adb   :  { %14254 = vmatprep.subr.mxu1 %v14944_v36 }
0x5add   :  { %14247 = vmatmul.mubr.msk.f32.vlgmr.msra.gmra.mrb[162].mxu1 %vm196_vm2, %v11778_v22 }
0x5ade   :  { %14256 = vmatprep.mubr.msk.f32.mxu1 %vm14945_vm1, %v14944_v36 }
0x5ba8   :  { %v11612_v43 = vpop.f32.mrb[64].mxu0 }
0x5ba9   :  { %v14233_v0 = vpop.f32.mrb[65].mxu0  ;;  %14241 = vmatprep.mubr.msk.f32.mxu0 %vm196_vm2, %v11612_v43 }
0x5bac   :  { %v11688_v26 = vpop.f32.mrb[160].mxu1 }
0x5bad   :  { %v14238_v53 = vpop.f32.mrb[161].mxu1  ;;  %14242 = vmatmul.mubr.msk.f32.vlgmr.msra.gmra.mrb[62].mxu0 %vm196_vm2, %v11688_v26 }
0x5bae   :  { %14250 = vmatpush3.xpose.msk.msra.mxu0 %vm196_vm2, %v11858_v51  ;;  %14251 = vmatprep.mubr.msk.f32.mxu0 %vm14945_vm1, %v14944_v36  ;;  %v12911_v51 = vld [vmem:[%s16900_s11 + $0x280] sm:$0xff] }
0x5baf   :  { %14259 = vmatprep.subr.mxu0 %v14944_v36  ;;  %v14571_v22 = vpack.c.bf16 %v12912_v18, %v12911_v51  ;;  %v12928_v18 = vld [vmem:[%s16901_s12 + $0x5] ss:$0 sm:$0xff] }
0x5bb0   :  { %v11851_v30 = vpop.f32.mrb[162].mxu1 }
0x5bb1   :  { %v11852_v12 = vadd.f32 %v11851_v30, %v15104_v50  ;;  %v14248_v61 = vpop.f32.mrb[163].mxu1  ;;  %14252 = vmatmul.mubr.msk.f32.vlgmr.msra.gmra.mrb[66].mxu0 %vm196_vm2, %v11856_v27 }
0x5bb2   :  { %14261 = vmatprep.mubr.msk.f32.mxu0 %vm14945_vm1, %v14944_v36  ;;  %v12901_v61 = vld [vmem:[%s16942_s3 + $0x5] ss:$0 sm:$0xff] }
0x5bb3   :  { %v11933_v32 = vsel %vm196_vm2, %v11852_v12, -inf }
0x5bb4   :  { %11934 = vmax.xlane.f32.xlu0 %v11933_v32 }
0x5c41   :  { %v11935_v34 = vpop.xlane.xlu0 %11934 }
0x5c42   :  { %v11939_v63 = vsub.f32 %v11852_v12, %v11935_v34 }
0x5c44   :  { %v11941_v17 = vmul.f32 1.442695, %v11939_v63 }
0x5c46   :  { %14904 = vpow2.f32 %v11941_v17  ;;  %v12902_v17 = vld [vmem:[%s16943_s1 + $0x5] ss:$0 sm:$0xff] }
0x5c50   :  { %v14905_v37 = vpop.eup %14904 }
0x5c51   :  { %v11945_v24 = vsel %vm196_vm2, %v14905_v37, 0.0 }
0x5c52   :  { %11946 = vadd.xlane.f32.xlu0 %v11945_v24 }
0x5c84   :  { %v11929_v41 = vpop.f32.mrb[66].mxu0 }
0x5c85   :  { %v11930_v38 = vadd.f32 %v11929_v41, %v15104_v50  ;;  %v14253_v44 = vpop.f32.mrb[67].mxu0 }
0x5c86   :  { %v12913_v44 = vld [vmem:[%s16900_s11 + $0x290] sm:$0xff] }
0x5c87   :  { %v11936_v46 = vsel %vm196_vm2, %v11930_v38, -inf }
0x5c88   :  { %11937 = vmax.xlane.f32.xlu1 %v11936_v46  ;;  %v12914_v46 = vld [vmem:[%s16900_s11 + $0x298] sm:$0xff] }
0x5c99   :  { %12031 = vrot.lane.b32.xlu1 %v16610_v21, %s16933_s23 }
0x5cdf   :  { %v11947_v50 = vpop.xlane.xlu0 %11946 }
0x5d15   :  { %v11938_v36 = vpop.xlane.xlu1 %11937 }
0x5d16   :  { %v11940_v29 = vsub.f32 %v11930_v38, %v11938_v36  ;;  %v14575_v36 = vpack.c.bf16 %v12914_v46, %v12913_v44 }
0x5d18   :  { %v11943_v19 = vmul.f32 1.442695, %v11940_v29  ;;  %v12915_v29 = vld [vmem:[%s16900_s11 + $0x2a0] sm:$0xff] }
0x5d19   :  { %v12032_v35 = vpop.permute.xlu1 %12031 }
0x5d1a   :  { %14906 = vpow2.f32 %v11943_v19  ;;  %14260 = vmatpush3.msra.mxu0 %v12032_v35  ;;  %v12916_v19 = vld [vmem:[%s16900_s11 + $0x2a8] sm:$0xff] }
0x5d1b   :  { %14908 = vrcp.f32 %v11947_v50  ;;  %14264 = vmatprep.subr.mxu0 %v12894_v45  ;;  %v14579_v35 = vpack.c.bf16 %v12916_v19, %v12915_v29 }
0x5d24   :  { %v14907_v11 = vpop.eup %14906 }
0x5d25   :  { %v11948_v47 = vsel %vm196_vm2, %v14907_v11, 0.0  ;;  %v14909_v28 = vpop.eup %14908 }
0x5d26   :  { %11949 = vadd.xlane.f32.xlu0 %v11948_v47  ;;  %v11952_v49 = vmul.f32 %v14909_v28, %v14905_v37  ;;  %v12918_v47 = vld [vmem:[%s16900_s11 + $0x2b8] sm:$0xff]  ;;  %v12920_v28 = vld [vmem:[%s16900_s11 + $0x2c8] sm:$0xff] }
0x5d3c   :  { %11955 = vrot.lane.b32.xlu0 %v16612_v1, %s16933_s23 }
0x5db3   :  { %v11950_v48 = vpop.xlane.xlu0 %11949 }
0x5db4   :  { %14910 = vrcp.f32 %v11950_v48  ;;  %v12919_v48 = vld [vmem:[%s16900_s11 + $0x2c0] sm:$0xff] }
0x5db7   :  { %v11956_v21 = vpop.permute.xlu0 %11955 }
0x5db8   :  { %14255 = vmatpush3.msra.mxu1 %v11956_v21  ;;  %v12921_v21 = vld [vmem:[%s16900_s11 + $0x2d0] sm:$0xff] }
0x5db9   :  { %14257 = vmatmul.mubr.msk.f32.vlgmr.msra.gmra.mrb[164].mxu1 %vm196_vm2, %v11952_v49  ;;  %14564 = vmatprep.subr.bf16.mxu1 %v14563_v16  ;;  %v14587_v49 = vpack.c.bf16 %v12920_v28, %v12919_v48 }
0x5dba   :  { %14566 = vmatpush3.bf16.msra.mxu1 %v14563_v16 }
0x5dbb   :  { %14568 = vmatprep.subr.bf16.mxu1 %v14567_v8 }
0x5dbe   :  { %v14911_v54 = vpop.eup %14910  ;;  %14570 = vmatpush3.bf16.msra.mxu1 %v14567_v8 }
0x5dbf   :  { %v11954_v14 = vmul.f32 %v14911_v54, %v14907_v11  ;;  %v12917_v11 = vld [vmem:[%s16900_s11 + $0x2b0] sm:$0xff]  ;;  %v12922_v54 = vld [vmem:[%s16900_s11 + $0x2d8] sm:$0xff] }
0x5dc0   :  { %v14583_v50 = vpack.c.bf16 %v12918_v47, %v12917_v11 }
0x5dc1   :  { %14262 = vmatmul.mubr.msk.f32.vlgmr.msra.gmra.mrb[68].mxu0 %vm196_vm2, %v11954_v14  ;;  %v14591_v14 = vpack.c.bf16 %v12922_v54, %v12921_v21 }
0x5dc2   :  { %14265 = vmatpush3.msra.mxu0 %v12894_v45  ;;  %v12923_v45 = vld [vmem:[%s16900_s11 + $0x2e0] sm:$0xff] }
0x5dc3   :  { %14572 = vmatprep.subr.bf16.mxu0 %v14571_v22 }
0x5e8c   :  { %v12027_v1 = vpop.f32.mrb[164].mxu1 }
0x5e8d   :  { %v14258_v56 = vpop.f32.mrb[165].mxu1  ;;  %14266 = vmatprep.mubr.msk.f32.mxu0 %vm196_vm2, %v12027_v1  ;;  %v12924_v1 = vld [vmem:[%s16900_s11 + $0x2e8] sm:$0xff] }
0x5e8e   :  { %v14595_v56 = vpack.c.bf16 %v12924_v1, %v12923_v45 }
0x5e94   :  { %v12103_v60 = vpop.f32.mrb[68].mxu0 }
0x5e95   :  { %v14263_v42 = vpop.f32.mrb[69].mxu0  ;;  %14267 = vmatmul.mubr.msk.f32.vlgmr.msra.gmra.mrb[62].mxu0 %vm196_vm2, %v12103_v60  ;;  %v12925_v60 = vld [vmem:[%s16900_s11 + $0x2f0] sm:$0xff] }
0x5e96   :  { %14574 = vmatpush3.bf16.msra.mxu0 %v14571_v22  ;;  %v12926_v42 = vld [vmem:[%s16900_s11 + $0x2f8] sm:$0xff] }
0x5e97   :  { %14576 = vmatprep.subr.bf16.mxu0 %v14575_v36 }
0x5e9a   :  { %14578 = vmatpush3.bf16.msra.mxu0 %v14575_v36 }
0x5e9b   :  { %14580 = vmatprep.subr.bf16.mxu0 %v14579_v35 }
0x5e9e   :  { %14582 = vmatpush3.bf16.msra.mxu0 %v14579_v35 }
0x5e9f   :  { %14584 = vmatprep.subr.bf16.mxu0 %v14583_v50 }
0x5ea2   :  { %14586 = vmatpush3.bf16.msra.mxu0 %v14583_v50 }
0x5ea3   :  { %14588 = vmatprep.subr.bf16.mxu0 %v14587_v49 }
0x5ea6   :  { %14590 = vmatpush3.bf16.msra.mxu0 %v14587_v49 }
0x5ea7   :  { %14592 = vmatprep.subr.bf16.mxu0 %v14591_v14 }
0x5eaa   :  { %14594 = vmatpush3.bf16.msra.mxu0 %v14591_v14 }
0x5eab   :  { %14596 = vmatprep.subr.bf16.mxu0 %v14595_v56 }
0x5eae   :  { %14598 = vmatpush3.bf16.msra.mxu0 %v14595_v56 }
0x5f68   :  { %v14268_v2 = vpop.f32.mrb[62].mxu0 }
0x5f69   :  { %v12193_v39 = vadd.f32 %v14268_v2, %v16571_v23  ;;  %v12181_v4 = vpop.f32.mrb[63].mxu0  ;;  %v14599_v2 = vpack.c.bf16 %v12926_v42, %v12925_v60 }
0x5f6a   :  { %v12192_v52 = vadd.f32 %v12181_v4, %v16574_v62 }
0x5f6b   :  { %v16787_v31 = vadd.f32 %v12898_v25, %v12193_v39  ;;  %14600 = vmatprep.subr.bf16.mxu0 %v14599_v2 }
0x5f6c   :  { %v16789_v5 = vadd.f32 %v12898_v25, %v12192_v52  ;;  %14602 = vmatpush3.bf16.msra.mxu0 %v14599_v2  ;;  %v12908_v25 = vld [vmem:[%s16899_s10 + $0x5] ss:$0 sm:$0xff] }
0x5f6d   :  { %v12211_v13 = vsel %vm55_vm0, %v16787_v31, 0.0 }
0x5f6e   :  { %12212 = vadd.xlane.f32.xlu0 %v12211_v13  ;;  %v12208_v6 = vsel %vm55_vm0, %v16789_v5, 0.0 }
0x5f6f   :  { %12209 = vadd.xlane.f32.xlu1 %v12208_v6 }
0x5ffb   :  { %v12213_v7 = vpop.xlane.xlu0 %12212 }
0x5ffc   :  { %v12215_v33 = vmul.f32 0.03125, %v12213_v7  ;;  %v12210_v59 = vpop.xlane.xlu1 %12209 }
0x5ffd   :  { %v12214_v55 = vmul.f32 0.03125, %v12210_v59 }
0x5ffe   :  { %v12217_v23 = vsub.f32 %v16787_v31, %v12215_v33 }
0x5fff   :  { %v12216_v62 = vsub.f32 %v16789_v5, %v12214_v55 }
0x6000   :  { %v12219_v40 = vmul.f32 %v12217_v23, %v12217_v23 }
0x6001   :  { %v12218_v9 = vmul.f32 %v12216_v62, %v12216_v62 }
0x6002   :  { %v12223_v58 = vsel %vm55_vm0, %v12219_v40, 0.0 }
0x6003   :  { %12224 = vadd.xlane.f32.xlu1 %v12223_v58  ;;  %v12220_v20 = vsel %vm55_vm0, %v12218_v9, 0.0 }
0x6004   :  { %12221 = vadd.xlane.f32.xlu0 %v12220_v20 }
0x6090   :  { %v12225_v43 = vpop.xlane.xlu1 %12224 }
0x6091   :  { %v12227_v0 = vmul.f32 0.03125, %v12225_v43  ;;  %v12222_v26 = vpop.xlane.xlu0 %12221 }
0x6092   :  { %v12226_v53 = vmul.f32 0.03125, %v12222_v26 }
0x6093   :  { %v12229_v27 = vadd.f32 1e-05, %v12227_v0 }
0x6094   :  { %v12228_v30 = vadd.f32 1e-05, %v12226_v53 }
0x6095   :  { %14912 = vrsqrt.f32 %v12229_v27 }
0x6096   :  { %14914 = vrsqrt.f32 %v12228_v30 }
0x609f   :  { %v14913_v12 = vpop.eup %14912 }
0x60a0   :  { %v14915_v32 = vpop.eup %14914  ;;  %v12233_v34 = vmul.f32 %v14913_v12, %v12217_v23 }
0x60a1   :  { %v12232_v63 = vmul.f32 %v14915_v32, %v12216_v62 }
0x60a2   :  { %v12241_v37 = vmul.f32 %v12901_v61, %v12233_v34 }
0x60a3   :  { %v12240_v24 = vmul.f32 %v12901_v61, %v12232_v63 }
0x60a4   :  { %v12249_v38 = vadd.f32 %v12902_v17, %v12241_v37 }
0x60a5   :  { %v12248_v41 = vadd.f32 %v12902_v17, %v12240_v24 }
0x60a7   :  { %14277 = vmatprep.mubr.msk.f32.mxu1 %vm55_vm0, %v12248_v41 }
0x60a8   :  { %14278 = vmatmul.mubr.msk.f32.vlgmr.msra.gmra.mrb[166].mxu1 %vm55_vm0, %v12249_v38 }
0x617b   :  { %v14279_v39 = vpop.f32.mrb[166].mxu1 }
0x617c   :  { %v12341_v4 = vadd.f32 %v14279_v39, %v12908_v25  ;;  %v12335_v52 = vpop.f32.mrb[167].mxu1 }
0x617d   :  { %v12336_v13 = vadd.f32 %v12908_v25, %v12335_v52 }
0x617e   :  { %v12347_v6 = vmul.f32 0.044715, %v12341_v4  ;;  %v12345_v57 = vmul.f32 0.5, %v12341_v4 }
0x617f   :  { %v12346_v7 = vmul.f32 0.044715, %v12336_v13  ;;  %v12344_v16 = vmul.f32 0.5, %v12336_v13 }
0x6180   :  { %v12349_v33 = vmul.f32 %v12347_v6, %v12341_v4 }
0x6181   :  { %v12348_v59 = vmul.f32 %v12346_v7, %v12336_v13 }
0x6182   :  { %v12351_v55 = vmul.f32 %v12349_v33, %v12341_v4 }
0x6183   :  { %v12350_v23 = vmul.f32 %v12348_v59, %v12336_v13 }
0x6184   :  { %v12353_v62 = vadd.f32 %v12351_v55, %v12341_v4 }
0x6185   :  { %v12352_v40 = vadd.f32 %v12350_v23, %v12336_v13 }
0x6186   :  { %v12355_v9 = vmul.f32 0.7978846, %v12353_v62 }
0x6187   :  { %v12354_v58 = vmul.f32 0.7978846, %v12352_v40 }
0x6188   :  { %14916 = vtanh.f32 %v12355_v9 }
0x6189   :  { %14918 = vtanh.f32 %v12354_v58 }
0x6192   :  { %v14917_v20 = vpop.eup %14916 }
0x6193   :  { %v14919_v10 = vpop.eup %14918  ;;  %v12359_v15 = vadd.f32 1.0, %v14917_v20 }
0x6194   :  { %v12358_v3 = vadd.f32 1.0, %v14919_v10 }
0x6195   :  { %v12361_v51 = vmul.f32 %v12359_v15, %v12345_v57 }
0x6196   :  { %v12360_v8 = vmul.f32 %v12358_v3, %v12344_v16 }
0x6198   :  { %14312 = vmatprep.mubr.f32.mxu0 %v12360_v8 }
0x6199   :  { %14313 = vmatmul.mubr.f32.vlgmr.msra.gmra.mrb[70].mxu0 %v12361_v51 }
0x626c   :  { %v14314_v22 = vpop.f32.mrb[70].mxu0 }
0x626d   :  { %v12459_v43 = vadd.f32 %v14314_v22, %v12928_v18  ;;  %v12453_v0 = vpop.f32.mrb[71].mxu0 }
0x626e   :  { %v12454_v26 = vadd.f32 %v12928_v18, %v12453_v0 }
0x626f   :  { %v12463_v53 = vadd.f32 %v12459_v43, %v16787_v31 }
0x6270   :  { %v12462_v27 = vadd.f32 %v12454_v26, %v16789_v5 }
0x6271   :  { %12465 = vst.msk [vmem:[#allocation2 + $0x8] sm:$0xff] %vm55_vm0, %v12463_v53 }
0x6272   :  { %12464 = vst.msk [vmem:[#allocation2] sm:$0xff] %vm55_vm0, %v12462_v27 }
0x6273   :  { %14931 = shalt.err (!%p14928_p4)
}
0x6274   :  { %s16944_s15 = sld [smem:[#allocation7_spill]] }
0x627a   :  { %s14932_s24 = scalar_lea.hbm %s16944_s15, 256 }
0x627b   :  { %p14933_p5 = scmp.ne.s32.totalorder %s16944_s15, %s14932_s24  ;;  %p14936_p6 = scmp.lt.u32.totalorder %s14932_s24, %s16944_s15 }
0x627d   :  { %p14938_p7 = pnand %p14936_p6, %p14933_p5 }
0x627f   :  { %14941 = shalt.err (!%p14938_p7)
}
0x6280   :  { %s14959_s30 = smov 128   ;;  %s14960_s14 = smov 8  }
0x6281   :  { %12477 = dma.vmem_to_hbm [thread:$0]  %s12472_s21, 256, %s16944_s15, [#allocation3], %s14959_s30, %s14959_s30, %s14960_s14  }
0x6282   :  { %14942 = dma.done.wait [#allocation3], 256  }
0x6283   :  { %14943 = vsyncadd [#allocation3], 4294967040 }
0x6284   :  { %12481 = vsyncpa [#allocation3], 1 }

</bundles_post_ra>
